<compile_context>
chip_gen: v7x
topology: tpu7x:2x2x1
jax: 0.10.0
libtpu: 0.0.40
codegen_flags: <defaults>
</compile_context>

<pallas_src>
import functools

import jax
import jax.numpy as jnp
from jax.experimental import pallas as pl
from jax.experimental.pallas import tpu as pltpu


# -----------------------------------------------------------------------------
# Hardware detection (bf16 epilogue only where the VPU has native bf16)
# -----------------------------------------------------------------------------
def _tpu_generation():
    try:
        kind = jax.devices()[0].device_kind.lower()
    except Exception:
        return 6
    for g in (7, 6, 5, 4, 3, 2):
        if f"v{g}" in kind or f"tpu{g}" in kind:
            return g
    return 6


def _default_bf16_epilogue():
    return _tpu_generation() >= 6


# -----------------------------------------------------------------------------
# Kernels
# -----------------------------------------------------------------------------
def make_trunk_kernel(*, relu_last, n_points, tn, nt, bf16_epilogue, use_acc):
    """Fused conv1(BN,ReLU) -> conv2(BN,ReLU) -> conv3(BN[,ReLU]) -> max over
    points.  Channels on sublanes, points on lanes."""
    needs_mask = (n_points % tn) != 0
    groups = tn // 128 if use_acc else 0
    neg_inf = float("-inf")

    def compute_tile(x_ref, w1_ref, b1_ref, w2_ref, b2_ref, w3_ref, b3_ref):
        x = x_ref[0]                                           # (Cin, TN) f32
        # conv1 (input transform already folded into w1; tiny K=3, f32).
        h = jnp.dot(w1_ref[0], x, preferred_element_type=jnp.float32)
        h = jnp.maximum(h + b1_ref[...], 0.0)                  # (64, TN) f32
        if bf16_epilogue:
            # bf16 operands + bf16 epilogue (v6e/v7x), f32 MXU accumulation.
            h = h.astype(jnp.bfloat16)
            h2 = jnp.dot(w2_ref[...], h, preferred_element_type=jnp.float32)
            h2 = jnp.maximum(h2.astype(jnp.bfloat16) + b2_ref[...], 0.0)
            h3 = jnp.dot(w3_ref[...], h2, preferred_element_type=jnp.float32)
            h3 = h3.astype(jnp.bfloat16) + b3_ref[...]
        else:
            # bf16 operands, f32 epilogue (v5e: no bf16 VALU).
            h2 = jnp.dot(w2_ref[...], h.astype(jnp.bfloat16),
                         preferred_element_type=jnp.float32)
            h2 = jnp.maximum(h2 + b2_ref[...], 0.0)
            h3 = jnp.dot(w3_ref[...], h2.astype(jnp.bfloat16),
                         preferred_element_type=jnp.float32)
            h3 = h3 + b3_ref[...]
        if relu_last:
            h3 = jnp.maximum(h3, 0.0)
        return h3                                              # (1024, TN)

    if not use_acc:
        # Single tile covering all points (TN == N): reduce and store directly.
        def kernel(x_ref, w1_ref, b1_ref, w2_ref, b2_ref, w3_ref, b3_ref,
                   out_ref):
            h = compute_tile(x_ref, w1_ref, b1_ref, w2_ref, b2_ref, w3_ref,
                             b3_ref)
            out_ref[0, 0] = jnp.max(h, axis=1, keepdims=True).astype(
                out_ref.dtype)
        return kernel

    def kernel(x_ref, w1_ref, b1_ref, w2_ref, b2_ref, w3_ref, b3_ref,
               out_ref, acc_ref):
        n_id = pl.program_id(2)
        nt_per = pl.num_programs(2)

        @pl.when(n_id == 0)
        def _init():
            acc_ref[...] = jnp.full(acc_ref.shape, neg_inf, acc_ref.dtype)

        h = compute_tile(x_ref, w1_ref, b1_ref, w2_ref, b2_ref, w3_ref, b3_ref)

        def accumulate(hv):
            # Fold TN lanes into 128 lane-columns with element-wise maxima
            # (pure VALU, no cross-lane data movement), then max into scratch.
            m = hv[:, 0:128]
            for g in range(1, groups):
                m = jnp.maximum(m, hv[:, g * 128:(g + 1) * 128])
            acc_ref[...] = jnp.maximum(acc_ref[...], m.astype(acc_ref.dtype))

        if needs_mask:
            # Tail mask only on the last (global) point tile.
            g_tile = pl.program_id(0) * nt_per + n_id
            is_tail = g_tile == nt - 1

            @pl.when(is_tail)
            def _tail():
                col = jax.lax.broadcasted_iota(jnp.int32, h.shape, 1)
                hv = jnp.where(g_tile * tn + col < n_points, h,
                               jnp.asarray(neg_inf, h.dtype))
                accumulate(hv)

            @pl.when(jnp.logical_not(is_tail))
            def _body():
                accumulate(h)
        else:
            accumulate(h)

        # Single cross-lane reduce + narrow store, once per (split, batch).
        @pl.when(n_id == nt_per - 1)
        def _finalize():
            out_ref[0, 0] = jnp.max(acc_ref[...], axis=1,
                                    keepdims=True).astype(out_ref.dtype)

    return kernel


def head_kernel(g_ref, w1_ref, b1_ref, w2_ref, b2_ref, w3_ref, b3_ref, out_ref):
    """TNet FC head: fc1(BN,ReLU) -> fc2(BN,ReLU) -> fc3 (bias = eye(k))."""
    h = jnp.dot(g_ref[...].astype(jnp.bfloat16), w1_ref[...],
                preferred_element_type=jnp.float32)
    h = jnp.maximum(h + b1_ref[...], 0.0)
    h = jnp.dot(h.astype(jnp.bfloat16), w2_ref[...],
                preferred_element_type=jnp.float32)
    h = jnp.maximum(h + b2_ref[...], 0.0)
    out_ref[...] = (jnp.dot(h, w3_ref[...], preferred_element_type=jnp.float32)
                    + b3_ref[...])


# -----------------------------------------------------------------------------
# Wrappers
# -----------------------------------------------------------------------------
def trunk_call(x_bcn, trans, weights, relu_last, tn=1024, bf16_epilogue=None):
    """Fused conv trunk + max-pool over points.

    x_bcn: (B, Cin, N) native PyTorch layout.  trans: (B, Cin, Cin) or None.
    """
    B, cin, N = x_bcn.shape
    w1t, b1, w2t, b2, w3t, b3 = weights
    c1, c2, cout = w1t.shape[0], w2t.shape[0], w3t.shape[0]

    if bf16_epilogue is None:
        bf16_epilogue = _default_bf16_epilogue()

    # Fold input transform into conv1:  (x^T @ T) @ W1^T == ((W1 @ T^T) x)^T.
    if trans is None:
        w1_eff = w1t[None]                                   # (1, c1, cin)
        w1_map = lambda s, b, n: (0, 0, 0)                    # no per-batch copy
    else:
        w1_eff = jnp.einsum("oc,bdc->bod", w1t, trans)        # (B, c1, cin)
        w1_map = lambda s, b, n: (b, 0, 0)

    # Point-tile size: multiple of 128 in [128, 2048] (rounded up), or the
    # full extent when N is small (single-tile path).
    tn_r = ((max(128, min(int(tn), 2048)) + 127) // 128) * 128
    if N <= tn_r:
        tn_eff, nt = N, 1
    else:
        tn_eff = tn_r
        nt = pl.cdiv(N, tn_eff)
    use_acc = nt > 1

    # v7x: give both TensorCores work at B == 1 by splitting the tile axis
    # over a leading parallel grid dim; partial maxima combined below.
    n_splits = 2 if (B == 1 and use_acc and nt % 2 == 0) else 1
    nt_per = nt // n_splits

    b2k = b2.astype(jnp.bfloat16) if bf16_epilogue else b2
    b3k = b3.astype(jnp.bfloat16) if bf16_epilogue else b3

    # VMEM budget ~2x the real working set (16-32 MiB), v7x-friendly.
    est = (2 * cin * tn_eff * 4
           + 2 * (w1_eff.shape[1] * w1_eff.shape[2] * 4
                  + w2t.size * 2 + w3t.size * 2 + (c1 + c2 + cout) * 4)
           + c1 * tn_eff * 6 + c2 * tn_eff * 6 + cout * tn_eff * 6
           + cout * 128 * 4 + 2 * cout * 4)
    vmem_limit = int(min(32 * 1024 * 1024, max(16 * 1024 * 1024, 2 * est)))

    flops = 2 * B * N * (cin * c1 + c1 * c2 + c2 * cout)
    bytes_accessed = (x_bcn.size * 4 + w1_eff.size * 4
                      + w2t.size * 2 + w3t.size * 2 + n_splits * B * cout * 4)

    kernel = make_trunk_kernel(relu_last=relu_last, n_points=N, tn=tn_eff,
                               nt=nt, bf16_epilogue=bf16_epilogue,
                               use_acc=use_acc)
    scratch = [pltpu.VMEM((cout, 128), jnp.float32)] if use_acc else []

    out = pl.pallas_call(
        kernel,
        out_shape=jax.ShapeDtypeStruct((n_splits, B, cout, 1), jnp.float32),
        grid=(n_splits, B, nt_per),
        in_specs=[
            pl.BlockSpec((1, cin, tn_eff),
                         lambda s, b, n: (b, 0, s * nt_per + n)),
            pl.BlockSpec((1, c1, cin), w1_map),
            pl.BlockSpec(b1.shape, lambda s, b, n: (0, 0)),
            pl.BlockSpec(w2t.shape, lambda s, b, n: (0, 0)),
            pl.BlockSpec(b2k.shape, lambda s, b, n: (0, 0)),
            pl.BlockSpec(w3t.shape, lambda s, b, n: (0, 0)),
            pl.BlockSpec(b3k.shape, lambda s, b, n: (0, 0)),
        ],
        out_specs=pl.BlockSpec((1, 1, cout, 1), lambda s, b, n: (s, b, 0, 0)),
        scratch_shapes=scratch,
        compiler_params=pltpu.CompilerParams(
            dimension_semantics=("parallel", "parallel", "arbitrary"),
            vmem_limit_bytes=vmem_limit),
        cost_estimate=pl.CostEstimate(flops=flops, transcendentals=0,
                                      bytes_accessed=bytes_accessed),
    )(x_bcn, w1_eff, b1, w2t, b2k, w3t, b3k)

    g = out[:, :, :, 0]                                      # (n_splits, B, 1024)
    return jnp.max(g, axis=0) if n_splits > 1 else g[0]      # (B, 1024)


def head_call(g, weights):
    w1, b1, w2, b2, w3, b3 = weights
    B = g.shape[0]
    return pl.pallas_call(
        head_kernel,
        out_shape=jax.ShapeDtypeStruct((B, w3.shape[1]), jnp.float32),
    )(g, w1, b1, w2, b2, w3, b3)


# -----------------------------------------------------------------------------
# Parameter init (deterministic; PyTorch-default eval BN stats folded in)
# -----------------------------------------------------------------------------
BN_EPS = 1e-5


def _bn_scale(cout):
    gamma = jnp.ones((cout,), jnp.float32)
    beta = jnp.zeros((cout,), jnp.float32)
    mean = jnp.zeros((cout,), jnp.float32)
    var = jnp.ones((cout,), jnp.float32)
    scale = gamma / jnp.sqrt(var + BN_EPS)
    shift = beta - mean * scale
    return scale, shift


def _conv_bn_t(key, cin, cout, w_dtype=jnp.float32):
    """Conv1d(cin, cout, 1) + BN folded; weight kept in (Cout, Cin) layout."""
    kw, kb = jax.random.split(key)
    w = jax.random.normal(kw, (cout, cin), jnp.float32) * 0.1
    b = jax.random.normal(kb, (cout,), jnp.float32) * 0.01
    scale, shift = _bn_scale(cout)
    wf = (w * scale[:, None]).astype(w_dtype)
    bf = (b * scale + shift).reshape(cout, 1)
    return wf, bf


def _fc_bn(key, cin, cout, w_dtype=jnp.float32):
    kw, kb = jax.random.split(key)
    w = jax.random.normal(kw, (cin, cout), jnp.float32) * 0.1
    b = jax.random.normal(kb, (cout,), jnp.float32) * 0.01
    scale, shift = _bn_scale(cout)
    return (w * scale[None, :]).astype(w_dtype), (b * scale + shift).reshape(1, cout)


def _trunk_params(k1, k2, k3):
    return (*_conv_bn_t(k1, 3, 64, jnp.float32),      # conv1 stays f32 (K=3)
            *_conv_bn_t(k2, 64, 128, jnp.bfloat16),   # bf16 operands, f32 accum
            *_conv_bn_t(k3, 128, 1024, jnp.bfloat16))


def init_params(key):
    ks = jax.random.split(key, 10)
    tnet_trunk = _trunk_params(ks[0], ks[1], ks[2])          # 3->64->128->1024 (ReLU)
    w1, b1 = _fc_bn(ks[3], 1024, 512, jnp.bfloat16)          # bf16 head weights
    w2, b2 = _fc_bn(ks[4], 512, 256, jnp.bfloat16)
    w3 = jax.random.normal(ks[5], (256, 9), jnp.float32) * 0.01
    b3 = jnp.eye(3, dtype=jnp.float32).reshape(1, 9)         # fc3.bias = eye(k)
    tnet_head = (w1, b1, w2, b2, w3, b3)
    main_trunk = _trunk_params(ks[6], ks[7], ks[8])           # conv3: BN only
    return {"tnet_trunk": tnet_trunk, "tnet_head": tnet_head,
            "main_trunk": main_trunk}


# -----------------------------------------------------------------------------
# PointNetfeat forward (global_feat=True, feature_transform=False)
# -----------------------------------------------------------------------------
def pointnetfeat_forward(x_bcn, params, tn=1024, bf16_epilogue=None):
    """x_bcn: (B, 3, N) in native PyTorch layout.  Returns (g, trans, None)."""
    B = x_bcn.shape[0]
    if bf16_epilogue is None:
        bf16_epilogue = _default_bf16_epilogue()
    # TNet(k=3): identity input transform (fold skipped), ReLU on conv3.
    g_t = trunk_call(x_bcn, None, params["tnet_trunk"], relu_last=True,
                     tn=tn, bf16_epilogue=bf16_epilogue)
    trans = head_call(g_t, params["tnet_head"]).reshape(B, 3, 3)
    # Main trunk: bmm(x^T, trans) folded into conv1; conv3 BN but no ReLU.
    g = trunk_call(x_bcn, trans, params["main_trunk"], relu_last=False,
                   tn=tn, bf16_epilogue=bf16_epilogue)
    # TODO(synk): global_feat=False (concat with pointfeat) and
    # feature_transform=True (TNet k=64) branches are not implemented.
    trans_feat = None
    return g, trans, trans_feat


# -----------------------------------------------------------------------------
# Pure-JAX reference mirroring the kernel's precision choices
# -----------------------------------------------------------------------------
def _ref_trunk(x_bcn, trans, weights, relu_last, bf16_epilogue):
    w1t, b1, w2t, b2, w3t, b3 = weights
    x = jnp.transpose(x_bcn, (0, 2, 1))                       # (B, N, 3)
    if trans is not None:
        x = jnp.einsum("bnc,bcd->bnd", x, trans)
    h = jnp.maximum(x @ w1t.T + b1[:, 0], 0.0)                # (B, N, 64) f32
    if bf16_epilogue:
        h = h.astype(jnp.bfloat16)
        h2 = jnp.einsum("bnk,ok->bno", h, w2t,
                        preferred_element_type=jnp.float32)
        h2 = jnp.maximum(h2.astype(jnp.bfloat16)
                         + b2[:, 0].astype(jnp.bfloat16), 0.0)
        h3 = jnp.einsum("bnk,ok->bno", h2, w3t,
                        preferred_element_type=jnp.float32)
        h3 = h3.astype(jnp.bfloat16) + b3[:, 0].astype(jnp.bfloat16)
        if relu_last:
            h3 = jnp.maximum(h3, 0.0)
        h3 = h3.astype(jnp.float32)
    else:
        h2 = jnp.einsum("bnk,ok->bno", h.astype(jnp.bfloat16), w2t,
                        preferred_element_type=jnp.float32)
        h2 = jnp.maximum(h2 + b2[:, 0], 0.0)
        h3 = jnp.einsum("bnk,ok->bno", h2.astype(jnp.bfloat16), w3t,
                        preferred_element_type=jnp.float32)
        h3 = h3 + b3[:, 0]
        if relu_last:
            h3 = jnp.maximum(h3, 0.0)
    return jnp.max(h3, axis=1)


def _ref_head(g, weights):
    w1, b1, w2, b2, w3, b3 = weights
    h = jnp.dot(g.astype(jnp.bfloat16), w1, preferred_element_type=jnp.float32)
    h = jnp.maximum(h + b1, 0.0)
    h = jnp.dot(h.astype(jnp.bfloat16), w2, preferred_element_type=jnp.float32)
    h = jnp.maximum(h + b2, 0.0)
    return jnp.dot(h, w3, preferred_element_type=jnp.float32) + b3


def _ref_forward(x_bcn, params, bf16_epilogue):
    B = x_bcn.shape[0]
    g_t = _ref_trunk(x_bcn, None, params["tnet_trunk"], True, bf16_epilogue)
    trans = _ref_head(g_t, params["tnet_head"]).reshape(B, 3, 3)
    g = _ref_trunk(x_bcn, trans, params["main_trunk"], False, bf16_epilogue)
    return g, trans


# -----------------------------------------------------------------------------
if __name__ == "__main__":
    key = jax.random.PRNGKey(0)
    kx, kp = jax.random.split(key)
    params = init_params(kp)
    auto_ep = _default_bf16_epilogue()

    # (B, N, tn, bf16_epilogue): covers the single-tile path, the tiled path
    # with tail masking + scratch accumulator, and the B==1 two-way split
    # path, plus both epilogue precisions.
    configs = [
        (2, 300, 1024, auto_ep),
        (2, 300, 128, True),
        (1, 1000, 256, False),
    ]
    for (B, N, tn, ep) in configs:
        kx, sub = jax.random.split(kx)
        x = jax.random.normal(sub, (B, 3, N), jnp.float32)
        fwd = jax.jit(functools.partial(pointnetfeat_forward, params=params,
                                        tn=tn, bf16_epilogue=ep))
        g, trans, trans_feat = fwd(x)
        jax.block_until_ready((g, trans))

        g_ref, trans_ref = _ref_forward(x, params, bf16_epilogue=ep)
        assert g.shape == (B, 1024) and trans.shape == (B, 3, 3)
        assert trans_feat is None
        assert jnp.allclose(trans, trans_ref, atol=2e-2, rtol=2e-2), (B, N, tn, ep)
        assert jnp.allclose(g, g_ref, atol=2e-2, rtol=2e-2), (B, N, tn, ep)

    print("KERNEL_OK")
</pallas_src>

<mosaic_0001>
module attributes {stable_mosaic.version = 11 : i64} {
  func.func @kernel(%arg0: i32, %arg1: i32, %arg2: i32, %arg3: memref<1x3x300xf32, #tpu.memory_space<vmem>>, %arg4: memref<1x64x3xf32, #tpu.memory_space<vmem>>, %arg5: memref<64x1xf32, #tpu.memory_space<vmem>>, %arg6: memref<128x64xbf16, #tpu.memory_space<vmem>>, %arg7: memref<128x1xbf16, #tpu.memory_space<vmem>>, %arg8: memref<1024x128xbf16, #tpu.memory_space<vmem>>, %arg9: memref<1024x1xbf16, #tpu.memory_space<vmem>>, %arg10: memref<1x1x1024x1xf32, #tpu.memory_space<vmem>>) attributes {dimension_semantics = [#tpu.dimension_semantics<parallel>, #tpu.dimension_semantics<parallel>, #tpu.dimension_semantics<arbitrary>], iteration_bounds = array<i64: 1, 2, 1>, scalar_prefetch = 0 : i64, scratch_operands = 0 : i64, tpu.core_type = #tpu.core_type<tc>, window_params = [{transform_indices = @transform_0, window_bounds = array<i64: 1, 3, 300>}, {pipeline_mode = #tpu.pipeline_mode<synchronous>, transform_indices = @transform_1, window_bounds = array<i64: 1, 64, 3>}, {pipeline_mode = #tpu.pipeline_mode<synchronous>, transform_indices = @transform_2, window_bounds = array<i64: 64, 1>}, {pipeline_mode = #tpu.pipeline_mode<synchronous>, transform_indices = @transform_3, window_bounds = array<i64: 128, 64>}, {pipeline_mode = #tpu.pipeline_mode<synchronous>, transform_indices = @transform_4, window_bounds = array<i64: 128, 1>}, {pipeline_mode = #tpu.pipeline_mode<synchronous>, transform_indices = @transform_5, window_bounds = array<i64: 1024, 128>}, {pipeline_mode = #tpu.pipeline_mode<synchronous>, transform_indices = @transform_6, window_bounds = array<i64: 1024, 1>}, {transform_indices = @transform_7, window_bounds = array<i64: 1, 1, 1024, 1>}]} {
    %c0 = arith.constant 0 : index
    %c0_0 = arith.constant 0 : index
    %c0_1 = arith.constant 0 : index
    %0 = vector.load %arg3[%c0, %c0_0, %c0_1] : memref<1x3x300xf32, #tpu.memory_space<vmem>>, vector<1x3x300xf32>
    %1 = vector.shape_cast %0 : vector<1x3x300xf32> to vector<3x300xf32>
    %c0_2 = arith.constant 0 : index
    %c0_3 = arith.constant 0 : index
    %c0_4 = arith.constant 0 : index
    %2 = vector.load %arg4[%c0_2, %c0_3, %c0_4] : memref<1x64x3xf32, #tpu.memory_space<vmem>>, vector<1x64x3xf32>
    %3 = vector.shape_cast %2 : vector<1x64x3xf32> to vector<64x3xf32>
    %cst = arith.constant dense<0.000000e+00> : vector<64x300xf32>
    %4 = tpu.matmul %3, %1, %cst {dimension_numbers = #tpu.dot_dimension_numbers<[1], [0], [0], [1], [0, 0, 1, 1], [], []>} : vector<64x3xf32>, vector<3x300xf32>, vector<64x300xf32> -> vector<64x300xf32>
    %c0_5 = arith.constant 0 : index
    %c0_6 = arith.constant 0 : index
    %5 = vector.load %arg5[%c0_5, %c0_6] : memref<64x1xf32, #tpu.memory_space<vmem>>, vector<64x1xf32>
    %6 = vector.broadcast %5 : vector<64x1xf32> to vector<64x300xf32>
    %7 = arith.addf %4, %6 : vector<64x300xf32>
    %cst_7 = arith.constant 0.000000e+00 : f32
    %8 = vector.broadcast %cst_7 : f32 to vector<64x300xf32>
    %9 = arith.maximumf %7, %8 : vector<64x300xf32>
    %10 = arith.truncf %9 : vector<64x300xf32> to vector<64x300xbf16>
    %c0_8 = arith.constant 0 : index
    %c0_9 = arith.constant 0 : index
    %11 = vector.load %arg6[%c0_8, %c0_9] : memref<128x64xbf16, #tpu.memory_space<vmem>>, vector<128x64xbf16>
    %cst_10 = arith.constant dense<0.000000e+00> : vector<128x300xf32>
    %12 = tpu.matmul %11, %10, %cst_10 {dimension_numbers = #tpu.dot_dimension_numbers<[1], [0], [0], [1], [0, 0, 1, 1], [], []>} : vector<128x64xbf16>, vector<64x300xbf16>, vector<128x300xf32> -> vector<128x300xf32>
    %13 = arith.truncf %12 : vector<128x300xf32> to vector<128x300xbf16>
    %c0_11 = arith.constant 0 : index
    %c0_12 = arith.constant 0 : index
    %14 = vector.load %arg7[%c0_11, %c0_12] : memref<128x1xbf16, #tpu.memory_space<vmem>>, vector<128x1xbf16>
    %15 = vector.broadcast %14 : vector<128x1xbf16> to vector<128x300xbf16>
    %16 = arith.addf %13, %15 : vector<128x300xbf16>
    %cst_13 = arith.constant 0.000000e+00 : bf16
    %17 = vector.broadcast %cst_13 : bf16 to vector<128x300xbf16>
    %18 = arith.maximumf %16, %17 : vector<128x300xbf16>
    %c0_14 = arith.constant 0 : index
    %c0_15 = arith.constant 0 : index
    %19 = vector.load %arg8[%c0_14, %c0_15] : memref<1024x128xbf16, #tpu.memory_space<vmem>>, vector<1024x128xbf16>
    %cst_16 = arith.constant dense<0.000000e+00> : vector<1024x300xf32>
    %20 = tpu.matmul %19, %18, %cst_16 {dimension_numbers = #tpu.dot_dimension_numbers<[1], [0], [0], [1], [0, 0, 1, 1], [], []>} : vector<1024x128xbf16>, vector<128x300xbf16>, vector<1024x300xf32> -> vector<1024x300xf32>
    %21 = arith.truncf %20 : vector<1024x300xf32> to vector<1024x300xbf16>
    %c0_17 = arith.constant 0 : index
    %c0_18 = arith.constant 0 : index
    %22 = vector.load %arg9[%c0_17, %c0_18] : memref<1024x1xbf16, #tpu.memory_space<vmem>>, vector<1024x1xbf16>
    %23 = vector.broadcast %22 : vector<1024x1xbf16> to vector<1024x300xbf16>
    %24 = arith.addf %21, %23 : vector<1024x300xbf16>
    %cst_19 = arith.constant 0.000000e+00 : bf16
    %25 = vector.broadcast %cst_19 : bf16 to vector<1024x300xbf16>
    %26 = arith.maximumf %24, %25 : vector<1024x300xbf16>
    %cst_20 = arith.constant dense<0xFF80> : vector<1024xbf16>
    %27 = vector.multi_reduction <maximumf>, %26, %cst_20 [1] : vector<1024x300xbf16> to vector<1024xbf16>
    %28 = vector.shape_cast %27 : vector<1024xbf16> to vector<1024x1xbf16>
    %29 = arith.extf %28 : vector<1024x1xbf16> to vector<1024x1xf32>
    %c0_21 = arith.constant 0 : index
    %c0_22 = arith.constant 0 : index
    %c0_23 = arith.constant 0 : index
    %c0_24 = arith.constant 0 : index
    %30 = vector.load %arg10[%c0_21, %c0_22, %c0_23, %c0_24] : memref<1x1x1024x1xf32, #tpu.memory_space<vmem>>, vector<1x1x1024x1xf32>
    %31 = vector.shape_cast %30 : vector<1x1x1024x1xf32> to vector<1024x1xf32>
    %32 = vector.shape_cast %29 : vector<1024x1xf32> to vector<1x1x1024x1xf32>
    tpu.vector_store %arg10[%c0_21, %c0_22, %c0_23, %c0_24], %32 {strides = array<i32>} : memref<1x1x1024x1xf32, #tpu.memory_space<vmem>>, vector<1x1x1024x1xf32>,
    return
  }
  func.func @transform_0(%arg0: i32, %arg1: i32, %arg2: i32) -> (i32, i32, i32) {
    %c1_i32 = arith.constant 1 : i32
    %0 = arith.muli %arg0, %c1_i32 : i32
    %1 = arith.addi %0, %arg2 : i32
    %c0_i32 = arith.constant 0 : i32
    %c0_i32_0 = arith.constant 0 : i32
    return %arg1, %c0_i32, %1 : i32, i32, i32
  }
  func.func @transform_1(%arg0: i32, %arg1: i32, %arg2: i32) -> (i32, i32, i32) {
    %c0_i32 = arith.constant 0 : i32
    %c0_i32_0 = arith.constant 0 : i32
    %c0_i32_1 = arith.constant 0 : i32
    %c0_i32_2 = arith.constant 0 : i32
    return %c0_i32, %c0_i32_0, %c0_i32_1 : i32, i32, i32
  }
  func.func @transform_2(%arg0: i32, %arg1: i32, %arg2: i32) -> (i32, i32) {
    %c0_i32 = arith.constant 0 : i32
    %c0_i32_0 = arith.constant 0 : i32
    %c0_i32_1 = arith.constant 0 : i32
    return %c0_i32, %c0_i32_0 : i32, i32
  }
  func.func @transform_3(%arg0: i32, %arg1: i32, %arg2: i32) -> (i32, i32) {
    %c0_i32 = arith.constant 0 : i32
    %c0_i32_0 = arith.constant 0 : i32
    %c0_i32_1 = arith.constant 0 : i32
    return %c0_i32, %c0_i32_0 : i32, i32
  }
  func.func @transform_4(%arg0: i32, %arg1: i32, %arg2: i32) -> (i32, i32) {
    %c0_i32 = arith.constant 0 : i32
    %c0_i32_0 = arith.constant 0 : i32
    %c0_i32_1 = arith.constant 0 : i32
    return %c0_i32, %c0_i32_0 : i32, i32
  }
  func.func @transform_5(%arg0: i32, %arg1: i32, %arg2: i32) -> (i32, i32) {
    %c0_i32 = arith.constant 0 : i32
    %c0_i32_0 = arith.constant 0 : i32
    %c0_i32_1 = arith.constant 0 : i32
    return %c0_i32, %c0_i32_0 : i32, i32
  }
  func.func @transform_6(%arg0: i32, %arg1: i32, %arg2: i32) -> (i32, i32) {
    %c0_i32 = arith.constant 0 : i32
    %c0_i32_0 = arith.constant 0 : i32
    %c0_i32_1 = arith.constant 0 : i32
    return %c0_i32, %c0_i32_0 : i32, i32
  }
  func.func @transform_7(%arg0: i32, %arg1: i32, %arg2: i32) -> (i32, i32, i32, i32) {
    %c0_i32 = arith.constant 0 : i32
    %c0_i32_0 = arith.constant 0 : i32
    %c0_i32_1 = arith.constant 0 : i32
    return %arg0, %arg1, %c0_i32, %c0_i32_0 : i32, i32, i32, i32
  }
}

module attributes {stable_mosaic.version = 11 : i64} {
  func.func @head_kernel(%arg0: memref<2x1024xf32, #tpu.memory_space<vmem>>, %arg1: memref<1024x512xbf16, #tpu.memory_space<vmem>>, %arg2: memref<1x512xf32, #tpu.memory_space<vmem>>, %arg3: memref<512x256xbf16, #tpu.memory_space<vmem>>, %arg4: memref<1x256xf32, #tpu.memory_space<vmem>>, %arg5: memref<256x9xf32, #tpu.memory_space<vmem>>, %arg6: memref<1x9xf32, #tpu.memory_space<vmem>>, %arg7: memref<2x9xf32, #tpu.memory_space<vmem>>) attributes {dimension_semantics = [], scalar_prefetch = 0 : i64, scratch_operands = 0 : i64, tpu.core_type = #tpu.core_type<tc>} {
    %c0 = arith.constant 0 : index
    %c0_0 = arith.constant 0 : index
    %0 = vector.load %arg0[%c0, %c0_0] : memref<2x1024xf32, #tpu.memory_space<vmem>>, vector<2x1024xf32>
    %1 = arith.truncf %0 : vector<2x1024xf32> to vector<2x1024xbf16>
    %c0_1 = arith.constant 0 : index
    %c0_2 = arith.constant 0 : index
    %2 = vector.load %arg1[%c0_1, %c0_2] : memref<1024x512xbf16, #tpu.memory_space<vmem>>, vector<1024x512xbf16>
    %cst = arith.constant dense<0.000000e+00> : vector<2x512xf32>
    %3 = tpu.matmul %1, %2, %cst {dimension_numbers = #tpu.dot_dimension_numbers<[1], [0], [0], [1], [0, 0, 1, 1], [], []>} : vector<2x1024xbf16>, vector<1024x512xbf16>, vector<2x512xf32> -> vector<2x512xf32>
    %c0_3 = arith.constant 0 : index
    %c0_4 = arith.constant 0 : index
    %4 = vector.load %arg2[%c0_3, %c0_4] : memref<1x512xf32, #tpu.memory_space<vmem>>, vector<1x512xf32>
    %5 = vector.broadcast %4 : vector<1x512xf32> to vector<2x512xf32>
    %6 = arith.addf %3, %5 : vector<2x512xf32>
    %cst_5 = arith.constant 0.000000e+00 : f32
    %7 = vector.broadcast %cst_5 : f32 to vector<2x512xf32>
    %8 = arith.maximumf %6, %7 : vector<2x512xf32>
    %9 = arith.truncf %8 : vector<2x512xf32> to vector<2x512xbf16>
    %c0_6 = arith.constant 0 : index
    %c0_7 = arith.constant 0 : index
    %10 = vector.load %arg3[%c0_6, %c0_7] : memref<512x256xbf16, #tpu.memory_space<vmem>>, vector<512x256xbf16>
    %cst_8 = arith.constant dense<0.000000e+00> : vector<2x256xf32>
    %11 = tpu.matmul %9, %10, %cst_8 {dimension_numbers = #tpu.dot_dimension_numbers<[1], [0], [0], [1], [0, 0, 1, 1], [], []>} : vector<2x512xbf16>, vector<512x256xbf16>, vector<2x256xf32> -> vector<2x256xf32>
    %c0_9 = arith.constant 0 : index
    %c0_10 = arith.constant 0 : index
    %12 = vector.load %arg4[%c0_9, %c0_10] : memref<1x256xf32, #tpu.memory_space<vmem>>, vector<1x256xf32>
    %13 = vector.broadcast %12 : vector<1x256xf32> to vector<2x256xf32>
    %14 = arith.addf %11, %13 : vector<2x256xf32>
    %cst_11 = arith.constant 0.000000e+00 : f32
    %15 = vector.broadcast %cst_11 : f32 to vector<2x256xf32>
    %16 = arith.maximumf %14, %15 : vector<2x256xf32>
    %c0_12 = arith.constant 0 : index
    %c0_13 = arith.constant 0 : index
    %17 = vector.load %arg5[%c0_12, %c0_13] : memref<256x9xf32, #tpu.memory_space<vmem>>, vector<256x9xf32>
    %cst_14 = arith.constant dense<0.000000e+00> : vector<2x9xf32>
    %18 = tpu.matmul %16, %17, %cst_14 {dimension_numbers = #tpu.dot_dimension_numbers<[1], [0], [0], [1], [0, 0, 1, 1], [], []>} : vector<2x256xf32>, vector<256x9xf32>, vector<2x9xf32> -> vector<2x9xf32>
    %c0_15 = arith.constant 0 : index
    %c0_16 = arith.constant 0 : index
    %19 = vector.load %arg6[%c0_15, %c0_16] : memref<1x9xf32, #tpu.memory_space<vmem>>, vector<1x9xf32>
    %20 = vector.broadcast %19 : vector<1x9xf32> to vector<2x9xf32>
    %21 = arith.addf %18, %20 : vector<2x9xf32>
    %c0_17 = arith.constant 0 : index
    %c0_18 = arith.constant 0 : index
    %22 = vector.load %arg7[%c0_17, %c0_18] : memref<2x9xf32, #tpu.memory_space<vmem>>, vector<2x9xf32>
    tpu.vector_store %arg7[%c0_17, %c0_18], %21 {strides = array<i32>} : memref<2x9xf32, #tpu.memory_space<vmem>>, vector<2x9xf32>,
    return
  }
}

module attributes {stable_mosaic.version = 11 : i64} {
  func.func @kernel(%arg0: i32, %arg1: i32, %arg2: i32, %arg3: memref<1x3x300xf32, #tpu.memory_space<vmem>>, %arg4: memref<1x64x3xf32, #tpu.memory_space<vmem>>, %arg5: memref<64x1xf32, #tpu.memory_space<vmem>>, %arg6: memref<128x64xbf16, #tpu.memory_space<vmem>>, %arg7: memref<128x1xbf16, #tpu.memory_space<vmem>>, %arg8: memref<1024x128xbf16, #tpu.memory_space<vmem>>, %arg9: memref<1024x1xbf16, #tpu.memory_space<vmem>>, %arg10: memref<1x1x1024x1xf32, #tpu.memory_space<vmem>>) attributes {dimension_semantics = [#tpu.dimension_semantics<parallel>, #tpu.dimension_semantics<parallel>, #tpu.dimension_semantics<arbitrary>], iteration_bounds = array<i64: 1, 2, 1>, scalar_prefetch = 0 : i64, scratch_operands = 0 : i64, tpu.core_type = #tpu.core_type<tc>, window_params = [{transform_indices = @transform_0, window_bounds = array<i64: 1, 3, 300>}, {transform_indices = @transform_1, window_bounds = array<i64: 1, 64, 3>}, {pipeline_mode = #tpu.pipeline_mode<synchronous>, transform_indices = @transform_2, window_bounds = array<i64: 64, 1>}, {pipeline_mode = #tpu.pipeline_mode<synchronous>, transform_indices = @transform_3, window_bounds = array<i64: 128, 64>}, {pipeline_mode = #tpu.pipeline_mode<synchronous>, transform_indices = @transform_4, window_bounds = array<i64: 128, 1>}, {pipeline_mode = #tpu.pipeline_mode<synchronous>, transform_indices = @transform_5, window_bounds = array<i64: 1024, 128>}, {pipeline_mode = #tpu.pipeline_mode<synchronous>, transform_indices = @transform_6, window_bounds = array<i64: 1024, 1>}, {transform_indices = @transform_7, window_bounds = array<i64: 1, 1, 1024, 1>}]} {
    %c0 = arith.constant 0 : index
    %c0_0 = arith.constant 0 : index
    %c0_1 = arith.constant 0 : index
    %0 = vector.load %arg3[%c0, %c0_0, %c0_1] : memref<1x3x300xf32, #tpu.memory_space<vmem>>, vector<1x3x300xf32>
    %1 = vector.shape_cast %0 : vector<1x3x300xf32> to vector<3x300xf32>
    %c0_2 = arith.constant 0 : index
    %c0_3 = arith.constant 0 : index
    %c0_4 = arith.constant 0 : index
    %2 = vector.load %arg4[%c0_2, %c0_3, %c0_4] : memref<1x64x3xf32, #tpu.memory_space<vmem>>, vector<1x64x3xf32>
    %3 = vector.shape_cast %2 : vector<1x64x3xf32> to vector<64x3xf32>
    %cst = arith.constant dense<0.000000e+00> : vector<64x300xf32>
    %4 = tpu.matmul %3, %1, %cst {dimension_numbers = #tpu.dot_dimension_numbers<[1], [0], [0], [1], [0, 0, 1, 1], [], []>} : vector<64x3xf32>, vector<3x300xf32>, vector<64x300xf32> -> vector<64x300xf32>
    %c0_5 = arith.constant 0 : index
    %c0_6 = arith.constant 0 : index
    %5 = vector.load %arg5[%c0_5, %c0_6] : memref<64x1xf32, #tpu.memory_space<vmem>>, vector<64x1xf32>
    %6 = vector.broadcast %5 : vector<64x1xf32> to vector<64x300xf32>
    %7 = arith.addf %4, %6 : vector<64x300xf32>
    %cst_7 = arith.constant 0.000000e+00 : f32
    %8 = vector.broadcast %cst_7 : f32 to vector<64x300xf32>
    %9 = arith.maximumf %7, %8 : vector<64x300xf32>
    %10 = arith.truncf %9 : vector<64x300xf32> to vector<64x300xbf16>
    %c0_8 = arith.constant 0 : index
    %c0_9 = arith.constant 0 : index
    %11 = vector.load %arg6[%c0_8, %c0_9] : memref<128x64xbf16, #tpu.memory_space<vmem>>, vector<128x64xbf16>
    %cst_10 = arith.constant dense<0.000000e+00> : vector<128x300xf32>
    %12 = tpu.matmul %11, %10, %cst_10 {dimension_numbers = #tpu.dot_dimension_numbers<[1], [0], [0], [1], [0, 0, 1, 1], [], []>} : vector<128x64xbf16>, vector<64x300xbf16>, vector<128x300xf32> -> vector<128x300xf32>
    %13 = arith.truncf %12 : vector<128x300xf32> to vector<128x300xbf16>
    %c0_11 = arith.constant 0 : index
    %c0_12 = arith.constant 0 : index
    %14 = vector.load %arg7[%c0_11, %c0_12] : memref<128x1xbf16, #tpu.memory_space<vmem>>, vector<128x1xbf16>
    %15 = vector.broadcast %14 : vector<128x1xbf16> to vector<128x300xbf16>
    %16 = arith.addf %13, %15 : vector<128x300xbf16>
    %cst_13 = arith.constant 0.000000e+00 : bf16
    %17 = vector.broadcast %cst_13 : bf16 to vector<128x300xbf16>
    %18 = arith.maximumf %16, %17 : vector<128x300xbf16>
    %c0_14 = arith.constant 0 : index
    %c0_15 = arith.constant 0 : index
    %19 = vector.load %arg8[%c0_14, %c0_15] : memref<1024x128xbf16, #tpu.memory_space<vmem>>, vector<1024x128xbf16>
    %cst_16 = arith.constant dense<0.000000e+00> : vector<1024x300xf32>
    %20 = tpu.matmul %19, %18, %cst_16 {dimension_numbers = #tpu.dot_dimension_numbers<[1], [0], [0], [1], [0, 0, 1, 1], [], []>} : vector<1024x128xbf16>, vector<128x300xbf16>, vector<1024x300xf32> -> vector<1024x300xf32>
    %21 = arith.truncf %20 : vector<1024x300xf32> to vector<1024x300xbf16>
    %c0_17 = arith.constant 0 : index
    %c0_18 = arith.constant 0 : index
    %22 = vector.load %arg9[%c0_17, %c0_18] : memref<1024x1xbf16, #tpu.memory_space<vmem>>, vector<1024x1xbf16>
    %23 = vector.broadcast %22 : vector<1024x1xbf16> to vector<1024x300xbf16>
    %24 = arith.addf %21, %23 : vector<1024x300xbf16>
    %cst_19 = arith.constant dense<0xFF80> : vector<1024xbf16>
    %25 = vector.multi_reduction <maximumf>, %24, %cst_19 [1] : vector<1024x300xbf16> to vector<1024xbf16>
    %26 = vector.shape_cast %25 : vector<1024xbf16> to vector<1024x1xbf16>
    %27 = arith.extf %26 : vector<1024x1xbf16> to vector<1024x1xf32>
    %c0_20 = arith.constant 0 : index
    %c0_21 = arith.constant 0 : index
    %c0_22 = arith.constant 0 : index
    %c0_23 = arith.constant 0 : index
    %28 = vector.load %arg10[%c0_20, %c0_21, %c0_22, %c0_23] : memref<1x1x1024x1xf32, #tpu.memory_space<vmem>>, vector<1x1x1024x1xf32>
    %29 = vector.shape_cast %28 : vector<1x1x1024x1xf32> to vector<1024x1xf32>
    %30 = vector.shape_cast %27 : vector<1024x1xf32> to vector<1x1x1024x1xf32>
    tpu.vector_store %arg10[%c0_20, %c0_21, %c0_22, %c0_23], %30 {strides = array<i32>} : memref<1x1x1024x1xf32, #tpu.memory_space<vmem>>, vector<1x1x1024x1xf32>,
    return
  }
  func.func @transform_0(%arg0: i32, %arg1: i32, %arg2: i32) -> (i32, i32, i32) {
    %c1_i32 = arith.constant 1 : i32
    %0 = arith.muli %arg0, %c1_i32 : i32
    %1 = arith.addi %0, %arg2 : i32
    %c0_i32 = arith.constant 0 : i32
    %c0_i32_0 = arith.constant 0 : i32
    return %arg1, %c0_i32, %1 : i32, i32, i32
  }
  func.func @transform_1(%arg0: i32, %arg1: i32, %arg2: i32) -> (i32, i32, i32) {
    %c0_i32 = arith.constant 0 : i32
    %c0_i32_0 = arith.constant 0 : i32
    %c0_i32_1 = arith.constant 0 : i32
    return %arg1, %c0_i32, %c0_i32_0 : i32, i32, i32
  }
  func.func @transform_2(%arg0: i32, %arg1: i32, %arg2: i32) -> (i32, i32) {
    %c0_i32 = arith.constant 0 : i32
    %c0_i32_0 = arith.constant 0 : i32
    %c0_i32_1 = arith.constant 0 : i32
    return %c0_i32, %c0_i32_0 : i32, i32
  }
  func.func @transform_3(%arg0: i32, %arg1: i32, %arg2: i32) -> (i32, i32) {
    %c0_i32 = arith.constant 0 : i32
    %c0_i32_0 = arith.constant 0 : i32
    %c0_i32_1 = arith.constant 0 : i32
    return %c0_i32, %c0_i32_0 : i32, i32
  }
  func.func @transform_4(%arg0: i32, %arg1: i32, %arg2: i32) -> (i32, i32) {
    %c0_i32 = arith.constant 0 : i32
    %c0_i32_0 = arith.constant 0 : i32
    %c0_i32_1 = arith.constant 0 : i32
    return %c0_i32, %c0_i32_0 : i32, i32
  }
  func.func @transform_5(%arg0: i32, %arg1: i32, %arg2: i32) -> (i32, i32) {
    %c0_i32 = arith.constant 0 : i32
    %c0_i32_0 = arith.constant 0 : i32
    %c0_i32_1 = arith.constant 0 : i32
    return %c0_i32, %c0_i32_0 : i32, i32
  }
  func.func @transform_6(%arg0: i32, %arg1: i32, %arg2: i32) -> (i32, i32) {
    %c0_i32 = arith.constant 0 : i32
    %c0_i32_0 = arith.constant 0 : i32
    %c0_i32_1 = arith.constant 0 : i32
    return %c0_i32, %c0_i32_0 : i32, i32
  }
  func.func @transform_7(%arg0: i32, %arg1: i32, %arg2: i32) -> (i32, i32, i32, i32) {
    %c0_i32 = arith.constant 0 : i32
    %c0_i32_0 = arith.constant 0 : i32
    %c0_i32_1 = arith.constant 0 : i32
    return %arg0, %arg1, %c0_i32, %c0_i32_0 : i32, i32, i32, i32
  }
}

</mosaic_0001>

<bundles_post_ra>
// kernel: pointnetfeat_forward.4
= control target key start
LH: loop header
LB: loop body
LE: loop exit
PB: predicated region body
PF: predicated region fallthrough
CT: control target
= control target key end

     0   :  { %v3472_v36 = vmov 1983009808   ;;  %v34_v38 = vlaneseq  ;;  %vm2563_vm0 = vcmask 66560   ;;  %s4659_s1 = inlined_call_operand.vmem [shape: bf16[1024,512], index: 1, kind: input, shape index: {}]   ;;  %s4660_s0 = inlined_call_operand.vmem [shape: f32[2,1024], index: 0, kind: input, shape index: {}]   ;;  %s4661_s3 = inlined_call_operand.vmem [shape: bf16[512,256], index: 3, kind: input, shape index: {}]   ;;  %s4662_s2 = inlined_call_operand.vmem [shape: f32[1,512], index: 2, kind: input, shape index: {}]   ;;  %s4663_s5 = inlined_call_operand.vmem [shape: f32[256,9], index: 5, kind: input, shape index: {}]   ;;  %s4664_s4 = inlined_call_operand.vmem [shape: f32[1,256], index: 4, kind: input, shape index: {}]   ;;  %s4665_s6 = inlined_call_operand.vmem [shape: f32[1,9], index: 6, kind: input, shape index: {}]   ;;  %s4666_s7 = inlined_call_operand.vmem [shape: f32[2,9], index: 7, kind: output, shape index: {}]  }
   0x1   :  { %v2990_v0 = vld [vmem:[%s4659_s1 + $0x4] ss:$16 sps:$4 sm:$0xff]   ;;  %v2994_v2 = vld [vmem:[%s4659_s1] ss:$16 sps:$4 sm:$0xff]   ;;  %v32_v37 = vunpack.c.l.s4 %v3472_v36 }
   0x2   :  { %v2992_v1 = vld [vmem:[%s4659_s1 + $0x204] ss:$16 sps:$4 sm:$0xff]   ;;  %1638 = vmatprep.subr.bf16.mxu1 %v2990_v0  ;;  %v2995_v3 = vld [vmem:[%s4659_s1 + $0x200] ss:$16 sps:$4 sm:$0xff]   ;;  %v3630_v43 = vshrl.u32 %v34_v38, 7 }
   0x3   :  { %1679 = vmatprep.subr.bf16.mxu0 %v2992_v1  ;;  %v2996_v4 = vld [vmem:[%s4659_s1 + $0x24] ss:$16 sps:$4 sm:$0xff]   ;;  %1639 = vmatpush1.bf16.msra.mxu1 %v2994_v2  ;;  %v3000_v6 = vld [vmem:[%s4659_s1 + $0x20] ss:$16 sps:$4 sm:$0xff]   ;;  %v33_v42 = vunpack.c.0.s8 %v32_v37  ;;  %v3117_v37 = vld [vmem:[%s4659_s1 + $0x8c] ss:$16 sps:$4 sm:$0xff]  }
   0x4   :  { %1680 = vmatpush1.bf16.msra.mxu0 %v2995_v3  ;;  %v2998_v5 = vld [vmem:[%s4659_s1 + $0x224] ss:$16 sps:$4 sm:$0xff]   ;;  %1640 = vmatprep.subr.bf16.mxu1 %v2996_v4  ;;  %v3001_v7 = vld [vmem:[%s4659_s1 + $0x220] ss:$16 sps:$4 sm:$0xff]  }
   0x5   :  { %1681 = vmatprep.subr.bf16.mxu0 %v2998_v5  ;;  %v3002_v8 = vld [vmem:[%s4659_s1 + $0x44] ss:$16 sps:$4 sm:$0xff]   ;;  %v3006_v10 = vld [vmem:[%s4659_s1 + $0x40] ss:$16 sps:$4 sm:$0xff]   ;;  %v3648_v49 = vsub.s32 %v33_v42, %v3630_v43 }
   0x6   :  { %v3004_v9 = vld [vmem:[%s4659_s1 + $0x244] ss:$16 sps:$4 sm:$0xff]   ;;  %v3007_v11 = vld [vmem:[%s4659_s1 + $0x240] ss:$16 sps:$4 sm:$0xff]  }
   0x7   :  { %1641 = vmatpush1.bf16.msra.mxu1 %v3000_v6  ;;  %v3008_v12 = vld [vmem:[%s4659_s1 + $0x64] ss:$16 sps:$4 sm:$0xff]   ;;  %v3012_v14 = vld [vmem:[%s4659_s1 + $0x60] ss:$16 sps:$4 sm:$0xff]  }
   0x8   :  { %1682 = vmatpush1.bf16.msra.mxu0 %v3001_v7  ;;  %1642 = vmatprep.subr.bf16.mxu1 %v3002_v8  ;;  %v3010_v13 = vld [vmem:[%s4659_s1 + $0x264] ss:$16 sps:$4 sm:$0xff]   ;;  %v3013_v15 = vld [vmem:[%s4659_s1 + $0x260] ss:$16 sps:$4 sm:$0xff]   ;;  %v3703_v8 = vld [vmem:[%s4660_s0 + $0x8] sm:$0xff] }
   0x9   :  { %1683 = vmatprep.subr.bf16.mxu0 %v3004_v9  ;;  %v3014_v16 = vld [vmem:[%s4659_s1 + $0x84] ss:$16 sps:$4 sm:$0xff]   ;;  %v3018_v18 = vld [vmem:[%s4659_s1 + $0x80] ss:$16 sps:$4 sm:$0xff]  }
   0xa   :  { %v3016_v17 = vld [vmem:[%s4659_s1 + $0x284] ss:$16 sps:$4 sm:$0xff]   ;;  %v3019_v19 = vld [vmem:[%s4659_s1 + $0x280] ss:$16 sps:$4 sm:$0xff]  }
   0xb   :  { %1643 = vmatpush1.bf16.msra.mxu1 %v3006_v10  ;;  %v3020_v20 = vld [vmem:[%s4659_s1 + $0xa4] ss:$16 sps:$4 sm:$0xff]   ;;  %v3024_v22 = vld [vmem:[%s4659_s1 + $0xa0] ss:$16 sps:$4 sm:$0xff]  }
   0xc   :  { %1684 = vmatpush1.bf16.msra.mxu0 %v3007_v11  ;;  %1644 = vmatprep.subr.bf16.mxu1 %v3008_v12  ;;  %v3022_v21 = vld [vmem:[%s4659_s1 + $0x2a4] ss:$16 sps:$4 sm:$0xff]   ;;  %v3025_v23 = vld [vmem:[%s4659_s1 + $0x2a0] ss:$16 sps:$4 sm:$0xff]  }
   0xd   :  { %1685 = vmatprep.subr.bf16.mxu0 %v3010_v13  ;;  %v3026_v24 = vld [vmem:[%s4659_s1 + $0xc4] ss:$16 sps:$4 sm:$0xff]   ;;  %v3030_v26 = vld [vmem:[%s4659_s1 + $0xc0] ss:$16 sps:$4 sm:$0xff]   ;;  %v3719_v13 = vrot.slane %v3703_v8, %v3648_v49 }
   0xe   :  { %v3028_v25 = vld [vmem:[%s4659_s1 + $0x2c4] ss:$16 sps:$4 sm:$0xff]   ;;  %v3031_v27 = vld [vmem:[%s4659_s1 + $0x2c0] ss:$16 sps:$4 sm:$0xff]  }
   0xf   :  { %1645 = vmatpush1.bf16.msra.mxu1 %v3012_v14  ;;  %v3032_v28 = vld [vmem:[%s4659_s1 + $0xe4] ss:$16 sps:$4 sm:$0xff]   ;;  %v3036_v30 = vld [vmem:[%s4659_s1 + $0xe0] ss:$16 sps:$4 sm:$0xff]  }
  0x10   :  { %1686 = vmatpush1.bf16.msra.mxu0 %v3013_v15  ;;  %1646 = vmatprep.subr.bf16.mxu1 %v3014_v16  ;;  %v3034_v29 = vld [vmem:[%s4659_s1 + $0x2e4] ss:$16 sps:$4 sm:$0xff]   ;;  %v3037_v31 = vld [vmem:[%s4659_s1 + $0x2e0] ss:$16 sps:$4 sm:$0xff]  }
  0x11   :  { %1687 = vmatprep.subr.bf16.mxu0 %v3016_v17  ;;  %v3038_v32 = vld [vmem:[%s4659_s1 + $0x104] ss:$16 sps:$4 sm:$0xff]   ;;  %v3042_v34 = vld [vmem:[%s4659_s1 + $0x100] ss:$16 sps:$4 sm:$0xff]   ;;  %v3093_v17 = vld [vmem:[%s4659_s1 + $0xc] ss:$16 sps:$4 sm:$0xff]  }
  0x12   :  { %v3040_v33 = vld [vmem:[%s4659_s1 + $0x304] ss:$16 sps:$4 sm:$0xff]   ;;  %v3043_v35 = vld [vmem:[%s4659_s1 + $0x300] ss:$16 sps:$4 sm:$0xff]  }
  0x13   :  { %1647 = vmatpush1.bf16.msra.mxu1 %v3018_v18  ;;  %v3044_v39 = vld [vmem:[%s4659_s1 + $0x124] ss:$16 sps:$4 sm:$0xff]   ;;  %v3048_v41 = vld [vmem:[%s4659_s1 + $0x120] ss:$16 sps:$4 sm:$0xff]   ;;  %v62_v18 = vcombine.high %v3719_v13, %v3719_v13 }
  0x14   :  { %1688 = vmatpush1.bf16.msra.mxu0 %v3019_v19  ;;  %1648 = vmatprep.subr.bf16.mxu1 %v3020_v20  ;;  %v3046_v40 = vld [vmem:[%s4659_s1 + $0x324] ss:$16 sps:$4 sm:$0xff]   ;;  %v3049_v44 = vld [vmem:[%s4659_s1 + $0x320] ss:$16 sps:$4 sm:$0xff]  }
  0x15   :  { %1689 = vmatprep.subr.bf16.mxu0 %v3022_v21  ;;  %v3050_v45 = vld [vmem:[%s4659_s1 + $0x144] ss:$16 sps:$4 sm:$0xff]   ;;  %v3054_v47 = vld [vmem:[%s4659_s1 + $0x140] ss:$16 sps:$4 sm:$0xff]  }
  0x16   :  { %v3052_v46 = vld [vmem:[%s4659_s1 + $0x344] ss:$16 sps:$4 sm:$0xff]   ;;  %v3055_v48 = vld [vmem:[%s4659_s1 + $0x340] ss:$16 sps:$4 sm:$0xff]  }
  0x17   :  { %1649 = vmatpush1.bf16.msra.mxu1 %v3024_v22  ;;  %v3056_v50 = vld [vmem:[%s4659_s1 + $0x164] ss:$16 sps:$4 sm:$0xff]   ;;  %v3060_v55 = vld [vmem:[%s4659_s1 + $0x160] ss:$16 sps:$4 sm:$0xff]   ;;  %v3091_v22 = vld [vmem:[%s4659_s1 + $0x8] ss:$16 sps:$4 sm:$0xff]  }
  0x18   :  { %1690 = vmatpush1.bf16.msra.mxu0 %v3025_v23  ;;  %1650 = vmatprep.subr.bf16.mxu1 %v3026_v24  ;;  %v3058_v51 = vld [vmem:[%s4659_s1 + $0x364] ss:$16 sps:$4 sm:$0xff]   ;;  %v3061_v56 = vld [vmem:[%s4659_s1 + $0x360] ss:$16 sps:$4 sm:$0xff]   ;;  %v3099_v24 = vld [vmem:[%s4659_s1 + $0x2c] ss:$16 sps:$4 sm:$0xff]  }
  0x19   :  { %1691 = vmatprep.subr.bf16.mxu0 %v3028_v25  ;;  %v26_v52 = vld [vmem:[%s4660_s0] sm:$0xff]  ;;  %v3751_v25 = vpack.c.bf16 %v62_v18, %v62_v18  ;;  %v3177_v18 = vld [vmem:[%s4659_s1 + $0x1cc] ss:$16 sps:$4 sm:$0xff]  }
  0x1a   :  { %v37_v53 = vrot.slane %v26_v52, %v3648_v49  ;;  %v30_v54 = vcombine.high %v26_v52, %v26_v52  ;;  %v3062_v57 = vld [vmem:[%s4659_s1 + $0x184] ss:$16 sps:$4 sm:$0xff]   ;;  %v3066_v63 = vld [vmem:[%s4659_s1 + $0x180] ss:$16 sps:$4 sm:$0xff]  }
  0x1b   :  { %1651 = vmatpush1.bf16.msra.mxu1 %v3030_v26  ;;  %v3064_v58 = vld [vmem:[%s4659_s1 + $0x384] ss:$16 sps:$4 sm:$0xff]   ;;  %v3067_v0 = vld [vmem:[%s4659_s1 + $0x380] ss:$16 sps:$4 sm:$0xff]  }
  0x1c   :  { %1692 = vmatpush1.bf16.msra.mxu0 %v3031_v27  ;;  %1652 = vmatprep.subr.bf16.mxu1 %v3032_v28  ;;  %v45_v59 = vcombine.high %v37_v53, %v37_v53  ;;  %v44_v60 = vrot.slane %v30_v54, %v3648_v49  ;;  %v3068_v1 = vld [vmem:[%s4659_s1 + $0x1a4] ss:$16 sps:$4 sm:$0xff]   ;;  %v3072_v4 = vld [vmem:[%s4659_s1 + $0x1a0] ss:$16 sps:$4 sm:$0xff]   ;;  %v3735_v19 = vpack.c.bf16 %v37_v53, %v37_v53  ;;  %v3097_v27 = vld [vmem:[%s4659_s1 + $0x28] ss:$16 sps:$4 sm:$0xff]  }
  0x1d   :  { %1693 = vmatprep.subr.bf16.mxu0 %v3034_v29  ;;  %v3070_v2 = vld [vmem:[%s4659_s1 + $0x3a4] ss:$16 sps:$4 sm:$0xff]   ;;  %v3073_v5 = vld [vmem:[%s4659_s1 + $0x3a0] ss:$16 sps:$4 sm:$0xff]   ;;  %v3105_v29 = vld [vmem:[%s4659_s1 + $0x4c] ss:$16 sps:$4 sm:$0xff]  }
  0x1e   :  { %v73_v61 = vpack.c.bf16 %v45_v59, %v45_v59  ;;  %v46_v62 = vcombine.high %v44_v60, %v44_v60  ;;  %v3074_v6 = vld [vmem:[%s4659_s1 + $0x1c4] ss:$16 sps:$4 sm:$0xff]   ;;  %v3078_v9 = vld [vmem:[%s4659_s1 + $0x1c0] ss:$16 sps:$4 sm:$0xff]   ;;  %v3737_v20 = vpack.c.bf16 %v44_v60, %v44_v60  ;;  %v3133_v53 = vld [vmem:[%s4659_s1 + $0xe8] ss:$16 sps:$4 sm:$0xff]  }
  0x1f   :  { %1653 = vmatpush1.bf16.msra.mxu1 %v3036_v30  ;;  %v3076_v7 = vld [vmem:[%s4659_s1 + $0x3c4] ss:$16 sps:$4 sm:$0xff]   ;;  %v3079_v10 = vld [vmem:[%s4659_s1 + $0x3c0] ss:$16 sps:$4 sm:$0xff]   ;;  %v3147_v59 = vld [vmem:[%s4659_s1 + $0x12c] ss:$16 sps:$4 sm:$0xff]  }
  0x20   :  { %1694 = vmatpush1.bf16.msra.mxu0 %v3037_v31  ;;  %1654 = vmatprep.subr.bf16.mxu1 %v3038_v32  ;;  %v3685_v3 = vpack.c.bf16 %v46_v62, %v46_v62  ;;  %v3080_v11 = vld [vmem:[%s4659_s1 + $0x1e4] ss:$16 sps:$4 sm:$0xff]   ;;  %v3084_v14 = vld [vmem:[%s4659_s1 + $0x1e0] ss:$16 sps:$4 sm:$0xff]   ;;  %v3103_v31 = vld [vmem:[%s4659_s1 + $0x48] ss:$16 sps:$4 sm:$0xff]  }
  0x21   :  { %1695 = vmatprep.subr.bf16.mxu0 %v3040_v33  ;;  %1670 = vmatprep.mubr.bf16.mxu1 %v73_v61  ;;  %v3082_v12 = vld [vmem:[%s4659_s1 + $0x3e4] ss:$16 sps:$4 sm:$0xff]   ;;  %v3085_v15 = vld [vmem:[%s4659_s1 + $0x3e0] ss:$16 sps:$4 sm:$0xff]   ;;  %v3111_v33 = vld [vmem:[%s4659_s1 + $0x6c] ss:$16 sps:$4 sm:$0xff]  }
  0x22   :  { %1711 = vmatprep.mubr.bf16.mxu0 %v3685_v3  ;;  %v3090_v16 = vld [vmem:[%s4659_s1 + $0x404] ss:$16 sps:$4 sm:$0xff]   ;;  %v3088_v21 = vld [vmem:[%s4659_s1 + $0x400] ss:$16 sps:$4 sm:$0xff]  }
  0x23   :  { %1655 = vmatpush1.bf16.msra.mxu1 %v3042_v34  ;;  %v3096_v23 = vld [vmem:[%s4659_s1 + $0x424] ss:$16 sps:$4 sm:$0xff]   ;;  %v3094_v26 = vld [vmem:[%s4659_s1 + $0x420] ss:$16 sps:$4 sm:$0xff]  }
  0x24   :  { %1696 = vmatpush1.bf16.msra.mxu0 %v3043_v35  ;;  %1656 = vmatprep.subr.bf16.mxu1 %v3044_v39  ;;  %v3102_v28 = vld [vmem:[%s4659_s1 + $0x444] ss:$16 sps:$4 sm:$0xff]   ;;  %v3100_v30 = vld [vmem:[%s4659_s1 + $0x440] ss:$16 sps:$4 sm:$0xff]   ;;  %v3109_v35 = vld [vmem:[%s4659_s1 + $0x68] ss:$16 sps:$4 sm:$0xff]  }
  0x25   :  { %1697 = vmatprep.subr.bf16.mxu0 %v3046_v40  ;;  %v3108_v32 = vld [vmem:[%s4659_s1 + $0x464] ss:$16 sps:$4 sm:$0xff]   ;;  %v3106_v34 = vld [vmem:[%s4659_s1 + $0x460] ss:$16 sps:$4 sm:$0xff]   ;;  %v3115_v39 = vld [vmem:[%s4659_s1 + $0x88] ss:$16 sps:$4 sm:$0xff]  }
  0x26   :  { %v3114_v36 = vld [vmem:[%s4659_s1 + $0x484] ss:$16 sps:$4 sm:$0xff]   ;;  %v3112_v38 = vld [vmem:[%s4659_s1 + $0x480] ss:$16 sps:$4 sm:$0xff]  }
  0x27   :  { %1657 = vmatpush1.bf16.msra.mxu1 %v3048_v41  ;;  %v3120_v40 = vld [vmem:[%s4659_s1 + $0x4a4] ss:$16 sps:$4 sm:$0xff]   ;;  %v3123_v41 = vld [vmem:[%s4659_s1 + $0xac] ss:$16 sps:$4 sm:$0xff]   ;;  %v3118_v42 = vld [vmem:[%s4659_s1 + $0x4a0] ss:$16 sps:$4 sm:$0xff]  }
  0x28   :  { %1698 = vmatpush1.bf16.msra.mxu0 %v3049_v44  ;;  %1658 = vmatprep.subr.bf16.mxu1 %v3050_v45  ;;  %v3121_v44 = vld [vmem:[%s4659_s1 + $0xa8] ss:$16 sps:$4 sm:$0xff]   ;;  %v3126_v45 = vld [vmem:[%s4659_s1 + $0x4c4] ss:$16 sps:$4 sm:$0xff]   ;;  %v3130_v52 = vld [vmem:[%s4659_s1 + $0x4e0] ss:$16 sps:$4 sm:$0xff]  }
  0x29   :  { %1699 = vmatprep.subr.bf16.mxu0 %v3052_v46  ;;  %v3129_v46 = vld [vmem:[%s4659_s1 + $0xcc] ss:$16 sps:$4 sm:$0xff]   ;;  %v3138_v54 = vld [vmem:[%s4659_s1 + $0x504] ss:$16 sps:$4 sm:$0xff]   ;;  %v3142_v60 = vld [vmem:[%s4659_s1 + $0x520] ss:$16 sps:$4 sm:$0xff]  }
  0x2a   :  { %v3150_v62 = vld [vmem:[%s4659_s1 + $0x544] ss:$16 sps:$4 sm:$0xff]  }
  0x2b   :  { %1659 = vmatpush1.bf16.msra.mxu1 %v3054_v47  ;;  %v3124_v47 = vld [vmem:[%s4659_s1 + $0x4c0] ss:$16 sps:$4 sm:$0xff]  }
  0x2c   :  { %1700 = vmatpush1.bf16.msra.mxu0 %v3055_v48  ;;  %1660 = vmatprep.subr.bf16.mxu1 %v3056_v50  ;;  %v3127_v48 = vld [vmem:[%s4659_s1 + $0xc8] ss:$16 sps:$4 sm:$0xff]   ;;  %v3132_v50 = vld [vmem:[%s4659_s1 + $0x4e4] ss:$16 sps:$4 sm:$0xff]  }
  0x2d   :  { %1701 = vmatprep.subr.bf16.mxu0 %v3058_v51  ;;  %v3135_v51 = vld [vmem:[%s4659_s1 + $0xec] ss:$16 sps:$4 sm:$0xff]  }
  0x2f   :  { %1661 = vmatpush1.bf16.msra.mxu1 %v3060_v55  ;;  %v3141_v55 = vld [vmem:[%s4659_s1 + $0x10c] ss:$16 sps:$4 sm:$0xff]  }
  0x30   :  { %1702 = vmatpush1.bf16.msra.mxu0 %v3061_v56  ;;  %1662 = vmatprep.subr.bf16.mxu1 %v3062_v57  ;;  %v3136_v56 = vld [vmem:[%s4659_s1 + $0x500] ss:$16 sps:$4 sm:$0xff]   ;;  %v3139_v57 = vld [vmem:[%s4659_s1 + $0x108] ss:$16 sps:$4 sm:$0xff]  }
  0x31   :  { %1703 = vmatprep.subr.bf16.mxu0 %v3064_v58  ;;  %v3144_v58 = vld [vmem:[%s4659_s1 + $0x524] ss:$16 sps:$4 sm:$0xff]  }
  0x33   :  { %1663 = vmatpush1.bf16.msra.mxu1 %v3066_v63  ;;  %v3153_v63 = vld [vmem:[%s4659_s1 + $0x14c] ss:$16 sps:$4 sm:$0xff]  }
  0x34   :  { %1704 = vmatpush1.bf16.msra.mxu0 %v3067_v0  ;;  %1664 = vmatprep.subr.bf16.mxu1 %v3068_v1  ;;  %v3148_v0 = vld [vmem:[%s4659_s1 + $0x540] ss:$16 sps:$4 sm:$0xff]   ;;  %v3151_v1 = vld [vmem:[%s4659_s1 + $0x148] ss:$16 sps:$4 sm:$0xff]  }
  0x35   :  { %1705 = vmatprep.subr.bf16.mxu0 %v3070_v2  ;;  %v3156_v2 = vld [vmem:[%s4659_s1 + $0x564] ss:$16 sps:$4 sm:$0xff]  }
  0x37   :  { %1665 = vmatpush1.bf16.msra.mxu1 %v3072_v4  ;;  %v3159_v4 = vld [vmem:[%s4659_s1 + $0x16c] ss:$16 sps:$4 sm:$0xff]  }
  0x38   :  { %1706 = vmatpush1.bf16.msra.mxu0 %v3073_v5  ;;  %1666 = vmatprep.subr.bf16.mxu1 %v3074_v6  ;;  %v3154_v5 = vld [vmem:[%s4659_s1 + $0x560] ss:$16 sps:$4 sm:$0xff]   ;;  %v3157_v6 = vld [vmem:[%s4659_s1 + $0x168] ss:$16 sps:$4 sm:$0xff]  }
  0x39   :  { %1707 = vmatprep.subr.bf16.mxu0 %v3076_v7  ;;  %v3162_v7 = vld [vmem:[%s4659_s1 + $0x584] ss:$16 sps:$4 sm:$0xff]  }
  0x3b   :  { %1667 = vmatpush1.bf16.msra.mxu1 %v3078_v9  ;;  %v3165_v9 = vld [vmem:[%s4659_s1 + $0x18c] ss:$16 sps:$4 sm:$0xff]  }
  0x3c   :  { %1708 = vmatpush1.bf16.msra.mxu0 %v3079_v10  ;;  %1668 = vmatprep.subr.bf16.mxu1 %v3080_v11  ;;  %v3160_v10 = vld [vmem:[%s4659_s1 + $0x580] ss:$16 sps:$4 sm:$0xff]   ;;  %v3163_v11 = vld [vmem:[%s4659_s1 + $0x188] ss:$16 sps:$4 sm:$0xff]  }
  0x3d   :  { %1709 = vmatprep.subr.bf16.mxu0 %v3082_v12  ;;  %v3168_v12 = vld [vmem:[%s4659_s1 + $0x5a4] ss:$16 sps:$4 sm:$0xff]  }
  0x3f   :  { %1669 = vmatpush1.bf16.msra.mxu1 %v3084_v14  ;;  %v3171_v14 = vld [vmem:[%s4659_s1 + $0x1ac] ss:$16 sps:$4 sm:$0xff]  }
  0x40   :  { %1710 = vmatpush1.bf16.msra.mxu0 %v3085_v15  ;;  %1802 = vmatprep.subr.bf16.mxu1 %v3093_v17  ;;  %v3166_v15 = vld [vmem:[%s4659_s1 + $0x5a0] ss:$16 sps:$4 sm:$0xff]   ;;  %v3174_v17 = vld [vmem:[%s4659_s1 + $0x5c4] ss:$16 sps:$4 sm:$0xff]  }
  0x41   :  { %1720 = vmatprep.subr.bf16.mxu0 %v3090_v16  ;;  %v3169_v16 = vld [vmem:[%s4659_s1 + $0x1a8] ss:$16 sps:$4 sm:$0xff]  }
  0x42   :  { %1671 = vmatmul.mubr.bf16.vlgmr.msra.gmra.mrb[0].mxu1 %v3735_v19 }
  0x43   :  { %1712 = vmatmul.mubr.bf16.vlgmr.msra.gmra.mrb[0].mxu0 %v3737_v20  ;;  %1803 = vmatpush1.bf16.msra.mxu1 %v3091_v22  ;;  %v3172_v22 = vld [vmem:[%s4659_s1 + $0x5c0] ss:$16 sps:$4 sm:$0xff]  }
  0x44   :  { %1721 = vmatpush1.bf16.msra.mxu0 %v3088_v21  ;;  %1804 = vmatprep.subr.bf16.mxu1 %v3099_v24  ;;  %v47_v21 = vcombine.high %v3703_v8, %v3703_v8  ;;  %v3180_v24 = vld [vmem:[%s4659_s1 + $0x5e4] ss:$16 sps:$4 sm:$0xff]   ;;  %v3183_v8 = vld [vmem:[%s4659_s1 + $0x1ec] ss:$16 sps:$4 sm:$0xff]  }
  0x45   :  { %1722 = vmatprep.subr.bf16.mxu0 %v3096_v23  ;;  %1752 = vmatprep.mubr.bf16.mxu0 %v3751_v25  ;;  %v3175_v23 = vld [vmem:[%s4659_s1 + $0x1c8] ss:$16 sps:$4 sm:$0xff]  }
  0x46   :  { %1834 = vmatprep.mubr.bf16.mxu1 %v73_v61  ;;  %v3145_v61 = vld [vmem:[%s4659_s1 + $0x128] ss:$16 sps:$4 sm:$0xff]  }
  0x47   :  { %1805 = vmatpush1.bf16.msra.mxu1 %v3097_v27  ;;  %v3178_v27 = vld [vmem:[%s4659_s1 + $0x5e0] ss:$16 sps:$4 sm:$0xff]  }
  0x48   :  { %1723 = vmatpush1.bf16.msra.mxu0 %v3094_v26  ;;  %1806 = vmatprep.subr.bf16.mxu1 %v3105_v29  ;;  %v3927_v26 = vrot.slane %v47_v21, %v3648_v49  ;;  %v3186_v29 = vld [vmem:[%s4659_s1 + $0x604] ss:$16 sps:$4 sm:$0xff]   ;;  %v3189_v49 = vld [vmem:[%s4659_s1 + $0x20c] ss:$16 sps:$4 sm:$0xff]   ;;  %v3256_v21 = vld [vmem:[%s4659_s1 + $0x780] ss:$16 sps:$4 sm:$0xff]  }
  0x49   :  { %1724 = vmatprep.subr.bf16.mxu0 %v3102_v28  ;;  %v3181_v28 = vld [vmem:[%s4659_s1 + $0x1e8] ss:$16 sps:$4 sm:$0xff]  }
  0x4b   :  { %1807 = vmatpush1.bf16.msra.mxu1 %v3103_v31  ;;  %v3945_v31 = vpack.c.bf16 %v3719_v13, %v3719_v13  ;;  %v3195_v13 = vld [vmem:[%s4659_s1 + $0x22c] ss:$16 sps:$4 sm:$0xff]  }
  0x4c   :  { %1725 = vmatpush1.bf16.msra.mxu0 %v3100_v30  ;;  %1808 = vmatprep.subr.bf16.mxu1 %v3111_v33  ;;  %v63_v30 = vcombine.high %v3927_v26, %v3927_v26  ;;  %v3187_v33 = vld [vmem:[%s4659_s1 + $0x208] ss:$16 sps:$4 sm:$0xff]  }
  0x4d   :  { %1726 = vmatprep.subr.bf16.mxu0 %v3108_v32  ;;  %v3184_v32 = vld [vmem:[%s4659_s1 + $0x600] ss:$16 sps:$4 sm:$0xff]  }
  0x4f   :  { %1809 = vmatpush1.bf16.msra.mxu1 %v3109_v35  ;;  %v3959_v35 = vpack.c.bf16 %v63_v30, %v63_v30  ;;  %v3271_v30 = vld [vmem:[%s4659_s1 + $0x3c8] ss:$16 sps:$4 sm:$0xff]  }
  0x50   :  { %1727 = vmatpush1.bf16.msra.mxu0 %v3106_v34  ;;  %1810 = vmatprep.subr.bf16.mxu1 %v3117_v37  ;;  %v3192_v34 = vld [vmem:[%s4659_s1 + $0x624] ss:$16 sps:$4 sm:$0xff]   ;;  %v3193_v37 = vld [vmem:[%s4659_s1 + $0x228] ss:$16 sps:$4 sm:$0xff]  }
  0x51   :  { %1728 = vmatprep.subr.bf16.mxu0 %v3114_v36  ;;  %v3190_v36 = vld [vmem:[%s4659_s1 + $0x620] ss:$16 sps:$4 sm:$0xff]  }
  0x53   :  { %1811 = vmatpush1.bf16.msra.mxu1 %v3115_v39  ;;  %v3196_v39 = vld [vmem:[%s4659_s1 + $0x640] ss:$16 sps:$4 sm:$0xff]  }
  0x54   :  { %1729 = vmatpush1.bf16.msra.mxu0 %v3112_v38  ;;  %1812 = vmatprep.subr.bf16.mxu1 %v3123_v41  ;;  %v3198_v38 = vld [vmem:[%s4659_s1 + $0x644] ss:$16 sps:$4 sm:$0xff]  }
  0x55   :  { %1730 = vmatprep.subr.bf16.mxu0 %v3120_v40  ;;  %v3199_v40 = vld [vmem:[%s4659_s1 + $0x248] ss:$16 sps:$4 sm:$0xff]   ;;  %v3204_v41 = vld [vmem:[%s4659_s1 + $0x664] ss:$16 sps:$4 sm:$0xff]  }
  0x57   :  { %1813 = vmatpush1.bf16.msra.mxu1 %v3121_v44  ;;  %v3205_v44 = vld [vmem:[%s4659_s1 + $0x268] ss:$16 sps:$4 sm:$0xff]  }
  0x58   :  { %1731 = vmatpush1.bf16.msra.mxu0 %v3118_v42  ;;  %1814 = vmatprep.subr.bf16.mxu1 %v3129_v46  ;;  %v3202_v42 = vld [vmem:[%s4659_s1 + $0x660] ss:$16 sps:$4 sm:$0xff]   ;;  %v3213_v46 = vld [vmem:[%s4659_s1 + $0x28c] ss:$16 sps:$4 sm:$0xff]  }
  0x59   :  { %1732 = vmatprep.subr.bf16.mxu0 %v3126_v45  ;;  %v3210_v45 = vld [vmem:[%s4659_s1 + $0x684] ss:$16 sps:$4 sm:$0xff]  }
  0x5b   :  { %1815 = vmatpush1.bf16.msra.mxu1 %v3127_v48  ;;  %v3211_v48 = vld [vmem:[%s4659_s1 + $0x288] ss:$16 sps:$4 sm:$0xff]  }
  0x5c   :  { %1733 = vmatpush1.bf16.msra.mxu0 %v3124_v47  ;;  %1816 = vmatprep.subr.bf16.mxu1 %v3135_v51  ;;  %v3208_v47 = vld [vmem:[%s4659_s1 + $0x680] ss:$16 sps:$4 sm:$0xff]   ;;  %v3219_v51 = vld [vmem:[%s4659_s1 + $0x2ac] ss:$16 sps:$4 sm:$0xff]  }
  0x5d   :  { %1734 = vmatprep.subr.bf16.mxu0 %v3132_v50  ;;  %v3216_v50 = vld [vmem:[%s4659_s1 + $0x6a4] ss:$16 sps:$4 sm:$0xff]  }
  0x5f   :  { %1817 = vmatpush1.bf16.msra.mxu1 %v3133_v53  ;;  %v3217_v53 = vld [vmem:[%s4659_s1 + $0x2a8] ss:$16 sps:$4 sm:$0xff]  }
  0x60   :  { %1735 = vmatpush1.bf16.msra.mxu0 %v3130_v52  ;;  %1818 = vmatprep.subr.bf16.mxu1 %v3141_v55  ;;  %v3214_v52 = vld [vmem:[%s4659_s1 + $0x6a0] ss:$16 sps:$4 sm:$0xff]   ;;  %v3225_v55 = vld [vmem:[%s4659_s1 + $0x2cc] ss:$16 sps:$4 sm:$0xff]  }
  0x61   :  { %1736 = vmatprep.subr.bf16.mxu0 %v3138_v54  ;;  %v3222_v54 = vld [vmem:[%s4659_s1 + $0x6c4] ss:$16 sps:$4 sm:$0xff]  }
  0x63   :  { %1819 = vmatpush1.bf16.msra.mxu1 %v3139_v57  ;;  %v3223_v57 = vld [vmem:[%s4659_s1 + $0x2c8] ss:$16 sps:$4 sm:$0xff]  }
  0x64   :  { %1737 = vmatpush1.bf16.msra.mxu0 %v3136_v56  ;;  %1820 = vmatprep.subr.bf16.mxu1 %v3147_v59  ;;  %v3220_v56 = vld [vmem:[%s4659_s1 + $0x6c0] ss:$16 sps:$4 sm:$0xff]   ;;  %v3231_v59 = vld [vmem:[%s4659_s1 + $0x2ec] ss:$16 sps:$4 sm:$0xff]  }
  0x65   :  { %1738 = vmatprep.subr.bf16.mxu0 %v3144_v58  ;;  %v3228_v58 = vld [vmem:[%s4659_s1 + $0x6e4] ss:$16 sps:$4 sm:$0xff]  }
  0x67   :  { %1821 = vmatpush1.bf16.msra.mxu1 %v3145_v61  ;;  %v3229_v61 = vld [vmem:[%s4659_s1 + $0x2e8] ss:$16 sps:$4 sm:$0xff]  }
  0x68   :  { %1739 = vmatpush1.bf16.msra.mxu0 %v3142_v60  ;;  %1822 = vmatprep.subr.bf16.mxu1 %v3153_v63  ;;  %v3226_v60 = vld [vmem:[%s4659_s1 + $0x6e0] ss:$16 sps:$4 sm:$0xff]   ;;  %v3237_v63 = vld [vmem:[%s4659_s1 + $0x30c] ss:$16 sps:$4 sm:$0xff]  }
  0x69   :  { %1740 = vmatprep.subr.bf16.mxu0 %v3150_v62  ;;  %v3234_v62 = vld [vmem:[%s4659_s1 + $0x704] ss:$16 sps:$4 sm:$0xff]  }
  0x6b   :  { %1823 = vmatpush1.bf16.msra.mxu1 %v3151_v1  ;;  %v3235_v1 = vld [vmem:[%s4659_s1 + $0x308] ss:$16 sps:$4 sm:$0xff]  }
  0x6c   :  { %1741 = vmatpush1.bf16.msra.mxu0 %v3148_v0  ;;  %1824 = vmatprep.subr.bf16.mxu1 %v3159_v4  ;;  %v3232_v0 = vld [vmem:[%s4659_s1 + $0x700] ss:$16 sps:$4 sm:$0xff]   ;;  %v3243_v4 = vld [vmem:[%s4659_s1 + $0x32c] ss:$16 sps:$4 sm:$0xff]  }
  0x6d   :  { %1742 = vmatprep.subr.bf16.mxu0 %v3156_v2  ;;  %v3240_v2 = vld [vmem:[%s4659_s1 + $0x724] ss:$16 sps:$4 sm:$0xff]  }
  0x6f   :  { %1825 = vmatpush1.bf16.msra.mxu1 %v3157_v6  ;;  %v3241_v6 = vld [vmem:[%s4659_s1 + $0x328] ss:$16 sps:$4 sm:$0xff]  }
  0x70   :  { %1743 = vmatpush1.bf16.msra.mxu0 %v3154_v5  ;;  %1826 = vmatprep.subr.bf16.mxu1 %v3165_v9  ;;  %v3238_v5 = vld [vmem:[%s4659_s1 + $0x720] ss:$16 sps:$4 sm:$0xff]   ;;  %v3249_v9 = vld [vmem:[%s4659_s1 + $0x34c] ss:$16 sps:$4 sm:$0xff]  }
  0x71   :  { %1744 = vmatprep.subr.bf16.mxu0 %v3162_v7  ;;  %v3246_v7 = vld [vmem:[%s4659_s1 + $0x744] ss:$16 sps:$4 sm:$0xff]  }
  0x73   :  { %1827 = vmatpush1.bf16.msra.mxu1 %v3163_v11  ;;  %v3247_v11 = vld [vmem:[%s4659_s1 + $0x348] ss:$16 sps:$4 sm:$0xff]  }
  0x74   :  { %1745 = vmatpush1.bf16.msra.mxu0 %v3160_v10  ;;  %1828 = vmatprep.subr.bf16.mxu1 %v3171_v14  ;;  %v3244_v10 = vld [vmem:[%s4659_s1 + $0x740] ss:$16 sps:$4 sm:$0xff]   ;;  %v3255_v14 = vld [vmem:[%s4659_s1 + $0x36c] ss:$16 sps:$4 sm:$0xff]  }
  0x75   :  { %1746 = vmatprep.subr.bf16.mxu0 %v3168_v12  ;;  %v3252_v12 = vld [vmem:[%s4659_s1 + $0x764] ss:$16 sps:$4 sm:$0xff]  }
  0x77   :  { %1829 = vmatpush1.bf16.msra.mxu1 %v3169_v16  ;;  %v3253_v16 = vld [vmem:[%s4659_s1 + $0x368] ss:$16 sps:$4 sm:$0xff]  }
  0x78   :  { %1747 = vmatpush1.bf16.msra.mxu0 %v3166_v15  ;;  %1830 = vmatprep.subr.bf16.mxu1 %v3177_v18  ;;  %v3250_v15 = vld [vmem:[%s4659_s1 + $0x760] ss:$16 sps:$4 sm:$0xff]   ;;  %v3261_v18 = vld [vmem:[%s4659_s1 + $0x38c] ss:$16 sps:$4 sm:$0xff]  }
  0x79   :  { %1748 = vmatprep.subr.bf16.mxu0 %v3174_v17  ;;  %v3258_v17 = vld [vmem:[%s4659_s1 + $0x784] ss:$16 sps:$4 sm:$0xff]  }
  0x7b   :  { %1831 = vmatpush1.bf16.msra.mxu1 %v3175_v23  ;;  %v3264_v23 = vld [vmem:[%s4659_s1 + $0x7a4] ss:$16 sps:$4 sm:$0xff]  }
  0x7c   :  { %1749 = vmatpush1.bf16.msra.mxu0 %v3172_v22  ;;  %1832 = vmatprep.subr.bf16.mxu1 %v3183_v8  ;;  %v3259_v22 = vld [vmem:[%s4659_s1 + $0x388] ss:$16 sps:$4 sm:$0xff]   ;;  %v3262_v8 = vld [vmem:[%s4659_s1 + $0x7a0] ss:$16 sps:$4 sm:$0xff]  }
  0x7d   :  { %1750 = vmatprep.subr.bf16.mxu0 %v3180_v24  ;;  %v3267_v24 = vld [vmem:[%s4659_s1 + $0x3ac] ss:$16 sps:$4 sm:$0xff]  }
  0x7f   :  { %1833 = vmatpush1.bf16.msra.mxu1 %v3181_v28  ;;  %v3270_v28 = vld [vmem:[%s4659_s1 + $0x7c4] ss:$16 sps:$4 sm:$0xff]  }
  0x80   :  { %1751 = vmatpush1.bf16.msra.mxu0 %v3178_v27  ;;  %1843 = vmatprep.subr.bf16.mxu1 %v3189_v49  ;;  %v3265_v27 = vld [vmem:[%s4659_s1 + $0x3a8] ss:$16 sps:$4 sm:$0xff]   ;;  %v3268_v49 = vld [vmem:[%s4659_s1 + $0x7c0] ss:$16 sps:$4 sm:$0xff]  }
  0x81   :  { %1761 = vmatprep.subr.bf16.mxu0 %v3186_v29  ;;  %v3273_v29 = vld [vmem:[%s4659_s1 + $0x3cc] ss:$16 sps:$4 sm:$0xff]  }
  0x82   :  { %1835 = vmatmul.mubr.bf16.vlgmr.msra.gmra.mrb[4].mxu1 %v3735_v19  ;;  %v3201_v19 = vld [vmem:[%s4659_s1 + $0x24c] ss:$16 sps:$4 sm:$0xff]  }
  0x83   :  { %1753 = vmatmul.mubr.bf16.vlgmr.msra.gmra.mrb[0].mxu0 %v3945_v31  ;;  %1844 = vmatpush1.bf16.msra.mxu1 %v3187_v33  ;;  %v3279_v33 = vld [vmem:[%s4659_s1 + $0x3ec] ss:$16 sps:$4 sm:$0xff]  }
  0x84   :  { %1762 = vmatpush1.bf16.msra.mxu0 %v3184_v32  ;;  %1845 = vmatprep.subr.bf16.mxu1 %v3195_v13  ;;  %v3276_v32 = vld [vmem:[%s4659_s1 + $0x7e4] ss:$16 sps:$4 sm:$0xff]   ;;  %v3277_v13 = vld [vmem:[%s4659_s1 + $0x3e8] ss:$16 sps:$4 sm:$0xff]  }
  0x85   :  { %1763 = vmatprep.subr.bf16.mxu0 %v3192_v34  ;;  %1793 = vmatprep.mubr.bf16.mxu0 %v3959_v35  ;;  %v3274_v34 = vld [vmem:[%s4659_s1 + $0x7e0] ss:$16 sps:$4 sm:$0xff]  }
  0x86   :  { %1875 = vmatprep.mubr.bf16.mxu1 %v3685_v3  ;;  %v3207_v3 = vld [vmem:[%s4659_s1 + $0x26c] ss:$16 sps:$4 sm:$0xff]  }
  0x87   :  { %1846 = vmatpush1.bf16.msra.mxu1 %v3193_v37  ;;  %v4144_v37 = vpack.c.bf16 %v3927_v26, %v3927_v26  ;;  %v3283_v26 = vld [vmem:[%s4659_s1 + $0x428] ss:$16 sps:$4 sm:$0xff]  }
  0x88   :  { %1764 = vmatpush1.bf16.msra.mxu0 %v3190_v36  ;;  %1847 = vmatprep.subr.bf16.mxu1 %v3201_v19  ;;  %v3282_v36 = vld [vmem:[%s4659_s1 + $0x40c] ss:$16 sps:$4 sm:$0xff]  }
  0x89   :  { %1765 = vmatprep.subr.bf16.mxu0 %v3198_v38  ;;  %v3280_v38 = vld [vmem:[%s4659_s1 + $0x408] ss:$16 sps:$4 sm:$0xff]   ;;  %v3285_v19 = vld [vmem:[%s4659_s1 + $0x42c] ss:$16 sps:$4 sm:$0xff]  }
  0x8b   :  { %1848 = vmatpush1.bf16.msra.mxu1 %v3199_v40  ;;  %v3376_v40 = vld [vmem:[%s4661_s3] ss:$8 sps:$4 sm:$0xff]  }
  0x8c   :  { %1766 = vmatpush1.bf16.msra.mxu0 %v3196_v39  ;;  %1849 = vmatprep.subr.bf16.mxu1 %v3207_v3  ;;  %v3288_v39 = vld [vmem:[%s4659_s1 + $0x44c] ss:$16 sps:$4 sm:$0xff]   ;;  %v3286_v3 = vld [vmem:[%s4659_s1 + $0x448] ss:$16 sps:$4 sm:$0xff]  }
  0x8d   :  { %1767 = vmatprep.subr.bf16.mxu0 %v3204_v41  ;;  %v3381_v41 = vld [vmem:[%s4661_s3 + $0x14] ss:$8 sps:$4 sm:$0xff]  }
  0x8f   :  { %1850 = vmatpush1.bf16.msra.mxu1 %v3205_v44  ;;  %v3384_v44 = vld [vmem:[%s4661_s3 + $0x24] ss:$8 sps:$4 sm:$0xff]  }
  0x90   :  { %1768 = vmatpush1.bf16.msra.mxu0 %v3202_v42  ;;  %1851 = vmatprep.subr.bf16.mxu1 %v3213_v46  ;;  %v3379_v42 = vld [vmem:[%s4661_s3 + $0x10] ss:$8 sps:$4 sm:$0xff]   ;;  %v3294_v46 = vld [vmem:[%s4659_s1 + $0x48c] ss:$16 sps:$4 sm:$0xff]  }
  0x91   :  { %1769 = vmatprep.subr.bf16.mxu0 %v3210_v45  ;;  %v3289_v45 = vld [vmem:[%s4659_s1 + $0x468] ss:$16 sps:$4 sm:$0xff]  }
  0x93   :  { %1852 = vmatpush1.bf16.msra.mxu1 %v3211_v48  ;;  %v3387_v48 = vld [vmem:[%s4661_s3 + $0x34] ss:$8 sps:$4 sm:$0xff]  }
  0x94   :  { %1770 = vmatpush1.bf16.msra.mxu0 %v3208_v47  ;;  %1853 = vmatprep.subr.bf16.mxu1 %v3219_v51  ;;  %v3382_v47 = vld [vmem:[%s4661_s3 + $0x20] ss:$8 sps:$4 sm:$0xff]   ;;  %v3297_v51 = vld [vmem:[%s4659_s1 + $0x4ac] ss:$16 sps:$4 sm:$0xff]  }
  0x95   :  { %1771 = vmatprep.subr.bf16.mxu0 %v3216_v50  ;;  %v3292_v50 = vld [vmem:[%s4659_s1 + $0x488] ss:$16 sps:$4 sm:$0xff]  }
  0x97   :  { %1854 = vmatpush1.bf16.msra.mxu1 %v3217_v53  ;;  %v3390_v53 = vld [vmem:[%s4661_s3 + $0x44] ss:$8 sps:$4 sm:$0xff]  }
  0x98   :  { %1772 = vmatpush1.bf16.msra.mxu0 %v3214_v52  ;;  %1855 = vmatprep.subr.bf16.mxu1 %v3225_v55  ;;  %v3385_v52 = vld [vmem:[%s4661_s3 + $0x30] ss:$8 sps:$4 sm:$0xff]   ;;  %v3300_v55 = vld [vmem:[%s4659_s1 + $0x4cc] ss:$16 sps:$4 sm:$0xff]  }
  0x99   :  { %1773 = vmatprep.subr.bf16.mxu0 %v3222_v54  ;;  %v3295_v54 = vld [vmem:[%s4659_s1 + $0x4a8] ss:$16 sps:$4 sm:$0xff]  }
  0x9b   :  { %1856 = vmatpush1.bf16.msra.mxu1 %v3223_v57  ;;  %v3393_v57 = vld [vmem:[%s4661_s3 + $0x54] ss:$8 sps:$4 sm:$0xff]  }
  0x9c   :  { %1774 = vmatpush1.bf16.msra.mxu0 %v3220_v56  ;;  %1857 = vmatprep.subr.bf16.mxu1 %v3231_v59  ;;  %v3388_v56 = vld [vmem:[%s4661_s3 + $0x40] ss:$8 sps:$4 sm:$0xff]   ;;  %v3391_v59 = vld [vmem:[%s4661_s3 + $0x50] ss:$8 sps:$4 sm:$0xff]  }
  0x9d   :  { %1775 = vmatprep.subr.bf16.mxu0 %v3228_v58  ;;  %v3298_v58 = vld [vmem:[%s4659_s1 + $0x4c8] ss:$16 sps:$4 sm:$0xff]  }
  0x9f   :  { %1858 = vmatpush1.bf16.msra.mxu1 %v3229_v61  ;;  %v3396_v61 = vld [vmem:[%s4661_s3 + $0x64] ss:$8 sps:$4 sm:$0xff]  }
  0xa0   :  { %1776 = vmatpush1.bf16.msra.mxu0 %v3226_v60  ;;  %1859 = vmatprep.subr.bf16.mxu1 %v3237_v63  ;;  %v3303_v60 = vld [vmem:[%s4659_s1 + $0x4ec] ss:$16 sps:$4 sm:$0xff]   ;;  %v3394_v63 = vld [vmem:[%s4661_s3 + $0x60] ss:$8 sps:$4 sm:$0xff]  }
  0xa1   :  { %1777 = vmatprep.subr.bf16.mxu0 %v3234_v62  ;;  %v3301_v62 = vld [vmem:[%s4659_s1 + $0x4e8] ss:$16 sps:$4 sm:$0xff]  }
  0xa3   :  { %1860 = vmatpush1.bf16.msra.mxu1 %v3235_v1  ;;  %v3399_v1 = vld [vmem:[%s4661_s3 + $0x74] ss:$8 sps:$4 sm:$0xff]  }
  0xa4   :  { %1778 = vmatpush1.bf16.msra.mxu0 %v3232_v0  ;;  %1861 = vmatprep.subr.bf16.mxu1 %v3243_v4  ;;  %v3306_v0 = vld [vmem:[%s4659_s1 + $0x50c] ss:$16 sps:$4 sm:$0xff]   ;;  %v3397_v4 = vld [vmem:[%s4661_s3 + $0x70] ss:$8 sps:$4 sm:$0xff]  }
  0xa5   :  { %1779 = vmatprep.subr.bf16.mxu0 %v3240_v2  ;;  %v3304_v2 = vld [vmem:[%s4659_s1 + $0x508] ss:$16 sps:$4 sm:$0xff]  }
  0xa7   :  { %1862 = vmatpush1.bf16.msra.mxu1 %v3241_v6  ;;  %v3402_v6 = vld [vmem:[%s4661_s3 + $0x84] ss:$8 sps:$4 sm:$0xff]  }
  0xa8   :  { %1780 = vmatpush1.bf16.msra.mxu0 %v3238_v5  ;;  %1863 = vmatprep.subr.bf16.mxu1 %v3249_v9  ;;  %v3309_v5 = vld [vmem:[%s4659_s1 + $0x52c] ss:$16 sps:$4 sm:$0xff]   ;;  %v3400_v9 = vld [vmem:[%s4661_s3 + $0x80] ss:$8 sps:$4 sm:$0xff]  }
  0xa9   :  { %1781 = vmatprep.subr.bf16.mxu0 %v3246_v7  ;;  %v3307_v7 = vld [vmem:[%s4659_s1 + $0x528] ss:$16 sps:$4 sm:$0xff]  }
  0xab   :  { %1864 = vmatpush1.bf16.msra.mxu1 %v3247_v11  ;;  %v3405_v11 = vld [vmem:[%s4661_s3 + $0x94] ss:$8 sps:$4 sm:$0xff]  }
  0xac   :  { %1782 = vmatpush1.bf16.msra.mxu0 %v3244_v10  ;;  %1865 = vmatprep.subr.bf16.mxu1 %v3255_v14  ;;  %v3312_v10 = vld [vmem:[%s4659_s1 + $0x54c] ss:$16 sps:$4 sm:$0xff]   ;;  %v3403_v14 = vld [vmem:[%s4661_s3 + $0x90] ss:$8 sps:$4 sm:$0xff]  }
  0xad   :  { %1783 = vmatprep.subr.bf16.mxu0 %v3252_v12  ;;  %v3310_v12 = vld [vmem:[%s4659_s1 + $0x548] ss:$16 sps:$4 sm:$0xff]  }
  0xaf   :  { %1866 = vmatpush1.bf16.msra.mxu1 %v3253_v16  ;;  %v3408_v16 = vld [vmem:[%s4661_s3 + $0xa4] ss:$8 sps:$4 sm:$0xff]  }
  0xb0   :  { %1784 = vmatpush1.bf16.msra.mxu0 %v3250_v15  ;;  %1867 = vmatprep.subr.bf16.mxu1 %v3261_v18  ;;  %v3315_v15 = vld [vmem:[%s4659_s1 + $0x56c] ss:$16 sps:$4 sm:$0xff]   ;;  %v3406_v18 = vld [vmem:[%s4661_s3 + $0xa0] ss:$8 sps:$4 sm:$0xff]  }
  0xb1   :  { %1785 = vmatprep.subr.bf16.mxu0 %v3258_v17  ;;  %v3313_v17 = vld [vmem:[%s4659_s1 + $0x568] ss:$16 sps:$4 sm:$0xff]  }
  0xb3   :  { %1868 = vmatpush1.bf16.msra.mxu1 %v3259_v22  ;;  %v3411_v22 = vld [vmem:[%s4661_s3 + $0xb4] ss:$8 sps:$4 sm:$0xff]  }
  0xb4   :  { %1786 = vmatpush1.bf16.msra.mxu0 %v3256_v21  ;;  %1869 = vmatprep.subr.bf16.mxu1 %v3267_v24  ;;  %v3318_v21 = vld [vmem:[%s4659_s1 + $0x58c] ss:$16 sps:$4 sm:$0xff]   ;;  %v3409_v24 = vld [vmem:[%s4661_s3 + $0xb0] ss:$8 sps:$4 sm:$0xff]  }
  0xb5   :  { %1787 = vmatprep.subr.bf16.mxu0 %v3264_v23  ;;  %v3316_v23 = vld [vmem:[%s4659_s1 + $0x588] ss:$16 sps:$4 sm:$0xff]  }
  0xb7   :  { %1870 = vmatpush1.bf16.msra.mxu1 %v3265_v27  ;;  %v3414_v27 = vld [vmem:[%s4661_s3 + $0xc4] ss:$8 sps:$4 sm:$0xff]  }
  0xb8   :  { %1788 = vmatpush1.bf16.msra.mxu0 %v3262_v8  ;;  %1871 = vmatprep.subr.bf16.mxu1 %v3273_v29  ;;  %v3321_v8 = vld [vmem:[%s4659_s1 + $0x5ac] ss:$16 sps:$4 sm:$0xff]   ;;  %v3412_v29 = vld [vmem:[%s4661_s3 + $0xc0] ss:$8 sps:$4 sm:$0xff]  }
  0xb9   :  { %1789 = vmatprep.subr.bf16.mxu0 %v3270_v28  ;;  %v3319_v28 = vld [vmem:[%s4659_s1 + $0x5a8] ss:$16 sps:$4 sm:$0xff]  }
  0xbb   :  { %1872 = vmatpush1.bf16.msra.mxu1 %v3271_v30  ;;  %v3417_v30 = vld [vmem:[%s4661_s3 + $0xd4] ss:$8 sps:$4 sm:$0xff]  }
  0xbc   :  { %1790 = vmatpush1.bf16.msra.mxu0 %v3268_v49  ;;  %1873 = vmatprep.subr.bf16.mxu1 %v3279_v33  ;;  %v3324_v49 = vld [vmem:[%s4659_s1 + $0x5cc] ss:$16 sps:$4 sm:$0xff]   ;;  %v3415_v33 = vld [vmem:[%s4661_s3 + $0xd0] ss:$8 sps:$4 sm:$0xff]  }
  0xbd   :  { %1791 = vmatprep.subr.bf16.mxu0 %v3276_v32  ;;  %v3322_v32 = vld [vmem:[%s4659_s1 + $0x5c8] ss:$16 sps:$4 sm:$0xff]  }
  0xbf   :  { %1874 = vmatpush1.bf16.msra.mxu1 %v3277_v13  ;;  %v3325_v13 = vld [vmem:[%s4659_s1 + $0x5e8] ss:$16 sps:$4 sm:$0xff]  }
  0xc0   :  { %1792 = vmatpush1.bf16.msra.mxu0 %v3274_v34  ;;  %1884 = vmatprep.subr.bf16.mxu1 %v3282_v36  ;;  %v3327_v34 = vld [vmem:[%s4659_s1 + $0x5ec] ss:$16 sps:$4 sm:$0xff]  }
  0xc1   :  { %v3330_v36 = vld [vmem:[%s4659_s1 + $0x60c] ss:$16 sps:$4 sm:$0xff]  }
  0xc2   :  { %1876 = vmatmul.mubr.bf16.vlgmr.msra.gmra.mrb[4].mxu1 %v3737_v20  ;;  %v3378_v20 = vld [vmem:[%s4661_s3 + $0x4] ss:$8 sps:$4 sm:$0xff]  }
  0xc3   :  { %1794 = vmatmul.mubr.bf16.vlgmr.msra.gmra.mrb[0].mxu0 %v4144_v37  ;;  %1885 = vmatpush1.bf16.msra.mxu1 %v3280_v38  ;;  %v3328_v38 = vld [vmem:[%s4659_s1 + $0x608] ss:$16 sps:$4 sm:$0xff]  }
  0xc4   :  { %1916 = vmatprep.mubr.bf16.mxu1 %v3751_v25  ;;  %1886 = vmatprep.subr.bf16.mxu1 %v3285_v19  ;;  %v3291_v25 = vld [vmem:[%s4659_s1 + $0x46c] ss:$16 sps:$4 sm:$0xff]  }
  0xc5   :  { %2370 = vmatprep.subr.bf16.mxu0 %v3378_v20  ;;  %v3333_v19 = vld [vmem:[%s4659_s1 + $0x62c] ss:$16 sps:$4 sm:$0xff]  }
  0xc6   :  { %2371 = vmatpush1.bf16.msra.mxu0 %v3376_v40  ;;  %v3334_v40 = vld [vmem:[%s4659_s1 + $0x648] ss:$16 sps:$4 sm:$0xff]   ;;  %v3342_v20 = vld [vmem:[%s4659_s1 + $0x68c] ss:$16 sps:$4 sm:$0xff]  }
  0xc7   :  { %1887 = vmatpush1.bf16.msra.mxu1 %v3283_v26  ;;  %2372 = vmatprep.subr.bf16.mxu0 %v3381_v41  ;;  %v3331_v26 = vld [vmem:[%s4659_s1 + $0x628] ss:$16 sps:$4 sm:$0xff]  }
  0xc8   :  { %1888 = vmatprep.subr.bf16.mxu1 %v3288_v39  ;;  %v3336_v39 = vld [vmem:[%s4659_s1 + $0x64c] ss:$16 sps:$4 sm:$0xff]   ;;  %v3340_v41 = vld [vmem:[%s4659_s1 + $0x688] ss:$16 sps:$4 sm:$0xff]  }
  0xca   :  { %2373 = vmatpush1.bf16.msra.mxu0 %v3379_v42  ;;  %v3348_v42 = vld [vmem:[%s4659_s1 + $0x6cc] ss:$16 sps:$4 sm:$0xff]  }
  0xcb   :  { %1889 = vmatpush1.bf16.msra.mxu1 %v3286_v3  ;;  %2374 = vmatprep.subr.bf16.mxu0 %v3384_v44  ;;  %v3345_v3 = vld [vmem:[%s4659_s1 + $0x6ac] ss:$16 sps:$4 sm:$0xff]  }
  0xcc   :  { %1890 = vmatprep.subr.bf16.mxu1 %v3291_v25  ;;  %v3343_v25 = vld [vmem:[%s4659_s1 + $0x6a8] ss:$16 sps:$4 sm:$0xff]   ;;  %v3420_v44 = vld [vmem:[%s4661_s3 + $0xe4] ss:$8 sps:$4 sm:$0xff]  }
  0xce   :  { %2375 = vmatpush1.bf16.msra.mxu0 %v3382_v47 }
  0xcf   :  { %1891 = vmatpush1.bf16.msra.mxu1 %v3289_v45  ;;  %2376 = vmatprep.subr.bf16.mxu0 %v3387_v48 }
  0xd0   :  { %1892 = vmatprep.subr.bf16.mxu1 %v3294_v46  ;;  %v3418_v46 = vld [vmem:[%s4661_s3 + $0xe0] ss:$8 sps:$4 sm:$0xff]  }
  0xd2   :  { %2377 = vmatpush1.bf16.msra.mxu0 %v3385_v52  ;;  %v3351_v52 = vld [vmem:[%s4659_s1 + $0x6ec] ss:$16 sps:$4 sm:$0xff]  }
  0xd3   :  { %1893 = vmatpush1.bf16.msra.mxu1 %v3292_v50  ;;  %2378 = vmatprep.subr.bf16.mxu0 %v3390_v53  ;;  %v3346_v50 = vld [vmem:[%s4659_s1 + $0x6c8] ss:$16 sps:$4 sm:$0xff]   ;;  %v3423_v53 = vld [vmem:[%s4661_s3 + $0xf4] ss:$8 sps:$4 sm:$0xff]  }
  0xd4   :  { %1894 = vmatprep.subr.bf16.mxu1 %v3297_v51 }
  0xd6   :  { %2379 = vmatpush1.bf16.msra.mxu0 %v3388_v56  ;;  %v3354_v56 = vld [vmem:[%s4659_s1 + $0x70c] ss:$16 sps:$4 sm:$0xff]  }
  0xd7   :  { %1895 = vmatpush1.bf16.msra.mxu1 %v3295_v54  ;;  %2380 = vmatprep.subr.bf16.mxu0 %v3393_v57  ;;  %v3421_v54 = vld [vmem:[%s4661_s3 + $0xf0] ss:$8 sps:$4 sm:$0xff]   ;;  %v3426_v57 = vld [vmem:[%s4661_s3 + $0x104] ss:$8 sps:$4 sm:$0xff]  }
  0xd8   :  { %1896 = vmatprep.subr.bf16.mxu1 %v3300_v55  ;;  %v3349_v55 = vld [vmem:[%s4659_s1 + $0x6e8] ss:$16 sps:$4 sm:$0xff]  }
  0xda   :  { %2381 = vmatpush1.bf16.msra.mxu0 %v3391_v59  ;;  %v3357_v59 = vld [vmem:[%s4659_s1 + $0x72c] ss:$16 sps:$4 sm:$0xff]  }
  0xdb   :  { %1897 = vmatpush1.bf16.msra.mxu1 %v3298_v58  ;;  %2382 = vmatprep.subr.bf16.mxu0 %v3396_v61  ;;  %v3352_v58 = vld [vmem:[%s4659_s1 + $0x708] ss:$16 sps:$4 sm:$0xff]   ;;  %v3360_v61 = vld [vmem:[%s4659_s1 + $0x74c] ss:$16 sps:$4 sm:$0xff]  }
  0xdc   :  { %1898 = vmatprep.subr.bf16.mxu1 %v3303_v60  ;;  %v3355_v60 = vld [vmem:[%s4659_s1 + $0x728] ss:$16 sps:$4 sm:$0xff]  }
  0xde   :  { %2383 = vmatpush1.bf16.msra.mxu0 %v3394_v63  ;;  %v3363_v63 = vld [vmem:[%s4659_s1 + $0x76c] ss:$16 sps:$4 sm:$0xff]  }
  0xdf   :  { %1899 = vmatpush1.bf16.msra.mxu1 %v3301_v62  ;;  %2384 = vmatprep.subr.bf16.mxu0 %v3399_v1  ;;  %v3358_v62 = vld [vmem:[%s4659_s1 + $0x748] ss:$16 sps:$4 sm:$0xff]   ;;  %v3366_v1 = vld [vmem:[%s4659_s1 + $0x78c] ss:$16 sps:$4 sm:$0xff]  }
  0xe0   :  { %1900 = vmatprep.subr.bf16.mxu1 %v3306_v0  ;;  %v3361_v0 = vld [vmem:[%s4659_s1 + $0x768] ss:$16 sps:$4 sm:$0xff]  }
  0xe2   :  { %2385 = vmatpush1.bf16.msra.mxu0 %v3397_v4  ;;  %v3369_v4 = vld [vmem:[%s4659_s1 + $0x7ac] ss:$16 sps:$4 sm:$0xff]  }
  0xe3   :  { %1901 = vmatpush1.bf16.msra.mxu1 %v3304_v2  ;;  %2386 = vmatprep.subr.bf16.mxu0 %v3402_v6  ;;  %v3364_v2 = vld [vmem:[%s4659_s1 + $0x788] ss:$16 sps:$4 sm:$0xff]   ;;  %v3372_v6 = vld [vmem:[%s4659_s1 + $0x7cc] ss:$16 sps:$4 sm:$0xff]  }
  0xe4   :  { %1902 = vmatprep.subr.bf16.mxu1 %v3309_v5  ;;  %v3367_v5 = vld [vmem:[%s4659_s1 + $0x7a8] ss:$16 sps:$4 sm:$0xff]  }
  0xe6   :  { %2387 = vmatpush1.bf16.msra.mxu0 %v3400_v9  ;;  %v3375_v9 = vld [vmem:[%s4659_s1 + $0x7ec] ss:$16 sps:$4 sm:$0xff]  }
  0xe7   :  { %1903 = vmatpush1.bf16.msra.mxu1 %v3307_v7  ;;  %2388 = vmatprep.subr.bf16.mxu0 %v3405_v11  ;;  %v3370_v7 = vld [vmem:[%s4659_s1 + $0x7c8] ss:$16 sps:$4 sm:$0xff]   ;;  %v340_v11 = vsub.s32 0, %v3630_v43 }
  0xe8   :  { %1904 = vmatprep.subr.bf16.mxu1 %v3312_v10  ;;  %v3373_v10 = vld [vmem:[%s4659_s1 + $0x7e8] ss:$16 sps:$4 sm:$0xff]  }
  0xea   :  { %2389 = vmatpush1.bf16.msra.mxu0 %v3403_v14  ;;  %v344_v14 = vsub.s32 1, %v3630_v43 }
  0xeb   :  { %1905 = vmatpush1.bf16.msra.mxu1 %v3310_v12  ;;  %2390 = vmatprep.subr.bf16.mxu0 %v3408_v16  ;;  %v4444_v12 = vld [vmem:[%s4662_s2] sm:$0xf] }
  0xec   :  { %1906 = vmatprep.subr.bf16.mxu1 %v3315_v15  ;;  %v341_v15 = vrot.slane %v4444_v12, %v340_v11  ;;  %v345_v16 = vrot.slane %v4444_v12, %v344_v14 }
  0xee   :  { %2391 = vmatpush1.bf16.msra.mxu0 %v3406_v18 }
  0xef   :  { %1907 = vmatpush1.bf16.msra.mxu1 %v3313_v17  ;;  %2392 = vmatprep.subr.bf16.mxu0 %v3411_v22 }
  0xf0   :  { %1908 = vmatprep.subr.bf16.mxu1 %v3318_v21 }
  0xf2   :  { %2393 = vmatpush1.bf16.msra.mxu0 %v3409_v24 }
  0xf3   :  { %1909 = vmatpush1.bf16.msra.mxu1 %v3316_v23  ;;  %2394 = vmatprep.subr.bf16.mxu0 %v3414_v27 }
  0xf4   :  { %1910 = vmatprep.subr.bf16.mxu1 %v3321_v8 }
  0xf6   :  { %2395 = vmatpush1.bf16.msra.mxu0 %v3412_v29 }
  0xf7   :  { %1911 = vmatpush1.bf16.msra.mxu1 %v3319_v28  ;;  %2396 = vmatprep.subr.bf16.mxu0 %v3417_v30 }
  0xf8   :  { %1912 = vmatprep.subr.bf16.mxu1 %v3324_v49  ;;  %v3424_v49 = vld [vmem:[%s4661_s3 + $0x100] ss:$8 sps:$4 sm:$0xff]  }
  0xfa   :  { %2397 = vmatpush1.bf16.msra.mxu0 %v3415_v33  ;;  %v3427_v33 = vld [vmem:[%s4661_s3 + $0x110] ss:$8 sps:$4 sm:$0xff]  }
  0xfb   :  { %1913 = vmatpush1.bf16.msra.mxu1 %v3322_v32  ;;  %2398 = vmatprep.subr.bf16.mxu0 %v3420_v44  ;;  %v3429_v32 = vld [vmem:[%s4661_s3 + $0x114] ss:$8 sps:$4 sm:$0xff]  }
  0xfc   :  { %1914 = vmatprep.subr.bf16.mxu1 %v3327_v34  ;;  %v3432_v34 = vld [vmem:[%s4661_s3 + $0x124] ss:$8 sps:$4 sm:$0xff]  }
  0xfe   :  { %2399 = vmatpush1.bf16.msra.mxu0 %v3418_v46 }
  0xff   :  { %1915 = vmatpush1.bf16.msra.mxu1 %v3325_v13  ;;  %2400 = vmatprep.subr.bf16.mxu0 %v3423_v53  ;;  %v2470_v13 = vld [vmem:[%s4663_s5 + $0x80] sm:$0xff] }
 0x100   :  { %1925 = vmatprep.subr.bf16.mxu1 %v3330_v36  ;;  %v2471_v36 = vld [vmem:[%s4663_s5 + $0x88] sm:$0xff] }
 0x102   :  { %1917 = vmatmul.mubr.bf16.vlgmr.msra.gmra.mrb[4].mxu1 %v3945_v31  ;;  %v3339_v31 = vld [vmem:[%s4659_s1 + $0x66c] ss:$16 sps:$4 sm:$0xff]   ;;  %2401 = vmatpush1.bf16.msra.mxu0 %v3421_v54 }
 0x103   :  { %1926 = vmatpush1.bf16.msra.mxu1 %v3328_v38  ;;  %1957 = vmatprep.mubr.bf16.mxu1 %v3959_v35  ;;  %v3337_v35 = vld [vmem:[%s4659_s1 + $0x668] ss:$16 sps:$4 sm:$0xff]   ;;  %v2454_v38 = vld [vmem:[%s4663_s5] sm:$0xff] }
 0x104   :  { %1927 = vmatprep.subr.bf16.mxu1 %v3333_v19  ;;  %2411 = vmatprep.subr.bf16.mxu0 %v3426_v57  ;;  %v2925_v19 = vpack.c.bf16 %v2471_v36, %v2470_v13  ;;  %v3438_v54 = vld [vmem:[%s4661_s3 + $0x144] ss:$8 sps:$4 sm:$0xff]   ;;  %v2461_v57 = vld [vmem:[%s4663_s5 + $0x38] sm:$0xff] }
 0x105   :  { %v3465_v13 = vld [vmem:[%s4661_s3 + $0x1d4] ss:$8 sps:$4 sm:$0xff]   ;;  %v3463_v36 = vld [vmem:[%s4661_s3 + $0x1d0] ss:$8 sps:$4 sm:$0xff]  }
 0x107   :  { %1928 = vmatpush1.bf16.msra.mxu1 %v3331_v26  ;;  %v2455_v26 = vld [vmem:[%s4663_s5 + $0x8] sm:$0xff] }
 0x108   :  { %1929 = vmatprep.subr.bf16.mxu1 %v3336_v39  ;;  %v2472_v39 = vld [vmem:[%s4663_s5 + $0x90] sm:$0xff] }
 0x10b   :  { %1930 = vmatpush1.bf16.msra.mxu1 %v3334_v40  ;;  %v2473_v40 = vld [vmem:[%s4663_s5 + $0x98] sm:$0xff] }
 0x10c   :  { %1931 = vmatprep.subr.bf16.mxu1 %v3339_v31  ;;  %v2927_v31 = vpack.c.bf16 %v2455_v26, %v2454_v38  ;;  %v3468_v38 = vld [vmem:[%s4661_s3 + $0x1e4] ss:$8 sps:$4 sm:$0xff]   ;;  %v3471_v26 = vld [vmem:[%s4661_s3 + $0x1f4] ss:$8 sps:$4 sm:$0xff]  }
 0x10f   :  { %1932 = vmatpush1.bf16.msra.mxu1 %v3337_v35  ;;  %v2929_v35 = vpack.c.bf16 %v2473_v40, %v2472_v39  ;;  %v3469_v39 = vld [vmem:[%s4661_s3 + $0x1f0] ss:$8 sps:$4 sm:$0xff]   ;;  %v348_v40 = vsub.s32 2, %v3630_v43 }
 0x110   :  { %1933 = vmatprep.subr.bf16.mxu1 %v3342_v20  ;;  %v2456_v20 = vld [vmem:[%s4663_s5 + $0x10] sm:$0xff] }
 0x113   :  { %1934 = vmatpush1.bf16.msra.mxu1 %v3340_v41  ;;  %v2457_v41 = vld [vmem:[%s4663_s5 + $0x18] sm:$0xff] }
 0x114   :  { %1935 = vmatprep.subr.bf16.mxu1 %v3345_v3  ;;  %v2474_v3 = vld [vmem:[%s4663_s5 + $0xa0] sm:$0xff]  ;;  %v2931_v44 = vpack.c.bf16 %v2457_v41, %v2456_v20 }
 0x115   :  { %v1672_v45 = vpop.f32.mrb[0].mxu1 }
 0x116   :  { %v1674_v47 = vpop.f32.mrb[1].mxu1  ;;  %v1673_v17 = vadd.f32 %v1672_v45, %v341_v15  ;;  %v3435_v45 = vld [vmem:[%s4661_s3 + $0x134] ss:$8 sps:$4 sm:$0xff]  }
 0x117   :  { %v1676_v48 = vpop.f32.mrb[2].mxu1  ;;  %1936 = vmatpush1.bf16.msra.mxu1 %v3343_v25  ;;  %v1675_v18 = vadd.f32 %v1674_v47, %v345_v16  ;;  %v2475_v25 = vld [vmem:[%s4663_s5 + $0xa8] sm:$0xff]  ;;  %v2458_v47 = vld [vmem:[%s4663_s5 + $0x20] sm:$0xff]  ;;  %v2465_v15 = vld [vmem:[%s4663_s5 + $0x58] sm:$0xff] }
 0x118   :  { %v1677_v51 = vpop.f32.mrb[3].mxu1  ;;  %1937 = vmatprep.subr.bf16.mxu1 %v3348_v42  ;;  %v3430_v42 = vld [vmem:[%s4661_s3 + $0x120] ss:$8 sps:$4 sm:$0xff]   ;;  %v2933_v46 = vpack.c.bf16 %v2475_v25, %v2474_v3 }
 0x119   :  { %v2459_v48 = vld [vmem:[%s4663_s5 + $0x28] sm:$0xff]  ;;  %v2477_v51 = vld [vmem:[%s4663_s5 + $0xb8] sm:$0xff]  ;;  %v2482_v16 = vld [vmem:[%s4663_s5 + $0xe0] sm:$0xff] }
 0x11a   :  { %v2935_v53 = vpack.c.bf16 %v2459_v48, %v2458_v47 }
 0x11b   :  { %1938 = vmatpush1.bf16.msra.mxu1 %v3346_v50  ;;  %v2476_v50 = vld [vmem:[%s4663_s5 + $0xb0] sm:$0xff] }
 0x11c   :  { %1939 = vmatprep.subr.bf16.mxu1 %v3351_v52  ;;  %v3433_v52 = vld [vmem:[%s4661_s3 + $0x130] ss:$8 sps:$4 sm:$0xff]  }
 0x11f   :  { %1940 = vmatpush1.bf16.msra.mxu1 %v3349_v55  ;;  %v2937_v55 = vpack.c.bf16 %v2477_v51, %v2476_v50  ;;  %v2466_v51 = vld [vmem:[%s4663_s5 + $0x60] sm:$0xff] }
 0x120   :  { %1941 = vmatprep.subr.bf16.mxu1 %v3354_v56  ;;  %v2460_v56 = vld [vmem:[%s4663_s5 + $0x30] sm:$0xff] }
 0x123   :  { %1942 = vmatpush1.bf16.msra.mxu1 %v3352_v58  ;;  %v2478_v58 = vld [vmem:[%s4663_s5 + $0xc0] sm:$0xff] }
 0x124   :  { %1943 = vmatprep.subr.bf16.mxu1 %v3357_v59  ;;  %v2479_v59 = vld [vmem:[%s4663_s5 + $0xc8] sm:$0xff] }
 0x127   :  { %1944 = vmatpush1.bf16.msra.mxu1 %v3355_v60  ;;  %v3436_v60 = vld [vmem:[%s4661_s3 + $0x140] ss:$8 sps:$4 sm:$0xff]  }
 0x128   :  { %1945 = vmatprep.subr.bf16.mxu1 %v3360_v61  ;;  %v2939_v61 = vpack.c.bf16 %v2461_v57, %v2460_v56  ;;  %v2468_v56 = vld [vmem:[%s4663_s5 + $0x70] sm:$0xff]  ;;  %v2469_v57 = vld [vmem:[%s4663_s5 + $0x78] sm:$0xff] }
 0x12b   :  { %1946 = vmatpush1.bf16.msra.mxu1 %v3358_v62  ;;  %v3441_v62 = vld [vmem:[%s4661_s3 + $0x154] ss:$8 sps:$4 sm:$0xff]  }
 0x12c   :  { %1947 = vmatprep.subr.bf16.mxu1 %v3363_v63  ;;  %v2941_v63 = vpack.c.bf16 %v2479_v59, %v2478_v58  ;;  %v2955_v58 = vpack.c.bf16 %v2469_v57, %v2468_v56  ;;  %v2038_v59 = vld [vmem:[%s4664_s4] sm:$0x3] }
 0x12f   :  { %1948 = vmatpush1.bf16.msra.mxu1 %v3361_v0  ;;  %v2462_v0 = vld [vmem:[%s4663_s5 + $0x40] sm:$0xff] }
 0x130   :  { %1949 = vmatprep.subr.bf16.mxu1 %v3366_v1  ;;  %v2463_v1 = vld [vmem:[%s4663_s5 + $0x48] sm:$0xff] }
 0x133   :  { %1950 = vmatpush1.bf16.msra.mxu1 %v3364_v2  ;;  %v2480_v2 = vld [vmem:[%s4663_s5 + $0xd0] sm:$0xff] }
 0x134   :  { %1951 = vmatprep.subr.bf16.mxu1 %v3369_v4  ;;  %v2481_v4 = vld [vmem:[%s4663_s5 + $0xd8] sm:$0xff] }
 0x137   :  { %1952 = vmatpush1.bf16.msra.mxu1 %v3367_v5  ;;  %v3439_v5 = vld [vmem:[%s4661_s3 + $0x150] ss:$8 sps:$4 sm:$0xff]  }
 0x138   :  { %1953 = vmatprep.subr.bf16.mxu1 %v3372_v6  ;;  %v2943_v6 = vpack.c.bf16 %v2463_v1, %v2462_v0 }
 0x13b   :  { %1954 = vmatpush1.bf16.msra.mxu1 %v3370_v7  ;;  %v3444_v7 = vld [vmem:[%s4661_s3 + $0x164] ss:$8 sps:$4 sm:$0xff]  }
 0x13c   :  { %1955 = vmatprep.subr.bf16.mxu1 %v3375_v9  ;;  %v2945_v9 = vpack.c.bf16 %v2481_v4, %v2480_v2 }
 0x13f   :  { %1956 = vmatpush1.bf16.msra.mxu1 %v3373_v10  ;;  %v2464_v10 = vld [vmem:[%s4663_s5 + $0x50] sm:$0xff] }
 0x140   :  { %2926 = vmatprep.subr.bf16.mxu1 %v2925_v19  ;;  %v3466_v19 = vld [vmem:[%s4661_s3 + $0x1e0] ss:$8 sps:$4 sm:$0xff]  }
 0x142   :  { %1958 = vmatmul.mubr.bf16.vlgmr.msra.gmra.mrb[4].mxu1 %v4144_v37 }
 0x143   :  { %2928 = vmatpush3.bf16.msra.mxu1 %v2927_v31  ;;  %v352_v31 = vsub.s32 3, %v3630_v43 }
 0x144   :  { %2930 = vmatprep.subr.bf16.mxu1 %v2929_v35  ;;  %v349_v35 = vrot.slane %v4444_v12, %v348_v40 }
 0x145   :  { %v353_v20 = vrot.slane %v4444_v12, %v352_v31  ;;  %v2467_v12 = vld [vmem:[%s4663_s5 + $0x68] sm:$0xff] }
 0x147   :  { %2932 = vmatpush3.bf16.msra.mxu1 %v2931_v44 }
 0x148   :  { %2934 = vmatprep.subr.bf16.mxu1 %v2933_v46 }
 0x14b   :  { %2936 = vmatpush3.bf16.msra.mxu1 %v2935_v53  ;;  %v2484_v53 = vld [vmem:[%s4663_s5 + $0xf0] sm:$0xff] }
 0x14c   :  { %2938 = vmatprep.subr.bf16.mxu1 %v2937_v55 }
 0x14f   :  { %2940 = vmatpush3.bf16.msra.mxu1 %v2939_v61  ;;  %v2047_v61 = vrot.slane %v2038_v59, %v344_v14 }
 0x150   :  { %2942 = vmatprep.subr.bf16.mxu1 %v2941_v63 }
 0x153   :  { %2944 = vmatpush3.bf16.msra.mxu1 %v2943_v6 }
 0x154   :  { %2946 = vmatprep.subr.bf16.mxu1 %v2945_v9  ;;  %v2889_v9 = vld [vmem:[%s4665_s6] ss:$0 sm:$0xff] }
 0x196   :  { %v1795_v37 = vpop.f32.mrb[0].mxu0 }
 0x197   :  { %v2958_v21 = vadd.f32 %v1795_v37, %v1673_v17  ;;  %v1797_v22 = vpop.f32.mrb[1].mxu0  ;;  %v2483_v17 = vld [vmem:[%s4663_s5 + $0xe8] sm:$0xff]  ;;  %v2947_v37 = vpack.c.bf16 %v2465_v15, %v2464_v10 }
 0x198   :  { %v2960_v23 = vadd.f32 %v1797_v22, %v1675_v18  ;;  %v1799_v24 = vpop.f32.mrb[2].mxu0  ;;  %v3442_v18 = vld [vmem:[%s4661_s3 + $0x160] ss:$8 sps:$4 sm:$0xff]   ;;  %v2949_v22 = vpack.c.bf16 %v2483_v17, %v2482_v16 }
 0x199   :  { %v1966_v8 = vmax.f32 %v2958_v21, 0.0  ;;  %v1800_v27 = vpop.f32.mrb[3].mxu0  ;;  %v3447_v21 = vld [vmem:[%s4661_s3 + $0x174] ss:$8 sps:$4 sm:$0xff]   ;;  %2948 = vmatpush3.bf16.msra.mxu1 %v2947_v37  ;;  %v3450_v24 = vld [vmem:[%s4661_s3 + $0x184] ss:$8 sps:$4 sm:$0xff]  }
 0x19a   :  { %v1967_v28 = vmax.f32 %v2960_v23, 0.0  ;;  %v3445_v23 = vld [vmem:[%s4661_s3 + $0x170] ss:$8 sps:$4 sm:$0xff]   ;;  %2950 = vmatprep.subr.bf16.mxu1 %v2949_v22  ;;  %v3453_v27 = vld [vmem:[%s4661_s3 + $0x194] ss:$8 sps:$4 sm:$0xff]  }
 0x19b   :  { %v1970_v30 = vpack.c.bf16 %v1966_v8, %v1966_v8  ;;  %v3448_v8 = vld [vmem:[%s4661_s3 + $0x180] ss:$8 sps:$4 sm:$0xff]  }
 0x19c   :  { %v1971_v29 = vpack.c.bf16 %v1967_v28, %v1967_v28  ;;  %v3451_v28 = vld [vmem:[%s4661_s3 + $0x190] ss:$8 sps:$4 sm:$0xff]  }
 0x19e   :  { %2402 = vmatprep.mubr.bf16.mxu0 %v1971_v29  ;;  %v3456_v29 = vld [vmem:[%s4661_s3 + $0x1a4] ss:$8 sps:$4 sm:$0xff]  }
 0x19f   :  { %2403 = vmatmul.mubr.bf16.vlgmr.msra.gmra.mrb[4].mxu0 %v1970_v30  ;;  %v3459_v30 = vld [vmem:[%s4661_s3 + $0x1b4] ss:$8 sps:$4 sm:$0xff]  }
 0x1a0   :  { %2412 = vmatpush1.bf16.msra.mxu0 %v3424_v49  ;;  %v3454_v49 = vld [vmem:[%s4661_s3 + $0x1a0] ss:$8 sps:$4 sm:$0xff]  }
 0x1a1   :  { %2413 = vmatprep.subr.bf16.mxu0 %v3429_v32  ;;  %v3457_v32 = vld [vmem:[%s4661_s3 + $0x1b0] ss:$8 sps:$4 sm:$0xff]  }
 0x1a4   :  { %2414 = vmatpush1.bf16.msra.mxu0 %v3427_v33  ;;  %v3462_v33 = vld [vmem:[%s4661_s3 + $0x1c4] ss:$8 sps:$4 sm:$0xff]  }
 0x1a5   :  { %2415 = vmatprep.subr.bf16.mxu0 %v3432_v34  ;;  %v3460_v34 = vld [vmem:[%s4661_s3 + $0x1c0] ss:$8 sps:$4 sm:$0xff]  }
 0x1a8   :  { %2416 = vmatpush1.bf16.msra.mxu0 %v3430_v42 }
 0x1a9   :  { %2417 = vmatprep.subr.bf16.mxu0 %v3435_v45 }
 0x1ac   :  { %2418 = vmatpush1.bf16.msra.mxu0 %v3433_v52  ;;  %v2951_v52 = vpack.c.bf16 %v2467_v12, %v2466_v51 }
 0x1ad   :  { %2419 = vmatprep.subr.bf16.mxu0 %v3438_v54  ;;  %v2485_v54 = vld [vmem:[%s4663_s5 + $0xf8] sm:$0xff] }
 0x1ae   :  { %2952 = vmatpush3.bf16.msra.mxu1 %v2951_v52  ;;  %v2953_v55 = vpack.c.bf16 %v2485_v54, %v2484_v53 }
 0x1b0   :  { %2420 = vmatpush1.bf16.msra.mxu0 %v3436_v60  ;;  %2954 = vmatprep.subr.bf16.mxu1 %v2953_v55  ;;  %v2043_v60 = vrot.slane %v2038_v59, %v340_v11 }
 0x1b1   :  { %2421 = vmatprep.subr.bf16.mxu0 %v3441_v62 }
 0x1b2   :  { %2956 = vmatpush3.bf16.msra.mxu1 %v2955_v58 }
 0x1b4   :  { %2422 = vmatpush1.bf16.msra.mxu0 %v3439_v5 }
 0x1b5   :  { %2423 = vmatprep.subr.bf16.mxu0 %v3444_v7 }
 0x1b8   :  { %2424 = vmatpush1.bf16.msra.mxu0 %v3442_v18 }
 0x1b9   :  { %2425 = vmatprep.subr.bf16.mxu0 %v3447_v21 }
 0x1bc   :  { %2426 = vmatpush1.bf16.msra.mxu0 %v3445_v23 }
 0x1bd   :  { %2427 = vmatprep.subr.bf16.mxu0 %v3450_v24 }
 0x1c0   :  { %2428 = vmatpush1.bf16.msra.mxu0 %v3448_v8 }
 0x1c1   :  { %2429 = vmatprep.subr.bf16.mxu0 %v3453_v27 }
 0x1c4   :  { %2430 = vmatpush1.bf16.msra.mxu0 %v3451_v28 }
 0x1c5   :  { %2431 = vmatprep.subr.bf16.mxu0 %v3456_v29 }
 0x1c8   :  { %2432 = vmatpush1.bf16.msra.mxu0 %v3454_v49 }
 0x1c9   :  { %2433 = vmatprep.subr.bf16.mxu0 %v3459_v30 }
 0x1cc   :  { %2434 = vmatpush1.bf16.msra.mxu0 %v3457_v32 }
 0x1cd   :  { %2435 = vmatprep.subr.bf16.mxu0 %v3462_v33 }
 0x1d0   :  { %2436 = vmatpush1.bf16.msra.mxu0 %v3460_v34 }
 0x1d1   :  { %2437 = vmatprep.subr.bf16.mxu0 %v3465_v13 }
 0x1d4   :  { %2438 = vmatpush1.bf16.msra.mxu0 %v3463_v36 }
 0x1d5   :  { %2439 = vmatprep.subr.bf16.mxu0 %v3468_v38 }
 0x1d8   :  { %2440 = vmatpush1.bf16.msra.mxu0 %v3466_v19 }
 0x1d9   :  { %2441 = vmatprep.subr.bf16.mxu0 %v3471_v26 }
 0x1dc   :  { %2442 = vmatpush1.bf16.msra.mxu0 %v3469_v39 }
 0x215   :  { %v1959_v41 = vpop.f32.mrb[4].mxu1 }
 0x216   :  { %v2961_v3 = vadd.f32 %v1959_v41, %v349_v35  ;;  %v1961_v25 = vpop.f32.mrb[5].mxu1 }
 0x217   :  { %v2962_v42 = vadd.f32 %v1961_v25, %v353_v20  ;;  %v1963_v44 = vpop.f32.mrb[6].mxu1 }
 0x218   :  { %v1968_v45 = vmax.f32 %v2961_v3, 0.0  ;;  %v1964_v46 = vpop.f32.mrb[7].mxu1 }
 0x219   :  { %v1969_v47 = vmax.f32 %v2962_v42, 0.0 }
 0x21a   :  { %v1972_v50 = vpack.c.bf16 %v1968_v45, %v1968_v45 }
 0x21b   :  { %v1973_v48 = vpack.c.bf16 %v1969_v47, %v1969_v47 }
 0x21d   :  { %2443 = vmatprep.mubr.bf16.mxu0 %v1973_v48 }
 0x21e   :  { %2444 = vmatmul.mubr.bf16.vlgmr.msra.gmra.mrb[4].mxu0 %v1972_v50 }
 0x2f1   :  { %v2445_v62 = vpop.f32.mrb[4].mxu0 }
 0x2f2   :  { %v2963_v63 = vadd.f32 %v2445_v62, %v2043_v60  ;;  %v2447_v0 = vpop.f32.mrb[5].mxu0 }
 0x2f3   :  { %v2964_v1 = vadd.f32 %v2447_v0, %v2047_v61  ;;  %v2449_v2 = vpop.f32.mrb[6].mxu0 }
 0x2f4   :  { %v2450_v4 = vpop.f32.mrb[7].mxu0  ;;  %v2452_v6 = vmax.f32 %v2963_v63, 0.0 }
 0x2f5   :  { %v2453_v5 = vmax.f32 %v2964_v1, 0.0 }
 0x2f7   :  { %2557 = vmatprep.mubr.f32.mxu1 %v2453_v5 }
 0x2f8   :  { %2558 = vmatmul.mubr.f32.vlgmr.msra.gmra.mrb[8].mxu1 %v2452_v6 }
 0x3cb   :  { %v2922_v7 = vpop.f32.mrb[8].mxu1 }
 0x3cc   :  { %v2923_v10 = vpop.f32.mrb[9].mxu1 }
 0x3cd   :  { %v2924_v11 = vadd.f32 %v2923_v10, %v2922_v7 }
 0x3cf   :  { %v2560_v43 = vadd.f32 %v2924_v11, %v2889_v9 }
 0x3d1   :  { %2564 = vst.msk [vmem:[%s4666_s7] sm:$0x3] %vm2563_vm0, %v2560_v43 }

// kernel: pointnetfeat_forward.3
= control target key start
LH: loop header
LB: loop body
LE: loop exit
PB: predicated region body
PF: predicated region fallthrough
CT: control target
= control target key end

     0   :  { %12 = vsyncpa [#allocation3], 0  ;;  %s10306_s0 = inlined_call_operand.vmem [shape: f32[2,3,300], index: 0, kind: input, shape index: {}]   ;;  %s10307_s1 = inlined_call_operand.hbm [shape: f32[1,64,3], index: 1, kind: input, shape index: {}]   ;;  %s10308_s2 = inlined_call_operand.hbm [shape: f32[64,1], index: 2, kind: input, shape index: {}]   ;;  %s10309_s3 = inlined_call_operand.hbm [shape: bf16[128,64], index: 3, kind: input, shape index: {}]   ;;  %s10310_s4 = inlined_call_operand.vmem [shape: bf16[128,1], index: 4, kind: input, shape index: {}]   ;;  %s10311_s5 = inlined_call_operand.vmem [shape: bf16[1024,128], index: 5, kind: input, shape index: {}]   ;;  %s10312_s6 = inlined_call_operand.vmem [shape: bf16[1024,1], index: 6, kind: input, shape index: {}]   ;;  %s10313_s7 = inlined_call_operand.vmem [shape: f32[1,2,1024,1], index: 7, kind: output, shape index: {}]  }
   0x1   :  { %13 = vsyncpa [#allocation5], 0  ;;  %s7334_s24 = smov 0   ;;  %s7336_s25 = smov 0  }
   0x2   :  { %s7338_s26 = smov 0  }
   0x3 LB: > { %s6528_s27 = sadd.s32 4294967295, %s7282_s26   ;;  %p6530_p0 = scmp.ge.s32.totalorder %s7282_s26, 1  ;;  %s7282_s26 = sphi %s7338_s26, %s19_s26   ;;  %s7278_s25 = sphi %s7336_s25, %s10728_s25   ;;  %s7274_s24 = sphi %s7334_s24, %s10727_s24  }
   0x4   : > { %p227_p1 = scmp.lt.s32.totalorder %s7282_s26, 3  ;;  %p7352_p2 = scmp.eq.s32.totalorder %s6528_s27, 0 }
   0x5   : > { %s7284_s30 = smov [#allocation4]   ;;  %s34_s10 = sadd.s32 1, %s7278_s25 }
   0x6   : > { %s10388_s28 = scalar_select %p7352_p2, 1, 0 }
   0x7   : > { %p7356_p3 = pnand %p6530_p0, %p227_p1  ;;  %s252_s8 = sshll.u32 %s7284_s30, 4  ;;  %s7360_s8 = int_to_ptr.vmem [resolvable:$true] %s252_s8 }
   0x8   : > { %p7371_p6 = scmp.ge.s32.totalorder %s34_s10, 2  ;;  %s7285_s12 = smov [#allocation2]  }
   0x9   : > { %s10389_s29 = scalar_select %p7356_p3, 1, 0 }
   0xa   : > { %p7028_p4 = pneg %p7356_p3  ;;  %s239_s13 = sshll.u32 %s7285_s12, 4  ;;  %s240_s13 = int_to_ptr.vmem [resolvable:$true] %s239_s13 }
   0xb   : > { %s7168_s16 = scalar_lea.hbm %s10308_s2, 1024 }
   0xc   : > { %p7366_p5 = pnand %p7352_p2, %p7028_p4  ;;  %p7169_p7 = scmp.ne.s32.totalorder %s10308_s2, %s7168_s16 }
   0xd   : > { %p7175_p11 = scmp.lt.u32.totalorder %s7168_s16, %s10308_s2 }
   0xe   : > { %p7383_p8 = pneg %p7366_p5 }
  0x10   : > { %p7171_p9 = pnand %p7383_p8, %p7169_p7 }
  0x12   : > { %p7172_p10 = pneg %p7171_p9 }
  0x14   : > { %p7177_p12 = pnand %p7175_p11, %p7172_p10 }
  0x16   : > { %7180 = shalt.err (!%p7177_p12)
}
  0x17   : > { %s7181_s22 = scalar_lea.vmem %s7360_s8, 1024  ;;  %p7189_p4 = scmp.lt.s32.totalorder %s7360_s8, %s7360_s8 }
  0x18   : > { %p7182_p13 = scmp.ne.s32.totalorder %s7360_s8, %s7181_s22  ;;  %p7190_p2 = scmp.lt.s32.totalorder %s7181_s22, %s7181_s22 }
  0x1a   : > { %p7184_p0 = pnand %p7182_p13, %p7383_p8  ;;  %p7191_p7 = por %p7190_p2, %p7189_p4 }
  0x1c   : > { %p7185_p1 = pneg %p7184_p0 }
  0x1e   : > { %p7192_p9 = pnand %p7191_p7, %p7185_p1 }
  0x20   : > { %7195 = shalt.err (!%p7192_p9)
}
  0x21   : > { %s7286_s23 = smov 128   ;;  %s7287_s27 = smov 8  }
  0x22   : > { %7034 = dma.hbm_to_vmem [thread:$0]  (!%p7366_p5), %s10308_s2, 1024, %s7360_s8, [#allocation5], %s7286_s23, %s7286_s23, %s7287_s27  }
  0x23   : > { %s10730_s10 = smov (%p7371_p6, %s34_s10), 0  ;;  %s7196_s16 = scalar_lea.hbm %s10307_s1, 1024 }
  0x24   : > { %p7197_p2 = scmp.ne.s32.totalorder %s10307_s1, %s7196_s16  ;;  %p7203_p12 = scmp.lt.u32.totalorder %s7196_s16, %s10307_s1 }
  0x26   : > { %p7199_p10 = pnand %p7197_p2, %p7383_p8 }
  0x28   : > { %p7200_p11 = pneg %p7199_p10 }
  0x2a   : > { %p7205_p13 = pnand %p7203_p12, %p7200_p11 }
  0x2c   : > { %7208 = shalt.err (!%p7205_p13)
}
  0x2d   : > { %s7209_s8 = scalar_lea.vmem %s240_s13, 1024  ;;  %p7217_p4 = scmp.lt.s32.totalorder %s240_s13, %s240_s13 }
  0x2e   : > { %p7210_p6 = scmp.ne.s32.totalorder %s240_s13, %s7209_s8  ;;  %p7218_p7 = scmp.lt.s32.totalorder %s7209_s8, %s7209_s8 }
  0x30   : > { %p7212_p0 = pnand %p7210_p6, %p7383_p8  ;;  %p7219_p9 = por %p7218_p7, %p7217_p4 }
  0x32   : > { %p7213_p1 = pneg %p7212_p0 }
  0x34   : > { %p7220_p3 = pnand %p7219_p9, %p7213_p1 }
  0x36   : > { %7223 = shalt.err (!%p7220_p3)
}
  0x37   : > { %7031 = dma.hbm_to_vmem [thread:$0]  (!%p7366_p5), %s10307_s1, 1024, %s240_s13, [#allocation3], %s7286_s23, %s7286_s23, %s7287_s27  }
  0x38   : > { %s7288_s30 = smov [#allocation6]   ;;  %s7224_s16 = scalar_lea.hbm %s10309_s3, 1024 }
  0x39   : > { %s265_s12 = sshll.u32 %s7288_s30, 4  ;;  %p7225_p2 = scmp.ne.s32.totalorder %s10309_s3, %s7224_s16  ;;  %s266_s12 = int_to_ptr.vmem [resolvable:$true] %s265_s12 }
  0x3a   : > { %p7231_p11 = scmp.lt.u32.totalorder %s7224_s16, %s10309_s3 }
  0x3b   : > { %p7227_p3 = pnand %p7225_p2, %p7383_p8 }
  0x3d   : > { %p7228_p10 = pneg %p7227_p3 }
  0x3f   : > { %p7233_p12 = pnand %p7231_p11, %p7228_p10 }
  0x41   : > { %7236 = shalt.err (!%p7233_p12)
}
  0x42   : > { %s7237_s13 = scalar_lea.vmem %s266_s12, 1024  ;;  %p7245_p1 = scmp.lt.s32.totalorder %s266_s12, %s266_s12 }
  0x43   : > { %p7238_p13 = scmp.ne.s32.totalorder %s266_s12, %s7237_s13  ;;  %p7246_p4 = scmp.lt.s32.totalorder %s7237_s13, %s7237_s13 }
  0x45   : > { %p7240_p6 = pnand %p7238_p13, %p7383_p8  ;;  %p7247_p7 = por %p7246_p4, %p7245_p1 }
  0x47   : > { %p7241_p0 = pneg %p7240_p6 }
  0x49   : > { %p7248_p9 = pnand %p7247_p7, %p7241_p0 }
  0x4b   : > { %7251 = shalt.err (!%p7248_p9)
}
  0x4c   : > { %s7289_s23 = smov 64   ;;  %s7290_s27 = smov 4  }
  0x4d   : > { %7037 = dma.hbm_to_vmem [thread:$0]  (!%p7366_p5), %s10309_s3, 1024, %s266_s12, [#allocation5], %s7289_s23, %s7289_s23, %s7290_s27  }
  0x4e   : > { %p10393_p2 = scmp.ne.s32.totalorder %s10389_s29, 0 }
  0x50   : > { %305 = sbr.rel (%p10393_p2) target bundleno = 1416 (0x588), region = 48 }
  0x57   : > { %p10394_p3 = scmp.ne.s32.totalorder %s10388_s28, 0 }
  0x59   : > { %7265 = dma.done.wait (%p10394_p3), [#allocation3], 1024  }
  0x5a   : > { %7267 = vsyncadd (%p10394_p3), [#allocation3], 4294966272 }
  0x5b   : > { %7269 = dma.done.wait (%p10394_p3), [#allocation5], 2048  }
  0x5c   : > { %7271 = vsyncadd (%p10394_p3), [#allocation5], 4294965248  ;;  %p356_p8 = scmp.lt.s32.totalorder %s7274_s24, 1  ;;  %v10317_v0 = vmov 0   ;;  %v7292_v1 = vmov 0.0   ;;  %vm463_vm0 = vcmask 1042432  }
  0x5d   : > { %7079 = vset.pattern.permute.xlu1 %v10317_v0  ;;  %7078 = vset.pattern.permute.xlu0 %v10317_v0  ;;  %vm438_vm1 = vcmask 23552   ;;  %v389_v2 = vld [vmem:[#allocation4 + $0x10] sm:$0xff]  ;;  %v387_v3 = vld [vmem:[#allocation4] sm:$0xff]  ;;  %v380_v7 = vld [vmem:[#allocation2 + $0x8] sm:$0xff]  ;;  %vm780_vm2 = vcmask 523264   ;;  %vm5698_vm3 = vcmask 359424  }
  0x5e   : > { %s10732_s24 = smov (!%p356_p8, %s7274_s24), 1  ;;  %534 = vmatprep.mubr.f32.mxu0 %v7292_v1  ;;  %407 = vperm.xlu1 %7079, %v389_v2   ;;  %v379_v5 = vld [vmem:[#allocation2] sm:$0xff]  ;;  %v390_v9 = vld [vmem:[#allocation4 + $0x18] sm:$0xff]  ;;  %v388_v10 = vld [vmem:[#allocation4 + $0x8] sm:$0xff]  ;;  %vm6275_vm4 = vcmask 7168  }
  0x5f   : > { %s7015_s29 = smul.u32 12, %s10732_s24  ;;  %397 = vperm.xlu0 %7078, %v387_v3   ;;  %6819 = vmatprep.mubr.msk.f32.mxu1 %vm438_vm1, %v379_v5  ;;  %v381_v11 = vld [vmem:[#allocation2 + $0x10] sm:$0xff]  ;;  %v382_v12 = vld [vmem:[#allocation2 + $0x18] sm:$0xff]  ;;  %v392_v13 = vld [vmem:[#allocation4 + $0x28] sm:$0xff]  ;;  %s6723_s21 = sshll.u32 %s10732_s24, 10 }
  0x60   : > { %v383_v14 = vld [vmem:[#allocation2 + $0x20] sm:$0xff]  ;;  %v384_v16 = vld [vmem:[#allocation2 + $0x28] sm:$0xff]  ;;  %v394_v17 = vld [vmem:[#allocation4 + $0x38] sm:$0xff]  ;;  %s9709_s23 = scalar_lea.vmem %s10313_s7, %s6723_s21 }
  0x61   : > { %s363_s28 = scalar_lea.vmem %s10306_s0, %s7015_s29  ;;  %v391_v15 = vld [vmem:[#allocation4 + $0x20] sm:$0xff]  ;;  %v385_v18 = vld [vmem:[#allocation2 + $0x30] sm:$0xff]  ;;  %v386_v20 = vld [vmem:[#allocation2 + $0x38] sm:$0xff] }
  0x62   : > { %v378_v4 = vld [vmem:[%s363_s28 + $0x8] sm:$0x7]  ;;  %v377_v6 = vld [vmem:[%s363_s28] sm:$0x77]  ;;  %412 = vperm.xlu1 %7079, %v390_v9   ;;  %v393_v19 = vld [vmem:[#allocation4 + $0x30] sm:$0xff] }
  0x63   : > { %6817 = vmatprep.subr.msk.mxu1 %vm463_vm0, %v378_v4  ;;  %v437_v8 = vcombine.high %v377_v6, %v377_v6  ;;  %402 = vperm.xlu0 %7078, %v388_v10   ;;  %v1040_v21 = vld [vmem:[%s10310_s4 + $0x4] sm:$0xf]  ;;  %v1039_v22 = vld [vmem:[%s10310_s4] sm:$0xf]  ;;  %v1042_v23 = vld [vmem:[%s10310_s4 + $0xc] sm:$0xf] }
  0x64   : > { %6818 = vmatpush3.msk.msra.mxu1 %vm463_vm0, %v378_v4  ;;  %v1041_v24 = vld [vmem:[%s10310_s4 + $0x8] sm:$0xf]  ;;  %v1044_v25 = vld [vmem:[%s10310_s4 + $0x14] sm:$0xf]  ;;  %v1043_v26 = vld [vmem:[%s10310_s4 + $0x10] sm:$0xf] }
  0x65   : > { %6542 = vmatprep.subr.msk.mxu0 %vm463_vm0, %v437_v8  ;;  %6820 = vmatmul.mubr.msk.f32.vlgmr.msra.gmra.mrb[0].mxu1 %vm438_vm1, %v380_v7  ;;  %v1046_v27 = vld [vmem:[%s10310_s4 + $0x1c] sm:$0xf]  ;;  %v1045_v28 = vld [vmem:[%s10310_s4 + $0x18] sm:$0xf]  ;;  %v1048_v29 = vld [vmem:[%s10310_s4 + $0x24] sm:$0xf] }
  0x66   : > { %6543 = vmatpush1.msk.msra.mxu0 %vm463_vm0, %v377_v6  ;;  %6822 = vmatprep.mubr.msk.f32.mxu1 %vm438_vm1, %v381_v11  ;;  %v1047_v30 = vld [vmem:[%s10310_s4 + $0x20] sm:$0xf]  ;;  %v1050_v31 = vld [vmem:[%s10310_s4 + $0x2c] sm:$0xf]  ;;  %v1049_v32 = vld [vmem:[%s10310_s4 + $0x28] sm:$0xf] }
  0x67   : > { %6544 = vmatmul.mubr.msk.f32.vlgmr.msra.gmra.mrb[0].mxu0 %vm438_vm1, %v379_v5  ;;  %422 = vperm.xlu1 %7079, %v392_v13   ;;  %v1052_v33 = vld [vmem:[%s10310_s4 + $0x34] sm:$0xf]  ;;  %v1051_v34 = vld [vmem:[%s10310_s4 + $0x30] sm:$0xf]  ;;  %v1054_v35 = vld [vmem:[%s10310_s4 + $0x3c] sm:$0xf] }
  0x68   : > { %540 = vmatprep.mubr.f32.mxu0 %v7292_v1  ;;  %417 = vperm.xlu0 %7078, %v391_v15   ;;  %v1053_v36 = vld [vmem:[%s10310_s4 + $0x38] sm:$0xf]  ;;  %v3266_v37 = vld [vmem:[%s10312_s6 + $0x4] sm:$0xf]  ;;  %v3265_v38 = vld [vmem:[%s10312_s6] sm:$0xf] }
  0x69   : > { %6823 = vmatmul.mubr.msk.f32.gmra.mrb[2].mxu1 %vm438_vm1, %v382_v12  ;;  %v3268_v39 = vld [vmem:[%s10312_s6 + $0xc] sm:$0xf]  ;;  %v3267_v40 = vld [vmem:[%s10312_s6 + $0x8] sm:$0xf]  ;;  %v3270_v41 = vld [vmem:[%s10312_s6 + $0x14] sm:$0xf] }
  0x6a   : > { %6825 = vmatprep.mubr.msk.f32.mxu1 %vm438_vm1, %v383_v14  ;;  %v3269_v42 = vld [vmem:[%s10312_s6 + $0x10] sm:$0xf]  ;;  %v3272_v43 = vld [vmem:[%s10312_s6 + $0x1c] sm:$0xf]  ;;  %v3271_v44 = vld [vmem:[%s10312_s6 + $0x18] sm:$0xf] }
  0x6b   : > { %6545 = vmatmul.mubr.msk.f32.gmra.mrb[2].mxu0 %vm438_vm1, %v380_v7  ;;  %432 = vperm.xlu1 %7079, %v394_v17   ;;  %v3274_v45 = vld [vmem:[%s10312_s6 + $0x24] sm:$0xf]  ;;  %v3273_v46 = vld [vmem:[%s10312_s6 + $0x20] sm:$0xf]  ;;  %v3276_v47 = vld [vmem:[%s10312_s6 + $0x2c] sm:$0xf] }
  0x6c   : > { %546 = vmatprep.mubr.f32.mxu0 %v7292_v1  ;;  %427 = vperm.xlu0 %7078, %v393_v19   ;;  %v3275_v48 = vld [vmem:[%s10312_s6 + $0x28] sm:$0xf]  ;;  %v3278_v49 = vld [vmem:[%s10312_s6 + $0x34] sm:$0xf]  ;;  %v3277_v50 = vld [vmem:[%s10312_s6 + $0x30] sm:$0xf] }
  0x6d   : > { %6826 = vmatmul.mubr.msk.f32.gmra.mrb[4].mxu1 %vm438_vm1, %v384_v16  ;;  %v3280_v51 = vld [vmem:[%s10312_s6 + $0x3c] sm:$0xf]  ;;  %v3279_v52 = vld [vmem:[%s10312_s6 + $0x38] sm:$0xf]  ;;  %v3282_v53 = vld [vmem:[%s10312_s6 + $0x44] sm:$0xf] }
  0x6e   : > { %6828 = vmatprep.mubr.msk.f32.mxu1 %vm438_vm1, %v385_v18  ;;  %v3281_v54 = vld [vmem:[%s10312_s6 + $0x40] sm:$0xf]  ;;  %v3284_v55 = vld [vmem:[%s10312_s6 + $0x4c] sm:$0xf]  ;;  %v3283_v56 = vld [vmem:[%s10312_s6 + $0x48] sm:$0xf] }
  0x6f   : > { %6546 = vmatmul.mubr.msk.f32.gmra.mrb[4].mxu0 %vm438_vm1, %v381_v11  ;;  %1069 = vperm.xlu1 %7079, %v1040_v21   ;;  %v3286_v57 = vld [vmem:[%s10312_s6 + $0x54] sm:$0xf]  ;;  %v3285_v58 = vld [vmem:[%s10312_s6 + $0x50] sm:$0xf]  ;;  %v3288_v59 = vld [vmem:[%s10312_s6 + $0x5c] sm:$0xf] }
  0x70   : > { %552 = vmatprep.mubr.f32.mxu0 %v7292_v1  ;;  %1057 = vperm.xlu0 %7078, %v1039_v22   ;;  %v3287_v60 = vld [vmem:[%s10312_s6 + $0x58] sm:$0xf]  ;;  %v3290_v61 = vld [vmem:[%s10312_s6 + $0x64] sm:$0xf]  ;;  %v3289_v62 = vld [vmem:[%s10312_s6 + $0x60] sm:$0xf] }
  0x71   : > { %6829 = vmatmul.mubr.msk.f32.gmra.mrb[6].mxu1 %vm438_vm1, %v386_v20  ;;  %v3292_v63 = vld [vmem:[%s10312_s6 + $0x6c] sm:$0xf]  ;;  %v3294_v2 = vld [vmem:[%s10312_s6 + $0x74] sm:$0xf]  ;;  %v3293_v3 = vld [vmem:[%s10312_s6 + $0x70] sm:$0xf] }
  0x72   : > { %837 = vmatprep.mubr.bf16.mxu1 %v10317_v0  ;;  %v3296_v4 = vld [vmem:[%s10312_s6 + $0x7c] sm:$0xf]  ;;  %v3295_v5 = vld [vmem:[%s10312_s6 + $0x78] sm:$0xf]  ;;  %v7637_v6 = vld [vmem:[#allocation6] sm:$0xff]  }
  0x73   : > { %6547 = vmatmul.mubr.msk.f32.gmra.mrb[6].mxu0 %vm438_vm1, %v382_v12  ;;  %1093 = vperm.xlu1 %7079, %v1042_v23   ;;  %v3298_v7 = vld [vmem:[%s10312_s6 + $0x84] sm:$0xf]  ;;  %v3297_v8 = vld [vmem:[%s10312_s6 + $0x80] sm:$0xf]  ;;  %v3300_v9 = vld [vmem:[%s10312_s6 + $0x8c] sm:$0xf] }
  0x74   : > { %558 = vmatprep.mubr.f32.mxu0 %v7292_v1  ;;  %1081 = vperm.xlu0 %7078, %v1041_v24   ;;  %v3299_v10 = vld [vmem:[%s10312_s6 + $0x88] sm:$0xf]  ;;  %v3302_v11 = vld [vmem:[%s10312_s6 + $0x94] sm:$0xf]  ;;  %v3301_v12 = vld [vmem:[%s10312_s6 + $0x90] sm:$0xf] }
  0x75   : > { %v3304_v13 = vld [vmem:[%s10312_s6 + $0x9c] sm:$0xf]  ;;  %v3306_v15 = vld [vmem:[%s10312_s6 + $0xa4] sm:$0xf]  ;;  %v3308_v19 = vld [vmem:[%s10312_s6 + $0xac] sm:$0xf] }
  0x76   : > { %v3310_v23 = vld [vmem:[%s10312_s6 + $0xb4] sm:$0xf]  ;;  %v3309_v24 = vld [vmem:[%s10312_s6 + $0xb0] sm:$0xf] }
  0x77   : > { %6548 = vmatmul.mubr.msk.f32.gmra.mrb[8].mxu0 %vm438_vm1, %v383_v14  ;;  %1117 = vperm.xlu1 %7079, %v1044_v25   ;;  %v3303_v14 = vld [vmem:[%s10312_s6 + $0x98] sm:$0xf] }
  0x78   : > { %564 = vmatprep.mubr.f32.mxu0 %v7292_v1  ;;  %1105 = vperm.xlu0 %7078, %v1043_v26  }
  0x7b   : > { %6549 = vmatmul.mubr.msk.f32.gmra.mrb[10].mxu0 %vm438_vm1, %v384_v16  ;;  %1141 = vperm.xlu1 %7079, %v1046_v27   ;;  %v3305_v16 = vld [vmem:[%s10312_s6 + $0xa0] sm:$0xf]  ;;  %v3312_v27 = vld [vmem:[%s10312_s6 + $0xbc] sm:$0xf] }
  0x7c   : > { %570 = vmatprep.mubr.f32.mxu0 %v7292_v1  ;;  %1129 = vperm.xlu0 %7078, %v1045_v28   ;;  %v3311_v28 = vld [vmem:[%s10312_s6 + $0xb8] sm:$0xf] }
  0x7f   : > { %6550 = vmatmul.mubr.msk.f32.gmra.mrb[12].mxu0 %vm438_vm1, %v385_v18  ;;  %1165 = vperm.xlu1 %7079, %v1048_v29  }
  0x80   : > { %576 = vmatprep.mubr.f32.mxu0 %v7292_v1  ;;  %1153 = vperm.xlu0 %7078, %v1047_v30   ;;  %v3291_v1 = vld [vmem:[%s10312_s6 + $0x68] sm:$0xf] }
  0x83   : > { %6551 = vmatmul.mubr.msk.f32.gmra.mrb[14].mxu0 %vm438_vm1, %v386_v20  ;;  %1189 = vperm.xlu1 %7079, %v1050_v31   ;;  %v3307_v20 = vld [vmem:[%s10312_s6 + $0xa8] sm:$0xf]  ;;  %v3314_v31 = vld [vmem:[%s10312_s6 + $0xc4] sm:$0xf] }
  0x84   : > { %1177 = vperm.xlu0 %7078, %v1049_v32   ;;  %6839 = vmatprep.mubr.msk.bf16.mxu0 %vm780_vm2, %v7637_v6  ;;  %v3313_v32 = vld [vmem:[%s10312_s6 + $0xc0] sm:$0xf] }
  0x87   : > { %1213 = vperm.xlu1 %7079, %v1052_v33  }
  0x88   : > { %1201 = vperm.xlu0 %7078, %v1051_v34  }
  0x8b   : > { %1237 = vperm.xlu1 %7079, %v1054_v35   ;;  %v3316_v35 = vld [vmem:[%s10312_s6 + $0xcc] sm:$0xf] }
  0x8c   : > { %1225 = vperm.xlu0 %7078, %v1053_v36   ;;  %v3315_v36 = vld [vmem:[%s10312_s6 + $0xc8] sm:$0xf] }
  0x8f   : > { %3407 = vperm.xlu1 %7079, %v3266_v37  }
  0x90   : > { %3395 = vperm.xlu0 %7078, %v3265_v38  }
  0x93   : > { %3431 = vperm.xlu1 %7079, %v3268_v39   ;;  %v3318_v39 = vld [vmem:[%s10312_s6 + $0xd4] sm:$0xf] }
  0x94   : > { %3419 = vperm.xlu0 %7078, %v3267_v40   ;;  %v3317_v40 = vld [vmem:[%s10312_s6 + $0xd0] sm:$0xf] }
  0x97   : > { %3455 = vperm.xlu1 %7079, %v3270_v41  }
  0x98   : > { %3443 = vperm.xlu0 %7078, %v3269_v42  }
  0x9b   : > { %3479 = vperm.xlu1 %7079, %v3272_v43   ;;  %v3320_v43 = vld [vmem:[%s10312_s6 + $0xdc] sm:$0xf] }
  0x9c   : > { %3467 = vperm.xlu0 %7078, %v3271_v44   ;;  %v3319_v44 = vld [vmem:[%s10312_s6 + $0xd8] sm:$0xf] }
  0x9f   : > { %3503 = vperm.xlu1 %7079, %v3274_v45  }
  0xa0   : > { %3491 = vperm.xlu0 %7078, %v3273_v46  }
  0xa3   : > { %3527 = vperm.xlu1 %7079, %v3276_v47   ;;  %v3322_v47 = vld [vmem:[%s10312_s6 + $0xe4] sm:$0xf] }
  0xa4   : > { %3515 = vperm.xlu0 %7078, %v3275_v48   ;;  %v3321_v48 = vld [vmem:[%s10312_s6 + $0xe0] sm:$0xf] }
  0xa7   : > { %3551 = vperm.xlu1 %7079, %v3278_v49  }
  0xa8   : > { %3539 = vperm.xlu0 %7078, %v3277_v50  }
  0xab   : > { %3575 = vperm.xlu1 %7079, %v3280_v51   ;;  %v3324_v51 = vld [vmem:[%s10312_s6 + $0xec] sm:$0xf] }
  0xac   : > { %3563 = vperm.xlu0 %7078, %v3279_v52   ;;  %v3323_v52 = vld [vmem:[%s10312_s6 + $0xe8] sm:$0xf] }
  0xaf   : > { %3599 = vperm.xlu1 %7079, %v3282_v53  }
  0xb0   : > { %3587 = vperm.xlu0 %7078, %v3281_v54  }
  0xb3   : > { %3623 = vperm.xlu1 %7079, %v3284_v55   ;;  %v3326_v55 = vld [vmem:[%s10312_s6 + $0xf4] sm:$0xf] }
  0xb4   : > { %3611 = vperm.xlu0 %7078, %v3283_v56   ;;  %v3325_v56 = vld [vmem:[%s10312_s6 + $0xf0] sm:$0xf] }
  0xb7   : > { %3647 = vperm.xlu1 %7079, %v3286_v57  }
  0xb8   : > { %3635 = vperm.xlu0 %7078, %v3285_v58  }
  0xbb   : > { %3671 = vperm.xlu1 %7079, %v3288_v59   ;;  %v3328_v59 = vld [vmem:[%s10312_s6 + $0xfc] sm:$0xf] }
  0xbc   : > { %3659 = vperm.xlu0 %7078, %v3287_v60   ;;  %v3327_v60 = vld [vmem:[%s10312_s6 + $0xf8] sm:$0xf] }
  0xbf   : > { %3695 = vperm.xlu1 %7079, %v3290_v61  }
  0xc0   : > { %3683 = vperm.xlu0 %7078, %v3289_v62  }
  0xc3   : > { %3719 = vperm.xlu1 %7079, %v3292_v63   ;;  %v3330_v63 = vld [vmem:[%s10312_s6 + $0x104] sm:$0xf] }
  0xc4   : > { %3707 = vperm.xlu0 %7078, %v3291_v1   ;;  %v3329_v1 = vld [vmem:[%s10312_s6 + $0x100] sm:$0xf] }
  0xc7   : > { %3743 = vperm.xlu1 %7079, %v3294_v2  }
  0xc8   : > { %3731 = vperm.xlu0 %7078, %v3293_v3  }
  0xcb   : > { %3767 = vperm.xlu1 %7079, %v3296_v4   ;;  %v3332_v4 = vld [vmem:[%s10312_s6 + $0x10c] sm:$0xf] }
  0xcc   : > { %3755 = vperm.xlu0 %7078, %v3295_v5   ;;  %v3331_v5 = vld [vmem:[%s10312_s6 + $0x108] sm:$0xf] }
  0xcf   : > { %3791 = vperm.xlu1 %7079, %v3298_v7  }
  0xd0   : > { %3779 = vperm.xlu0 %7078, %v3297_v8  }
  0xd3   : > { %3815 = vperm.xlu1 %7079, %v3300_v9   ;;  %v3334_v9 = vld [vmem:[%s10312_s6 + $0x114] sm:$0xf] }
  0xd4   : > { %3803 = vperm.xlu0 %7078, %v3299_v10   ;;  %v3333_v10 = vld [vmem:[%s10312_s6 + $0x110] sm:$0xf] }
  0xd7   : > { %3839 = vperm.xlu1 %7079, %v3302_v11  }
  0xd8   : > { %3827 = vperm.xlu0 %7078, %v3301_v12  }
  0xdb   : > { %3863 = vperm.xlu1 %7079, %v3304_v13   ;;  %v3336_v13 = vld [vmem:[%s10312_s6 + $0x11c] sm:$0xf] }
  0xdc   : > { %3851 = vperm.xlu0 %7078, %v3303_v14   ;;  %v3335_v14 = vld [vmem:[%s10312_s6 + $0x118] sm:$0xf] }
  0xdd   : > { %v7671_v17 = vpop.permute.xlu1 %407 }
  0xde   : > { %v7673_v18 = vpop.permute.xlu0 %397 }
  0xdf   : > { %3887 = vperm.xlu1 %7079, %v3306_v15  }
  0xe0   : > { %3875 = vperm.xlu0 %7078, %v3305_v16  }
  0xe1   : > { %v7681_v21 = vpop.permute.xlu1 %412 }
  0xe2   : > { %v7683_v22 = vpop.permute.xlu0 %402 }
  0xe3   : > { %3911 = vperm.xlu1 %7079, %v3308_v19   ;;  %v3338_v19 = vld [vmem:[%s10312_s6 + $0x124] sm:$0xf] }
  0xe4   : > { %3899 = vperm.xlu0 %7078, %v3307_v20   ;;  %v3337_v20 = vld [vmem:[%s10312_s6 + $0x120] sm:$0xf] }
  0xe6   : > { %v7691_v25 = vpop.permute.xlu1 %422 }
  0xe7   : > { %v7693_v26 = vpop.permute.xlu0 %417  ;;  %3935 = vperm.xlu1 %7079, %v3310_v23  }
  0xe8   : > { %3923 = vperm.xlu0 %7078, %v3309_v24  }
  0xea   : > { %v7701_v29 = vpop.permute.xlu1 %432 }
  0xeb   : > { %v7703_v30 = vpop.permute.xlu0 %427  ;;  %3959 = vperm.xlu1 %7079, %v3312_v27   ;;  %v3340_v27 = vld [vmem:[%s10312_s6 + $0x12c] sm:$0xf] }
  0xec   : > { %3947 = vperm.xlu0 %7078, %v3311_v28   ;;  %v3339_v28 = vld [vmem:[%s10312_s6 + $0x128] sm:$0xf] }
  0xee   : > { %v7711_v33 = vpop.permute.xlu1 %1069 }
  0xef   : > { %v7713_v34 = vpop.permute.xlu0 %1057  ;;  %3983 = vperm.xlu1 %7079, %v3314_v31  }
  0xf0   : > { %3971 = vperm.xlu0 %7078, %v3313_v32  }
  0xf2   : > { %v7721_v37 = vpop.permute.xlu1 %1093 }
  0xf3   : > { %v7723_v38 = vpop.permute.xlu0 %1081  ;;  %4007 = vperm.xlu1 %7079, %v3316_v35   ;;  %v3342_v35 = vld [vmem:[%s10312_s6 + $0x134] sm:$0xf] }
  0xf4   : > { %3995 = vperm.xlu0 %7078, %v3315_v36   ;;  %v3341_v36 = vld [vmem:[%s10312_s6 + $0x130] sm:$0xf] }
  0xf6   : > { %v7731_v41 = vpop.permute.xlu1 %1117 }
  0xf7   : > { %v7733_v42 = vpop.permute.xlu0 %1105  ;;  %4031 = vperm.xlu1 %7079, %v3318_v39  }
  0xf8   : > { %4019 = vperm.xlu0 %7078, %v3317_v40  }
  0xfa   : > { %v7741_v45 = vpop.permute.xlu1 %1141 }
  0xfb   : > { %v7743_v46 = vpop.permute.xlu0 %1129  ;;  %4055 = vperm.xlu1 %7079, %v3320_v43   ;;  %v3344_v43 = vld [vmem:[%s10312_s6 + $0x13c] sm:$0xf] }
  0xfc   : > { %4043 = vperm.xlu0 %7078, %v3319_v44   ;;  %v3343_v44 = vld [vmem:[%s10312_s6 + $0x138] sm:$0xf] }
  0xfe   : > { %v7751_v49 = vpop.permute.xlu1 %1165 }
  0xff   : > { %v7753_v50 = vpop.permute.xlu0 %1153  ;;  %4079 = vperm.xlu1 %7079, %v3322_v47  }
 0x100   : > { %4067 = vperm.xlu0 %7078, %v3321_v48  }
 0x102   : > { %v7761_v53 = vpop.permute.xlu1 %1189 }
 0x103   : > { %v7763_v54 = vpop.permute.xlu0 %1177  ;;  %4103 = vperm.xlu1 %7079, %v3324_v51   ;;  %v3346_v51 = vld [vmem:[%s10312_s6 + $0x144] sm:$0xf] }
 0x104   : > { %4091 = vperm.xlu0 %7078, %v3323_v52   ;;  %v3345_v52 = vld [vmem:[%s10312_s6 + $0x140] sm:$0xf] }
 0x106   : > { %v7771_v57 = vpop.permute.xlu1 %1213 }
 0x107   : > { %v7773_v58 = vpop.permute.xlu0 %1201  ;;  %4127 = vperm.xlu1 %7079, %v3326_v55  }
 0x108   : > { %4115 = vperm.xlu0 %7078, %v3325_v56  }
 0x10a   : > { %v7781_v61 = vpop.permute.xlu1 %1237 }
 0x10b   : > { %v7783_v62 = vpop.permute.xlu0 %1225  ;;  %4151 = vperm.xlu1 %7079, %v3328_v59   ;;  %v3348_v59 = vld [vmem:[%s10312_s6 + $0x14c] sm:$0xf] }
 0x10c   : > { %4139 = vperm.xlu0 %7078, %v3327_v60   ;;  %v3347_v60 = vld [vmem:[%s10312_s6 + $0x148] sm:$0xf] }
 0x10e   : > { %v7791_v2 = vpop.permute.xlu1 %3407 }
 0x10f   : > { %v7793_v3 = vpop.permute.xlu0 %3395  ;;  %4175 = vperm.xlu1 %7079, %v3330_v63  }
 0x110   : > { %4163 = vperm.xlu0 %7078, %v3329_v1  }
 0x112   : > { %v7801_v7 = vpop.permute.xlu1 %3431 }
 0x113   : > { %v7803_v8 = vpop.permute.xlu0 %3419  ;;  %4199 = vperm.xlu1 %7079, %v3332_v4   ;;  %v3350_v4 = vld [vmem:[%s10312_s6 + $0x154] sm:$0xf] }
 0x114   : > { %4187 = vperm.xlu0 %7078, %v3331_v5  }
 0x116   : > { %v7811_v11 = vpop.permute.xlu1 %3455 }
 0x117   : > { %v7813_v12 = vpop.permute.xlu0 %3443  ;;  %4223 = vperm.xlu1 %7079, %v3334_v9   ;;  %v3349_v9 = vld [vmem:[%s10312_s6 + $0x150] sm:$0xf] }
 0x118   : > { %4211 = vperm.xlu0 %7078, %v3333_v10  }
 0x11a   : > { %v7821_v15 = vpop.permute.xlu1 %3479 }
 0x11b   : > { %v7823_v16 = vpop.permute.xlu0 %3467  ;;  %4247 = vperm.xlu1 %7079, %v3336_v13  }
 0x11c   : > { %4235 = vperm.xlu0 %7078, %v3335_v14  }
 0x11e   : > { %v7831_v23 = vpop.permute.xlu1 %3503 }
 0x11f   : > { %v7833_v24 = vpop.permute.xlu0 %3491  ;;  %4271 = vperm.xlu1 %7079, %v3338_v19  }
 0x120   : > { %4259 = vperm.xlu0 %7078, %v3337_v20  }
 0x122   : > { %v7841_v31 = vpop.permute.xlu1 %3527 }
 0x123   : > { %v7843_v32 = vpop.permute.xlu0 %3515  ;;  %4295 = vperm.xlu1 %7079, %v3340_v27  }
 0x124   : > { %4283 = vperm.xlu0 %7078, %v3339_v28  }
 0x126   : > { %v7851_v39 = vpop.permute.xlu1 %3551 }
 0x127   : > { %10395 = vst [vmem:[#allocation9_spill] sm:$0xff] %v7851_v39  ;;  %v7853_v40 = vpop.permute.xlu0 %3539  ;;  %4319 = vperm.xlu1 %7079, %v3342_v35  }
 0x128   : > { %10396 = vst [vmem:[#allocation10_spill] sm:$0xff] %v7853_v40  ;;  %4307 = vperm.xlu0 %7078, %v3341_v36   ;;  %v3352_v36 = vld [vmem:[%s10312_s6 + $0x15c] sm:$0xf] }
 0x12a   : > { %v7861_v47 = vpop.permute.xlu1 %3575 }
 0x12b   : > { %10397 = vst [vmem:[#allocation11_spill] sm:$0xff] %v7861_v47  ;;  %v7863_v48 = vpop.permute.xlu0 %3563  ;;  %4343 = vperm.xlu1 %7079, %v3344_v43  }
 0x12c   : > { %10398 = vst [vmem:[#allocation12_spill] sm:$0xff] %v7863_v48  ;;  %4331 = vperm.xlu0 %7078, %v3343_v44  }
 0x12e   : > { %v7871_v55 = vpop.permute.xlu1 %3599 }
 0x12f   : > { %10399 = vst [vmem:[#allocation13_spill] sm:$0xff] %v7871_v55  ;;  %v7873_v56 = vpop.permute.xlu0 %3587  ;;  %4367 = vperm.xlu1 %7079, %v3346_v51   ;;  %v3351_v51 = vld [vmem:[%s10312_s6 + $0x158] sm:$0xf] }
 0x130   : > { %10400 = vst [vmem:[#allocation14_spill] sm:$0xff] %v7873_v56  ;;  %4355 = vperm.xlu0 %7078, %v3345_v52  }
 0x132   : > { %v7881_v63 = vpop.permute.xlu1 %3623 }
 0x133   : > { %10401 = vst [vmem:[#allocation15_spill] sm:$0xff] %v7881_v63  ;;  %v7883_v1 = vpop.permute.xlu0 %3611  ;;  %4391 = vperm.xlu1 %7079, %v3348_v59  }
 0x134   : > { %10402 = vst [vmem:[#allocation16_spill] sm:$0xff] %v7883_v1  ;;  %4379 = vperm.xlu0 %7078, %v3347_v60  }
 0x136   : > { %v7892_v14 = vpop.permute.xlu1 %3647 }
 0x137   : > { %10403 = vst [vmem:[#allocation17_spill] sm:$0xff] %v7892_v14  ;;  %v7895_v20 = vpop.permute.xlu0 %3635  ;;  %4415 = vperm.xlu1 %7079, %v3350_v4  }
 0x138   : > { %v6821_v5 = vpop.f32.mrb[0].mxu1  ;;  %10404 = vst [vmem:[#allocation18_spill] sm:$0xff] %v7895_v20  ;;  %4403 = vperm.xlu0 %7078, %v3349_v9  }
 0x139   : > { %v655_v10 = vadd.f32 %v6821_v5, %v7683_v22  ;;  %v649_v13 = vpop.f32.mrb[1].mxu1 }
 0x13a   : > { %v650_v19 = vadd.f32 %v649_v13, %v7673_v18  ;;  %v536_v27 = vpop.f32.mrb[0].mxu0  ;;  %v7905_v5 = vpop.permute.xlu1 %3671 }
 0x13b   : > { %v693_v28 = vmax.f32 %v655_v10, 0.0  ;;  %v538_v35 = vpop.f32.mrb[1].mxu0  ;;  %v537_v52 = vadd.f32 %v536_v27, %v7673_v18  ;;  %10405 = vst [vmem:[#allocation19_spill] sm:$0xff] %v7905_v5  ;;  %v7909_v13 = vpop.permute.xlu0 %3659  ;;  %4439 = vperm.xlu1 %7079, %v3352_v36   ;;  %v3354_v27 = vld [vmem:[%s10312_s6 + $0x164] sm:$0xf] }
 0x13c   : > { %v690_v43 = vmax.f32 %v650_v19, 0.0  ;;  %v6824_v44 = vpop.f32.mrb[2].mxu1  ;;  %v539_v9 = vadd.f32 %v538_v35, %v7673_v18  ;;  %10406 = vst [vmem:[#allocation20_spill] sm:$0xff] %v7909_v13  ;;  %4427 = vperm.xlu0 %7078, %v3351_v51   ;;  %v3353_v18 = vld [vmem:[%s10312_s6 + $0x160] sm:$0xf] }
 0x13d   : > { %v665_v59 = vadd.f32 %v6824_v44, %v7681_v21  ;;  %v659_v60 = vpop.f32.mrb[3].mxu1  ;;  %v688_v35 = vmax.f32 %v537_v52, 0.0 }
 0x13e   : > { %v714_v4 = vpack.c.bf16 %v693_v28, %v690_v43  ;;  %v660_v10 = vadd.f32 %v659_v60, %v7671_v17  ;;  %v542_v19 = vpop.f32.mrb[2].mxu0  ;;  %v7920_v51 = vpop.permute.xlu1 %3695 }
 0x13f   : > { %v699_v0 = vmax.f32 %v665_v59, 0.0  ;;  %v543_v20 = vadd.f32 %v542_v19, %v7683_v22  ;;  %v544_v14 = vpop.f32.mrb[3].mxu0  ;;  %10407 = vst [vmem:[#allocation21_spill] sm:$0xff] %v7920_v51  ;;  %v689_v19 = vmax.f32 %v539_v9, 0.0  ;;  %4463 = vperm.xlu1 %7079, %v3354_v27  }
 0x140   : > { %v696_v44 = vmax.f32 %v660_v10, 0.0  ;;  %v545_v28 = vadd.f32 %v544_v14, %v7683_v22  ;;  %v6827_v43 = vpop.f32.mrb[4].mxu1  ;;  %6831 = vmatprep.subr.bf16.mxu0 %v714_v4  ;;  %v7923_v22 = vpop.permute.xlu0 %3683  ;;  %4451 = vperm.xlu0 %7078, %v3353_v18  }
 0x141   : > { %v691_v36 = vmax.f32 %v543_v20, 0.0  ;;  %v675_v59 = vadd.f32 %v6827_v43, %v7691_v25  ;;  %v669_v60 = vpop.f32.mrb[5].mxu1  ;;  %6832 = vmatpush3.bf16.msra.mxu0 %v714_v4  ;;  %10408 = vst [vmem:[#allocation22_spill] sm:$0xff] %v7923_v22  ;;  %v3356_v20 = vld [vmem:[%s10312_s6 + $0x16c] sm:$0xf] }
 0x142   : > { %v717_v13 = vpack.c.bf16 %v699_v0, %v696_v44  ;;  %v692_v5 = vmax.f32 %v545_v28, 0.0  ;;  %v670_v10 = vadd.f32 %v669_v60, %v7693_v26  ;;  %v548_v14 = vpop.f32.mrb[4].mxu0  ;;  %v3355_v0 = vld [vmem:[%s10312_s6 + $0x168] sm:$0xf]  ;;  %v7933_v28 = vpop.permute.xlu1 %3719 }
 0x143   : > { %v712_v1 = vpack.c.bf16 %v691_v36, %v688_v35  ;;  %v705_v63 = vmax.f32 %v675_v59, 0.0  ;;  %v550_v52 = vpop.f32.mrb[5].mxu0  ;;  %v549_v9 = vadd.f32 %v548_v14, %v7671_v17  ;;  %10409 = vst [vmem:[#allocation23_spill] sm:$0xff] %v7933_v28  ;;  %4487 = vperm.xlu1 %7079, %v3356_v20  }
 0x144   : > { %v713_v4 = vpack.c.bf16 %v692_v5, %v689_v19  ;;  %v702_v43 = vmax.f32 %v670_v10, 0.0  ;;  %v6830_v51 = vpop.f32.mrb[6].mxu1  ;;  %6833 = vmatprep.subr.bf16.mxu0 %v717_v13  ;;  %v551_v35 = vadd.f32 %v550_v52, %v7671_v17  ;;  %v7937_v36 = vpop.permute.xlu0 %3707  ;;  %4475 = vperm.xlu0 %7078, %v3355_v0  }
 0x145   : > { %v685_v27 = vadd.f32 %v6830_v51, %v7701_v29  ;;  %v679_v44 = vpop.f32.mrb[7].mxu1  ;;  %6834 = vmatpush3.bf16.msra.mxu0 %v717_v13  ;;  %10410 = vst [vmem:[#allocation24_spill] sm:$0xff] %v7937_v36  ;;  %v3358_v13 = vld [vmem:[%s10312_s6 + $0x174] sm:$0xf]  ;;  %v3357_v51 = vld [vmem:[%s10312_s6 + $0x170] sm:$0xf] }
 0x146   : > { %v720_v18 = vpack.c.bf16 %v705_v63, %v702_v43  ;;  %v680_v5 = vadd.f32 %v679_v44, %v7703_v30  ;;  %v554_v59 = vpop.f32.mrb[6].mxu0  ;;  %805 = vmatprep.subr.bf16.mxu1 %v713_v4  ;;  %v694_v14 = vmax.f32 %v549_v9, 0.0  ;;  %v7947_v20 = vpop.permute.xlu1 %3743  ;;  %v695_v4 = vmax.f32 %v551_v35, 0.0  ;;  %v3359_v9 = vld [vmem:[%s10312_s6 + $0x178] sm:$0xf] }
 0x147   : > { %v711_v60 = vmax.f32 %v685_v27, 0.0  ;;  %v555_v19 = vadd.f32 %v554_v59, %v7681_v21  ;;  %v556_v10 = vpop.f32.mrb[7].mxu0  ;;  %806 = vmatpush1.bf16.msra.mxu1 %v712_v1  ;;  %10411 = vst [vmem:[#allocation25_spill] sm:$0xff] %v7947_v20  ;;  %4511 = vperm.xlu1 %7079, %v3358_v13  }
 0x148   : > { %v708_v63 = vmax.f32 %v680_v5, 0.0  ;;  %v557_v17 = vadd.f32 %v556_v10, %v7681_v21  ;;  %6835 = vmatprep.subr.bf16.mxu0 %v720_v18  ;;  %v7949_v0 = vpop.permute.xlu0 %3731  ;;  %4499 = vperm.xlu0 %7078, %v3357_v51   ;;  %v3360_v5 = vld [vmem:[%s10312_s6 + $0x17c] sm:$0xf] }
 0x149   : > { %v697_v52 = vmax.f32 %v555_v19, 0.0  ;;  %6836 = vmatpush3.bf16.msra.mxu0 %v720_v18  ;;  %10412 = vst [vmem:[#allocation26_spill] sm:$0xff] %v7949_v0  ;;  %v7957_v18 = vld [vmem:[#allocation6 + $0x8] sm:$0xff]   ;;  %v7962_v19 = vld [vmem:[#allocation6 + $0x10] sm:$0xff]  }
 0x14a   : > { %v723_v43 = vpack.c.bf16 %v711_v60, %v708_v63  ;;  %v698_v1 = vmax.f32 %v557_v17, 0.0  ;;  %v560_v27 = vpop.f32.mrb[8].mxu0  ;;  %v7960_v60 = vpop.permute.xlu1 %3767 }
 0x14b   : > { %v715_v44 = vpack.c.bf16 %v697_v52, %v694_v14  ;;  %v562_v21 = vpop.f32.mrb[9].mxu0  ;;  %v561_v35 = vadd.f32 %v560_v27, %v7693_v26  ;;  %10413 = vst [vmem:[#allocation27_spill] sm:$0xff] %v7960_v60  ;;  %4535 = vperm.xlu1 %7079, %v3360_v5   ;;  %v3362_v14 = vld [vmem:[%s10312_s6 + $0x184] sm:$0xf] }
 0x14c   : > { %v716_v59 = vpack.c.bf16 %v698_v1, %v695_v4  ;;  %6837 = vmatprep.subr.bf16.mxu0 %v723_v43  ;;  %v563_v10 = vadd.f32 %v562_v21, %v7693_v26  ;;  %v7965_v13 = vpop.permute.xlu0 %3755  ;;  %4523 = vperm.xlu0 %7078, %v3359_v9   ;;  %v3361_v26 = vld [vmem:[%s10312_s6 + $0x180] sm:$0xf]  ;;  %v3364_v9 = vld [vmem:[%s10312_s6 + $0x18c] sm:$0xf] }
 0x14d   : > { %6838 = vmatpush3.bf16.msra.mxu0 %v723_v43  ;;  %10414 = vst [vmem:[#allocation28_spill] sm:$0xff] %v7965_v13  ;;  %v700_v4 = vmax.f32 %v561_v35, 0.0 }
 0x14e   : > { %v566_v63 = vpop.f32.mrb[10].mxu0  ;;  %807 = vmatprep.subr.bf16.mxu1 %v716_v59  ;;  %v7977_v1 = vpop.permute.xlu1 %3791  ;;  %v701_v27 = vmax.f32 %v563_v10, 0.0 }
 0x14f   : > { %v567_v17 = vadd.f32 %v566_v63, %v7691_v25  ;;  %v568_v51 = vpop.f32.mrb[11].mxu0  ;;  %808 = vmatpush1.bf16.msra.mxu1 %v715_v44  ;;  %10415 = vst [vmem:[#allocation29_spill] sm:$0xff] %v7977_v1  ;;  %4559 = vperm.xlu1 %7079, %v3362_v14   ;;  %v3363_v63 = vld [vmem:[%s10312_s6 + $0x188] sm:$0xf] }
 0x150   : > { %v569_v52 = vadd.f32 %v568_v51, %v7691_v25  ;;  %6840 = vmatmul.mubr.msk.bf16.vlgmr.msra.gmra.mrb[16].mxu0 %vm780_vm2, %v7957_v18  ;;  %v7981_v21 = vpop.permute.xlu0 %3779  ;;  %4547 = vperm.xlu0 %7078, %v3361_v26  }
 0x151   : > { %v703_v43 = vmax.f32 %v567_v17, 0.0  ;;  %6843 = vmatprep.mubr.msk.bf16.mxu0 %vm780_vm2, %v7962_v19  ;;  %10416 = vst [vmem:[#allocation30_spill] sm:$0xff] %v7981_v21  ;;  %v7989_v17 = vld [vmem:[#allocation6 + $0x18] sm:$0xff]  }
 0x152   : > { %v704_v44 = vmax.f32 %v569_v52, 0.0  ;;  %v572_v5 = vpop.f32.mrb[12].mxu0  ;;  %v7992_v51 = vpop.permute.xlu1 %3815  ;;  %v7994_v52 = vld [vmem:[#allocation6 + $0x20] sm:$0xff]  }
 0x153   : > { %v718_v25 = vpack.c.bf16 %v703_v43, %v700_v4  ;;  %v574_v59 = vpop.f32.mrb[13].mxu0  ;;  %v573_v10 = vadd.f32 %v572_v5, %v7703_v30  ;;  %10417 = vst [vmem:[#allocation31_spill] sm:$0xff] %v7992_v51  ;;  %4583 = vperm.xlu1 %7079, %v3364_v9  }
 0x154   : > { %v719_v35 = vpack.c.bf16 %v704_v44, %v701_v27  ;;  %v575_v14 = vadd.f32 %v574_v59, %v7703_v30  ;;  %v7997_v26 = vpop.permute.xlu0 %3803  ;;  %4571 = vperm.xlu0 %7078, %v3363_v63   ;;  %v3366_v44 = vld [vmem:[%s10312_s6 + $0x194] sm:$0xf]  ;;  %v3365_v30 = vld [vmem:[%s10312_s6 + $0x190] sm:$0xf] }
 0x155   : > { %10418 = vst [vmem:[#allocation32_spill] sm:$0xff] %v7997_v26  ;;  %v706_v59 = vmax.f32 %v573_v10, 0.0  ;;  %v3367_v10 = vld [vmem:[%s10312_s6 + $0x198] sm:$0xf] }
 0x156   : > { %v578_v4 = vpop.f32.mrb[14].mxu0  ;;  %809 = vmatprep.subr.bf16.mxu1 %v719_v35  ;;  %v8009_v35 = vpop.permute.xlu1 %3839 }
 0x157   : > { %v579_v43 = vadd.f32 %v578_v4, %v7701_v29  ;;  %v580_v27 = vpop.f32.mrb[15].mxu0  ;;  %810 = vmatpush1.bf16.msra.mxu1 %v718_v25  ;;  %10419 = vst [vmem:[#allocation33_spill] sm:$0xff] %v8009_v35  ;;  %v707_v25 = vmax.f32 %v575_v14, 0.0  ;;  %4607 = vperm.xlu1 %7079, %v3366_v44   ;;  %v8025_v14 = vld [vmem:[#allocation6 + $0x30] sm:$0xff]   ;;  %v3370_v44 = vld [vmem:[%s10312_s6 + $0x1a4] sm:$0xf] }
 0x158   : > { %v581_v5 = vadd.f32 %v580_v27, %v7701_v29  ;;  %6844 = vmatmul.mubr.msk.bf16.gmra.mrb[20].mxu0 %vm780_vm2, %v7989_v17  ;;  %v8013_v4 = vpop.permute.xlu0 %3827  ;;  %4595 = vperm.xlu0 %7078, %v3365_v30   ;;  %v3368_v27 = vld [vmem:[%s10312_s6 + $0x19c] sm:$0xf]  ;;  %v3369_v30 = vld [vmem:[%s10312_s6 + $0x1a0] sm:$0xf] }
 0x159   : > { %v709_v9 = vmax.f32 %v579_v43, 0.0  ;;  %6847 = vmatprep.mubr.msk.bf16.mxu0 %vm780_vm2, %v7994_v52  ;;  %10420 = vst [vmem:[#allocation34_spill] sm:$0xff] %v8013_v4  ;;  %v8021_v43 = vld [vmem:[#allocation6 + $0x28] sm:$0xff]  }
 0x15a   : > { %v710_v63 = vmax.f32 %v581_v5, 0.0  ;;  %v8023_v35 = vpop.permute.xlu1 %3863 }
 0x15b   : > { %v721_v29 = vpack.c.bf16 %v709_v9, %v706_v59  ;;  %10421 = vst [vmem:[#allocation35_spill] sm:$0xff] %v8023_v35  ;;  %4631 = vperm.xlu1 %7079, %v3368_v27   ;;  %v3372_v9 = vld [vmem:[%s10312_s6 + $0x1ac] sm:$0xf] }
 0x15c   : > { %v722_v26 = vpack.c.bf16 %v710_v63, %v707_v25  ;;  %v8027_v5 = vpop.permute.xlu0 %3851  ;;  %4619 = vperm.xlu0 %7078, %v3367_v10   ;;  %v10425_v25 = vmov 0   ;;  %v3371_v63 = vld [vmem:[%s10312_s6 + $0x1a8] sm:$0xf] }
 0x15d   : > { %10422 = vst [vmem:[#allocation36_spill] sm:$0xff] %v8027_v5 }
 0x15e   : > { %811 = vmatprep.subr.bf16.mxu1 %v722_v26  ;;  %v8037_v59 = vpop.permute.xlu1 %3887 }
 0x15f   : > { %812 = vmatpush1.bf16.msra.mxu1 %v721_v29  ;;  %10423 = vst [vmem:[#allocation37_spill] sm:$0xff] %v8037_v59  ;;  %4655 = vperm.xlu1 %7079, %v3370_v44   ;;  %v8052_v29 = vld [vmem:[#allocation6 + $0x38] sm:$0xff]   ;;  %v3373_v44 = vld [vmem:[%s10312_s6 + $0x1b0] sm:$0xf] }
 0x160   : > { %6848 = vmatmul.mubr.msk.bf16.gmra.mrb[24].mxu0 %vm780_vm2, %v8021_v43  ;;  %v8041_v26 = vpop.permute.xlu0 %3875  ;;  %4643 = vperm.xlu0 %7078, %v3369_v30  }
 0x161   : > { %6851 = vmatprep.mubr.msk.bf16.mxu0 %vm780_vm2, %v8025_v14  ;;  %10424 = vst [vmem:[#allocation38_spill] sm:$0xff] %v8041_v26 }
 0x162   : > { %6569 = vmatmul.mubr.msk.bf16.vlgmr.msra.gmra.mrb[8].mxu1 %vm780_vm2, %v7637_v6  ;;  %v8054_v27 = vpop.permute.xlu1 %3911  ;;  %v3374_v6 = vld [vmem:[%s10312_s6 + $0x1b4] sm:$0xf] }
 0x163   : > { %847 = vmatprep.mubr.bf16.mxu1 %v10425_v25  ;;  %10426 = vst [vmem:[#allocation39_spill] sm:$0xff] %v8054_v27  ;;  %4679 = vperm.xlu1 %7079, %v3372_v9   ;;  %v3376_v9 = vld [vmem:[%s10312_s6 + $0x1bc] sm:$0xf] }
 0x164   : > { %v8056_v10 = vpop.permute.xlu0 %3899  ;;  %4667 = vperm.xlu0 %7078, %v3371_v63   ;;  %v3375_v63 = vld [vmem:[%s10312_s6 + $0x1b8] sm:$0xf] }
 0x165   : > { %10427 = vst [vmem:[#allocation40_spill] sm:$0xff] %v8056_v10 }
 0x166   : > { %v8066_v30 = vpop.permute.xlu1 %3935 }
 0x167   : > { %10428 = vst [vmem:[#allocation41_spill] sm:$0xff] %v8066_v30  ;;  %4703 = vperm.xlu1 %7079, %v3374_v6   ;;  %v3377_v6 = vld [vmem:[%s10312_s6 + $0x1c0] sm:$0xf] }
 0x168   : > { %6852 = vmatmul.mubr.msk.bf16.gmra.mrb[28].mxu0 %vm780_vm2, %v8052_v29  ;;  %v8069_v27 = vpop.permute.xlu0 %3923  ;;  %4691 = vperm.xlu0 %7078, %v3373_v44  }
 0x169   : > { %1887 = vmatprep.mubr.bf16.mxu0 %v10425_v25  ;;  %10429 = vst [vmem:[#allocation42_spill] sm:$0xff] %v8069_v27 }
 0x16a   : > { %6570 = vmatmul.mubr.msk.bf16.gmra.mrb[12].mxu1 %vm780_vm2, %v7957_v18  ;;  %v8080_v30 = vpop.permute.xlu1 %3959  ;;  %v3378_v18 = vld [vmem:[%s10312_s6 + $0x1c4] sm:$0xf] }
 0x16b   : > { %857 = vmatprep.mubr.bf16.mxu1 %v10425_v25  ;;  %10430 = vst [vmem:[#allocation43_spill] sm:$0xff] %v8080_v30  ;;  %4727 = vperm.xlu1 %7079, %v3376_v9   ;;  %v3380_v9 = vld [vmem:[%s10312_s6 + $0x1cc] sm:$0xf] }
 0x16c   : > { %v8082_v10 = vpop.permute.xlu0 %3947  ;;  %4715 = vperm.xlu0 %7078, %v3375_v63   ;;  %v3379_v63 = vld [vmem:[%s10312_s6 + $0x1c8] sm:$0xf] }
 0x16d   : > { %10431 = vst [vmem:[#allocation44_spill] sm:$0xff] %v8082_v10 }
 0x16e   : > { %v8090_v44 = vpop.permute.xlu1 %3983 }
 0x16f   : > { %10432 = vst [vmem:[#allocation45_spill] sm:$0xff] %v8090_v44  ;;  %4751 = vperm.xlu1 %7079, %v3378_v18   ;;  %v3381_v18 = vld [vmem:[%s10312_s6 + $0x1d0] sm:$0xf] }
 0x170   : > { %v8092_v27 = vpop.permute.xlu0 %3971  ;;  %4739 = vperm.xlu0 %7078, %v3377_v6  }
 0x171   : > { %10433 = vst [vmem:[#allocation46_spill] sm:$0xff] %v8092_v27 }
 0x172   : > { %6571 = vmatmul.mubr.msk.bf16.gmra.mrb[16].mxu1 %vm780_vm2, %v7962_v19  ;;  %v8103_v10 = vpop.permute.xlu1 %4007  ;;  %v3382_v19 = vld [vmem:[%s10312_s6 + $0x1d4] sm:$0xf] }
 0x173   : > { %867 = vmatprep.mubr.bf16.mxu1 %v10425_v25  ;;  %10434 = vst [vmem:[#allocation47_spill] sm:$0xff] %v8103_v10  ;;  %4775 = vperm.xlu1 %7079, %v3380_v9   ;;  %v3384_v9 = vld [vmem:[%s10312_s6 + $0x1dc] sm:$0xf] }
 0x174   : > { %v8105_v44 = vpop.permute.xlu0 %3995  ;;  %4763 = vperm.xlu0 %7078, %v3379_v63   ;;  %v3383_v63 = vld [vmem:[%s10312_s6 + $0x1d8] sm:$0xf] }
 0x175   : > { %10435 = vst [vmem:[#allocation48_spill] sm:$0xff] %v8105_v44 }
 0x176   : > { %v8113_v6 = vpop.permute.xlu1 %4031 }
 0x177   : > { %10436 = vst [vmem:[#allocation49_spill] sm:$0xff] %v8113_v6  ;;  %4799 = vperm.xlu1 %7079, %v3382_v19   ;;  %v3385_v19 = vld [vmem:[%s10312_s6 + $0x1e0] sm:$0xf] }
 0x178   : > { %v8115_v27 = vpop.permute.xlu0 %4019  ;;  %4787 = vperm.xlu0 %7078, %v3381_v18  }
 0x179   : > { %10437 = vst [vmem:[#allocation50_spill] sm:$0xff] %v8115_v27 }
 0x17a   : > { %6572 = vmatmul.mubr.msk.bf16.gmra.mrb[20].mxu1 %vm780_vm2, %v7989_v17  ;;  %v8126_v44 = vpop.permute.xlu1 %4055  ;;  %v3386_v17 = vld [vmem:[%s10312_s6 + $0x1e4] sm:$0xf] }
 0x17b   : > { %877 = vmatprep.mubr.bf16.mxu1 %v10425_v25  ;;  %10438 = vst [vmem:[#allocation51_spill] sm:$0xff] %v8126_v44  ;;  %4823 = vperm.xlu1 %7079, %v3384_v9   ;;  %v3388_v9 = vld [vmem:[%s10312_s6 + $0x1ec] sm:$0xf]  ;;  %v1063_v44 = vlaneseq }
 0x17c   : > { %v8128_v6 = vpop.permute.xlu0 %4043  ;;  %4811 = vperm.xlu0 %7078, %v3383_v63   ;;  %v3387_v63 = vld [vmem:[%s10312_s6 + $0x1e8] sm:$0xf] }
 0x17d   : > { %10439 = vst [vmem:[#allocation52_spill] sm:$0xff] %v8128_v6  ;;  %v1064_v10 = vshrl.u32 %v1063_v44, 7 }
 0x17e   : > { %v8136_v18 = vpop.permute.xlu1 %4079 }
 0x17f   : > { %10440 = vst [vmem:[#allocation53_spill] sm:$0xff] %v8136_v18  ;;  %4847 = vperm.xlu1 %7079, %v3386_v17   ;;  %v3389_v17 = vld [vmem:[%s10312_s6 + $0x1f0] sm:$0xf] }
 0x180   : > { %v8138_v27 = vpop.permute.xlu0 %4067  ;;  %4835 = vperm.xlu0 %7078, %v3385_v19  }
 0x181   : > { %10441 = vst [vmem:[#allocation54_spill] sm:$0xff] %v8138_v27 }
 0x182   : > { %6573 = vmatmul.mubr.msk.bf16.gmra.mrb[24].mxu1 %vm780_vm2, %v7994_v52  ;;  %v8149_v6 = vpop.permute.xlu1 %4103  ;;  %v3390_v52 = vld [vmem:[%s10312_s6 + $0x1f4] sm:$0xf] }
 0x183   : > { %887 = vmatprep.mubr.bf16.mxu1 %v10425_v25  ;;  %10442 = vst [vmem:[#allocation55_spill] sm:$0xff] %v8149_v6  ;;  %4871 = vperm.xlu1 %7079, %v3388_v9   ;;  %v3392_v9 = vld [vmem:[%s10312_s6 + $0x1fc] sm:$0xf] }
 0x184   : > { %v8151_v18 = vpop.permute.xlu0 %4091  ;;  %4859 = vperm.xlu0 %7078, %v3387_v63   ;;  %v3391_v63 = vld [vmem:[%s10312_s6 + $0x1f8] sm:$0xf] }
 0x185   : > { %10443 = vst [vmem:[#allocation56_spill] sm:$0xff] %v8151_v18 }
 0x186   : > { %v8159_v19 = vpop.permute.xlu1 %4127 }
 0x187   : > { %10444 = vst [vmem:[#allocation57_spill] sm:$0xff] %v8159_v19  ;;  %4895 = vperm.xlu1 %7079, %v3390_v52  }
 0x188   : > { %v8161_v27 = vpop.permute.xlu0 %4115  ;;  %4883 = vperm.xlu0 %7078, %v3389_v17  }
 0x189   : > { %10445 = vst [vmem:[#allocation58_spill] sm:$0xff] %v8161_v27 }
 0x18a   : > { %6574 = vmatmul.mubr.msk.bf16.gmra.mrb[28].mxu1 %vm780_vm2, %v8021_v43  ;;  %v8172_v18 = vpop.permute.xlu1 %4151 }
 0x18b   : > { %897 = vmatprep.mubr.bf16.mxu1 %v10425_v25  ;;  %10446 = vst [vmem:[#allocation59_spill] sm:$0xff] %v8172_v18  ;;  %4919 = vperm.xlu1 %7079, %v3392_v9  }
 0x18c   : > { %v8174_v19 = vpop.permute.xlu0 %4139  ;;  %4907 = vperm.xlu0 %7078, %v3391_v63  }
 0x18d   : > { %10447 = vst [vmem:[#allocation60_spill] sm:$0xff] %v8174_v19 }
 0x18e   : > { %v8176_v27 = vpop.permute.xlu1 %4175 }
 0x18f   : > { %10448 = vst [vmem:[#allocation61_spill] sm:$0xff] %v8176_v27 }
 0x190   : > { %v8178_v43 = vpop.permute.xlu0 %4163 }
 0x191   : > { %10449 = vst [vmem:[#allocation62_spill] sm:$0xff] %v8178_v43 }
 0x192   : > { %6575 = vmatmul.mubr.msk.bf16.gmra.mrb[32].mxu1 %vm780_vm2, %v8025_v14  ;;  %v8183_v52 = vpop.permute.xlu1 %4199 }
 0x193   : > { %907 = vmatprep.mubr.bf16.mxu1 %v10425_v25  ;;  %10450 = vst [vmem:[#allocation63_spill] sm:$0xff] %v8183_v52 }
 0x194   : > { %v8185_v17 = vpop.permute.xlu0 %4187 }
 0x195   : > { %10451 = vst [vmem:[#allocation64_spill] sm:$0xff] %v8185_v17 }
 0x196   : > { %v8187_v6 = vpop.permute.xlu1 %4223 }
 0x197   : > { %10452 = vst [vmem:[#allocation65_spill] sm:$0xff] %v8187_v6 }
 0x198   : > { %v8189_v18 = vpop.permute.xlu0 %4211 }
 0x199   : > { %10453 = vst [vmem:[#allocation66_spill] sm:$0xff] %v8189_v18 }
 0x19a   : > { %6576 = vmatmul.mubr.msk.bf16.gmra.mrb[36].mxu1 %vm780_vm2, %v8052_v29  ;;  %v8194_v9 = vpop.permute.xlu1 %4247 }
 0x19b   : > { %2377 = vmatprep.mubr.bf16.mxu1 %v10425_v25  ;;  %10454 = vst [vmem:[#allocation67_spill] sm:$0xff] %v8194_v9 }
 0x19c   : > { %v8196_v63 = vpop.permute.xlu0 %4235 }
 0x19d   : > { %10455 = vst [vmem:[#allocation68_spill] sm:$0xff] %v8196_v63 }
 0x19e   : > { %v8198_v14 = vpop.permute.xlu1 %4271 }
 0x19f   : > { %10456 = vst [vmem:[#allocation69_spill] sm:$0xff] %v8198_v14 }
 0x1a0   : > { %v8200_v43 = vpop.permute.xlu0 %4259 }
 0x1a1   : > { %10457 = vst [vmem:[#allocation70_spill] sm:$0xff] %v8200_v43 }
 0x1a2   : > { %v8202_v52 = vpop.permute.xlu1 %4295 }
 0x1a3   : > { %10458 = vst [vmem:[#allocation71_spill] sm:$0xff] %v8202_v52 }
 0x1a4   : > { %v8204_v17 = vpop.permute.xlu0 %4283 }
 0x1a5   : > { %10459 = vst [vmem:[#allocation72_spill] sm:$0xff] %v8204_v17 }
 0x1a6   : > { %v8206_v6 = vpop.permute.xlu1 %4319 }
 0x1a7   : > { %10460 = vst [vmem:[#allocation73_spill] sm:$0xff] %v8206_v6 }
 0x1a8   : > { %v8208_v18 = vpop.permute.xlu0 %4307 }
 0x1a9   : > { %10461 = vst [vmem:[#allocation74_spill] sm:$0xff] %v8208_v18 }
 0x1aa   : > { %v8210_v27 = vpop.permute.xlu1 %4343 }
 0x1ab   : > { %10462 = vst [vmem:[#allocation75_spill] sm:$0xff] %v8210_v27 }
 0x1ac   : > { %v8212_v29 = vpop.permute.xlu0 %4331 }
 0x1ad   : > { %10463 = vst [vmem:[#allocation76_spill] sm:$0xff] %v8212_v29  ;;  %v7293_v29 = vmov 839922192  }
 0x1ae   : > { %v8214_v19 = vpop.permute.xlu1 %4367 }
 0x1af   : > { %10464 = vst [vmem:[#allocation77_spill] sm:$0xff] %v8214_v19  ;;  %v1061_v19 = vunpack.c.l.s4 %v7293_v29 }
 0x1b0   : > { %v8216_v9 = vpop.permute.xlu0 %4355 }
 0x1b1   : > { %10465 = vst [vmem:[#allocation78_spill] sm:$0xff] %v8216_v9 }
 0x1b2   : > { %v8218_v63 = vpop.permute.xlu1 %4391 }
 0x1b3   : > { %10466 = vst [vmem:[#allocation79_spill] sm:$0xff] %v8218_v63 }
 0x1b4   : > { %v8220_v14 = vpop.permute.xlu0 %4379 }
 0x1b5   : > { %10467 = vst [vmem:[#allocation80_spill] sm:$0xff] %v8220_v14  ;;  %v1062_v14 = vunpack.c.0.s8 %v1061_v19 }
 0x1b6   : > { %v8222_v43 = vpop.permute.xlu1 %4415 }
 0x1b7   : > { %10468 = vst [vmem:[#allocation81_spill] sm:$0xff] %v8222_v43 }
 0x1b8   : > { %v8224_v52 = vpop.permute.xlu0 %4403 }
 0x1b9   : > { %10469 = vst [vmem:[#allocation82_spill] sm:$0xff] %v8224_v52 }
 0x1ba   : > { %v8226_v17 = vpop.permute.xlu1 %4439 }
 0x1bb   : > { %10470 = vst [vmem:[#allocation83_spill] sm:$0xff] %v8226_v17  ;;  %v8242_v17 = vsub.s32 %v1062_v14, %v1064_v10 }
 0x1bc   : > { %v8228_v6 = vpop.permute.xlu0 %4427 }
 0x1bd   : > { %10471 = vst [vmem:[#allocation84_spill] sm:$0xff] %v8228_v6  ;;  %v1090_v47 = vrot.slane %v7723_v38, %v8242_v17  ;;  %v1126_v39 = vrot.slane %v7731_v41, %v8242_v17 }
 0x1be   : > { %v8230_v18 = vpop.permute.xlu1 %4463 }
 0x1bf   : > { %10472 = vst [vmem:[#allocation85_spill] sm:$0xff] %v8230_v18 }
 0x1c0   : > { %v8232_v27 = vpop.permute.xlu0 %4451 }
 0x1c1   : > { %10473 = vst [vmem:[#allocation86_spill] sm:$0xff] %v8232_v27 }
 0x1c2   : > { %v8234_v9 = vpop.permute.xlu1 %4487 }
 0x1c3   : > { %10474 = vst [vmem:[#allocation87_spill] sm:$0xff] %v8234_v9 }
 0x1c4   : > { %v8236_v63 = vpop.permute.xlu0 %4475 }
 0x1c5   : > { %10475 = vst [vmem:[#allocation88_spill] sm:$0xff] %v8236_v63 }
 0x1c6   : > { %v8238_v43 = vpop.permute.xlu1 %4511 }
 0x1c7   : > { %10476 = vst [vmem:[#allocation89_spill] sm:$0xff] %v8238_v43 }
 0x1c8   : > { %v8240_v52 = vpop.permute.xlu0 %4499 }
 0x1c9   : > { %10477 = vst [vmem:[#allocation90_spill] sm:$0xff] %v8240_v52 }
 0x1ca   : > { %v4536_v6 = vpop.permute.xlu1 %4535 }
 0x1cb   : > { %v4544_v18 = vrot.slane %v4536_v6, %v8242_v17 }
 0x1cc   : > { %v4524_v30 = vpop.permute.xlu0 %4523 }
 0x1cd   : > { %v4532_v27 = vrot.slane %v4524_v30, %v8242_v17 }
 0x1ce   : > { %v4560_v26 = vpop.permute.xlu1 %4559 }
 0x1cf   : > { %v8246_v29 = vcombine.low %v4532_v27, %v4544_v18  ;;  %v4568_v9 = vrot.slane %v4560_v26, %v8242_v17 }
 0x1d0   : > { %v4548_v63 = vpop.permute.xlu0 %4547 }
 0x1d1   : > { %10478 = vst [vmem:[#allocation91_spill] sm:$0xff] %v8246_v29  ;;  %v4556_v44 = vrot.slane %v4548_v63, %v8242_v17 }
 0x1d2   : > { %v4584_v43 = vpop.permute.xlu1 %4583 }
 0x1d3   : > { %v8250_v19 = vcombine.low %v4556_v44, %v4568_v9  ;;  %v4592_v10 = vrot.slane %v4584_v43, %v8242_v17 }
 0x1d4   : > { %v4572_v14 = vpop.permute.xlu0 %4571 }
 0x1d5   : > { %10479 = vst [vmem:[#allocation92_spill] sm:$0xff] %v8250_v19  ;;  %v4580_v52 = vrot.slane %v4572_v14, %v8242_v17 }
 0x1d6   : > { %v4608_v59 = vpop.permute.xlu1 %4607 }
 0x1d7   : > { %v8254_v6 = vcombine.low %v4580_v52, %v4592_v10  ;;  %v4616_v27 = vrot.slane %v4608_v59, %v8242_v17 }
 0x1d8   : > { %v4596_v30 = vpop.permute.xlu0 %4595 }
 0x1d9   : > { %10480 = vst [vmem:[#allocation93_spill] sm:$0xff] %v8254_v6  ;;  %v4604_v18 = vrot.slane %v4596_v30, %v8242_v17 }
 0x1da   : > { %v4632_v29 = vpop.permute.xlu1 %4631 }
 0x1db   : > { %v8258_v26 = vcombine.low %v4604_v18, %v4616_v27  ;;  %v4640_v9 = vrot.slane %v4632_v29, %v8242_v17 }
 0x1dc   : > { %v4620_v63 = vpop.permute.xlu0 %4619 }
 0x1dd   : > { %10481 = vst [vmem:[#allocation94_spill] sm:$0xff] %v8258_v26  ;;  %v4628_v44 = vrot.slane %v4620_v63, %v8242_v17 }
 0x1de   : > { %v4656_v19 = vpop.permute.xlu1 %4655 }
 0x1df   : > { %v8262_v43 = vcombine.low %v4628_v44, %v4640_v9  ;;  %v4664_v52 = vrot.slane %v4656_v19, %v8242_v17 }
 0x1e0   : > { %v4644_v10 = vpop.permute.xlu0 %4643 }
 0x1e1   : > { %10482 = vst [vmem:[#allocation95_spill] sm:$0xff] %v8262_v43  ;;  %v4652_v14 = vrot.slane %v4644_v10, %v8242_v17 }
 0x1e2   : > { %v4680_v5 = vpop.permute.xlu1 %4679 }
 0x1e3   : > { %v8266_v59 = vcombine.low %v4652_v14, %v4664_v52  ;;  %v4688_v27 = vrot.slane %v4680_v5, %v8242_v17 }
 0x1e4   : > { %v4668_v30 = vpop.permute.xlu0 %4667 }
 0x1e5   : > { %10483 = vst [vmem:[#allocation96_spill] sm:$0xff] %v8266_v59  ;;  %v4676_v18 = vrot.slane %v4668_v30, %v8242_v17 }
 0x1e6   : > { %v4704_v35 = vpop.permute.xlu1 %4703 }
 0x1e7   : > { %v8270_v29 = vcombine.low %v4676_v18, %v4688_v27  ;;  %v4712_v9 = vrot.slane %v4704_v35, %v8242_v17 }
 0x1e8   : > { %v4692_v63 = vpop.permute.xlu0 %4691 }
 0x1e9   : > { %10484 = vst [vmem:[#allocation97_spill] sm:$0xff] %v8270_v29  ;;  %v4700_v44 = vrot.slane %v4692_v63, %v8242_v17 }
 0x1ea   : > { %v4728_v4 = vpop.permute.xlu1 %4727 }
 0x1eb   : > { %v8274_v19 = vcombine.low %v4700_v44, %v4712_v9  ;;  %v4736_v52 = vrot.slane %v4728_v4, %v8242_v17 }
 0x1ec   : > { %v4716_v10 = vpop.permute.xlu0 %4715 }
 0x1ed   : > { %10485 = vst [vmem:[#allocation98_spill] sm:$0xff] %v8274_v19  ;;  %v4724_v14 = vrot.slane %v4716_v10, %v8242_v17 }
 0x1ee   : > { %v4752_v51 = vpop.permute.xlu1 %4751 }
 0x1ef   : > { %v8278_v5 = vcombine.low %v4724_v14, %v4736_v52  ;;  %v4760_v27 = vrot.slane %v4752_v51, %v8242_v17 }
 0x1f0   : > { %v4740_v30 = vpop.permute.xlu0 %4739 }
 0x1f1   : > { %10486 = vst [vmem:[#allocation99_spill] sm:$0xff] %v8278_v5  ;;  %v4748_v18 = vrot.slane %v4740_v30, %v8242_v17 }
 0x1f2   : > { %v4776_v21 = vpop.permute.xlu1 %4775 }
 0x1f3   : > { %v8282_v35 = vcombine.low %v4748_v18, %v4760_v27  ;;  %v4784_v9 = vrot.slane %v4776_v21, %v8242_v17 }
 0x1f4   : > { %v4764_v63 = vpop.permute.xlu0 %4763 }
 0x1f5   : > { %10487 = vst [vmem:[#allocation100_spill] sm:$0xff] %v8282_v35  ;;  %v4772_v44 = vrot.slane %v4764_v63, %v8242_v17 }
 0x1f6   : > { %v4800_v1 = vpop.permute.xlu1 %4799 }
 0x1f7   : > { %v8286_v4 = vcombine.low %v4772_v44, %v4784_v9  ;;  %v4808_v52 = vrot.slane %v4800_v1, %v8242_v17 }
 0x1f8   : > { %v4788_v10 = vpop.permute.xlu0 %4787 }
 0x1f9   : > { %10488 = vst [vmem:[#allocation101_spill] sm:$0xff] %v8286_v4  ;;  %v4796_v14 = vrot.slane %v4788_v10, %v8242_v17 }
 0x1fa   : > { %v4824_v13 = vpop.permute.xlu1 %4823 }
 0x1fb   : > { %v8290_v51 = vcombine.low %v4796_v14, %v4808_v52  ;;  %v4832_v27 = vrot.slane %v4824_v13, %v8242_v17 }
 0x1fc   : > { %v4812_v30 = vpop.permute.xlu0 %4811 }
 0x1fd   : > { %10489 = vst [vmem:[#allocation102_spill] sm:$0xff] %v8290_v51  ;;  %v4820_v18 = vrot.slane %v4812_v30, %v8242_v17 }
 0x1fe   : > { %v4848_v60 = vpop.permute.xlu1 %4847 }
 0x1ff   : > { %v8294_v21 = vcombine.low %v4820_v18, %v4832_v27  ;;  %v4856_v9 = vrot.slane %v4848_v60, %v8242_v17 }
 0x200   : > { %v4836_v63 = vpop.permute.xlu0 %4835 }
 0x201   : > { %10490 = vst [vmem:[#allocation103_spill] sm:$0xff] %v8294_v21  ;;  %v4844_v44 = vrot.slane %v4836_v63, %v8242_v17 }
 0x202   : > { %v4872_v0 = vpop.permute.xlu1 %4871 }
 0x203   : > { %v8298_v1 = vcombine.low %v4844_v44, %v4856_v9  ;;  %v4880_v52 = vrot.slane %v4872_v0, %v8242_v17 }
 0x204   : > { %v4860_v10 = vpop.permute.xlu0 %4859 }
 0x205   : > { %10491 = vst [vmem:[#allocation104_spill] sm:$0xff] %v8298_v1  ;;  %v4868_v14 = vrot.slane %v4860_v10, %v8242_v17 }
 0x206   : > { %v4896_v20 = vpop.permute.xlu1 %4895 }
 0x207   : > { %v8302_v13 = vcombine.low %v4868_v14, %v4880_v52  ;;  %v4904_v27 = vrot.slane %v4896_v20, %v8242_v17  ;;  %v1066_v52 = vrot.slane %v7713_v34, %v8242_v17 }
 0x208   : > { %v4884_v30 = vpop.permute.xlu0 %4883 }
 0x209   : > { %10492 = vst [vmem:[#allocation105_spill] sm:$0xff] %v8302_v13  ;;  %v4892_v18 = vrot.slane %v4884_v30, %v8242_v17 }
 0x20b   : > { %v8306_v60 = vcombine.low %v4892_v18, %v4904_v27  ;;  %v1102_v27 = vrot.slane %v7721_v37, %v8242_v17  ;;  %v1114_v37 = vrot.slane %v7733_v42, %v8242_v17 }
 0x20d   : > { %10493 = vst [vmem:[#allocation106_spill] sm:$0xff] %v8306_v60  ;;  %v1078_v60 = vrot.slane %v7711_v33, %v8242_v17  ;;  %v8370_v38 = vcombine.low %v1090_v47, %v1102_v27 }
 0x20f   : > { %v8348_v4 = vcombine.low %v1066_v52, %v1078_v60 }
 0x223   : > { %v8308_v36 = vpop.f32.mrb[16].mxu0 }
 0x224   : > { %v8310_v9 = vpop.f32.mrb[17].mxu0 }
 0x225   : > { %v8312_v63 = vpop.f32.mrb[18].mxu0 }
 0x226   : > { %v8316_v44 = vpop.f32.mrb[19].mxu0 }
 0x22b   : > { %v8320_v20 = vpop.f32.mrb[20].mxu0 }
 0x22c   : > { %v8322_v10 = vpop.f32.mrb[21].mxu0 }
 0x22d   : > { %v8324_v14 = vpop.f32.mrb[22].mxu0 }
 0x22e   : > { %v8328_v30 = vpop.f32.mrb[23].mxu0 }
 0x233   : > { %v8332_v0 = vpop.f32.mrb[24].mxu0 }
 0x234   : > { %v8338_v28 = vpop.f32.mrb[25].mxu0 }
 0x235   : > { %v839_v13 = vpop.f32.mrb[8].mxu1  ;;  %v8340_v22 = vpop.f32.mrb[26].mxu0 }
 0x236   : > { %v841_v1 = vpop.f32.mrb[9].mxu1  ;;  %v8344_v21 = vpop.f32.mrb[27].mxu0 }
 0x237   : > { %v843_v51 = vpop.f32.mrb[10].mxu1 }
 0x238   : > { %v1015_v33 = vpack.c.bf16 %v843_v51, %v839_v13  ;;  %v845_v56 = vpop.f32.mrb[11].mxu1 }
 0x239   : > { %v1016_v34 = vpack.c.bf16 %v845_v56, %v841_v1 }
 0x23a   : > { %v1295_v55 = vadd.bf16 %v8348_v4, %v1015_v33 }
 0x23b   : > { %v1296_v35 = vadd.bf16 %v8348_v4, %v1016_v34  ;;  %v8352_v48 = vpop.f32.mrb[28].mxu0 }
 0x23c   : > { %v8358_v5 = vpop.f32.mrb[29].mxu0  ;;  %v1319_v56 = vmax.bf16 %v10425_v25, %v1295_v55 }
 0x23d   : > { %v849_v18 = vpop.f32.mrb[12].mxu1  ;;  %v8360_v60 = vpop.f32.mrb[30].mxu0  ;;  %v1320_v51 = vmax.bf16 %v10425_v25, %v1296_v35 }
 0x23e   : > { %v851_v13 = vpop.f32.mrb[13].mxu1  ;;  %v8366_v52 = vpop.f32.mrb[31].mxu0 }
 0x23f   : > { %v853_v33 = vpop.f32.mrb[14].mxu1  ;;  %1855 = vmatprep.subr.bf16.mxu0 %v1320_v51  ;;  %6999 = vmatprep.subr.bf16.mxu1 %v1320_v51 }
 0x240   : > { %v1018_v34 = vpack.c.bf16 %v853_v33, %v849_v18  ;;  %v855_v40 = vpop.f32.mrb[15].mxu1  ;;  %1856 = vmatpush1.bf16.msra.mxu0 %v1319_v56  ;;  %7007 = vmatpush1.bf16.msra.mxu1 %v1319_v56 }
 0x241   : > { %v1019_v35 = vpack.c.bf16 %v855_v40, %v851_v13  ;;  %v8380_v40 = vcombine.low %v1114_v37, %v1126_v39 }
 0x242   : > { %v1298_v55 = vadd.bf16 %v8370_v38, %v1018_v34  ;;  %v1138_v34 = vrot.slane %v7743_v46, %v8242_v17 }
 0x243   : > { %v1299_v1 = vadd.bf16 %v8370_v38, %v1019_v35 }
 0x244   : > { %v1322_v47 = vmax.bf16 %v10425_v25, %v1298_v55 }
 0x245   : > { %v859_v19 = vpop.f32.mrb[16].mxu1  ;;  %v1323_v51 = vmax.bf16 %v10425_v25, %v1299_v1  ;;  %v1150_v1 = vrot.slane %v7741_v45, %v8242_v17 }
 0x246   : > { %v861_v27 = vpop.f32.mrb[17].mxu1 }
 0x247   : > { %v863_v18 = vpop.f32.mrb[18].mxu1  ;;  %1857 = vmatprep.subr.bf16.mxu0 %v1323_v51  ;;  %7000 = vmatprep.subr.bf16.mxu1 %v1323_v51  ;;  %v8390_v51 = vcombine.low %v1138_v34, %v1150_v1 }
 0x248   : > { %v1021_v56 = vpack.c.bf16 %v863_v18, %v859_v19  ;;  %v865_v13 = vpop.f32.mrb[19].mxu1  ;;  %1858 = vmatpush1.bf16.msra.mxu0 %v1322_v47  ;;  %7008 = vmatpush1.bf16.msra.mxu1 %v1322_v47 }
 0x249   : > { %v1022_v33 = vpack.c.bf16 %v865_v13, %v861_v27  ;;  %v1162_v13 = vrot.slane %v7753_v50, %v8242_v17 }
 0x24a   : > { %v1301_v41 = vadd.bf16 %v8380_v40, %v1021_v56  ;;  %v1174_v56 = vrot.slane %v7751_v49, %v8242_v17 }
 0x24b   : > { %v1302_v42 = vadd.bf16 %v8380_v40, %v1022_v33 }
 0x24c   : > { %v1325_v39 = vmax.bf16 %v10425_v25, %v1301_v41 }
 0x24d   : > { %v869_v35 = vpop.f32.mrb[20].mxu1  ;;  %v1326_v55 = vmax.bf16 %v10425_v25, %v1302_v42 }
 0x24e   : > { %v871_v19 = vpop.f32.mrb[21].mxu1 }
 0x24f   : > { %v873_v37 = vpop.f32.mrb[22].mxu1  ;;  %1859 = vmatprep.subr.bf16.mxu0 %v1326_v55  ;;  %7001 = vmatprep.subr.bf16.mxu1 %v1326_v55 }
 0x250   : > { %v1024_v47 = vpack.c.bf16 %v873_v37, %v869_v35  ;;  %v875_v27 = vpop.f32.mrb[23].mxu1  ;;  %1860 = vmatpush1.bf16.msra.mxu0 %v1325_v39  ;;  %7009 = vmatpush1.bf16.msra.mxu1 %v1325_v39  ;;  %v8400_v35 = vcombine.low %v1162_v13, %v1174_v56  ;;  %v1198_v37 = vrot.slane %v7761_v53, %v8242_v17 }
 0x251   : > { %v1025_v18 = vpack.c.bf16 %v875_v27, %v871_v19 }
 0x252   : > { %v1304_v45 = vadd.bf16 %v8390_v51, %v1024_v47  ;;  %v1186_v47 = vrot.slane %v7763_v54, %v8242_v17 }
 0x253   : > { %v1305_v46 = vadd.bf16 %v8390_v51, %v1025_v18 }
 0x254   : > { %v1328_v42 = vmax.bf16 %v10425_v25, %v1304_v45  ;;  %v8410_v13 = vcombine.low %v1186_v47, %v1198_v37 }
 0x255   : > { %v879_v33 = vpop.f32.mrb[24].mxu1  ;;  %v1329_v41 = vmax.bf16 %v10425_v25, %v1305_v46 }
 0x256   : > { %v881_v1 = vpop.f32.mrb[25].mxu1 }
 0x257   : > { %v883_v34 = vpop.f32.mrb[26].mxu1  ;;  %1861 = vmatprep.subr.bf16.mxu0 %v1329_v41  ;;  %7002 = vmatprep.subr.bf16.mxu1 %v1329_v41 }
 0x258   : > { %v1027_v55 = vpack.c.bf16 %v883_v34, %v879_v33  ;;  %v885_v39 = vpop.f32.mrb[27].mxu1  ;;  %1862 = vmatpush1.bf16.msra.mxu0 %v1328_v42  ;;  %7010 = vmatpush1.bf16.msra.mxu1 %v1328_v42  ;;  %v1210_v34 = vrot.slane %v7773_v58, %v8242_v17 }
 0x259   : > { %v1028_v19 = vpack.c.bf16 %v885_v39, %v881_v1  ;;  %v1222_v1 = vrot.slane %v7771_v57, %v8242_v17 }
 0x25a   : > { %v1307_v49 = vadd.bf16 %v8400_v35, %v1027_v55 }
 0x25b   : > { %v1308_v50 = vadd.bf16 %v8400_v35, %v1028_v19  ;;  %v8420_v37 = vcombine.low %v1210_v34, %v1222_v1 }
 0x25c   : > { %v1331_v45 = vmax.bf16 %v10425_v25, %v1307_v49 }
 0x25d   : > { %v889_v27 = vpop.f32.mrb[28].mxu1  ;;  %v1332_v18 = vmax.bf16 %v10425_v25, %v1308_v50 }
 0x25e   : > { %v891_v46 = vpop.f32.mrb[29].mxu1 }
 0x25f   : > { %v893_v56 = vpop.f32.mrb[30].mxu1  ;;  %1863 = vmatprep.subr.bf16.mxu0 %v1332_v18  ;;  %7003 = vmatprep.subr.bf16.mxu1 %v1332_v18 }
 0x260   : > { %v1030_v33 = vpack.c.bf16 %v893_v56, %v889_v27  ;;  %v895_v41 = vpop.f32.mrb[31].mxu1  ;;  %1864 = vmatpush1.bf16.msra.mxu0 %v1331_v45  ;;  %7011 = vmatpush1.bf16.msra.mxu1 %v1331_v45  ;;  %v1246_v45 = vrot.slane %v7781_v61, %v8242_v17  ;;  %v10494_v61 = vpack.c.bf16 %v8316_v44, %v8310_v9  ;;  %v8444_v9 = vld [vmem:[%s10311_s5] sm:$0xff]  }
 0x261   : > { %v1031_v42 = vpack.c.bf16 %v895_v41, %v891_v46  ;;  %v1234_v46 = vrot.slane %v7783_v62, %v8242_v17 }
 0x262   : > { %v1310_v53 = vadd.bf16 %v8410_v13, %v1030_v33  ;;  %v1297_v62 = vadd.bf16 %v8348_v4, %v10494_v61  ;;  %v7090_v4 = vld [vmem:[%s10311_s5 + $0x188] sm:$0xff]  }
 0x263   : > { %v1311_v54 = vadd.bf16 %v8410_v13, %v1031_v42  ;;  %v7107_v61 = vld [vmem:[%s10311_s5 + $0x48] sm:$0xff]  }
 0x264   : > { %v1334_v19 = vmax.bf16 %v10425_v25, %v1310_v53 }
 0x265   : > { %v899_v55 = vpop.f32.mrb[32].mxu1  ;;  %v1335_v39 = vmax.bf16 %v10425_v25, %v1311_v54  ;;  %v6592_v54 = vcombine.low %v1234_v46, %v1246_v45  ;;  %v10500_v46 = vpack.c.bf16 %v8366_v52, %v8358_v5  ;;  %v8506_v5 = vld [vmem:[%s10311_s5 + $0x18] sm:$0xff]   ;;  %v7096_v52 = vld [vmem:[%s10311_s5 + $0x1a0] sm:$0xff]  }
 0x266   : > { %v901_v49 = vpop.f32.mrb[33].mxu1 }
 0x267   : > { %v903_v50 = vpop.f32.mrb[34].mxu1  ;;  %1865 = vmatprep.subr.bf16.mxu0 %v1335_v39  ;;  %7004 = vmatprep.subr.bf16.mxu1 %v1335_v39 }
 0x268   : > { %v1033_v47 = vpack.c.bf16 %v903_v50, %v899_v55  ;;  %v905_v27 = vpop.f32.mrb[35].mxu1  ;;  %1866 = vmatpush1.bf16.msra.mxu0 %v1334_v19  ;;  %7012 = vmatpush1.bf16.msra.mxu1 %v1334_v19 }
 0x269   : > { %v1034_v18 = vpack.c.bf16 %v905_v27, %v901_v49 }
 0x26a   : > { %v1313_v57 = vadd.bf16 %v8420_v37, %v1033_v47  ;;  %v10495_v47 = vpack.c.bf16 %v8312_v63, %v8308_v36  ;;  %v10496_v36 = vpack.c.bf16 %v8328_v30, %v8322_v10  ;;  %v8465_v30 = vld [vmem:[%s10311_s5 + $0x8] sm:$0xff]  }
 0x26b   : > { %v1314_v58 = vadd.bf16 %v8420_v37, %v1034_v18  ;;  %v1321_v18 = vmax.bf16 %v10425_v25, %v1297_v62  ;;  %v7108_v62 = vld [vmem:[%s10311_s5 + $0x1d0] sm:$0xff]  }
 0x26c   : > { %v1337_v41 = vmax.bf16 %v10425_v25, %v1313_v57  ;;  %v1300_v27 = vadd.bf16 %v8370_v38, %v10495_v47  ;;  %v1303_v63 = vadd.bf16 %v8380_v40, %v10496_v36  ;;  %v10497_v38 = vpack.c.bf16 %v8324_v14, %v8320_v20  ;;  %v7092_v40 = vld [vmem:[%s10311_s5 + $0x190] sm:$0xff]   ;;  %v7112_v47 = vld [vmem:[%s10311_s5 + $0x1e0] sm:$0xff]  }
 0x26d   : > { %v909_v56 = vpop.f32.mrb[36].mxu1  ;;  %v1338_v33 = vmax.bf16 %v10425_v25, %v1314_v58  ;;  %v10498_v58 = vpack.c.bf16 %v8344_v21, %v8338_v28  ;;  %v8486_v21 = vld [vmem:[%s10311_s5 + $0x10] sm:$0xff]  }
 0x26e   : > { %v911_v42 = vpop.f32.mrb[37].mxu1  ;;  %v1324_v44 = vmax.bf16 %v10425_v25, %v1300_v27  ;;  %v1306_v57 = vadd.bf16 %v8390_v51, %v10497_v38  ;;  %v1327_v10 = vmax.bf16 %v10425_v25, %v1303_v63  ;;  %v10499_v51 = vpack.c.bf16 %v8340_v22, %v8332_v0  ;;  %v7113_v27 = vld [vmem:[%s10311_s5 + $0x60] sm:$0xff]   ;;  %v7116_v36 = vld [vmem:[%s10311_s5 + $0x1f0] sm:$0xff]   ;;  %v7119_v38 = vld [vmem:[%s10311_s5 + $0x78] sm:$0xff]  }
 0x26f   : > { %v913_v53 = vpop.f32.mrb[38].mxu1  ;;  %1867 = vmatprep.subr.bf16.mxu0 %v1338_v33  ;;  %7005 = vmatprep.subr.bf16.mxu1 %v1338_v33  ;;  %v1309_v20 = vadd.bf16 %v8400_v35, %v10498_v58  ;;  %v7094_v35 = vld [vmem:[%s10311_s5 + $0x198] sm:$0xff]   ;;  %v1315_v22 = vadd.bf16 %v8420_v37, %v10500_v46  ;;  %v7117_v63 = vld [vmem:[%s10311_s5 + $0x70] sm:$0xff]   ;;  %v7125_v58 = vld [vmem:[%s10311_s5 + $0xa8] sm:$0xff]  }
 0x270   : > { %v1036_v1 = vpack.c.bf16 %v913_v53, %v909_v56  ;;  %v915_v34 = vpop.f32.mrb[39].mxu1  ;;  %1868 = vmatpush1.bf16.msra.mxu0 %v1337_v41  ;;  %7013 = vmatpush1.bf16.msra.mxu1 %v1337_v41  ;;  %v1330_v14 = vmax.bf16 %v10425_v25, %v1306_v57  ;;  %v1312_v45 = vadd.bf16 %v8410_v13, %v10499_v51  ;;  %v8529_v41 = vld [vmem:[%s10311_s5 + $0x28] sm:$0xff]   ;;  %v8540_v53 = vld [vmem:[%s10311_s5 + $0x30] sm:$0xff]   ;;  %v7120_v57 = vld [vmem:[%s10311_s5 + $0x80] sm:$0xff]  }
 0x271   : > { %v1037_v55 = vpack.c.bf16 %v915_v34, %v911_v42  ;;  %v1333_v28 = vmax.bf16 %v10425_v25, %v1309_v20  ;;  %v10501_v13 = vpack.c.bf16 %v8360_v60, %v8352_v48  ;;  %v1339_v33 = vmax.bf16 %v10425_v25, %v1315_v22  ;;  %v8518_v48 = vld [vmem:[%s10311_s5 + $0x20] sm:$0xff]   ;;  %v7098_v60 = vld [vmem:[%s10311_s5 + $0x1a8] sm:$0xff]   ;;  %v7100_v42 = vld [vmem:[%s10311_s5 + $0x1b0] sm:$0xff]  }
 0x272   : > { %v1316_v39 = vadd.bf16 %v6592_v54, %v1036_v1  ;;  %v1336_v0 = vmax.bf16 %v10425_v25, %v1312_v45  ;;  %v8551_v1 = vld [vmem:[%s10311_s5 + $0x38] sm:$0xff]   ;;  %v7104_v34 = vld [vmem:[%s10311_s5 + $0x1c0] sm:$0xff]   ;;  %v7126_v20 = vld [vmem:[%s10311_s5 + $0xb0] sm:$0xff]  }
 0x273   : > { %v1317_v19 = vadd.bf16 %v6592_v54, %v1037_v55  ;;  %v1318_v56 = vadd.bf16 %v6592_v54, %v10501_v13  ;;  %v7102_v54 = vld [vmem:[%s10311_s5 + $0x1b8] sm:$0xff]   ;;  %v7105_v55 = vld [vmem:[%s10311_s5 + $0x40] sm:$0xff]   ;;  %v7129_v45 = vld [vmem:[%s10311_s5 + $0xc8] sm:$0xff]  }
 0x274   : > { %v1340_v50 = vmax.bf16 %v10425_v25, %v1316_v39  ;;  %v7106_v39 = vld [vmem:[%s10311_s5 + $0x1c8] sm:$0xff]   ;;  %v7128_v51 = vld [vmem:[%s10311_s5 + $0xc0] sm:$0xff]  }
 0x275   : > { %v1341_v49 = vmax.bf16 %v10425_v25, %v1317_v19  ;;  %v1342_v37 = vmax.bf16 %v10425_v25, %v1318_v56  ;;  %v7109_v19 = vld [vmem:[%s10311_s5 + $0x50] sm:$0xff]   ;;  %v7131_v56 = vld [vmem:[%s10311_s5 + $0xd8] sm:$0xff]  }
 0x277   : > { %1869 = vmatprep.subr.bf16.mxu0 %v1341_v49  ;;  %7006 = vmatprep.subr.bf16.mxu1 %v1341_v49  ;;  %v7110_v49 = vld [vmem:[%s10311_s5 + $0x1d8] sm:$0xff]  }
 0x278   : > { %1870 = vmatpush1.bf16.msra.mxu0 %v1340_v50  ;;  %7014 = vmatpush1.bf16.msra.mxu1 %v1340_v50  ;;  %v7111_v50 = vld [vmem:[%s10311_s5 + $0x58] sm:$0xff]  }
 0x279   : > { %6855 = vmatprep.subr.bf16.mxu1 %v1321_v18 }
 0x27b   : > { %1888 = vmatmul.mubr.bf16.vlgmr.msra.gmra.mrb[32].mxu0 %v8444_v9  ;;  %2378 = vmatmul.mubr.bf16.vlgmr.msra.gmra.mrb[40].mxu1 %v7090_v4  ;;  %v7115_v4 = vld [vmem:[%s10311_s5 + $0x68] sm:$0xff]  }
 0x27c   : > { %6856 = vmatpush3.bf16.msra.mxu1 %v1321_v18  ;;  %1897 = vmatprep.mubr.bf16.mxu0 %v10425_v25  ;;  %v7114_v18 = vld [vmem:[%s10311_s5 + $0x1e8] sm:$0xff]  }
 0x27d   : > { %6857 = vmatprep.subr.bf16.mxu1 %v1324_v44  ;;  %2387 = vmatprep.mubr.bf16.mxu1 %v10425_v25 }
 0x280   : > { %6858 = vmatpush3.bf16.msra.mxu1 %v1324_v44  ;;  %v7118_v44 = vld [vmem:[%s10311_s5 + $0x1f8] sm:$0xff]  }
 0x281   : > { %6859 = vmatprep.subr.bf16.mxu1 %v1327_v10 }
 0x283   : > { %1898 = vmatmul.mubr.bf16.gmra.mrb[36].mxu0 %v8465_v30  ;;  %2388 = vmatmul.mubr.bf16.gmra.mrb[44].mxu1 %v7092_v40  ;;  %v7124_v40 = vld [vmem:[%s10311_s5 + $0xa0] sm:$0xff]  }
 0x284   : > { %6860 = vmatpush3.bf16.msra.mxu1 %v1327_v10  ;;  %1907 = vmatprep.mubr.bf16.mxu0 %v10425_v25  ;;  %v7122_v10 = vld [vmem:[%s10311_s5 + $0x90] sm:$0xff]  }
 0x285   : > { %6861 = vmatprep.subr.bf16.mxu1 %v1330_v14  ;;  %2397 = vmatprep.mubr.bf16.mxu1 %v10425_v25 }
 0x288   : > { %6862 = vmatpush3.bf16.msra.mxu1 %v1330_v14  ;;  %v7127_v14 = vld [vmem:[%s10311_s5 + $0xb8] sm:$0xff]  }
 0x289   : > { %6863 = vmatprep.subr.bf16.mxu1 %v1333_v28 }
 0x28b   : > { %1908 = vmatmul.mubr.bf16.gmra.mrb[40].mxu0 %v8486_v21  ;;  %2398 = vmatmul.mubr.bf16.gmra.mrb[48].mxu1 %v7094_v35  ;;  %v3404_v35 = vrot.slane %v7793_v3, %v8242_v17 }
 0x28c   : > { %6864 = vmatpush3.bf16.msra.mxu1 %v1333_v28  ;;  %1917 = vmatprep.mubr.bf16.mxu0 %v10425_v25  ;;  %v7130_v28 = vld [vmem:[%s10311_s5 + $0xd0] sm:$0xff]  }
 0x28d   : > { %6865 = vmatprep.subr.bf16.mxu1 %v1336_v0  ;;  %2407 = vmatprep.mubr.bf16.mxu1 %v10425_v25 }
 0x290   : > { %6866 = vmatpush3.bf16.msra.mxu1 %v1336_v0 }
 0x291   : > { %6867 = vmatprep.subr.bf16.mxu1 %v1339_v33 }
 0x293   : > { %1918 = vmatmul.mubr.bf16.gmra.mrb[44].mxu0 %v8506_v5  ;;  %2408 = vmatmul.mubr.bf16.gmra.mrb[52].mxu1 %v7096_v52 }
 0x294   : > { %6868 = vmatpush3.bf16.msra.mxu1 %v1339_v33  ;;  %1927 = vmatprep.mubr.bf16.mxu0 %v10425_v25 }
 0x295   : > { %6869 = vmatprep.subr.bf16.mxu1 %v1342_v37  ;;  %2417 = vmatprep.mubr.bf16.mxu1 %v10425_v25 }
 0x298   : > { %6870 = vmatpush3.bf16.msra.mxu1 %v1342_v37 }
 0x29b   : > { %1928 = vmatmul.mubr.bf16.gmra.mrb[48].mxu0 %v8518_v48  ;;  %2418 = vmatmul.mubr.bf16.gmra.mrb[56].mxu1 %v7098_v60 }
 0x29c   : > { %1937 = vmatprep.mubr.bf16.mxu0 %v10425_v25  ;;  %2427 = vmatprep.mubr.bf16.mxu1 %v10425_v25 }
 0x2a3   : > { %1938 = vmatmul.mubr.bf16.gmra.mrb[52].mxu0 %v8529_v41  ;;  %2428 = vmatmul.mubr.bf16.gmra.mrb[60].mxu1 %v7100_v42 }
 0x2a4   : > { %1947 = vmatprep.mubr.bf16.mxu0 %v10425_v25  ;;  %2437 = vmatprep.mubr.bf16.mxu1 %v10425_v25 }
 0x2ab   : > { %1948 = vmatmul.mubr.bf16.gmra.mrb[56].mxu0 %v8540_v53  ;;  %2438 = vmatmul.mubr.bf16.gmra.mrb[64].mxu1 %v7102_v54 }
 0x2ac   : > { %1957 = vmatprep.mubr.bf16.mxu0 %v10425_v25  ;;  %2447 = vmatprep.mubr.bf16.mxu1 %v10425_v25 }
 0x2b3   : > { %1958 = vmatmul.mubr.bf16.gmra.mrb[60].mxu0 %v8551_v1  ;;  %2448 = vmatmul.mubr.bf16.gmra.mrb[68].mxu1 %v7104_v34  ;;  %v3440_v34 = vrot.slane %v7801_v7, %v8242_v17  ;;  %v7132_v7 = vld [vmem:[%s10311_s5 + $0xe0] sm:$0xff]  }
 0x2b4   : > { %1967 = vmatprep.mubr.bf16.mxu0 %v10425_v25  ;;  %2457 = vmatprep.mubr.bf16.mxu1 %v10425_v25 }
 0x2bb   : > { %1968 = vmatmul.mubr.bf16.gmra.mrb[64].mxu0 %v7105_v55  ;;  %2458 = vmatmul.mubr.bf16.gmra.mrb[72].mxu1 %v7106_v39 }
 0x2bc   : > { %1977 = vmatprep.mubr.bf16.mxu0 %v10425_v25  ;;  %2467 = vmatprep.mubr.bf16.mxu1 %v10425_v25 }
 0x2c3   : > { %1978 = vmatmul.mubr.bf16.gmra.mrb[68].mxu0 %v7107_v61  ;;  %2468 = vmatmul.mubr.bf16.gmra.mrb[76].mxu1 %v7108_v62 }
 0x2c4   : > { %1987 = vmatprep.mubr.bf16.mxu0 %v10425_v25  ;;  %2477 = vmatprep.mubr.bf16.mxu1 %v10425_v25 }
 0x2cb   : > { %1988 = vmatmul.mubr.bf16.gmra.mrb[72].mxu0 %v7109_v19  ;;  %2478 = vmatmul.mubr.bf16.gmra.mrb[80].mxu1 %v7110_v49 }
 0x2cc   : > { %1997 = vmatprep.mubr.bf16.mxu0 %v10425_v25  ;;  %2487 = vmatprep.mubr.bf16.mxu1 %v10425_v25 }
 0x2d3   : > { %1998 = vmatmul.mubr.bf16.gmra.mrb[76].mxu0 %v7111_v50  ;;  %2488 = vmatmul.mubr.bf16.gmra.mrb[84].mxu1 %v7112_v47 }
 0x2d4   : > { %2007 = vmatprep.mubr.bf16.mxu0 %v10425_v25  ;;  %2497 = vmatprep.mubr.bf16.mxu1 %v10425_v25 }
 0x2db   : > { %2008 = vmatmul.mubr.bf16.gmra.mrb[80].mxu0 %v7113_v27  ;;  %2498 = vmatmul.mubr.bf16.gmra.mrb[88].mxu1 %v7114_v18 }
 0x2dc   : > { %2017 = vmatprep.mubr.bf16.mxu0 %v10425_v25  ;;  %2507 = vmatprep.mubr.bf16.mxu1 %v10425_v25 }
 0x2e3   : > { %2018 = vmatmul.mubr.bf16.gmra.mrb[84].mxu0 %v7115_v4  ;;  %2508 = vmatmul.mubr.bf16.gmra.mrb[92].mxu1 %v7116_v36 }
 0x2e4   : > { %2027 = vmatprep.mubr.bf16.mxu0 %v10425_v25  ;;  %2517 = vmatprep.mubr.bf16.mxu1 %v10425_v25 }
 0x2eb   : > { %2028 = vmatmul.mubr.bf16.gmra.mrb[88].mxu0 %v7117_v63  ;;  %2518 = vmatmul.mubr.bf16.gmra.mrb[96].mxu1 %v7118_v44 }
 0x2ec   : > { %2037 = vmatprep.mubr.bf16.mxu0 %v10425_v25  ;;  %6871 = vmatprep.mubr.bf16.mxu1 %v8444_v9  ;;  %v7121_v9 = vld [vmem:[%s10311_s5 + $0x88] sm:$0xff]  }
 0x2f3   : > { %2038 = vmatmul.mubr.bf16.gmra.mrb[92].mxu0 %v7119_v38  ;;  %6872 = vmatmul.mubr.bf16.vlgmr.msra.gmra.mrb[100].mxu1 %v8465_v30  ;;  %v7123_v30 = vld [vmem:[%s10311_s5 + $0x98] sm:$0xff]  }
 0x2f4   : > { %2047 = vmatprep.mubr.bf16.mxu0 %v10425_v25  ;;  %6875 = vmatprep.mubr.bf16.mxu1 %v8486_v21  ;;  %v3416_v21 = vrot.slane %v7791_v2, %v8242_v17 }
 0x2f6   : > { %v8677_v52 = vcombine.low %v3404_v35, %v3416_v21 }
 0x2fb   : > { %2048 = vmatmul.mubr.bf16.gmra.mrb[96].mxu0 %v7120_v57  ;;  %6876 = vmatmul.mubr.bf16.gmra.mrb[104].mxu1 %v8506_v5 }
 0x2fc   : > { %2057 = vmatprep.mubr.bf16.mxu0 %v10425_v25  ;;  %6879 = vmatprep.mubr.bf16.mxu1 %v8518_v48 }
 0x303   : > { %2058 = vmatmul.mubr.bf16.gmra.mrb[100].mxu0 %v7121_v9  ;;  %6880 = vmatmul.mubr.bf16.gmra.mrb[108].mxu1 %v8529_v41 }
 0x304   : > { %2067 = vmatprep.mubr.bf16.mxu0 %v10425_v25  ;;  %6883 = vmatprep.mubr.bf16.mxu1 %v8540_v53 }
 0x30b   : > { %2068 = vmatmul.mubr.bf16.gmra.mrb[104].mxu0 %v7122_v10  ;;  %6884 = vmatmul.mubr.bf16.gmra.mrb[112].mxu1 %v8551_v1 }
 0x30c   : > { %2077 = vmatprep.mubr.bf16.mxu0 %v10425_v25  ;;  %6887 = vmatprep.mubr.bf16.mxu1 %v7105_v55  ;;  %v3428_v55 = vrot.slane %v7803_v8, %v8242_v17 }
 0x313   : > { %2078 = vmatmul.mubr.bf16.gmra.mrb[108].mxu0 %v7123_v30  ;;  %6888 = vmatmul.mubr.bf16.gmra.mrb[116].mxu1 %v7107_v61 }
 0x314   : > { %2087 = vmatprep.mubr.bf16.mxu0 %v10425_v25  ;;  %6891 = vmatprep.mubr.bf16.mxu1 %v7109_v19 }
 0x31b   : > { %2088 = vmatmul.mubr.bf16.gmra.mrb[112].mxu0 %v7124_v40  ;;  %6892 = vmatmul.mubr.bf16.gmra.mrb[120].mxu1 %v7111_v50 }
 0x31c   : > { %2097 = vmatprep.mubr.bf16.mxu0 %v10425_v25  ;;  %6895 = vmatprep.mubr.bf16.mxu1 %v7113_v27 }
 0x323   : > { %2098 = vmatmul.mubr.bf16.gmra.mrb[116].mxu0 %v7125_v58  ;;  %6896 = vmatmul.mubr.bf16.gmra.mrb[124].mxu1 %v7115_v4  ;;  %v10517_v4 = vld [vmem:[#allocation99_spill] sm:$0xff] }
 0x324   : > { %2107 = vmatprep.mubr.bf16.mxu0 %v10425_v25  ;;  %6899 = vmatprep.mubr.bf16.mxu1 %v7117_v63  ;;  %v8707_v63 = vcombine.low %v3428_v55, %v3440_v34 }
 0x32b   : > { %2108 = vmatmul.mubr.bf16.gmra.mrb[120].mxu0 %v7126_v20  ;;  %6900 = vmatmul.mubr.bf16.gmra.mrb[128].mxu1 %v7119_v38 }
 0x32c   : > { %2117 = vmatprep.mubr.bf16.mxu0 %v10425_v25  ;;  %6903 = vmatprep.mubr.bf16.mxu1 %v7120_v57 }
 0x333   : > { %2118 = vmatmul.mubr.bf16.gmra.mrb[124].mxu0 %v7127_v14  ;;  %6904 = vmatmul.mubr.bf16.gmra.mrb[132].mxu1 %v7121_v9 }
 0x334   : > { %2127 = vmatprep.mubr.bf16.mxu0 %v10425_v25  ;;  %6907 = vmatprep.mubr.bf16.mxu1 %v7122_v10 }
 0x33b   : > { %2128 = vmatmul.mubr.bf16.gmra.mrb[128].mxu0 %v7128_v51  ;;  %6908 = vmatmul.mubr.bf16.gmra.mrb[136].mxu1 %v7123_v30 }
 0x33c   : > { %2137 = vmatprep.mubr.bf16.mxu0 %v10425_v25  ;;  %6911 = vmatprep.mubr.bf16.mxu1 %v7124_v40 }
 0x343   : > { %2138 = vmatmul.mubr.bf16.gmra.mrb[132].mxu0 %v7129_v45  ;;  %6912 = vmatmul.mubr.bf16.gmra.mrb[140].mxu1 %v7125_v58 }
 0x344   : > { %2147 = vmatprep.mubr.bf16.mxu0 %v10425_v25  ;;  %6915 = vmatprep.mubr.bf16.mxu1 %v7126_v20 }
 0x34b   : > { %2148 = vmatmul.mubr.bf16.gmra.mrb[136].mxu0 %v7130_v28  ;;  %6916 = vmatmul.mubr.bf16.gmra.mrb[144].mxu1 %v7127_v14 }
 0x34c   : > { %2157 = vmatprep.mubr.bf16.mxu0 %v10425_v25  ;;  %6919 = vmatprep.mubr.bf16.mxu1 %v7128_v51  ;;  %v3464_v51 = vrot.slane %v7811_v11, %v8242_v17  ;;  %v7133_v11 = vld [vmem:[%s10311_s5 + $0xe8] sm:$0xff]  }
 0x34e   : > { %v1889_v46 = vpop.f32.mrb[32].mxu0  ;;  %v2379_v22 = vpop.f32.mrb[40].mxu1 }
 0x34f   : > { %v1891_v0 = vpop.f32.mrb[33].mxu0  ;;  %v2381_v13 = vpop.f32.mrb[41].mxu1 }
 0x350   : > { %v1893_v33 = vpop.f32.mrb[34].mxu0  ;;  %v2383_v5 = vpop.f32.mrb[42].mxu1 }
 0x351   : > { %v3073_v37 = vpack.c.bf16 %v1893_v33, %v1889_v46  ;;  %v3220_v48 = vpack.c.bf16 %v2383_v5, %v2379_v22  ;;  %v1895_v60 = vpop.f32.mrb[35].mxu0  ;;  %v2385_v41 = vpop.f32.mrb[43].mxu1  ;;  %v7134_v5 = vld [vmem:[%s10311_s5 + $0xf0] sm:$0xff]  }
 0x352   : > { %v3074_v2 = vpack.c.bf16 %v1895_v60, %v1891_v0  ;;  %v3221_v42 = vpack.c.bf16 %v2385_v41, %v2381_v13 }
 0x353   : > { %v5313_v3 = vadd.bf16 %v8677_v52, %v3073_v37  ;;  %v5460_v53 = vadd.bf16 %v8254_v6, %v3220_v48  ;;  %2158 = vmatmul.mubr.bf16.gmra.mrb[140].mxu0 %v7131_v56  ;;  %6920 = vmatmul.mubr.bf16.gmra.mrb[148].mxu1 %v7129_v45  ;;  %v3452_v45 = vrot.slane %v7813_v12, %v8242_v17 }
 0x354   : > { %v5314_v54 = vadd.bf16 %v8677_v52, %v3074_v2  ;;  %v5461_v1 = vadd.bf16 %v8254_v6, %v3221_v42  ;;  %2167 = vmatprep.mubr.bf16.mxu0 %v10425_v25  ;;  %6923 = vmatprep.mubr.bf16.mxu1 %v7130_v28 }
 0x355   : > { %v8689_v39 = vmax.bf16 %v10425_v25, %v5313_v3  ;;  %v8692_v61 = vmax.bf16 %v10425_v25, %v5460_v53  ;;  %v8740_v60 = vcombine.low %v3452_v45, %v3464_v51 }
 0x356   : > { %v8695_v62 = vmax.bf16 %v10425_v25, %v5314_v54  ;;  %v8698_v19 = vmax.bf16 %v10425_v25, %v5461_v1  ;;  %v1899_v49 = vpop.f32.mrb[36].mxu0  ;;  %v2389_v50 = vpop.f32.mrb[44].mxu1 }
 0x357   : > { %10502 = vst [vmem:[#allocation107_spill] sm:$0xff] %v8692_v61  ;;  %v1901_v47 = vpop.f32.mrb[37].mxu0  ;;  %v2391_v27 = vpop.f32.mrb[45].mxu1 }
 0x358   : > { %10503 = vst [vmem:[#allocation108_spill] sm:$0xff] %v8698_v19  ;;  %v1903_v8 = vpop.f32.mrb[38].mxu0  ;;  %v2393_v18 = vpop.f32.mrb[46].mxu1  ;;  %v10541_v19 = vld [vmem:[#allocation103_spill] sm:$0xff] }
 0x359   : > { %v3076_v44 = vpack.c.bf16 %v1903_v8, %v1899_v49  ;;  %v3223_v38 = vpack.c.bf16 %v2393_v18, %v2389_v50  ;;  %v1905_v57 = vpop.f32.mrb[39].mxu0  ;;  %v2395_v9 = vpop.f32.mrb[47].mxu1  ;;  %v3488_v50 = vrot.slane %v7821_v15, %v8242_v17  ;;  %v7135_v15 = vld [vmem:[%s10311_s5 + $0xf8] sm:$0xff]  }
 0x35a   : > { %v3077_v10 = vpack.c.bf16 %v1905_v57, %v1901_v47  ;;  %v3224_v30 = vpack.c.bf16 %v2395_v9, %v2391_v27  ;;  %v3476_v47 = vrot.slane %v7823_v16, %v8242_v17 }
 0x35b   : > { %v5316_v40 = vadd.bf16 %v8707_v63, %v3076_v44  ;;  %v5463_v58 = vadd.bf16 %v8258_v26, %v3223_v38  ;;  %2168 = vmatmul.mubr.bf16.gmra.mrb[144].mxu0 %v7132_v7  ;;  %6924 = vmatmul.mubr.bf16.gmra.mrb[152].mxu1 %v7131_v56 }
 0x35c   : > { %v5317_v20 = vadd.bf16 %v8707_v63, %v3077_v10  ;;  %v5464_v14 = vadd.bf16 %v8258_v26, %v3224_v30  ;;  %2177 = vmatprep.mubr.bf16.mxu0 %v10425_v25  ;;  %6927 = vmatprep.mubr.bf16.mxu1 %v7132_v7  ;;  %v8769_v30 = vld [vmem:[%s10311_s5 + $0x100] sm:$0xff]  }
 0x35d   : > { %v8719_v28 = vmax.bf16 %v10425_v25, %v5316_v40  ;;  %v8722_v21 = vmax.bf16 %v10425_v25, %v5463_v58 }
 0x35e   : > { %v8725_v35 = vmax.bf16 %v10425_v25, %v5317_v20  ;;  %v8728_v46 = vmax.bf16 %v10425_v25, %v5464_v14  ;;  %v1909_v22 = vpop.f32.mrb[40].mxu0  ;;  %v2399_v0 = vpop.f32.mrb[48].mxu1  ;;  %v8775_v20 = vcombine.low %v3476_v47, %v3488_v50  ;;  %v8807_v50 = vld [vmem:[%s10311_s5 + $0x110] sm:$0xff]  }
 0x35f   : > { %10504 = vst [vmem:[#allocation109_spill] sm:$0xff] %v8722_v21  ;;  %v1911_v13 = vpop.f32.mrb[41].mxu0  ;;  %v2401_v56 = vpop.f32.mrb[49].mxu1 }
 0x360   : > { %10505 = vst [vmem:[#allocation110_spill] sm:$0xff] %v8728_v46  ;;  %v1913_v12 = vpop.f32.mrb[42].mxu0  ;;  %v2403_v33 = vpop.f32.mrb[50].mxu1 }
 0x361   : > { %v3079_v41 = vpack.c.bf16 %v1913_v12, %v1909_v22  ;;  %v3226_v2 = vpack.c.bf16 %v2403_v33, %v2399_v0  ;;  %v1915_v42 = vpop.f32.mrb[43].mxu0  ;;  %v2405_v3 = vpop.f32.mrb[51].mxu1 }
 0x362   : > { %v3080_v53 = vpack.c.bf16 %v1915_v42, %v1911_v13  ;;  %v3227_v54 = vpack.c.bf16 %v2405_v3, %v2401_v56 }
 0x363   : > { %v5319_v1 = vadd.bf16 %v8740_v60, %v3079_v41  ;;  %v5466_v34 = vadd.bf16 %v8262_v43, %v3226_v2  ;;  %2178 = vmatmul.mubr.bf16.gmra.mrb[148].mxu0 %v7133_v11  ;;  %6928 = vmatmul.mubr.bf16.gmra.mrb[156].mxu1 %v7133_v11  ;;  %v3512_v41 = vrot.slane %v7831_v23, %v8242_v17  ;;  %v8802_v23 = vld [vmem:[%s10311_s5 + $0x108] sm:$0xff]  }
 0x364   : > { %v5320_v55 = vadd.bf16 %v8740_v60, %v3080_v53  ;;  %v5467_v49 = vadd.bf16 %v8262_v43, %v3227_v54  ;;  %2187 = vmatprep.mubr.bf16.mxu0 %v10425_v25  ;;  %6931 = vmatprep.mubr.bf16.mxu1 %v7134_v5  ;;  %v3500_v2 = vrot.slane %v7833_v24, %v8242_v17 }
 0x365   : > { %v8752_v27 = vmax.bf16 %v10425_v25, %v5319_v1  ;;  %v8755_v7 = vmax.bf16 %v10425_v25, %v5466_v34 }
 0x366   : > { %v8758_v8 = vmax.bf16 %v10425_v25, %v5320_v55  ;;  %v8761_v18 = vmax.bf16 %v10425_v25, %v5467_v49  ;;  %v1919_v44 = vpop.f32.mrb[44].mxu0  ;;  %v2409_v38 = vpop.f32.mrb[52].mxu1 }
 0x367   : > { %10506 = vst [vmem:[#allocation111_spill] sm:$0xff] %v8755_v7  ;;  %v1921_v57 = vpop.f32.mrb[45].mxu0  ;;  %v2411_v9 = vpop.f32.mrb[53].mxu1 }
 0x368   : > { %10507 = vst [vmem:[#allocation112_spill] sm:$0xff] %v8761_v18  ;;  %v1923_v16 = vpop.f32.mrb[46].mxu0  ;;  %v2413_v10 = vpop.f32.mrb[54].mxu1  ;;  %v10534_v18 = vld [vmem:[#allocation102_spill] sm:$0xff] }
 0x369   : > { %v3082_v14 = vpack.c.bf16 %v1923_v16, %v1919_v44  ;;  %v3229_v51 = vpack.c.bf16 %v2413_v10, %v2409_v38  ;;  %v1925_v45 = vpop.f32.mrb[47].mxu0  ;;  %v2415_v22 = vpop.f32.mrb[55].mxu1  ;;  %v8813_v38 = vcombine.low %v3500_v2, %v3512_v41 }
 0x36a   : > { %v3083_v0 = vpack.c.bf16 %v1925_v45, %v1921_v57  ;;  %v3230_v13 = vpack.c.bf16 %v2415_v22, %v2411_v9 }
 0x36b   : > { %v5322_v56 = vadd.bf16 %v8775_v20, %v3082_v14  ;;  %v5469_v11 = vadd.bf16 %v8266_v59, %v3229_v51  ;;  %2188 = vmatmul.mubr.bf16.gmra.mrb[152].mxu0 %v7134_v5  ;;  %6932 = vmatmul.mubr.bf16.gmra.mrb[160].mxu1 %v7135_v15 }
 0x36c   : > { %v5323_v12 = vadd.bf16 %v8775_v20, %v3083_v0  ;;  %v5470_v33 = vadd.bf16 %v8266_v59, %v3230_v13  ;;  %2197 = vmatprep.mubr.bf16.mxu0 %v10425_v25  ;;  %6935 = vmatprep.mubr.bf16.mxu1 %v8769_v30 }
 0x36d   : > { %v8788_v42 = vmax.bf16 %v10425_v25, %v5322_v56  ;;  %v8791_v5 = vmax.bf16 %v10425_v25, %v5469_v11  ;;  %v3536_v56 = vrot.slane %v7841_v31, %v8242_v17  ;;  %v3524_v11 = vrot.slane %v7843_v32, %v8242_v17  ;;  %v8841_v31 = vld [vmem:[%s10311_s5 + $0x118] sm:$0xff]  }
 0x36e   : > { %v8794_v3 = vmax.bf16 %v10425_v25, %v5323_v12  ;;  %v8797_v53 = vmax.bf16 %v10425_v25, %v5470_v33  ;;  %v1929_v54 = vpop.f32.mrb[48].mxu0  ;;  %v2419_v1 = vpop.f32.mrb[56].mxu1 }
 0x36f   : > { %10508 = vst [vmem:[#allocation113_spill] sm:$0xff] %v8791_v5  ;;  %v1931_v34 = vpop.f32.mrb[49].mxu0  ;;  %v2421_v55 = vpop.f32.mrb[57].mxu1 }
 0x370   : > { %10509 = vst [vmem:[#allocation114_spill] sm:$0xff] %v8797_v53  ;;  %v1933_v24 = vpop.f32.mrb[50].mxu0  ;;  %v2423_v49 = vpop.f32.mrb[58].mxu1  ;;  %v10522_v53 = vld [vmem:[#allocation100_spill] sm:$0xff] }
 0x371   : > { %v3085_v57 = vpack.c.bf16 %v1933_v24, %v1929_v54  ;;  %v3232_v9 = vpack.c.bf16 %v2423_v49, %v2419_v1  ;;  %v1935_v16 = vpop.f32.mrb[51].mxu0  ;;  %v2425_v10 = vpop.f32.mrb[59].mxu1  ;;  %v8846_v24 = vld [vmem:[%s10311_s5 + $0x120] sm:$0xff]  }
 0x372   : > { %v3086_v14 = vpack.c.bf16 %v1935_v16, %v1931_v34  ;;  %v3233_v51 = vpack.c.bf16 %v2425_v10, %v2421_v55 }
 0x373   : > { %v5325_v45 = vadd.bf16 %v8813_v38, %v3085_v57  ;;  %v5472_v22 = vadd.bf16 %v8270_v29, %v3232_v9  ;;  %2198 = vmatmul.mubr.bf16.gmra.mrb[156].mxu0 %v7135_v15  ;;  %6936 = vmatmul.mubr.bf16.gmra.mrb[164].mxu1 %v8802_v23  ;;  %v8852_v9 = vcombine.low %v3524_v11, %v3536_v56  ;;  %v10513_v56 = vld [vmem:[#allocation9_spill] sm:$0xff] }
 0x374   : > { %v5326_v0 = vadd.bf16 %v8813_v38, %v3086_v14  ;;  %v5473_v13 = vadd.bf16 %v8270_v29, %v3233_v51  ;;  %2207 = vmatprep.mubr.bf16.mxu0 %v10425_v25  ;;  %6939 = vmatprep.mubr.bf16.mxu1 %v8807_v50  ;;  %v3560_v11 = vrot.slane %v10513_v56, %v8242_v17  ;;  %v10527_v29 = vld [vmem:[#allocation101_spill] sm:$0xff] }
 0x375   : > { %v8827_v12 = vmax.bf16 %v10425_v25, %v5325_v45  ;;  %v8830_v15 = vmax.bf16 %v10425_v25, %v5472_v22 }
 0x376   : > { %v8833_v33 = vmax.bf16 %v10425_v25, %v5326_v0  ;;  %v8836_v41 = vmax.bf16 %v10425_v25, %v5473_v13  ;;  %v1939_v2 = vpop.f32.mrb[52].mxu0  ;;  %v2429_v54 = vpop.f32.mrb[60].mxu1  ;;  %v10512_v13 = vld [vmem:[#allocation98_spill] sm:$0xff] }
 0x377   : > { %10510 = vst [vmem:[#allocation115_spill] sm:$0xff] %v8830_v15  ;;  %v1941_v1 = vpop.f32.mrb[53].mxu0  ;;  %v2431_v34 = vpop.f32.mrb[61].mxu1 }
 0x378   : > { %10511 = vst [vmem:[#allocation116_spill] sm:$0xff] %v8836_v41  ;;  %v1943_v32 = vpop.f32.mrb[54].mxu0  ;;  %v2433_v55 = vpop.f32.mrb[62].mxu1 }
 0x379   : > { %v3088_v16 = vpack.c.bf16 %v1943_v32, %v1939_v2  ;;  %v3235_v10 = vpack.c.bf16 %v2433_v55, %v2429_v54  ;;  %v1945_v14 = vpop.f32.mrb[55].mxu0  ;;  %v2435_v51 = vpop.f32.mrb[63].mxu1  ;;  %v10514_v2 = vld [vmem:[#allocation10_spill] sm:$0xff] }
 0x37a   : > { %v3089_v45 = vpack.c.bf16 %v1945_v14, %v1941_v1  ;;  %v3236_v22 = vpack.c.bf16 %v2435_v51, %v2431_v34  ;;  %v3548_v54 = vrot.slane %v10514_v2, %v8242_v17  ;;  %v8881_v51 = vld [vmem:[%s10311_s5 + $0x128] sm:$0xff]  }
 0x37b   : > { %v5328_v0 = vadd.bf16 %v8852_v9, %v3088_v16  ;;  %v5475_v44 = vadd.bf16 %v10512_v13, %v3235_v10  ;;  %2208 = vmatmul.mubr.bf16.gmra.mrb[160].mxu0 %v8769_v30  ;;  %6940 = vmatmul.mubr.bf16.gmra.mrb[168].mxu1 %v8841_v31 }
 0x37c   : > { %v5329_v48 = vadd.bf16 %v8852_v9, %v3089_v45  ;;  %v5476_v57 = vadd.bf16 %v10512_v13, %v3236_v22  ;;  %2217 = vmatprep.mubr.bf16.mxu0 %v10425_v25  ;;  %6943 = vmatprep.mubr.bf16.mxu1 %v8846_v24 }
 0x37d   : > { %v8867_v1 = vmax.bf16 %v10425_v25, %v5328_v0  ;;  %v8870_v30 = vmax.bf16 %v10425_v25, %v5475_v44  ;;  %v8886_v44 = vld [vmem:[%s10311_s5 + $0x130] sm:$0xff]   ;;  %v8892_v0 = vcombine.low %v3548_v54, %v3560_v11 }
 0x37e   : > { %v8873_v34 = vmax.bf16 %v10425_v25, %v5329_v48  ;;  %v8876_v32 = vmax.bf16 %v10425_v25, %v5476_v57  ;;  %v1949_v55 = vpop.f32.mrb[56].mxu0  ;;  %v2439_v16 = vpop.f32.mrb[64].mxu1  ;;  %v10518_v11 = vld [vmem:[#allocation11_spill] sm:$0xff] }
 0x37f   : > { %10515 = vst [vmem:[#allocation9_spill] sm:$0xff] %v8870_v30  ;;  %v1951_v10 = vpop.f32.mrb[57].mxu0  ;;  %v2441_v14 = vpop.f32.mrb[65].mxu1 }
 0x380   : > { %10516 = vst [vmem:[#allocation10_spill] sm:$0xff] %v8876_v32  ;;  %v1953_v45 = vpop.f32.mrb[58].mxu0  ;;  %v2443_v22 = vpop.f32.mrb[66].mxu1 }
 0x381   : > { %v3091_v56 = vpack.c.bf16 %v1953_v45, %v1949_v55  ;;  %v3238_v2 = vpack.c.bf16 %v2443_v22, %v2439_v16  ;;  %v1955_v58 = vpop.f32.mrb[59].mxu0  ;;  %v2445_v36 = vpop.f32.mrb[67].mxu1  ;;  %v8921_v22 = vld [vmem:[%s10311_s5 + $0x138] sm:$0xff]  }
 0x382   : > { %v3092_v49 = vpack.c.bf16 %v1955_v58, %v1951_v10  ;;  %v3239_v40 = vpack.c.bf16 %v2445_v36, %v2441_v14  ;;  %v3584_v58 = vrot.slane %v10518_v11, %v8242_v17  ;;  %v10519_v36 = vld [vmem:[#allocation12_spill] sm:$0xff] }
 0x383   : > { %v5331_v47 = vadd.bf16 %v8892_v0, %v3091_v56  ;;  %v5478_v37 = vadd.bf16 %v10517_v4, %v3238_v2  ;;  %2218 = vmatmul.mubr.bf16.gmra.mrb[164].mxu0 %v8802_v23  ;;  %6944 = vmatmul.mubr.bf16.gmra.mrb[172].mxu1 %v8881_v51  ;;  %v3572_v54 = vrot.slane %v10519_v36, %v8242_v17 }
 0x384   : > { %v5332_v48 = vadd.bf16 %v8892_v0, %v3092_v49  ;;  %v5479_v57 = vadd.bf16 %v10517_v4, %v3239_v40  ;;  %2227 = vmatprep.mubr.bf16.mxu0 %v10425_v25  ;;  %6947 = vmatprep.mubr.bf16.mxu1 %v8886_v44 }
 0x385   : > { %v8907_v55 = vmax.bf16 %v10425_v25, %v5331_v47  ;;  %v8910_v23 = vmax.bf16 %v10425_v25, %v5478_v37  ;;  %v8926_v37 = vld [vmem:[%s10311_s5 + $0x140] sm:$0xff]   ;;  %v8932_v2 = vcombine.low %v3572_v54, %v3584_v58 }
 0x386   : > { %v8913_v49 = vmax.bf16 %v10425_v25, %v5332_v48  ;;  %v8916_v40 = vmax.bf16 %v10425_v25, %v5479_v57  ;;  %v1959_v16 = vpop.f32.mrb[60].mxu0  ;;  %v2449_v10 = vpop.f32.mrb[68].mxu1  ;;  %v10523_v58 = vld [vmem:[#allocation13_spill] sm:$0xff] }
 0x387   : > { %10520 = vst [vmem:[#allocation11_spill] sm:$0xff] %v8910_v23  ;;  %v1961_v14 = vpop.f32.mrb[61].mxu0  ;;  %v2451_v45 = vpop.f32.mrb[69].mxu1 }
 0x388   : > { %10521 = vst [vmem:[#allocation12_spill] sm:$0xff] %v8916_v40  ;;  %v1963_v47 = vpop.f32.mrb[62].mxu0  ;;  %v2453_v56 = vpop.f32.mrb[70].mxu1 }
 0x389   : > { %v3094_v11 = vpack.c.bf16 %v1963_v47, %v1959_v16  ;;  %v3241_v36 = vpack.c.bf16 %v2453_v56, %v2449_v10  ;;  %v1965_v30 = vpop.f32.mrb[63].mxu0  ;;  %v2455_v32 = vpop.f32.mrb[71].mxu1  ;;  %v8961_v56 = vld [vmem:[%s10311_s5 + $0x148] sm:$0xff]  }
 0x38a   : > { %v3095_v13 = vpack.c.bf16 %v1965_v30, %v1961_v14  ;;  %v3242_v4 = vpack.c.bf16 %v2455_v32, %v2451_v45  ;;  %v3608_v30 = vrot.slane %v10523_v58, %v8242_v17  ;;  %v10524_v32 = vld [vmem:[#allocation14_spill] sm:$0xff] }
 0x38b   : > { %v5334_v5 = vadd.bf16 %v8932_v2, %v3094_v11  ;;  %v5481_v15 = vadd.bf16 %v10522_v53, %v3241_v36  ;;  %2228 = vmatmul.mubr.bf16.gmra.mrb[168].mxu0 %v8807_v50  ;;  %6948 = vmatmul.mubr.bf16.gmra.mrb[176].mxu1 %v8921_v22  ;;  %v3596_v54 = vrot.slane %v10524_v32, %v8242_v17 }
 0x38c   : > { %v5335_v48 = vadd.bf16 %v8932_v2, %v3095_v13  ;;  %v5482_v57 = vadd.bf16 %v10522_v53, %v3242_v4  ;;  %2237 = vmatprep.mubr.bf16.mxu0 %v10425_v25  ;;  %6951 = vmatprep.mubr.bf16.mxu1 %v8926_v37 }
 0x38d   : > { %v8947_v16 = vmax.bf16 %v10425_v25, %v5334_v5  ;;  %v8950_v50 = vmax.bf16 %v10425_v25, %v5481_v15  ;;  %v8966_v15 = vld [vmem:[%s10311_s5 + $0x150] sm:$0xff]   ;;  %v8972_v36 = vcombine.low %v3596_v54, %v3608_v30 }
 0x38e   : > { %v8953_v13 = vmax.bf16 %v10425_v25, %v5335_v48  ;;  %v8956_v4 = vmax.bf16 %v10425_v25, %v5482_v57  ;;  %v1969_v10 = vpop.f32.mrb[64].mxu0  ;;  %v2459_v14 = vpop.f32.mrb[72].mxu1  ;;  %v10528_v30 = vld [vmem:[#allocation15_spill] sm:$0xff] }
 0x38f   : > { %10525 = vst [vmem:[#allocation13_spill] sm:$0xff] %v8950_v50  ;;  %v1971_v45 = vpop.f32.mrb[65].mxu0  ;;  %v2461_v47 = vpop.f32.mrb[73].mxu1 }
 0x390   : > { %10526 = vst [vmem:[#allocation14_spill] sm:$0xff] %v8956_v4  ;;  %v1973_v5 = vpop.f32.mrb[66].mxu0  ;;  %v2463_v11 = vpop.f32.mrb[74].mxu1 }
 0x391   : > { %v3097_v58 = vpack.c.bf16 %v1973_v5, %v1969_v10  ;;  %v3244_v32 = vpack.c.bf16 %v2463_v11, %v2459_v14  ;;  %v1975_v53 = vpop.f32.mrb[67].mxu0  ;;  %v2465_v23 = vpop.f32.mrb[75].mxu1  ;;  %v9001_v11 = vld [vmem:[%s10311_s5 + $0x158] sm:$0xff]  }
 0x392   : > { %v3098_v40 = vpack.c.bf16 %v1975_v53, %v1971_v45  ;;  %v3245_v41 = vpack.c.bf16 %v2465_v23, %v2461_v47  ;;  %v3632_v53 = vrot.slane %v10528_v30, %v8242_v17  ;;  %v10529_v23 = vld [vmem:[#allocation16_spill] sm:$0xff] }
 0x393   : > { %v5337_v59 = vadd.bf16 %v8972_v36, %v3097_v58  ;;  %v5484_v21 = vadd.bf16 %v10527_v29, %v3244_v32  ;;  %2238 = vmatmul.mubr.bf16.gmra.mrb[172].mxu0 %v8841_v31  ;;  %6952 = vmatmul.mubr.bf16.gmra.mrb[180].mxu1 %v8961_v56  ;;  %v3620_v54 = vrot.slane %v10529_v23, %v8242_v17 }
 0x394   : > { %v5338_v48 = vadd.bf16 %v8972_v36, %v3098_v40  ;;  %v5485_v57 = vadd.bf16 %v10527_v29, %v3245_v41  ;;  %2247 = vmatprep.mubr.bf16.mxu0 %v10425_v25  ;;  %6955 = vmatprep.mubr.bf16.mxu1 %v8966_v15 }
 0x395   : > { %v8987_v10 = vmax.bf16 %v10425_v25, %v5337_v59  ;;  %v8990_v31 = vmax.bf16 %v10425_v25, %v5484_v21  ;;  %v9006_v21 = vld [vmem:[%s10311_s5 + $0x160] sm:$0xff]   ;;  %v9012_v32 = vcombine.low %v3620_v54, %v3632_v53 }
 0x396   : > { %v8993_v40 = vmax.bf16 %v10425_v25, %v5338_v48  ;;  %v8996_v41 = vmax.bf16 %v10425_v25, %v5485_v57  ;;  %v1979_v14 = vpop.f32.mrb[68].mxu0  ;;  %v2469_v45 = vpop.f32.mrb[76].mxu1  ;;  %v10535_v53 = vld [vmem:[#allocation17_spill] sm:$0xff] }
 0x397   : > { %10530 = vst [vmem:[#allocation15_spill] sm:$0xff] %v8987_v10  ;;  %10531 = vst [vmem:[#allocation16_spill] sm:$0xff] %v8990_v31  ;;  %v1981_v47 = vpop.f32.mrb[69].mxu0  ;;  %v2471_v5 = vpop.f32.mrb[77].mxu1 }
 0x398   : > { %10532 = vst [vmem:[#allocation117_spill] sm:$0xff] %v8993_v40  ;;  %10533 = vst [vmem:[#allocation118_spill] sm:$0xff] %v8996_v41  ;;  %v1983_v59 = vpop.f32.mrb[70].mxu0  ;;  %v2473_v58 = vpop.f32.mrb[78].mxu1  ;;  %v10550_v40 = vld [vmem:[#allocation104_spill] sm:$0xff] }
 0x399   : > { %v3100_v30 = vpack.c.bf16 %v1983_v59, %v1979_v14  ;;  %v3247_v23 = vpack.c.bf16 %v2473_v58, %v2469_v45  ;;  %v1985_v50 = vpop.f32.mrb[71].mxu0  ;;  %v2475_v4 = vpop.f32.mrb[79].mxu1  ;;  %v9041_v58 = vld [vmem:[%s10311_s5 + $0x168] sm:$0xff]  }
 0x39a   : > { %v3101_v29 = vpack.c.bf16 %v1985_v50, %v1981_v47  ;;  %v3248_v46 = vpack.c.bf16 %v2475_v4, %v2471_v5  ;;  %v3656_v50 = vrot.slane %v10535_v53, %v8242_v17  ;;  %v10536_v4 = vld [vmem:[#allocation18_spill] sm:$0xff] }
 0x39b   : > { %v5340_v7 = vadd.bf16 %v9012_v32, %v3100_v30  ;;  %v5487_v26 = vadd.bf16 %v10534_v18, %v3247_v23  ;;  %2248 = vmatmul.mubr.bf16.gmra.mrb[176].mxu0 %v8846_v24  ;;  %6956 = vmatmul.mubr.bf16.gmra.mrb[184].mxu1 %v9001_v11  ;;  %v3644_v54 = vrot.slane %v10536_v4, %v8242_v17 }
 0x39c   : > { %v5341_v48 = vadd.bf16 %v9012_v32, %v3101_v29  ;;  %v5488_v57 = vadd.bf16 %v10534_v18, %v3248_v46  ;;  %2257 = vmatprep.mubr.bf16.mxu0 %v10425_v25  ;;  %6959 = vmatprep.mubr.bf16.mxu1 %v9006_v21 }
 0x39d   : > { %v9027_v14 = vmax.bf16 %v10425_v25, %v5340_v7  ;;  %v9030_v24 = vmax.bf16 %v10425_v25, %v5487_v26  ;;  %v9046_v26 = vld [vmem:[%s10311_s5 + $0x170] sm:$0xff]   ;;  %v9052_v23 = vcombine.low %v3644_v54, %v3656_v50 }
 0x39e   : > { %v9033_v29 = vmax.bf16 %v10425_v25, %v5341_v48  ;;  %v9036_v46 = vmax.bf16 %v10425_v25, %v5488_v57  ;;  %v1989_v45 = vpop.f32.mrb[72].mxu0  ;;  %v2479_v47 = vpop.f32.mrb[80].mxu1  ;;  %v10542_v50 = vld [vmem:[#allocation19_spill] sm:$0xff] }
 0x39f   : > { %10537 = vst [vmem:[#allocation17_spill] sm:$0xff] %v9027_v14  ;;  %10538 = vst [vmem:[#allocation18_spill] sm:$0xff] %v9030_v24  ;;  %v1991_v5 = vpop.f32.mrb[73].mxu0  ;;  %v2481_v59 = vpop.f32.mrb[81].mxu1 }
 0x3a0   : > { %10539 = vst [vmem:[#allocation119_spill] sm:$0xff] %v9036_v46  ;;  %v1993_v7 = vpop.f32.mrb[74].mxu0  ;;  %v2483_v30 = vpop.f32.mrb[82].mxu1  ;;  %10540 = vst [vmem:[#allocation120_spill] sm:$0xff] %v9052_v23 }
 0x3a1   : > { %v3103_v53 = vpack.c.bf16 %v1993_v7, %v1989_v45  ;;  %v3250_v4 = vpack.c.bf16 %v2483_v30, %v2479_v47  ;;  %v1995_v18 = vpop.f32.mrb[75].mxu0  ;;  %v2485_v31 = vpop.f32.mrb[83].mxu1  ;;  %v9081_v30 = vld [vmem:[%s10311_s5 + $0x178] sm:$0xff]  }
 0x3a2   : > { %v3104_v41 = vpack.c.bf16 %v1995_v18, %v1991_v5  ;;  %v3251_v43 = vpack.c.bf16 %v2485_v31, %v2481_v59  ;;  %v3680_v18 = vrot.slane %v10542_v50, %v8242_v17  ;;  %v10543_v31 = vld [vmem:[#allocation20_spill] sm:$0xff]  ;;  %10548 = vst [vmem:[#allocation123_spill] sm:$0xff] %v9081_v30 }
 0x3a3   : > { %v5343_v61 = vadd.bf16 %v9052_v23, %v3103_v53  ;;  %v5490_v6 = vadd.bf16 %v10541_v19, %v3250_v4  ;;  %2258 = vmatmul.mubr.bf16.gmra.mrb[180].mxu0 %v8881_v51  ;;  %6960 = vmatmul.mubr.bf16.gmra.mrb[188].mxu1 %v9041_v58  ;;  %v3668_v54 = vrot.slane %v10543_v31, %v8242_v17 }
 0x3a4   : > { %v5344_v48 = vadd.bf16 %v9052_v23, %v3104_v41  ;;  %v5491_v57 = vadd.bf16 %v10541_v19, %v3251_v43  ;;  %2267 = vmatprep.mubr.bf16.mxu0 %v10425_v25  ;;  %6963 = vmatprep.mubr.bf16.mxu1 %v9046_v26 }
 0x3a5   : > { %v9067_v45 = vmax.bf16 %v10425_v25, %v5343_v61  ;;  %v9070_v51 = vmax.bf16 %v10425_v25, %v5490_v6  ;;  %v9086_v6 = vld [vmem:[%s10311_s5 + $0x180] sm:$0xff]   ;;  %v9092_v4 = vcombine.low %v3668_v54, %v3680_v18 }
 0x3a6   : > { %v9073_v41 = vmax.bf16 %v10425_v25, %v5344_v48  ;;  %v9076_v43 = vmax.bf16 %v10425_v25, %v5491_v57  ;;  %v1999_v47 = vpop.f32.mrb[76].mxu0  ;;  %v2489_v5 = vpop.f32.mrb[84].mxu1  ;;  %10549 = vst [vmem:[#allocation124_spill] sm:$0xff] %v9086_v6  ;;  %v10551_v18 = vld [vmem:[#allocation21_spill] sm:$0xff] }
 0x3a7   : > { %10544 = vst [vmem:[#allocation19_spill] sm:$0xff] %v9067_v45  ;;  %10545 = vst [vmem:[#allocation20_spill] sm:$0xff] %v9070_v51  ;;  %v2001_v59 = vpop.f32.mrb[77].mxu0  ;;  %v2491_v7 = vpop.f32.mrb[85].mxu1 }
 0x3a8   : > { %10546 = vst [vmem:[#allocation121_spill] sm:$0xff] %v9073_v41  ;;  %10547 = vst [vmem:[#allocation122_spill] sm:$0xff] %v9076_v43  ;;  %v2003_v61 = vpop.f32.mrb[78].mxu0  ;;  %v2493_v53 = vpop.f32.mrb[86].mxu1  ;;  %v10564_v41 = vld [vmem:[#allocation25_spill] sm:$0xff] }
 0x3a9   : > { %v3106_v50 = vpack.c.bf16 %v2003_v61, %v1999_v47  ;;  %v3253_v31 = vpack.c.bf16 %v2493_v53, %v2489_v5  ;;  %v2005_v24 = vpop.f32.mrb[79].mxu0  ;;  %v2495_v46 = vpop.f32.mrb[87].mxu1 }
 0x3aa   : > { %v3107_v19 = vpack.c.bf16 %v2005_v24, %v2001_v59  ;;  %v3254_v23 = vpack.c.bf16 %v2495_v46, %v2491_v7  ;;  %v3704_v24 = vrot.slane %v10551_v18, %v8242_v17  ;;  %v10552_v46 = vld [vmem:[#allocation22_spill] sm:$0xff] }
 0x3ab   : > { %v5346_v10 = vadd.bf16 %v9092_v4, %v3106_v50  ;;  %v5493_v14 = vadd.bf16 %v10550_v40, %v3253_v31  ;;  %2268 = vmatmul.mubr.bf16.gmra.mrb[184].mxu0 %v8886_v44  ;;  %6964 = vmatmul.mubr.bf16.gmra.mrb[192].mxu1 %v9081_v30  ;;  %v3692_v54 = vrot.slane %v10552_v46, %v8242_v17  ;;  %v7153_v31 = vld [vmem:[%s10311_s5 + $0x188] sm:$0xff]  }
 0x3ac   : > { %v5347_v48 = vadd.bf16 %v9092_v4, %v3107_v19  ;;  %v5494_v57 = vadd.bf16 %v10550_v40, %v3254_v23  ;;  %2277 = vmatprep.mubr.bf16.mxu0 %v10425_v25  ;;  %6967 = vmatprep.mubr.bf16.mxu1 %v9086_v6  ;;  %v10558_v6 = vld [vmem:[#allocation105_spill] sm:$0xff]  ;;  %v10565_v30 = vld [vmem:[#allocation106_spill] sm:$0xff] }
 0x3ad   : > { %v9107_v47 = vmax.bf16 %v10425_v25, %v5346_v10  ;;  %v9110_v44 = vmax.bf16 %v10425_v25, %v5493_v14  ;;  %v9122_v14 = vcombine.low %v3692_v54, %v3704_v24 }
 0x3ae   : > { %v9113_v19 = vmax.bf16 %v10425_v25, %v5347_v48  ;;  %v9116_v23 = vmax.bf16 %v10425_v25, %v5494_v57  ;;  %v2009_v5 = vpop.f32.mrb[80].mxu0  ;;  %v2499_v59 = vpop.f32.mrb[88].mxu1 }
 0x3af   : > { %10553 = vst [vmem:[#allocation21_spill] sm:$0xff] %v9107_v47  ;;  %10554 = vst [vmem:[#allocation22_spill] sm:$0xff] %v9110_v44  ;;  %v2011_v7 = vpop.f32.mrb[81].mxu0  ;;  %v2501_v61 = vpop.f32.mrb[89].mxu1  ;;  %v3752_v47 = vrot.slane %v10564_v41, %v8242_v17  ;;  %v7156_v41 = vld [vmem:[%s10311_s5 + $0x1a0] sm:$0xff]  }
 0x3b0   : > { %10555 = vst [vmem:[#allocation125_spill] sm:$0xff] %v9113_v19  ;;  %10556 = vst [vmem:[#allocation126_spill] sm:$0xff] %v9116_v23  ;;  %v2013_v53 = vpop.f32.mrb[82].mxu0  ;;  %v2503_v50 = vpop.f32.mrb[90].mxu1 }
 0x3b1   : > { %10557 = vst [vmem:[#allocation127_spill] sm:$0xff] %v9122_v14  ;;  %v3109_v18 = vpack.c.bf16 %v2013_v53, %v2009_v5  ;;  %v3256_v48 = vpack.c.bf16 %v2503_v50, %v2499_v59  ;;  %v2015_v46 = vpop.f32.mrb[83].mxu0  ;;  %v2505_v40 = vpop.f32.mrb[91].mxu1  ;;  %v10559_v5 = vld [vmem:[#allocation23_spill] sm:$0xff] }
 0x3b2   : > { %v3110_v57 = vpack.c.bf16 %v2015_v46, %v2011_v7  ;;  %v3257_v51 = vpack.c.bf16 %v2505_v40, %v2501_v61  ;;  %v7154_v40 = vld [vmem:[%s10311_s5 + $0x190] sm:$0xff]   ;;  %v3728_v59 = vrot.slane %v10559_v5, %v8242_v17  ;;  %v4908_v23 = vpop.permute.xlu0 %4907 }
 0x3b3   : > { %v5349_v43 = vadd.bf16 %v9122_v14, %v3109_v18  ;;  %v5496_v45 = vadd.bf16 %v10558_v6, %v3256_v48  ;;  %2278 = vmatmul.mubr.bf16.gmra.mrb[188].mxu0 %v8921_v22  ;;  %6968 = vmatmul.mubr.bf16.gmra.mrb[196].mxu1 %v7153_v31  ;;  %v10560_v22 = vld [vmem:[#allocation24_spill] sm:$0xff] }
 0x3b4   : > { %v5350_v24 = vadd.bf16 %v9122_v14, %v3110_v57  ;;  %v5497_v54 = vadd.bf16 %v10558_v6, %v3257_v51  ;;  %2287 = vmatprep.mubr.bf16.mxu0 %v10425_v25  ;;  %6971 = vmatprep.mubr.bf16.mxu1 %v7154_v40  ;;  %v3716_v7 = vrot.slane %v10560_v22, %v8242_v17 }
 0x3b5   : > { %v9141_v61 = vmax.bf16 %v10425_v25, %v5349_v43  ;;  %v9144_v53 = vmax.bf16 %v10425_v25, %v5496_v45 }
 0x3b6   : > { %v9147_v51 = vmax.bf16 %v10425_v25, %v5350_v24  ;;  %v9150_v50 = vmax.bf16 %v10425_v25, %v5497_v54  ;;  %v2019_v31 = vpop.f32.mrb[84].mxu0  ;;  %v2509_v18 = vpop.f32.mrb[92].mxu1  ;;  %v9156_v45 = vcombine.low %v3716_v7, %v3728_v59  ;;  %v7155_v59 = vld [vmem:[%s10311_s5 + $0x198] sm:$0xff]   ;;  %v10566_v7 = vld [vmem:[#allocation26_spill] sm:$0xff] }
 0x3b7   : > { %10561 = vst [vmem:[#allocation23_spill] sm:$0xff] %v9141_v61  ;;  %10562 = vst [vmem:[#allocation24_spill] sm:$0xff] %v9144_v53  ;;  %v2021_v48 = vpop.f32.mrb[85].mxu0  ;;  %v2511_v46 = vpop.f32.mrb[93].mxu1 }
 0x3b8   : > { %10563 = vst [vmem:[#allocation128_spill] sm:$0xff] %v9150_v50  ;;  %v2023_v57 = vpop.f32.mrb[86].mxu0  ;;  %v2513_v40 = vpop.f32.mrb[94].mxu1 }
 0x3b9   : > { %v3112_v22 = vpack.c.bf16 %v2023_v57, %v2019_v31  ;;  %v3259_v24 = vpack.c.bf16 %v2513_v40, %v2509_v18  ;;  %v2025_v10 = vpop.f32.mrb[87].mxu0  ;;  %v2515_v44 = vpop.f32.mrb[95].mxu1  ;;  %v3740_v31 = vrot.slane %v10566_v7, %v8242_v17  ;;  %v4916_v18 = vrot.slane %v4908_v23, %v8242_v17 }
 0x3ba   : > { %v4920_v54 = vpop.permute.xlu1 %4919  ;;  %v3113_v6 = vpack.c.bf16 %v2025_v10, %v2021_v48  ;;  %v3260_v14 = vpack.c.bf16 %v2515_v44, %v2511_v46 }
 0x3bb   : > { %v5352_v19 = vadd.bf16 %v9156_v45, %v3112_v22  ;;  %v5499_v5 = vadd.bf16 %v10565_v30, %v3259_v24  ;;  %2288 = vmatmul.mubr.bf16.gmra.mrb[192].mxu0 %v8926_v37  ;;  %6972 = vmatmul.mubr.bf16.gmra.mrb[200].mxu1 %v7155_v59  ;;  %v4928_v37 = vrot.slane %v4920_v54, %v8242_v17 }
 0x3bc   : > { %v5353_v10 = vadd.bf16 %v9156_v45, %v3113_v6  ;;  %v5500_v44 = vadd.bf16 %v10565_v30, %v3260_v14  ;;  %2297 = vmatprep.mubr.bf16.mxu0 %v10425_v25  ;;  %6975 = vmatprep.mubr.bf16.mxu1 %v7156_v41 }
 0x3bd   : > { %v9177_v48 = vmax.bf16 %v10425_v25, %v5352_v19  ;;  %v9180_v46 = vmax.bf16 %v10425_v25, %v5499_v5  ;;  %v9192_v5 = vcombine.low %v3740_v31, %v3752_v47  ;;  %v9194_v7 = vcombine.low %v4916_v18, %v4928_v37  ;;  %v7157_v19 = vld [vmem:[%s10311_s5 + $0x1a8] sm:$0xff]   ;;  %v10570_v37 = vld [vmem:[#allocation27_spill] sm:$0xff] }
 0x3be   : > { %v9183_v6 = vmax.bf16 %v10425_v25, %v5353_v10  ;;  %v9186_v14 = vmax.bf16 %v10425_v25, %v5500_v44  ;;  %v2029_v57 = vpop.f32.mrb[88].mxu0  ;;  %v2519_v40 = vpop.f32.mrb[96].mxu1  ;;  %v3776_v18 = vrot.slane %v10570_v37, %v8242_v17 }
 0x3bf   : > { %10567 = vst [vmem:[#allocation25_spill] sm:$0xff] %v9180_v46  ;;  %v2031_v22 = vpop.f32.mrb[89].mxu0  ;;  %v2521_v24 = vpop.f32.mrb[97].mxu1  ;;  %10569 = vst [vmem:[#allocation129_spill] sm:$0xff] %v9194_v7 }
 0x3c0   : > { %10568 = vst [vmem:[#allocation26_spill] sm:$0xff] %v9186_v14  ;;  %v2033_v59 = vpop.f32.mrb[90].mxu0  ;;  %v2523_v54 = vpop.f32.mrb[98].mxu1 }
 0x3c1   : > { %v3115_v10 = vpack.c.bf16 %v2033_v59, %v2029_v57  ;;  %v3262_v41 = vpack.c.bf16 %v2523_v54, %v2519_v40  ;;  %v2035_v44 = vpop.f32.mrb[91].mxu0  ;;  %v2525_v43 = vpop.f32.mrb[99].mxu1 }
 0x3c2   : > { %v3116_v30 = vpack.c.bf16 %v2035_v44, %v2031_v22  ;;  %v3263_v53 = vpack.c.bf16 %v2525_v43, %v2521_v24  ;;  %v7158_v43 = vld [vmem:[%s10311_s5 + $0x1b0] sm:$0xff]   ;;  %v7159_v44 = vld [vmem:[%s10311_s5 + $0x1b8] sm:$0xff]  }
 0x3c3   : > { %v5355_v50 = vadd.bf16 %v9192_v5, %v3115_v10  ;;  %v5502_v61 = vadd.bf16 %v9194_v7, %v3262_v41  ;;  %2298 = vmatmul.mubr.bf16.gmra.mrb[196].mxu0 %v8961_v56  ;;  %6976 = vmatmul.mubr.bf16.gmra.mrb[204].mxu1 %v7157_v19  ;;  %v10571_v56 = vld [vmem:[#allocation28_spill] sm:$0xff] }
 0x3c4   : > { %v5356_v47 = vadd.bf16 %v9192_v5, %v3116_v30  ;;  %v5503_v31 = vadd.bf16 %v9194_v7, %v3263_v53  ;;  %2307 = vmatprep.mubr.bf16.mxu0 %v10425_v25  ;;  %6979 = vmatprep.mubr.bf16.mxu1 %v7158_v43  ;;  %v3764_v57 = vrot.slane %v10571_v56, %v8242_v17 }
 0x3c5   : > { %v9213_v40 = vmax.bf16 %v10425_v25, %v5355_v50  ;;  %v9216_v30 = vmax.bf16 %v10425_v25, %v5502_v61 }
 0x3c6   : > { %v9219_v53 = vmax.bf16 %v10425_v25, %v5356_v47  ;;  %v9222_v22 = vmax.bf16 %v10425_v25, %v5503_v31  ;;  %v2039_v24 = vpop.f32.mrb[92].mxu0  ;;  %v6873_v59 = vpop.f32.mrb[100].mxu1  ;;  %v9228_v61 = vcombine.low %v3764_v57, %v3776_v18 }
 0x3c7   : > { %10572 = vst [vmem:[#allocation27_spill] sm:$0xff] %v9213_v40  ;;  %10573 = vst [vmem:[#allocation28_spill] sm:$0xff] %v9216_v30  ;;  %v2041_v54 = vpop.f32.mrb[93].mxu0  ;;  %v2562_v19 = vpop.f32.mrb[101].mxu1 }
 0x3c8   : > { %10574 = vst [vmem:[#allocation130_spill] sm:$0xff] %v9222_v22  ;;  %v2043_v10 = vpop.f32.mrb[94].mxu0  ;;  %v6874_v41 = vpop.f32.mrb[102].mxu1 }
 0x3c9   : > { %v3118_v43 = vpack.c.bf16 %v2043_v10, %v2039_v24  ;;  %v3078_v47 = vpack.c.bf16 %v6874_v41, %v6873_v59  ;;  %v2045_v37 = vpop.f32.mrb[95].mxu0  ;;  %v2565_v56 = vpop.f32.mrb[103].mxu1  ;;  %v7160_v24 = vld [vmem:[%s10311_s5 + $0x1c0] sm:$0xff]   ;;  %v10576_v59 = vld [vmem:[#allocation30_spill] sm:$0xff] }
 0x3ca   : > { %v3119_v31 = vpack.c.bf16 %v2045_v37, %v2041_v54  ;;  %v3075_v23 = vpack.c.bf16 %v2565_v56, %v2562_v19  ;;  %v3788_v54 = vrot.slane %v10576_v59, %v8242_v17 }
 0x3cb   : > { %v5358_v46 = vadd.bf16 %v9228_v61, %v3118_v43  ;;  %v5318_v14 = vadd.bf16 %v8707_v63, %v3078_v47  ;;  %2308 = vmatmul.mubr.bf16.gmra.mrb[200].mxu0 %v8966_v15  ;;  %6980 = vmatmul.mubr.bf16.gmra.mrb[208].mxu1 %v7159_v44  ;;  %v10575_v63 = vld [vmem:[#allocation29_spill] sm:$0xff] }
 0x3cc   : > { %v5359_v18 = vadd.bf16 %v9228_v61, %v3119_v31  ;;  %v5315_v57 = vadd.bf16 %v8677_v52, %v3075_v23  ;;  %2317 = vmatprep.mubr.bf16.mxu0 %v10425_v25  ;;  %6983 = vmatprep.mubr.bf16.mxu1 %v7160_v24  ;;  %v3800_v15 = vrot.slane %v10575_v63, %v8242_v17 }
 0x3cd   : > { %v9247_v19 = vmax.bf16 %v10425_v25, %v5358_v46  ;;  %v5510_v10 = vmax.bf16 %v10425_v25, %v5318_v14  ;;  %v10577_v24 = vmax.bf16 %v8725_v35, %v8719_v28 }
 0x3ce   : > { %v9251_v52 = vmax.bf16 %v10425_v25, %v5359_v18  ;;  %v5507_v23 = vmax.bf16 %v10425_v25, %v5315_v57  ;;  %v2049_v41 = vpop.f32.mrb[96].mxu0  ;;  %v6877_v44 = vpop.f32.mrb[104].mxu1  ;;  %v9261_v18 = vcombine.low %v3788_v54, %v3800_v15  ;;  %v7161_v15 = vld [vmem:[%s10311_s5 + $0x1c8] sm:$0xff]  }
 0x3cf   : > { %v2051_v43 = vpop.f32.mrb[97].mxu0  ;;  %v2578_v47 = vpop.f32.mrb[105].mxu1  ;;  %v5708_v37 = vsel %vm5698_vm3, %v5510_v10, 4286644096  ;;  %v10578_v10 = vmax.bf16 %v8695_v62, %v8689_v39  ;;  %v10579_v39 = vld [vmem:[#allocation31_spill] sm:$0xff] }
 0x3d0   : > { %v2053_v56 = vpop.f32.mrb[98].mxu0  ;;  %v6878_v31 = vpop.f32.mrb[106].mxu1  ;;  %v5710_v46 = vmax.bf16 %v5708_v37, %v10577_v24  ;;  %v5701_v63 = vsel %vm5698_vm3, %v5507_v23, 4286644096  ;;  %v5804_v14 = vmax.bf16 %v9251_v52, %v9247_v19  ;;  %v3824_v62 = vrot.slane %v10579_v39, %v8242_v17 }
 0x3d1   : > { %v3121_v57 = vpack.c.bf16 %v2053_v56, %v2049_v41  ;;  %v3084_v59 = vpack.c.bf16 %v6878_v31, %v6877_v44  ;;  %v2055_v50 = vpop.f32.mrb[99].mxu0  ;;  %v2581_v30 = vpop.f32.mrb[107].mxu1  ;;  %v5703_v22 = vmax.bf16 %v5701_v63, %v10578_v10  ;;  %v10581_v31 = vmax.bf16 %v8794_v3, %v8788_v42 }
 0x3d2   : > { %v3122_v7 = vpack.c.bf16 %v2055_v50, %v2051_v43  ;;  %v3081_v40 = vpack.c.bf16 %v2581_v30, %v2578_v47  ;;  %5711 = vmax.xlane.bf16.xlu1 %v5710_v46  ;;  %v10580_v30 = vld [vmem:[#allocation32_spill] sm:$0xff] }
 0x3d3   : > { %v5361_v28 = vadd.bf16 %v9261_v18, %v3121_v57  ;;  %v5324_v35 = vadd.bf16 %v8775_v20, %v3084_v59  ;;  %2318 = vmatmul.mubr.bf16.gmra.mrb[204].mxu0 %v9001_v11  ;;  %6984 = vmatmul.mubr.bf16.gmra.mrb[212].mxu1 %v7161_v15  ;;  %v3812_v20 = vrot.slane %v10580_v30, %v8242_v17 }
 0x3d4   : > { %v5362_v54 = vadd.bf16 %v9261_v18, %v3122_v7  ;;  %v5321_v23 = vadd.bf16 %v8740_v60, %v3081_v40  ;;  %5704 = vmax.xlane.bf16.xlu0 %v5703_v22  ;;  %2327 = vmatprep.mubr.bf16.mxu0 %v10425_v25  ;;  %v7162_v7 = vld [vmem:[%s10311_s5 + $0x1d0] sm:$0xff]   ;;  %v10582_v15 = vmax.bf16 %v8758_v8, %v8752_v27  ;;  %v10583_v27 = vld [vmem:[#allocation33_spill] sm:$0xff] }
 0x3d5   : > { %v9280_v11 = vmax.bf16 %v10425_v25, %v5361_v28  ;;  %v5516_v50 = vmax.bf16 %v10425_v25, %v5324_v35  ;;  %6987 = vmatprep.mubr.bf16.mxu1 %v7162_v7  ;;  %v9297_v57 = vcombine.low %v3812_v20, %v3824_v62  ;;  %v7163_v62 = vld [vmem:[%s10311_s5 + $0x1d8] sm:$0xff]   ;;  %v3848_v8 = vrot.slane %v10583_v27, %v8242_v17 }
 0x3d6   : > { %v9287_v60 = vmax.bf16 %v10425_v25, %v5362_v54  ;;  %v5513_v40 = vmax.bf16 %v10425_v25, %v5321_v23  ;;  %v2059_v22 = vpop.f32.mrb[100].mxu0  ;;  %v6881_v41 = vpop.f32.mrb[108].mxu1 }
 0x3d7   : > { %v2061_v44 = vpop.f32.mrb[101].mxu0  ;;  %v2594_v43 = vpop.f32.mrb[109].mxu1  ;;  %v5722_v47 = vsel %vm5698_vm3, %v5516_v50, 4286644096  ;;  %v10584_v50 = vld [vmem:[#allocation34_spill] sm:$0xff] }
 0x3d8   : > { %v2063_v37 = vpop.f32.mrb[102].mxu0  ;;  %v6882_v56 = vpop.f32.mrb[110].mxu1  ;;  %v5724_v24 = vmax.bf16 %v5722_v47, %v10581_v31  ;;  %v5715_v46 = vsel %vm5698_vm3, %v5513_v40, 4286644096  ;;  %v5811_v63 = vmax.bf16 %v9287_v60, %v9280_v11  ;;  %v7164_v40 = vld [vmem:[%s10311_s5 + $0x1e0] sm:$0xff]  }
 0x3d9   : > { %v3124_v59 = vpack.c.bf16 %v2063_v37, %v2059_v22  ;;  %v3090_v10 = vpack.c.bf16 %v6882_v56, %v6881_v41  ;;  %v2065_v28 = vpop.f32.mrb[103].mxu0  ;;  %v2597_v35 = vpop.f32.mrb[111].mxu1  ;;  %v5717_v54 = vmax.bf16 %v5715_v46, %v10582_v15 }
 0x3da   : > { %v3125_v23 = vpack.c.bf16 %v2065_v28, %v2061_v44  ;;  %v3087_v39 = vpack.c.bf16 %v2597_v35, %v2594_v43  ;;  %5725 = vmax.xlane.bf16.xlu1 %v5724_v24  ;;  %v10585_v24 = vmax.bf16 %v8873_v34, %v8867_v1 }
 0x3db   : > { %v5364_v42 = vadd.bf16 %v9297_v57, %v3124_v59  ;;  %v5330_v3 = vadd.bf16 %v8852_v9, %v3090_v10  ;;  %2328 = vmatmul.mubr.bf16.gmra.mrb[208].mxu0 %v9006_v21  ;;  %6988 = vmatmul.mubr.bf16.gmra.mrb[216].mxu1 %v7163_v62  ;;  %v3836_v9 = vrot.slane %v10584_v50, %v8242_v17 }
 0x3dc   : > { %v5365_v30 = vadd.bf16 %v9297_v57, %v3125_v23  ;;  %v5327_v20 = vadd.bf16 %v8813_v38, %v3087_v39  ;;  %5718 = vmax.xlane.bf16.xlu0 %v5717_v54  ;;  %2337 = vmatprep.mubr.bf16.mxu0 %v10425_v25  ;;  %v10586_v39 = vmax.bf16 %v8833_v33, %v8827_v12  ;;  %v10587_v12 = vld [vmem:[#allocation35_spill] sm:$0xff] }
 0x3dd   : > { %v9316_v21 = vmax.bf16 %v10425_v25, %v5364_v42  ;;  %v5522_v7 = vmax.bf16 %v10425_v25, %v5330_v3  ;;  %6991 = vmatprep.mubr.bf16.mxu1 %v7164_v40  ;;  %v9333_v28 = vcombine.low %v3836_v9, %v3848_v8  ;;  %v3872_v33 = vrot.slane %v10587_v12, %v8242_v17  ;;  %v10588_v8 = vld [vmem:[#allocation36_spill] sm:$0xff]  ;;  %v7166_v9 = vld [vmem:[%s10311_s5 + $0x1f0] sm:$0xff]  }
 0x3de   : > { %v9323_v38 = vmax.bf16 %v10425_v25, %v5365_v30  ;;  %v5519_v22 = vmax.bf16 %v10425_v25, %v5327_v20  ;;  %v2069_v41 = vpop.f32.mrb[104].mxu0  ;;  %v6885_v44 = vpop.f32.mrb[112].mxu1  ;;  %v7165_v30 = vld [vmem:[%s10311_s5 + $0x1e8] sm:$0xff]  }
 0x3df   : > { %v2071_v43 = vpop.f32.mrb[105].mxu0  ;;  %v2610_v47 = vpop.f32.mrb[113].mxu1  ;;  %v5736_v37 = vsel %vm5698_vm3, %v5522_v7, 4286644096 }
 0x3e0   : > { %v2073_v56 = vpop.f32.mrb[106].mxu0  ;;  %v6886_v31 = vpop.f32.mrb[114].mxu1  ;;  %v5738_v46 = vmax.bf16 %v5736_v37, %v10585_v24  ;;  %v5729_v59 = vsel %vm5698_vm3, %v5519_v22, 4286644096  ;;  %v5818_v10 = vmax.bf16 %v9323_v38, %v9316_v21 }
 0x3e1   : > { %v3127_v35 = vpack.c.bf16 %v2073_v56, %v2069_v41  ;;  %v3096_v15 = vpack.c.bf16 %v6886_v31, %v6885_v44  ;;  %v2075_v54 = vpop.f32.mrb[107].mxu0  ;;  %v2613_v23 = vpop.f32.mrb[115].mxu1  ;;  %v5731_v42 = vmax.bf16 %v5729_v59, %v10586_v39  ;;  %v10589_v56 = vmax.bf16 %v8953_v13, %v8947_v16 }
 0x3e2   : > { %v3128_v3 = vpack.c.bf16 %v2075_v54, %v2071_v43  ;;  %v3093_v62 = vpack.c.bf16 %v2613_v23, %v2610_v47  ;;  %5739 = vmax.xlane.bf16.xlu1 %v5738_v46  ;;  %v10590_v39 = vmax.bf16 %v8913_v49, %v8907_v55  ;;  %v10591_v55 = vld [vmem:[#allocation37_spill] sm:$0xff] }
 0x3e3   : > { %v5367_v1 = vadd.bf16 %v9333_v28, %v3127_v35  ;;  %v5336_v34 = vadd.bf16 %v8932_v2, %v3096_v15  ;;  %2338 = vmatmul.mubr.bf16.gmra.mrb[212].mxu0 %v9041_v58  ;;  %6992 = vmatmul.mubr.bf16.gmra.mrb[220].mxu1 %v7165_v30  ;;  %v3860_v2 = vrot.slane %v10588_v8, %v8242_v17 }
 0x3e4   : > { %v5368_v20 = vadd.bf16 %v9333_v28, %v3128_v3  ;;  %v5333_v27 = vadd.bf16 %v8892_v0, %v3093_v62  ;;  %5732 = vmax.xlane.bf16.xlu0 %v5731_v42  ;;  %2347 = vmatprep.mubr.bf16.mxu0 %v10425_v25  ;;  %v3896_v49 = vrot.slane %v10591_v55, %v8242_v17 }
 0x3e5   : > { %v9352_v58 = vmax.bf16 %v10425_v25, %v5367_v1  ;;  %v5528_v50 = vmax.bf16 %v10425_v25, %v5336_v34  ;;  %6995 = vmatprep.mubr.bf16.mxu1 %v7166_v9  ;;  %v9369_v59 = vcombine.low %v3860_v2, %v3872_v33  ;;  %v7167_v1 = vld [vmem:[%s10311_s5 + $0x1f8] sm:$0xff]  }
 0x3e6   : > { %v9359_v0 = vmax.bf16 %v10425_v25, %v5368_v20  ;;  %v5525_v7 = vmax.bf16 %v10425_v25, %v5333_v27  ;;  %v2079_v40 = vpop.f32.mrb[108].mxu0  ;;  %v6889_v22 = vpop.f32.mrb[116].mxu1  ;;  %v10592_v20 = vld [vmem:[#allocation38_spill] sm:$0xff] }
 0x3e7   : > { %v2081_v41 = vpop.f32.mrb[109].mxu0  ;;  %v2626_v44 = vpop.f32.mrb[117].mxu1  ;;  %v5750_v43 = vsel %vm5698_vm3, %v5528_v50, 4286644096 }
 0x3e8   : > { %v2083_v47 = vpop.f32.mrb[110].mxu0  ;;  %v6890_v37 = vpop.f32.mrb[118].mxu1  ;;  %v5752_v31 = vmax.bf16 %v5750_v43, %v10589_v56  ;;  %v5743_v24 = vsel %vm5698_vm3, %v5525_v7, 4286644096  ;;  %v5825_v46 = vmax.bf16 %v9359_v0, %v9352_v58 }
 0x3e9   : > { %v3130_v35 = vpack.c.bf16 %v2083_v47, %v2079_v40  ;;  %v3102_v15 = vpack.c.bf16 %v6890_v37, %v6889_v22  ;;  %v2085_v54 = vpop.f32.mrb[111].mxu0  ;;  %v2629_v23 = vpop.f32.mrb[119].mxu1  ;;  %v5745_v42 = vmax.bf16 %v5743_v24, %v10590_v39  ;;  %v10593_v22 = vld [vmem:[#allocation17_spill] sm:$0xff] }
 0x3ea   : > { %v3131_v3 = vpack.c.bf16 %v2085_v54, %v2081_v41  ;;  %v3099_v62 = vpack.c.bf16 %v2629_v23, %v2626_v44  ;;  %5753 = vmax.xlane.bf16.xlu1 %v5752_v31  ;;  %v10594_v41 = vmax.bf16 %v9033_v29, %v10593_v22  ;;  %v10596_v54 = vld [vmem:[#allocation15_spill] sm:$0xff]  ;;  %v10602_v22 = vld [vmem:[#allocation125_spill] sm:$0xff] }
 0x3eb   : > { %v5370_v16 = vadd.bf16 %v9369_v59, %v3130_v35  ;;  %v5342_v13 = vadd.bf16 %v9012_v32, %v3102_v15  ;;  %2348 = vmatmul.mubr.bf16.gmra.mrb[216].mxu0 %v9046_v26  ;;  %6996 = vmatmul.mubr.bf16.gmra.mrb[224].mxu1 %v7167_v1  ;;  %v3884_v32 = vrot.slane %v10592_v20, %v8242_v17  ;;  %v10595_v15 = vld [vmem:[#allocation117_spill] sm:$0xff]  ;;  %v10599_v1 = vld [vmem:[#allocation120_spill] sm:$0xff] }
 0x3ec   : > { %v5371_v34 = vadd.bf16 %v9369_v59, %v3131_v3  ;;  %v5339_v30 = vadd.bf16 %v8972_v36, %v3099_v62  ;;  %5746 = vmax.xlane.bf16.xlu0 %v5745_v42  ;;  %2357 = vmatprep.mubr.bf16.mxu0 %v10425_v25  ;;  %v10597_v23 = vmax.bf16 %v10595_v15, %v10596_v54 }
 0x3ed   : > { %v9388_v26 = vmax.bf16 %v10425_v25, %v5370_v16  ;;  %v5534_v27 = vmax.bf16 %v10425_v25, %v5342_v13  ;;  %v9402_v37 = vcombine.low %v3884_v32, %v3896_v49  ;;  %v10598_v16 = vld [vmem:[#allocation123_spill] sm:$0xff]  ;;  %v10601_v49 = vld [vmem:[#allocation40_spill] sm:$0xff] }
 0x3ee   : > { %v9392_v12 = vmax.bf16 %v10425_v25, %v5371_v34  ;;  %v5531_v33 = vmax.bf16 %v10425_v25, %v5339_v30  ;;  %v2089_v36 = vpop.f32.mrb[112].mxu0  ;;  %v6893_v8 = vpop.f32.mrb[120].mxu1  ;;  %v10600_v30 = vld [vmem:[#allocation39_spill] sm:$0xff]  ;;  %v3908_v20 = vrot.slane %v10601_v49, %v8242_v17 }
 0x3ef   : > { %v2091_v2 = vpop.f32.mrb[113].mxu0  ;;  %v2642_v50 = vpop.f32.mrb[121].mxu1  ;;  %v5764_v9 = vsel %vm5698_vm3, %v5534_v27, 4286644096  ;;  %v3920_v55 = vrot.slane %v10600_v30, %v8242_v17 }
 0x3f0   : > { %v2093_v7 = vpop.f32.mrb[114].mxu0  ;;  %v6894_v40 = vpop.f32.mrb[122].mxu1  ;;  %v5766_v44 = vmax.bf16 %v5764_v9, %v10594_v41  ;;  %v5757_v43 = vsel %vm5698_vm3, %v5531_v33, 4286644096  ;;  %v5832_v47 = vmax.bf16 %v9392_v12, %v9388_v26  ;;  %v10603_v41 = vld [vmem:[#allocation21_spill] sm:$0xff] }
 0x3f1   : > { %v3133_v56 = vpack.c.bf16 %v2093_v7, %v2089_v36  ;;  %v3108_v31 = vpack.c.bf16 %v6894_v40, %v6893_v8  ;;  %v2095_v24 = vpop.f32.mrb[115].mxu0  ;;  %v2645_v35 = vpop.f32.mrb[123].mxu1  ;;  %v5759_v39 = vmax.bf16 %v5757_v43, %v10597_v23 }
 0x3f2   : > { %v3134_v42 = vpack.c.bf16 %v2095_v24, %v2091_v2  ;;  %v3105_v3 = vpack.c.bf16 %v2645_v35, %v2642_v50  ;;  %5767 = vmax.xlane.bf16.xlu1 %v5766_v44  ;;  %v10604_v44 = vmax.bf16 %v10602_v22, %v10603_v41  ;;  %v9432_v24 = vcombine.low %v3908_v20, %v3920_v55  ;;  %v10609_v55 = vld [vmem:[#allocation127_spill] sm:$0xff]  ;;  %v10610_v20 = vld [vmem:[#allocation41_spill] sm:$0xff] }
 0x3f3   : > { %v5373_v29 = vadd.bf16 %v9402_v37, %v3133_v56  ;;  %v5348_v62 = vadd.bf16 %v9092_v4, %v3108_v31  ;;  %2358 = vmatmul.mubr.bf16.gmra.mrb[220].mxu0 %v10598_v16 }
 0x3f4   : > { %v5374_v13 = vadd.bf16 %v9402_v37, %v3134_v42  ;;  %v5345_v34 = vadd.bf16 %v10599_v1, %v3105_v3  ;;  %5760 = vmax.xlane.bf16.xlu0 %v5759_v39  ;;  %2367 = vmatprep.mubr.bf16.mxu0 %v10425_v25  ;;  %v10605_v39 = vld [vmem:[#allocation121_spill] sm:$0xff]  ;;  %v10606_v42 = vld [vmem:[#allocation19_spill] sm:$0xff] }
 0x3f5   : > { %v9418_v32 = vmax.bf16 %v10425_v25, %v5373_v29  ;;  %v5540_v4 = vmax.bf16 %v10425_v25, %v5348_v62  ;;  %v10607_v3 = vmax.bf16 %v10605_v39, %v10606_v42 }
 0x3f6   : > { %v9422_v27 = vmax.bf16 %v10425_v25, %v5374_v13  ;;  %v5537_v33 = vmax.bf16 %v10425_v25, %v5345_v34  ;;  %v2099_v36 = vpop.f32.mrb[116].mxu0  ;;  %v6897_v8 = vpop.f32.mrb[124].mxu1  ;;  %v10608_v34 = vld [vmem:[#allocation124_spill] sm:$0xff] }
 0x3f7   : > { %v2101_v2 = vpop.f32.mrb[117].mxu0  ;;  %v2658_v50 = vpop.f32.mrb[125].mxu1  ;;  %v5778_v9 = vsel %vm5698_vm3, %v5540_v4, 4286644096  ;;  %v3944_v4 = vrot.slane %v10610_v20, %v8242_v17 }
 0x3f8   : > { %v2103_v7 = vpop.f32.mrb[118].mxu0  ;;  %v6898_v40 = vpop.f32.mrb[126].mxu1  ;;  %v5780_v43 = vmax.bf16 %v5778_v9, %v10604_v44  ;;  %v5771_v56 = vsel %vm5698_vm3, %v5537_v33, 4286644096  ;;  %v5839_v31 = vmax.bf16 %v9422_v27, %v9418_v32  ;;  %v10611_v33 = vld [vmem:[#allocation42_spill] sm:$0xff] }
 0x3f9   : > { %v3136_v35 = vpack.c.bf16 %v2103_v7, %v2099_v36  ;;  %v3114_v15 = vpack.c.bf16 %v6898_v40, %v6897_v8  ;;  %v2105_v54 = vpop.f32.mrb[119].mxu0  ;;  %v2661_v23 = vpop.f32.mrb[127].mxu1  ;;  %v5773_v29 = vmax.bf16 %v5771_v56, %v10607_v3  ;;  %v3932_v36 = vrot.slane %v10611_v33, %v8242_v17 }
 0x3fa   : > { %v3137_v62 = vpack.c.bf16 %v2105_v54, %v2101_v2  ;;  %v3111_v16 = vpack.c.bf16 %v2661_v23, %v2658_v50  ;;  %5781 = vmax.xlane.bf16.xlu1 %v5780_v43  ;;  %v10612_v56 = vmax.bf16 %v9183_v6, %v9177_v48 }
 0x3fb   : > { %v5376_v13 = vadd.bf16 %v9432_v24, %v3136_v35  ;;  %v5354_v1 = vadd.bf16 %v9156_v45, %v3114_v15  ;;  %2368 = vmatmul.mubr.bf16.gmra.mrb[224].mxu0 %v10608_v34  ;;  %v9461_v23 = vcombine.low %v3932_v36, %v3944_v4  ;;  %v10616_v4 = vld [vmem:[#allocation44_spill] sm:$0xff] }
 0x3fc   : > { %v5377_v30 = vadd.bf16 %v9432_v24, %v3137_v62  ;;  %v5351_v49 = vadd.bf16 %v10609_v55, %v3111_v16  ;;  %5774 = vmax.xlane.bf16.xlu0 %v5773_v29  ;;  %v10613_v62 = vld [vmem:[#allocation23_spill] sm:$0xff]  ;;  %v3956_v33 = vrot.slane %v10616_v4, %v8242_v17 }
 0x3fd   : > { %v9447_v8 = vmax.bf16 %v10425_v25, %v5376_v13  ;;  %v5546_v2 = vmax.bf16 %v10425_v25, %v5354_v1  ;;  %v10614_v16 = vmax.bf16 %v9147_v51, %v10613_v62 }
 0x3fe   : > { %v9451_v45 = vmax.bf16 %v10425_v25, %v5377_v30  ;;  %v5543_v50 = vmax.bf16 %v10425_v25, %v5351_v49  ;;  %v2109_v9 = vpop.f32.mrb[120].mxu0  ;;  %v6901_v7 = vpop.f32.mrb[128].mxu1  ;;  %v10615_v49 = vld [vmem:[#allocation43_spill] sm:$0xff] }
 0x3ff   : > { %v2111_v40 = vpop.f32.mrb[121].mxu0  ;;  %v2674_v22 = vpop.f32.mrb[129].mxu1  ;;  %v5792_v41 = vsel %vm5698_vm3, %v5546_v2, 4286644096  ;;  %v3968_v20 = vrot.slane %v10615_v49, %v8242_v17 }
 0x400   : > { %v2113_v44 = vpop.f32.mrb[122].mxu0  ;;  %v6902_v43 = vpop.f32.mrb[130].mxu1  ;;  %v5794_v35 = vmax.bf16 %v5792_v41, %v10612_v56  ;;  %v5785_v15 = vsel %vm5698_vm3, %v5543_v50, 4286644096  ;;  %v5846_v54 = vmax.bf16 %v9451_v45, %v9447_v8 }
 0x401   : > { %v3139_v39 = vpack.c.bf16 %v2113_v44, %v2109_v9  ;;  %v3120_v42 = vpack.c.bf16 %v6902_v43, %v6901_v7  ;;  %v2115_v3 = vpop.f32.mrb[123].mxu0  ;;  %v2677_v29 = vpop.f32.mrb[131].mxu1  ;;  %v5787_v13 = vmax.bf16 %v5785_v15, %v10614_v16 }
 0x402   : > { %v3140_v1 = vpack.c.bf16 %v2115_v3, %v2111_v40  ;;  %v3117_v34 = vpack.c.bf16 %v2677_v29, %v2674_v22  ;;  %5795 = vmax.xlane.bf16.xlu1 %v5794_v35  ;;  %v9489_v35 = vcombine.low %v3956_v33, %v3968_v20  ;;  %v10617_v29 = vld [vmem:[#allocation27_spill] sm:$0xff] }
 0x403   : > { %v5379_v48 = vadd.bf16 %v9461_v23, %v3139_v39  ;;  %v5360_v6 = vadd.bf16 %v9228_v61, %v3120_v42  ;;  %v10618_v62 = vmax.bf16 %v9219_v53, %v10617_v29 }
 0x404   : > { %v5380_v30 = vadd.bf16 %v9461_v23, %v3140_v1  ;;  %v5357_v55 = vadd.bf16 %v9192_v5, %v3117_v34  ;;  %5788 = vmax.xlane.bf16.xlu0 %v5787_v13 }
 0x405   : > { %v9475_v51 = vmax.bf16 %v10425_v25, %v5379_v48  ;;  %v5552_v36 = vmax.bf16 %v10425_v25, %v5360_v6  ;;  %v10619_v48 = vld [vmem:[#allocation45_spill] sm:$0xff] }
 0x406   : > { %v9479_v2 = vmax.bf16 %v10425_v25, %v5380_v30  ;;  %v5549_v61 = vmax.bf16 %v10425_v25, %v5357_v55  ;;  %v2119_v50 = vpop.f32.mrb[124].mxu0  ;;  %v6905_v9 = vpop.f32.mrb[132].mxu1  ;;  %v3992_v6 = vrot.slane %v10619_v48, %v8242_v17  ;;  %v10620_v30 = vld [vmem:[#allocation46_spill] sm:$0xff] }
 0x407   : > { %v2121_v5 = vpop.f32.mrb[125].mxu0  ;;  %v2690_v7 = vpop.f32.mrb[133].mxu1  ;;  %v5806_v40 = vsel %vm5698_vm3, %v5552_v36, 4286644096  ;;  %v3980_v55 = vrot.slane %v10620_v30, %v8242_v17 }
 0x408   : > { %v2123_v22 = vpop.f32.mrb[126].mxu0  ;;  %v6906_v41 = vpop.f32.mrb[134].mxu1  ;;  %v5808_v44 = vmax.bf16 %v5806_v40, %v5804_v14  ;;  %v5799_v43 = vsel %vm5698_vm3, %v5549_v61, 4286644096  ;;  %v5853_v56 = vmax.bf16 %v9479_v2, %v9475_v51 }
 0x409   : > { %v3142_v15 = vpack.c.bf16 %v2123_v22, %v2119_v50  ;;  %v3126_v39 = vpack.c.bf16 %v6906_v41, %v6905_v9  ;;  %v2125_v42 = vpop.f32.mrb[127].mxu0  ;;  %v2693_v3 = vpop.f32.mrb[135].mxu1  ;;  %v5801_v16 = vmax.bf16 %v5799_v43, %v10618_v62  ;;  %v9517_v22 = vcombine.low %v3980_v55, %v3992_v6  ;;  %v10621_v62 = vld [vmem:[#allocation47_spill] sm:$0xff] }
 0x40a   : > { %v3143_v13 = vpack.c.bf16 %v2125_v42, %v2121_v5  ;;  %v3123_v1 = vpack.c.bf16 %v2693_v3, %v2690_v7  ;;  %5809 = vmax.xlane.bf16.xlu1 %v5808_v44 }
 0x40b   : > { %v5382_v19 = vadd.bf16 %v9489_v35, %v3142_v15  ;;  %v5366_v52 = vadd.bf16 %v9297_v57, %v3126_v39 }
 0x40c   : > { %v5383_v14 = vadd.bf16 %v9489_v35, %v3143_v13  ;;  %v5363_v34 = vadd.bf16 %v9261_v18, %v3123_v1  ;;  %5802 = vmax.xlane.bf16.xlu0 %v5801_v16  ;;  %v4016_v16 = vrot.slane %v10621_v62, %v8242_v17  ;;  %v10622_v13 = vld [vmem:[#allocation48_spill] sm:$0xff] }
 0x40d   : > { %v9503_v53 = vmax.bf16 %v10425_v25, %v5382_v19  ;;  %v5558_v49 = vmax.bf16 %v10425_v25, %v5366_v52  ;;  %v4004_v1 = vrot.slane %v10622_v13, %v8242_v17 }
 0x40e   : > { %v9507_v20 = vmax.bf16 %v10425_v25, %v5383_v14  ;;  %v5555_v57 = vmax.bf16 %v10425_v25, %v5363_v34  ;;  %v2129_v4 = vpop.f32.mrb[128].mxu0  ;;  %v6909_v33 = vpop.f32.mrb[136].mxu1 }
 0x40f   : > { %v2131_v18 = vpop.f32.mrb[129].mxu0  ;;  %v2706_v36 = vpop.f32.mrb[137].mxu1  ;;  %v5820_v61 = vsel %vm5698_vm3, %v5558_v49, 4286644096 }
 0x410   : > { %v2133_v50 = vpop.f32.mrb[130].mxu0  ;;  %v6910_v9 = vpop.f32.mrb[138].mxu1  ;;  %v5822_v5 = vmax.bf16 %v5820_v61, %v5818_v10  ;;  %v5813_v7 = vsel %vm5698_vm3, %v5555_v57, 4286644096  ;;  %v5860_v40 = vmax.bf16 %v9507_v20, %v9503_v53  ;;  %v9545_v57 = vcombine.low %v4004_v1, %v4016_v16 }
 0x411   : > { %v3145_v41 = vpack.c.bf16 %v2133_v50, %v2129_v4  ;;  %v3132_v44 = vpack.c.bf16 %v6910_v9, %v6909_v33  ;;  %v2135_v43 = vpop.f32.mrb[131].mxu0  ;;  %v2709_v15 = vpop.f32.mrb[139].mxu1  ;;  %v5815_v39 = vmax.bf16 %v5813_v7, %v5811_v63  ;;  %v10623_v7 = vld [vmem:[#allocation49_spill] sm:$0xff] }
 0x412   : > { %v3146_v42 = vpack.c.bf16 %v2135_v43, %v2131_v18  ;;  %v3129_v3 = vpack.c.bf16 %v2709_v15, %v2706_v36  ;;  %5823 = vmax.xlane.bf16.xlu1 %v5822_v5 }
 0x413   : > { %v5385_v21 = vadd.bf16 %v9517_v22, %v3145_v41  ;;  %v5372_v38 = vadd.bf16 %v9369_v59, %v3132_v44  ;;  %v4040_v41 = vrot.slane %v10623_v7, %v8242_v17  ;;  %v10624_v44 = vld [vmem:[#allocation50_spill] sm:$0xff] }
 0x414   : > { %v5386_v10 = vadd.bf16 %v9517_v22, %v3146_v42  ;;  %v5369_v29 = vadd.bf16 %v9333_v28, %v3129_v3  ;;  %5816 = vmax.xlane.bf16.xlu0 %v5815_v39  ;;  %v4028_v43 = vrot.slane %v10624_v44, %v8242_v17 }
 0x415   : > { %v9531_v11 = vmax.bf16 %v10425_v25, %v5385_v21  ;;  %v5564_v60 = vmax.bf16 %v10425_v25, %v5372_v38 }
 0x416   : > { %v9535_v63 = vmax.bf16 %v10425_v25, %v5386_v10  ;;  %v5561_v59 = vmax.bf16 %v10425_v25, %v5369_v29  ;;  %v2139_v19 = vpop.f32.mrb[132].mxu0  ;;  %v6913_v52 = vpop.f32.mrb[140].mxu1  ;;  %v9573_v16 = vcombine.low %v4028_v43, %v4040_v41 }
 0x417   : > { %v2141_v28 = vpop.f32.mrb[133].mxu0  ;;  %v2722_v14 = vpop.f32.mrb[141].mxu1  ;;  %v5834_v34 = vsel %vm5698_vm3, %v5564_v60, 4286644096 }
 0x418   : > { %v2143_v48 = vpop.f32.mrb[134].mxu0  ;;  %v6914_v6 = vpop.f32.mrb[142].mxu1  ;;  %v5836_v30 = vmax.bf16 %v5834_v34, %v5832_v47  ;;  %v5827_v55 = vsel %vm5698_vm3, %v5561_v59, 4286644096  ;;  %v5867_v49 = vmax.bf16 %v9535_v63, %v9531_v11  ;;  %v10625_v34 = vld [vmem:[#allocation51_spill] sm:$0xff] }
 0x419   : > { %v3148_v4 = vpack.c.bf16 %v2143_v48, %v2139_v19  ;;  %v3138_v33 = vpack.c.bf16 %v6914_v6, %v6913_v52  ;;  %v2145_v18 = vpop.f32.mrb[135].mxu0  ;;  %v2725_v36 = vpop.f32.mrb[143].mxu1  ;;  %v5829_v61 = vmax.bf16 %v5827_v55, %v5825_v46  ;;  %v4064_v48 = vrot.slane %v10625_v34, %v8242_v17  ;;  %v10626_v6 = vld [vmem:[#allocation52_spill] sm:$0xff] }
 0x41a   : > { %v3149_v50 = vpack.c.bf16 %v2145_v18, %v2141_v28  ;;  %v3135_v9 = vpack.c.bf16 %v2725_v36, %v2722_v14  ;;  %5837 = vmax.xlane.bf16.xlu1 %v5836_v30  ;;  %v4052_v30 = vrot.slane %v10626_v6, %v8242_v17  ;;  %v10629_v6 = vld [vmem:[#allocation55_spill] sm:$0xff] }
 0x41b   : > { %v5388_v26 = vadd.bf16 %v9545_v57, %v3148_v4  ;;  %v5378_v12 = vadd.bf16 %v9432_v24, %v3138_v33 }
 0x41c   : > { %v5389_v47 = vadd.bf16 %v9545_v57, %v3149_v50  ;;  %v5375_v5 = vadd.bf16 %v9402_v37, %v3135_v9  ;;  %5830 = vmax.xlane.bf16.xlu0 %v5829_v61 }
 0x41d   : > { %v9559_v58 = vmax.bf16 %v10425_v25, %v5388_v26  ;;  %v5570_v0 = vmax.bf16 %v10425_v25, %v5378_v12  ;;  %v6684_v12 = vcombine.low %v4052_v30, %v4064_v48  ;;  %v4112_v30 = vrot.slane %v10629_v6, %v8242_v17 }
 0x41e   : > { %v9563_v46 = vmax.bf16 %v10425_v25, %v5389_v47  ;;  %v5567_v24 = vmax.bf16 %v10425_v25, %v5375_v5  ;;  %v2149_v15 = vpop.f32.mrb[136].mxu0  ;;  %v6917_v39 = vpop.f32.mrb[144].mxu1 }
 0x41f   : > { %v2151_v37 = vpop.f32.mrb[137].mxu0  ;;  %v2738_v42 = vpop.f32.mrb[145].mxu1  ;;  %v5848_v3 = vsel %vm5698_vm3, %v5570_v0, 4286644096 }
 0x420   : > { %v2153_v21 = vpop.f32.mrb[138].mxu0  ;;  %v6918_v38 = vpop.f32.mrb[146].mxu1  ;;  %v5850_v10 = vmax.bf16 %v5848_v3, %v5846_v54  ;;  %v5841_v29 = vsel %vm5698_vm3, %v5567_v24, 4286644096  ;;  %v5874_v62 = vmax.bf16 %v9563_v46, %v9559_v58  ;;  %v10627_v46 = vld [vmem:[#allocation53_spill] sm:$0xff] }
 0x421   : > { %v3151_v13 = vpack.c.bf16 %v2153_v21, %v2149_v15  ;;  %v3144_v1 = vpack.c.bf16 %v6918_v38, %v6917_v39  ;;  %v2155_v60 = vpop.f32.mrb[139].mxu0  ;;  %v2741_v59 = vpop.f32.mrb[147].mxu1  ;;  %v5843_v19 = vmax.bf16 %v5841_v29, %v5839_v31  ;;  %v4088_v24 = vrot.slane %v10627_v46, %v8242_v17  ;;  %v10628_v15 = vld [vmem:[#allocation54_spill] sm:$0xff] }
 0x422   : > { %v3152_v52 = vpack.c.bf16 %v2155_v60, %v2151_v37  ;;  %v3141_v28 = vpack.c.bf16 %v2741_v59, %v2738_v42  ;;  %5851 = vmax.xlane.bf16.xlu1 %v5850_v10  ;;  %v4076_v39 = vrot.slane %v10628_v15, %v8242_v17 }
 0x423   : > { %v5391_v8 = vadd.bf16 %v9573_v16, %v3151_v13  ;;  %v5384_v45 = vadd.bf16 %v9489_v35, %v3144_v1 }
 0x424   : > { %v5392_v54 = vadd.bf16 %v9573_v16, %v3152_v52  ;;  %v5381_v14 = vadd.bf16 %v9461_v23, %v3141_v28  ;;  %5844 = vmax.xlane.bf16.xlu0 %v5843_v19  ;;  %v6685_v60 = vcombine.low %v4076_v39, %v4088_v24  ;;  %v10632_v24 = vld [vmem:[#allocation58_spill] sm:$0xff] }
 0x425   : > { %v9587_v32 = vmax.bf16 %v10425_v25, %v5391_v8  ;;  %v5576_v27 = vmax.bf16 %v10425_v25, %v5384_v45  ;;  %v4124_v15 = vrot.slane %v10632_v24, %v8242_v17 }
 0x426   : > { %v9591_v31 = vmax.bf16 %v10425_v25, %v5392_v54  ;;  %v5573_v35 = vmax.bf16 %v10425_v25, %v5381_v14  ;;  %v2159_v55 = vpop.f32.mrb[140].mxu0  ;;  %v6921_v4 = vpop.f32.mrb[148].mxu1 }
 0x427   : > { %v2161_v23 = vpop.f32.mrb[141].mxu0  ;;  %v2754_v33 = vpop.f32.mrb[149].mxu1  ;;  %v5862_v18 = vsel %vm5698_vm3, %v5576_v27, 4286644096  ;;  %v10630_v27 = vld [vmem:[#allocation56_spill] sm:$0xff] }
 0x428   : > { %v2163_v36 = vpop.f32.mrb[142].mxu0  ;;  %v6922_v61 = vpop.f32.mrb[150].mxu1  ;;  %v5864_v50 = vmax.bf16 %v5862_v18, %v5860_v40  ;;  %v5855_v9 = vsel %vm5698_vm3, %v5573_v35, 4286644096  ;;  %v5881_v26 = vmax.bf16 %v9591_v31, %v9587_v32  ;;  %v4100_v35 = vrot.slane %v10630_v27, %v8242_v17 }
 0x429   : > { %v3154_v47 = vpack.c.bf16 %v2163_v36, %v2159_v55  ;;  %v3150_v5 = vpack.c.bf16 %v6922_v61, %v6921_v4  ;;  %v2165_v7 = vpop.f32.mrb[143].mxu0  ;;  %v2757_v41 = vpop.f32.mrb[151].mxu1  ;;  %v5857_v44 = vmax.bf16 %v5855_v9, %v5853_v56 }
 0x42a   : > { %v3155_v43 = vpack.c.bf16 %v2165_v7, %v2161_v23  ;;  %v3147_v58 = vpack.c.bf16 %v2757_v41, %v2754_v33  ;;  %5865 = vmax.xlane.bf16.xlu1 %v5864_v50 }
 0x42b   : > { %v5394_v0 = vadd.bf16 %v6684_v12, %v3154_v47  ;;  %v5390_v53 = vadd.bf16 %v9545_v57, %v3150_v5  ;;  %v6686_v47 = vcombine.low %v4100_v35, %v4112_v30 }
 0x42c   : > { %v5395_v20 = vadd.bf16 %v6684_v12, %v3155_v43  ;;  %v5387_v40 = vadd.bf16 %v9517_v22, %v3147_v58  ;;  %5858 = vmax.xlane.bf16.xlu0 %v5857_v44 }
 0x42d   : > { %v5586_v37 = vmax.bf16 %v10425_v25, %v5394_v0  ;;  %v5582_v51 = vmax.bf16 %v10425_v25, %v5390_v53 }
 0x42e   : > { %v5587_v2 = vmax.bf16 %v10425_v25, %v5395_v20  ;;  %v5579_v56 = vmax.bf16 %v10425_v25, %v5387_v40  ;;  %v2169_v42 = vpop.f32.mrb[144].mxu0  ;;  %v6925_v57 = vpop.f32.mrb[152].mxu1  ;;  %v10631_v40 = vld [vmem:[#allocation57_spill] sm:$0xff] }
 0x42f   : > { %v2171_v3 = vpop.f32.mrb[145].mxu0  ;;  %v2770_v21 = vpop.f32.mrb[153].mxu1  ;;  %v5876_v22 = vsel %vm5698_vm3, %v5582_v51, 4286644096  ;;  %v4136_v46 = vrot.slane %v10631_v40, %v8242_v17 }
 0x430   : > { %v2173_v38 = vpop.f32.mrb[146].mxu0  ;;  %v6926_v10 = vpop.f32.mrb[154].mxu1  ;;  %v5878_v29 = vmax.bf16 %v5876_v22, %v5874_v62  ;;  %v5869_v13 = vsel %vm5698_vm3, %v5579_v56, 4286644096  ;;  %v5888_v1 = vmax.bf16 %v5587_v2, %v5586_v37 }
 0x431   : > { %v3157_v59 = vpack.c.bf16 %v2173_v38, %v2169_v42  ;;  %v3156_v19 = vpack.c.bf16 %v6926_v10, %v6925_v57  ;;  %v2175_v52 = vpop.f32.mrb[147].mxu0  ;;  %v2773_v28 = vpop.f32.mrb[155].mxu1  ;;  %v5871_v8 = vmax.bf16 %v5869_v13, %v5867_v49 }
 0x432   : > { %v3158_v45 = vpack.c.bf16 %v2175_v52, %v2171_v3  ;;  %v3153_v54 = vpack.c.bf16 %v2773_v28, %v2770_v21  ;;  %5879 = vmax.xlane.bf16.xlu1 %v5878_v29  ;;  %v6687_v3 = vcombine.low %v4124_v15, %v4136_v46 }
 0x433   : > { %v5397_v14 = vadd.bf16 %v6685_v60, %v3157_v59  ;;  %v5396_v34 = vadd.bf16 %v6684_v12, %v3156_v19 }
 0x434   : > { %v5398_v48 = vadd.bf16 %v6685_v60, %v3158_v45  ;;  %v5393_v62 = vadd.bf16 %v9573_v16, %v3153_v54  ;;  %5872 = vmax.xlane.bf16.xlu0 %v5871_v8  ;;  %v10633_v45 = vld [vmem:[#allocation59_spill] sm:$0xff] }
 0x435   : > { %v5589_v55 = vmax.bf16 %v10425_v25, %v5397_v14  ;;  %v5588_v11 = vmax.bf16 %v10425_v25, %v5396_v34  ;;  %v4160_v54 = vrot.slane %v10633_v45, %v8242_v17  ;;  %v10634_v14 = vld [vmem:[#allocation60_spill] sm:$0xff] }
 0x436   : > { %v5590_v63 = vmax.bf16 %v10425_v25, %v5398_v48  ;;  %v5585_v49 = vmax.bf16 %v10425_v25, %v5393_v62  ;;  %v2179_v4 = vpop.f32.mrb[148].mxu0  ;;  %v6929_v23 = vpop.f32.mrb[156].mxu1  ;;  %v4148_v34 = vrot.slane %v10634_v14, %v8242_v17 }
 0x437   : > { %v2181_v33 = vpop.f32.mrb[149].mxu0  ;;  %v2786_v18 = vpop.f32.mrb[157].mxu1  ;;  %v5890_v16 = vsel %vm5698_vm3, %v5588_v11, 4286644096 }
 0x438   : > { %v2183_v36 = vpop.f32.mrb[150].mxu0  ;;  %v6930_v61 = vpop.f32.mrb[158].mxu1  ;;  %v5892_v50 = vmax.bf16 %v5890_v16, %v5888_v1  ;;  %v5883_v9 = vsel %vm5698_vm3, %v5585_v49, 4286644096  ;;  %v5895_v12 = vmax.bf16 %v5590_v63, %v5589_v55  ;;  %v6688_v63 = vcombine.low %v4148_v34, %v4160_v54 }
 0x439   : > { %v3160_v5 = vpack.c.bf16 %v2183_v36, %v2179_v4  ;;  %v3162_v7 = vpack.c.bf16 %v6930_v61, %v6929_v23  ;;  %v2185_v41 = vpop.f32.mrb[151].mxu0  ;;  %v2789_v44 = vpop.f32.mrb[159].mxu1  ;;  %v5885_v43 = vmax.bf16 %v5883_v9, %v5881_v26 }
 0x43a   : > { %v3161_v58 = vpack.c.bf16 %v2185_v41, %v2181_v33  ;;  %v3159_v0 = vpack.c.bf16 %v2789_v44, %v2786_v18  ;;  %5893 = vmax.xlane.bf16.xlu1 %v5892_v50  ;;  %v10635_v41 = vld [vmem:[#allocation61_spill] sm:$0xff] }
 0x43b   : > { %v5400_v53 = vadd.bf16 %v6686_v47, %v3160_v5  ;;  %v5402_v20 = vadd.bf16 %v6686_v47, %v3162_v7  ;;  %v4184_v44 = vrot.slane %v10635_v41, %v8242_v17 }
 0x43c   : > { %v5401_v39 = vadd.bf16 %v6686_v47, %v3161_v58  ;;  %v5399_v37 = vadd.bf16 %v6685_v60, %v3159_v0  ;;  %5886 = vmax.xlane.bf16.xlu0 %v5885_v43  ;;  %v10636_v43 = vld [vmem:[#allocation62_spill] sm:$0xff] }
 0x43d   : > { %v5592_v51 = vmax.bf16 %v10425_v25, %v5400_v53  ;;  %v5594_v2 = vmax.bf16 %v10425_v25, %v5402_v20  ;;  %v4172_v58 = vrot.slane %v10636_v43, %v8242_v17 }
 0x43e   : > { %v5593_v32 = vmax.bf16 %v10425_v25, %v5401_v39  ;;  %v5591_v31 = vmax.bf16 %v10425_v25, %v5399_v37  ;;  %v2189_v26 = vpop.f32.mrb[152].mxu0  ;;  %v6933_v56 = vpop.f32.mrb[160].mxu1 }
 0x43f   : > { %v2191_v42 = vpop.f32.mrb[153].mxu0  ;;  %v2802_v57 = vpop.f32.mrb[161].mxu1  ;;  %v5904_v19 = vsel %vm5698_vm3, %v5594_v2, 4286644096  ;;  %v6689_v39 = vcombine.low %v4172_v58, %v4184_v44 }
 0x440   : > { %v2193_v21 = vpop.f32.mrb[154].mxu0  ;;  %v6934_v22 = vpop.f32.mrb[162].mxu1  ;;  %v5897_v38 = vsel %vm5698_vm3, %v5591_v31, 4286644096  ;;  %v5902_v10 = vmax.bf16 %v5593_v32, %v5592_v51 }
 0x441   : > { %v3163_v29 = vpack.c.bf16 %v2193_v21, %v2189_v26  ;;  %v3168_v13 = vpack.c.bf16 %v6934_v22, %v6933_v56  ;;  %v2195_v1 = vpop.f32.mrb[155].mxu0  ;;  %v2805_v60 = vpop.f32.mrb[163].mxu1  ;;  %v5899_v59 = vmax.bf16 %v5897_v38, %v5895_v12 }
 0x442   : > { %v3164_v52 = vpack.c.bf16 %v2195_v1, %v2191_v42  ;;  %v3165_v28 = vpack.c.bf16 %v2805_v60, %v2802_v57  ;;  %v5906_v8 = vmax.bf16 %v5904_v19, %v5902_v10  ;;  %v10638_v1 = vld [vmem:[#allocation64_spill] sm:$0xff] }
 0x443   : > { %v5403_v48 = vadd.bf16 %v6687_v3, %v3163_v29  ;;  %v5408_v36 = vadd.bf16 %v6688_v63, %v3168_v13  ;;  %v10637_v29 = vld [vmem:[#allocation63_spill] sm:$0xff]  ;;  %v4196_v60 = vrot.slane %v10638_v1, %v8242_v17 }
 0x444   : > { %v5404_v62 = vadd.bf16 %v6687_v3, %v3164_v52  ;;  %v5405_v6 = vadd.bf16 %v6687_v3, %v3165_v28  ;;  %5900 = vmax.xlane.bf16.xlu0 %v5899_v59  ;;  %5907 = vmax.xlane.bf16.xlu1 %v5906_v8  ;;  %v4208_v13 = vrot.slane %v10637_v29, %v8242_v17 }
 0x445   : > { %v5595_v30 = vmax.bf16 %v10425_v25, %v5403_v48  ;;  %v5600_v20 = vmax.bf16 %v10425_v25, %v5408_v36  ;;  %v10640_v36 = vld [vmem:[#allocation66_spill] sm:$0xff] }
 0x446   : > { %v5596_v27 = vmax.bf16 %v10425_v25, %v5404_v62  ;;  %v5597_v35 = vmax.bf16 %v10425_v25, %v5405_v6  ;;  %v2199_v55 = vpop.f32.mrb[156].mxu0  ;;  %v6937_v11 = vpop.f32.mrb[164].mxu1  ;;  %v6690_v14 = vcombine.low %v4196_v60, %v4208_v13 }
 0x447   : > { %v2201_v49 = vpop.f32.mrb[157].mxu0  ;;  %v2818_v4 = vpop.f32.mrb[165].mxu1  ;;  %v5918_v21 = vsel %vm5698_vm3, %v5600_v20, 4286644096 }
 0x448   : > { %v2203_v23 = vpop.f32.mrb[158].mxu0  ;;  %v6938_v33 = vpop.f32.mrb[166].mxu1  ;;  %v5909_v18 = vmax.bf16 %v5596_v27, %v5595_v30  ;;  %v5911_v16 = vsel %vm5698_vm3, %v5597_v35, 4286644096 }
 0x449   : > { %v3166_v61 = vpack.c.bf16 %v2203_v23, %v2199_v55  ;;  %v3174_v50 = vpack.c.bf16 %v6938_v33, %v6937_v11  ;;  %v2205_v9 = vpop.f32.mrb[159].mxu0  ;;  %v2821_v12 = vpop.f32.mrb[167].mxu1 }
 0x44a   : > { %v3167_v47 = vpack.c.bf16 %v2205_v9, %v2201_v49  ;;  %v3171_v5 = vpack.c.bf16 %v2821_v12, %v2818_v4  ;;  %v5913_v7 = vmax.bf16 %v5911_v16, %v5909_v18  ;;  %v10639_v18 = vld [vmem:[#allocation65_spill] sm:$0xff] }
 0x44b   : > { %v5406_v0 = vadd.bf16 %v6688_v63, %v3166_v61  ;;  %v5414_v27 = vadd.bf16 %v6690_v14, %v3174_v50  ;;  %v4232_v16 = vrot.slane %v10639_v18, %v8242_v17  ;;  %v4220_v61 = vrot.slane %v10640_v36, %v8242_v17 }
 0x44c   : > { %v5407_v53 = vadd.bf16 %v6688_v63, %v3167_v47  ;;  %5914 = vmax.xlane.bf16.xlu0 %v5913_v7  ;;  %v5411_v26 = vadd.bf16 %v6689_v39, %v3171_v5 }
 0x44d   : > { %v5598_v40 = vmax.bf16 %v10425_v25, %v5406_v0  ;;  %v5606_v12 = vmax.bf16 %v10425_v25, %v5414_v27  ;;  %v6691_v44 = vcombine.low %v4220_v61, %v4232_v16 }
 0x44e   : > { %v5599_v46 = vmax.bf16 %v10425_v25, %v5407_v53  ;;  %v2209_v24 = vpop.f32.mrb[160].mxu0  ;;  %v9658_v15 = vpop.f32.mrb[168].mxu1  ;;  %v5603_v52 = vmax.bf16 %v10425_v25, %v5411_v26 }
 0x44f   : > { %v2211_v37 = vpop.f32.mrb[161].mxu0  ;;  %v2834_v51 = vpop.f32.mrb[169].mxu1 }
 0x450   : > { %v2213_v2 = vpop.f32.mrb[162].mxu0  ;;  %v9660_v32 = vpop.f32.mrb[170].mxu1  ;;  %v5916_v31 = vmax.bf16 %v5599_v46, %v5598_v40  ;;  %v5925_v49 = vsel %vm5698_vm3, %v5603_v52, 4286644096 }
 0x451   : > { %v3169_v56 = vpack.c.bf16 %v2213_v2, %v2209_v24  ;;  %v3180_v42 = vpack.c.bf16 %v9660_v32, %v9658_v15  ;;  %v2215_v57 = vpop.f32.mrb[163].mxu0  ;;  %v2837_v3 = vpop.f32.mrb[171].mxu1  ;;  %v10644_v32 = vld [vmem:[#allocation70_spill] sm:$0xff] }
 0x452   : > { %v3170_v22 = vpack.c.bf16 %v2215_v57, %v2211_v37  ;;  %v3177_v38 = vpack.c.bf16 %v2837_v3, %v2834_v51  ;;  %v5920_v10 = vmax.bf16 %v5918_v21, %v5916_v31  ;;  %v5932_v51 = vsel %vm5698_vm3, %v5606_v12, 4286644096  ;;  %v10642_v3 = vld [vmem:[#allocation68_spill] sm:$0xff] }
 0x453   : > { %v5409_v59 = vadd.bf16 %v6689_v39, %v3169_v56  ;;  %v10641_v56 = vld [vmem:[#allocation67_spill] sm:$0xff]  ;;  %v4244_v21 = vrot.slane %v10642_v3, %v8242_v17 }
 0x454   : > { %v5410_v19 = vadd.bf16 %v6689_v39, %v3170_v22  ;;  %5921 = vmax.xlane.bf16.xlu1 %v5920_v10  ;;  %v5417_v40 = vadd.bf16 %v6691_v44, %v3177_v38  ;;  %v4256_v57 = vrot.slane %v10641_v56, %v8242_v17 }
 0x455   : > { %v5601_v28 = vmax.bf16 %v10425_v25, %v5409_v59 }
 0x456   : > { %v5602_v8 = vmax.bf16 %v10425_v25, %v5410_v19  ;;  %v2219_v45 = vpop.f32.mrb[164].mxu0  ;;  %v9672_v54 = vpop.f32.mrb[172].mxu1  ;;  %v5609_v1 = vmax.bf16 %v10425_v25, %v5417_v40 }
 0x457   : > { %v2221_v34 = vpop.f32.mrb[165].mxu0  ;;  %v9674_v48 = vpop.f32.mrb[173].mxu1 }
 0x458   : > { %v2223_v62 = vpop.f32.mrb[166].mxu0  ;;  %v9676_v6 = vpop.f32.mrb[174].mxu1  ;;  %v5923_v30 = vmax.bf16 %v5602_v8, %v5601_v28  ;;  %v5939_v16 = vsel %vm5698_vm3, %v5609_v1, 4286644096 }
 0x459   : > { %v3172_v35 = vpack.c.bf16 %v2223_v62, %v2219_v45  ;;  %v3186_v55 = vpack.c.bf16 %v9676_v6, %v9672_v54  ;;  %v2225_v11 = vpop.f32.mrb[167].mxu0  ;;  %v9680_v63 = vpop.f32.mrb[175].mxu1  ;;  %v10648_v6 = vld [vmem:[#allocation74_spill] sm:$0xff] }
 0x45a   : > { %v3173_v4 = vpack.c.bf16 %v2225_v11, %v2221_v34  ;;  %v3183_v23 = vpack.c.bf16 %v9680_v63, %v9674_v48  ;;  %v5927_v33 = vmax.bf16 %v5925_v49, %v5923_v30  ;;  %v10646_v63 = vld [vmem:[#allocation72_spill] sm:$0xff] }
 0x45b   : > { %v5412_v50 = vadd.bf16 %v6690_v14, %v3172_v35 }
 0x45c   : > { %v5413_v9 = vadd.bf16 %v6690_v14, %v3173_v4  ;;  %5928 = vmax.xlane.bf16.xlu0 %v5927_v33  ;;  %v6692_v14 = vcombine.low %v4244_v21, %v4256_v57 }
 0x45d   : > { %v5604_v47 = vmax.bf16 %v10425_v25, %v5412_v50 }
 0x45e   : > { %v5605_v5 = vmax.bf16 %v10425_v25, %v5413_v9  ;;  %v2229_v7 = vpop.f32.mrb[168].mxu0  ;;  %v9692_v41 = vpop.f32.mrb[176].mxu1  ;;  %v5420_v11 = vadd.bf16 %v6692_v14, %v3180_v42  ;;  %v10643_v9 = vld [vmem:[#allocation69_spill] sm:$0xff]  ;;  %v4268_v42 = vrot.slane %v10644_v32, %v8242_v17 }
 0x45f   : > { %v2231_v43 = vpop.f32.mrb[169].mxu0  ;;  %v9694_v58 = vpop.f32.mrb[177].mxu1  ;;  %v4280_v15 = vrot.slane %v10643_v9, %v8242_v17 }
 0x460   : > { %v2233_v0 = vpop.f32.mrb[170].mxu0  ;;  %v9697_v53 = vpop.f32.mrb[178].mxu1  ;;  %v5930_v20 = vmax.bf16 %v5605_v5, %v5604_v47 }
 0x461   : > { %v3175_v46 = vpack.c.bf16 %v2233_v0, %v2229_v7  ;;  %v3192_v24 = vpack.c.bf16 %v9697_v53, %v9692_v41  ;;  %v2235_v39 = vpop.f32.mrb[171].mxu0  ;;  %v9701_v37 = vpop.f32.mrb[179].mxu1  ;;  %v10654_v41 = vld [vmem:[#allocation93_spill] sm:$0xff] }
 0x462   : > { %v3176_v2 = vpack.c.bf16 %v2235_v39, %v2231_v43  ;;  %v3189_v31 = vpack.c.bf16 %v9701_v37, %v9694_v58  ;;  %v5934_v26 = vmax.bf16 %v5932_v51, %v5930_v20  ;;  %v5612_v43 = vmax.bf16 %v10425_v25, %v5420_v11  ;;  %v10650_v58 = vld [vmem:[#allocation76_spill] sm:$0xff] }
 0x463   : > { %v5415_v22 = vadd.bf16 %v6691_v44, %v3175_v46  ;;  %v5712_v38 = vpop.xlane.xlu1 %5711  ;;  %v4340_v37 = vrot.slane %v10650_v58, %v8242_v17  ;;  %v10655_v58 = vld [vmem:[#allocation92_spill] sm:$0xff] }
 0x464   : > { %v5416_v10 = vadd.bf16 %v6691_v44, %v3176_v2  ;;  %v6149_v29 = vunpack.c.l.bf16 %v5712_v38  ;;  %v6150_v13 = vunpack.c.h.bf16 %v5712_v38  ;;  %5935 = vmax.xlane.bf16.xlu1 %v5934_v26  ;;  %v6693_v26 = vcombine.low %v4268_v42, %v4280_v15 }
 0x465   : > { %v5607_v60 = vmax.bf16 %v10425_v25, %v5415_v22  ;;  %v5705_v59 = vpop.xlane.xlu0 %5704 }
 0x466   : > { %v5608_v19 = vmax.bf16 %v10425_v25, %v5416_v10  ;;  %6278 = vst.msk [vmem:[%s9709_s23 + $0x10] sm:$0xff] %vm6275_vm4, %v6149_v29  ;;  %6279 = vst.msk [vmem:[%s9709_s23 + $0x18] sm:$0xff] %vm6275_vm4, %v6150_v13  ;;  %v6147_v52 = vunpack.c.l.bf16 %v5705_v59  ;;  %v6148_v28 = vunpack.c.h.bf16 %v5705_v59  ;;  %v2239_v8 = vpop.f32.mrb[172].mxu0  ;;  %v9722_v45 = vpop.f32.mrb[180].mxu1  ;;  %v5423_v38 = vadd.bf16 %v6693_v26, %v3183_v23 }
 0x467   : > { %v2241_v34 = vpop.f32.mrb[173].mxu0  ;;  %v9724_v62 = vpop.f32.mrb[181].mxu1  ;;  %v4292_v23 = vrot.slane %v10646_v63, %v8242_v17 }
 0x468   : > { %6276 = vst.msk [vmem:[%s9709_s23] sm:$0xff] %vm6275_vm4, %v6147_v52  ;;  %6277 = vst.msk [vmem:[%s9709_s23 + $0x8] sm:$0xff] %vm6275_vm4, %v6148_v28  ;;  %v2243_v30 = vpop.f32.mrb[174].mxu0  ;;  %v9730_v27 = vpop.f32.mrb[182].mxu1  ;;  %v5937_v35 = vmax.bf16 %v5608_v19, %v5607_v60  ;;  %v5946_v60 = vsel %vm5698_vm3, %v5612_v43, 4286644096  ;;  %v5615_v11 = vmax.bf16 %v10425_v25, %v5423_v38 }
 0x469   : > { %v3178_v49 = vpack.c.bf16 %v2243_v30, %v2239_v8  ;;  %v3198_v4 = vpack.c.bf16 %v9730_v27, %v9722_v45  ;;  %v2245_v33 = vpop.f32.mrb[175].mxu0  ;;  %v9737_v18 = vpop.f32.mrb[183].mxu1  ;;  %v10645_v28 = vld [vmem:[#allocation71_spill] sm:$0xff] }
 0x46a   : > { %v3179_v36 = vpack.c.bf16 %v2245_v33, %v2241_v34  ;;  %v3195_v61 = vpack.c.bf16 %v9737_v18, %v9724_v62  ;;  %v5941_v50 = vmax.bf16 %v5939_v16, %v5937_v35  ;;  %v4304_v48 = vrot.slane %v10645_v28, %v8242_v17 }
 0x46b   : > { %v5418_v12 = vadd.bf16 %v6692_v14, %v3178_v49  ;;  %v5726_v47 = vpop.xlane.xlu1 %5725 }
 0x46c   : > { %v5419_v5 = vadd.bf16 %v6692_v14, %v3179_v36  ;;  %v6153_v7 = vunpack.c.l.bf16 %v5726_v47  ;;  %v6154_v44 = vunpack.c.h.bf16 %v5726_v47  ;;  %5942 = vmax.xlane.bf16.xlu0 %v5941_v50  ;;  %v6694_v32 = vcombine.low %v4292_v23, %v4304_v48 }
 0x46d   : > { %v5610_v0 = vmax.bf16 %v10425_v25, %v5418_v12  ;;  %v5719_v20 = vpop.xlane.xlu0 %5718 }
 0x46e   : > { %v5611_v40 = vmax.bf16 %v10425_v25, %v5419_v5  ;;  %6282 = vst.msk [vmem:[%s9709_s23 + $0x30] sm:$0xff] %vm6275_vm4, %v6153_v7  ;;  %6283 = vst.msk [vmem:[%s9709_s23 + $0x38] sm:$0xff] %vm6275_vm4, %v6154_v44  ;;  %v6151_v46 = vunpack.c.l.bf16 %v5719_v20  ;;  %v6152_v39 = vunpack.c.h.bf16 %v5719_v20  ;;  %v2249_v51 = vpop.f32.mrb[176].mxu0  ;;  %v9753_v2 = vpop.f32.mrb[184].mxu1  ;;  %v5426_v44 = vadd.bf16 %v6694_v32, %v3186_v55 }
 0x46f   : > { %v2251_v56 = vpop.f32.mrb[177].mxu0  ;;  %v9755_v57 = vpop.f32.mrb[185].mxu1  ;;  %v4316_v55 = vrot.slane %v10648_v6, %v8242_v17 }
 0x470   : > { %6280 = vst.msk [vmem:[%s9709_s23 + $0x20] sm:$0xff] %vm6275_vm4, %v6151_v46  ;;  %6281 = vst.msk [vmem:[%s9709_s23 + $0x28] sm:$0xff] %vm6275_vm4, %v6152_v39  ;;  %v2253_v3 = vpop.f32.mrb[178].mxu0  ;;  %v9761_v21 = vpop.f32.mrb[186].mxu1  ;;  %v5944_v22 = vmax.bf16 %v5611_v40, %v5610_v0  ;;  %v5953_v46 = vsel %vm5698_vm3, %v5615_v11, 4286644096 }
 0x471   : > { %v3181_v10 = vpack.c.bf16 %v2253_v3, %v2249_v51  ;;  %v3204_v29 = vpack.c.bf16 %v9761_v21, %v9753_v2  ;;  %v2255_v13 = vpop.f32.mrb[179].mxu0  ;;  %v9768_v1 = vpop.f32.mrb[187].mxu1 }
 0x472   : > { %v3182_v59 = vpack.c.bf16 %v2255_v13, %v2251_v56  ;;  %v3201_v19 = vpack.c.bf16 %v9768_v1, %v9755_v57  ;;  %v5948_v52 = vmax.bf16 %v5946_v60, %v5944_v22  ;;  %v10647_v56 = vld [vmem:[#allocation73_spill] sm:$0xff]  ;;  %v5618_v60 = vmax.bf16 %v10425_v25, %v5426_v44  ;;  %v10649_v44 = vld [vmem:[#allocation75_spill] sm:$0xff] }
 0x473   : > { %v5421_v8 = vadd.bf16 %v6693_v26, %v3181_v10  ;;  %v5740_v14 = vpop.xlane.xlu1 %5739  ;;  %v4328_v54 = vrot.slane %v10647_v56, %v8242_v17 }
 0x474   : > { %v5422_v34 = vadd.bf16 %v6693_v26, %v3182_v59  ;;  %v6157_v30 = vunpack.c.l.bf16 %v5740_v14  ;;  %v6158_v35 = vunpack.c.h.bf16 %v5740_v14  ;;  %5949 = vmax.xlane.bf16.xlu1 %v5948_v52 }
 0x475   : > { %v5613_v49 = vmax.bf16 %v10425_v25, %v5421_v8  ;;  %v5733_v33 = vpop.xlane.xlu0 %5732  ;;  %v6695_v14 = vcombine.low %v4316_v55, %v4328_v54 }
 0x476   : > { %v5614_v16 = vmax.bf16 %v10425_v25, %v5422_v34  ;;  %6286 = vst.msk [vmem:[%s9709_s23 + $0x50] sm:$0xff] %vm6275_vm4, %v6157_v30  ;;  %6287 = vst.msk [vmem:[%s9709_s23 + $0x58] sm:$0xff] %vm6275_vm4, %v6158_v35  ;;  %v6155_v36 = vunpack.c.l.bf16 %v5733_v33  ;;  %v6156_v50 = vunpack.c.h.bf16 %v5733_v33  ;;  %v2259_v9 = vpop.f32.mrb[180].mxu0  ;;  %v9784_v15 = vpop.f32.mrb[188].mxu1 }
 0x477   : > { %v2261_v42 = vpop.f32.mrb[181].mxu0  ;;  %v9786_v12 = vpop.f32.mrb[189].mxu1  ;;  %v5429_v33 = vadd.bf16 %v6695_v14, %v3189_v31 }
 0x478   : > { %6284 = vst.msk [vmem:[%s9709_s23 + $0x40] sm:$0xff] %vm6275_vm4, %v6155_v36  ;;  %6285 = vst.msk [vmem:[%s9709_s23 + $0x48] sm:$0xff] %vm6275_vm4, %v6156_v50  ;;  %v2263_v47 = vpop.f32.mrb[182].mxu0  ;;  %v9792_v5 = vpop.f32.mrb[190].mxu1  ;;  %v5951_v7 = vmax.bf16 %v5614_v16, %v5613_v49 }
 0x479   : > { %v3184_v43 = vpack.c.bf16 %v2263_v47, %v2259_v9  ;;  %v3210_v0 = vpack.c.bf16 %v9792_v5, %v9784_v15  ;;  %v2265_v20 = vpop.f32.mrb[183].mxu0  ;;  %v9799_v40 = vpop.f32.mrb[191].mxu1  ;;  %v5621_v6 = vmax.bf16 %v10425_v25, %v5429_v33 }
 0x47a   : > { %v3185_v39 = vpack.c.bf16 %v2265_v20, %v2261_v42  ;;  %v3207_v51 = vpack.c.bf16 %v9799_v40, %v9786_v12  ;;  %v5955_v26 = vmax.bf16 %v5953_v46, %v5951_v7  ;;  %v10651_v20 = vld [vmem:[#allocation91_spill] sm:$0xff] }
 0x47b   : > { %v5424_v3 = vadd.bf16 %v6694_v32, %v3184_v43  ;;  %v5754_v22 = vpop.xlane.xlu1 %5753  ;;  %v4352_v43 = vrot.slane %v10649_v44, %v8242_v17 }
 0x47c   : > { %v5425_v38 = vadd.bf16 %v6694_v32, %v3185_v39  ;;  %v6161_v10 = vunpack.c.l.bf16 %v5754_v22  ;;  %v6162_v13 = vunpack.c.h.bf16 %v5754_v22  ;;  %5956 = vmax.xlane.bf16.xlu0 %v5955_v26  ;;  %v5960_v32 = vsel %vm5698_vm3, %v5618_v60, 4286644096 }
 0x47d   : > { %v5616_v59 = vmax.bf16 %v10425_v25, %v5424_v3  ;;  %v5747_v52 = vpop.xlane.xlu0 %5746 }
 0x47e   : > { %v5617_v28 = vmax.bf16 %v10425_v25, %v5425_v38  ;;  %6290 = vst.msk [vmem:[%s9709_s23 + $0x70] sm:$0xff] %vm6275_vm4, %v6161_v10  ;;  %6291 = vst.msk [vmem:[%s9709_s23 + $0x78] sm:$0xff] %vm6275_vm4, %v6162_v13  ;;  %v6159_v48 = vunpack.c.l.bf16 %v5747_v52  ;;  %v6160_v63 = vunpack.c.h.bf16 %v5747_v52  ;;  %v2269_v23 = vpop.f32.mrb[184].mxu0  ;;  %v6965_v8 = vpop.f32.mrb[192].mxu1 }
 0x47f   : > { %v2271_v34 = vpop.f32.mrb[185].mxu0  ;;  %v9815_v30 = vpop.f32.mrb[193].mxu1 }
 0x480   : > { %6288 = vst.msk [vmem:[%s9709_s23 + $0x60] sm:$0xff] %vm6275_vm4, %v6159_v48  ;;  %6289 = vst.msk [vmem:[%s9709_s23 + $0x68] sm:$0xff] %vm6275_vm4, %v6160_v63  ;;  %v2273_v35 = vpop.f32.mrb[186].mxu0  ;;  %v6966_v11 = vpop.f32.mrb[194].mxu1  ;;  %v5958_v49 = vmax.bf16 %v5617_v28, %v5616_v59  ;;  %v6696_v59 = vcombine.low %v4340_v37, %v4352_v43 }
 0x481   : > { %v3187_v16 = vpack.c.bf16 %v2273_v35, %v2269_v23  ;;  %v3216_v36 = vpack.c.bf16 %v6966_v11, %v6965_v8  ;;  %v2275_v50 = vpop.f32.mrb[187].mxu0  ;;  %v9824_v9 = vpop.f32.mrb[195].mxu1 }
 0x482   : > { %v3188_v42 = vpack.c.bf16 %v2275_v50, %v2271_v34  ;;  %v3213_v47 = vpack.c.bf16 %v9824_v9, %v9815_v30  ;;  %v5962_v7 = vmax.bf16 %v5960_v32, %v5958_v49  ;;  %v5432_v8 = vadd.bf16 %v6696_v59, %v3192_v24  ;;  %v10652_v50 = vld [vmem:[#allocation77_spill] sm:$0xff] }
 0x483   : > { %v5427_v31 = vadd.bf16 %v6695_v14, %v3187_v16  ;;  %v9834_v46 = vadd.bf16 %v10651_v20, %v3216_v36  ;;  %v5768_v39 = vpop.xlane.xlu1 %5767  ;;  %v5967_v49 = vsel %vm5698_vm3, %v5621_v6, 4286644096  ;;  %v4376_v32 = vrot.slane %v10652_v50, %v8242_v17  ;;  %v10719_v30 = vld [vmem:[#allocation129_spill] sm:$0xff] }
 0x484   : > { %v5428_v26 = vadd.bf16 %v6695_v14, %v3188_v42  ;;  %v6165_v56 = vunpack.c.l.bf16 %v5768_v39  ;;  %v6166_v54 = vunpack.c.h.bf16 %v5768_v39  ;;  %5963 = vmax.xlane.bf16.xlu1 %v5962_v7  ;;  %v10653_v42 = vld [vmem:[#allocation78_spill] sm:$0xff] }
 0x485   : > { %v5619_v55 = vmax.bf16 %v10425_v25, %v5427_v31  ;;  %v5761_v3 = vpop.xlane.xlu0 %5760  ;;  %v4364_v7 = vrot.slane %v10653_v42, %v8242_v17 }
 0x486   : > { %v5620_v22 = vmax.bf16 %v10425_v25, %v5428_v26  ;;  %6294 = vst.msk [vmem:[%s9709_s23 + $0x90] sm:$0xff] %vm6275_vm4, %v6165_v56  ;;  %6295 = vst.msk [vmem:[%s9709_s23 + $0x98] sm:$0xff] %vm6275_vm4, %v6166_v54  ;;  %v6163_v38 = vunpack.c.l.bf16 %v5761_v3  ;;  %v6164_v10 = vunpack.c.h.bf16 %v5761_v3  ;;  %v2279_v13 = vpop.f32.mrb[188].mxu0  ;;  %v6969_v60 = vpop.f32.mrb[196].mxu1  ;;  %v5624_v26 = vmax.bf16 %v10425_v25, %v5432_v8 }
 0x487   : > { %v2281_v52 = vpop.f32.mrb[189].mxu0  ;;  %v2946_v28 = vpop.f32.mrb[197].mxu1 }
 0x488   : > { %6292 = vst.msk [vmem:[%s9709_s23 + $0x80] sm:$0xff] %vm6275_vm4, %v6163_v38  ;;  %6293 = vst.msk [vmem:[%s9709_s23 + $0x88] sm:$0xff] %vm6275_vm4, %v6164_v10  ;;  %v2283_v48 = vpop.f32.mrb[190].mxu0  ;;  %v6970_v63 = vpop.f32.mrb[198].mxu1  ;;  %v5965_v23 = vmax.bf16 %v5620_v22, %v5619_v55 }
 0x489   : > { %v3190_v14 = vpack.c.bf16 %v2283_v48, %v2279_v13  ;;  %v3222_v34 = vpack.c.bf16 %v6970_v63, %v6969_v60  ;;  %v2285_v35 = vpop.f32.mrb[191].mxu0  ;;  %v2949_v11 = vpop.f32.mrb[199].mxu1  ;;  %v6697_v13 = vcombine.low %v4364_v7, %v4376_v32  ;;  %v10657_v63 = vld [vmem:[#allocation80_spill] sm:$0xff]  ;;  %v5974_v7 = vsel %vm5698_vm3, %v5624_v26, 4286644096 }
 0x48a   : > { %v3191_v33 = vpack.c.bf16 %v2285_v35, %v2281_v52  ;;  %v3219_v16 = vpack.c.bf16 %v2949_v11, %v2946_v28  ;;  %v5969_v36 = vmax.bf16 %v5967_v49, %v5965_v23  ;;  %v10656_v28 = vld [vmem:[#allocation79_spill] sm:$0xff]  ;;  %v4388_v23 = vrot.slane %v10657_v63, %v8242_v17 }
 0x48b   : > { %v5430_v44 = vadd.bf16 %v6696_v59, %v3190_v14  ;;  %v5462_v53 = vadd.bf16 %v10654_v41, %v3222_v34  ;;  %v5782_v24 = vpop.xlane.xlu1 %5781  ;;  %v4400_v48 = vrot.slane %v10656_v28, %v8242_v17  ;;  %v10658_v34 = vld [vmem:[#allocation108_spill] sm:$0xff]  ;;  %v10659_v35 = vld [vmem:[#allocation107_spill] sm:$0xff] }
 0x48c   : > { %v5431_v43 = vadd.bf16 %v6696_v59, %v3191_v33  ;;  %v9857_v37 = vadd.bf16 %v10655_v58, %v3219_v16  ;;  %v6169_v31 = vunpack.c.l.bf16 %v5782_v24  ;;  %v6170_v39 = vunpack.c.h.bf16 %v5782_v24  ;;  %5970 = vmax.xlane.bf16.xlu0 %v5969_v36 }
 0x48d   : > { %v5622_v56 = vmax.bf16 %v10425_v25, %v5430_v44  ;;  %v5654_v54 = vmax.bf16 %v10425_v25, %v5462_v53  ;;  %v5775_v6 = vpop.xlane.xlu0 %5774  ;;  %v10660_v11 = vmax.bf16 %v10658_v34, %v10659_v35  ;;  %v5435_v16 = vadd.bf16 %v6697_v13, %v3195_v61  ;;  %v10663_v35 = vld [vmem:[#allocation112_spill] sm:$0xff] }
 0x48e   : > { %v5623_v55 = vmax.bf16 %v10425_v25, %v5431_v43  ;;  %6298 = vst.msk [vmem:[%s9709_s23 + $0xb0] sm:$0xff] %vm6275_vm4, %v6169_v31  ;;  %6299 = vst.msk [vmem:[%s9709_s23 + $0xb8] sm:$0xff] %vm6275_vm4, %v6170_v39  ;;  %v6167_v3 = vunpack.c.l.bf16 %v5775_v6  ;;  %v6168_v22 = vunpack.c.h.bf16 %v5775_v6  ;;  %v2289_v38 = vpop.f32.mrb[192].mxu0  ;;  %v6973_v10 = vpop.f32.mrb[200].mxu1  ;;  %v10661_v43 = vld [vmem:[#allocation95_spill] sm:$0xff]  ;;  %v6698_v6 = vcombine.low %v4388_v23, %v4400_v48 }
 0x48f   : > { %v2291_v60 = vpop.f32.mrb[193].mxu0  ;;  %v2962_v59 = vpop.f32.mrb[201].mxu1  ;;  %v6044_v52 = vsel %vm5698_vm3, %v5654_v54, 4286644096  ;;  %v10662_v54 = vld [vmem:[#allocation94_spill] sm:$0xff] }
 0x490   : > { %6296 = vst.msk [vmem:[%s9709_s23 + $0xa0] sm:$0xff] %vm6275_vm4, %v6167_v3  ;;  %6297 = vst.msk [vmem:[%s9709_s23 + $0xa8] sm:$0xff] %vm6275_vm4, %v6168_v22  ;;  %v2293_v8 = vpop.f32.mrb[194].mxu0  ;;  %v6974_v14 = vpop.f32.mrb[202].mxu1  ;;  %v6046_v49 = vmax.bf16 %v6044_v52, %v10660_v11  ;;  %v5972_v33 = vmax.bf16 %v5623_v55, %v5622_v56  ;;  %v5627_v55 = vmax.bf16 %v10425_v25, %v5435_v16  ;;  %v10664_v11 = vld [vmem:[#allocation111_spill] sm:$0xff] }
 0x491   : > { %v3193_v36 = vpack.c.bf16 %v2293_v8, %v2289_v38  ;;  %v3228_v50 = vpack.c.bf16 %v6974_v14, %v6973_v10  ;;  %v2295_v32 = vpop.f32.mrb[195].mxu0  ;;  %v2965_v42 = vpop.f32.mrb[203].mxu1  ;;  %v5438_v28 = vadd.bf16 %v6698_v6, %v3198_v4 }
 0x492   : > { %v3194_v44 = vpack.c.bf16 %v2295_v32, %v2291_v60  ;;  %v3225_v41 = vpack.c.bf16 %v2965_v42, %v2962_v59  ;;  %6047 = vmax.xlane.bf16.xlu1 %v6046_v49  ;;  %v5976_v53 = vmax.bf16 %v5974_v7, %v5972_v33  ;;  %v10665_v49 = vmax.bf16 %v10663_v35, %v10664_v11  ;;  %v10667_v32 = vld [vmem:[#allocation109_spill] sm:$0xff]  ;;  %v10674_v35 = vld [vmem:[#allocation84_spill] sm:$0xff] }
 0x493   : > { %v5433_v24 = vadd.bf16 %v6697_v13, %v3193_v36  ;;  %v5468_v31 = vadd.bf16 %v10661_v43, %v3228_v50  ;;  %v5796_v39 = vpop.xlane.xlu1 %5795  ;;  %v10666_v50 = vld [vmem:[#allocation110_spill] sm:$0xff]  ;;  %v4436_v11 = vrot.slane %v10674_v35, %v8242_v17 }
 0x494   : > { %v5434_v56 = vadd.bf16 %v6697_v13, %v3194_v44  ;;  %v5465_v62 = vadd.bf16 %v10662_v54, %v3225_v41  ;;  %v6173_v18 = vunpack.c.l.bf16 %v5796_v39  ;;  %v6174_v61 = vunpack.c.h.bf16 %v5796_v39  ;;  %v10669_v41 = vld [vmem:[#allocation81_spill] sm:$0xff] }
 0x495   : > { %v5625_v26 = vmax.bf16 %v10425_v25, %v5433_v24  ;;  %v5660_v3 = vmax.bf16 %v10425_v25, %v5468_v31  ;;  %v5789_v22 = vpop.xlane.xlu0 %5788  ;;  %v10668_v42 = vmax.bf16 %v10666_v50, %v10667_v32  ;;  %v5981_v44 = vsel %vm5698_vm3, %v5627_v55, 4286644096  ;;  %v10676_v50 = vld [vmem:[#allocation115_spill] sm:$0xff] }
 0x496   : > { %v5626_v38 = vmax.bf16 %v10425_v25, %v5434_v56  ;;  %v5657_v10 = vmax.bf16 %v10425_v25, %v5465_v62  ;;  %6302 = vst.msk [vmem:[%s9709_s23 + $0xd0] sm:$0xff] %vm6275_vm4, %v6173_v18  ;;  %6303 = vst.msk [vmem:[%s9709_s23 + $0xd8] sm:$0xff] %vm6275_vm4, %v6174_v61  ;;  %v6171_v13 = vunpack.c.l.bf16 %v5789_v22  ;;  %v6172_v60 = vunpack.c.h.bf16 %v5789_v22  ;;  %v2299_v59 = vpop.f32.mrb[196].mxu0  ;;  %v6977_v52 = vpop.f32.mrb[204].mxu1  ;;  %v10670_v56 = vld [vmem:[#allocation82_spill] sm:$0xff]  ;;  %v10671_v61 = vld [vmem:[#allocation97_spill] sm:$0xff] }
 0x497   : > { %v2301_v48 = vpop.f32.mrb[197].mxu0  ;;  %v2978_v63 = vpop.f32.mrb[205].mxu1  ;;  %v6058_v23 = vsel %vm5698_vm3, %v5660_v3, 4286644096  ;;  %v4424_v24 = vrot.slane %v10669_v41, %v8242_v17  ;;  %v4412_v54 = vrot.slane %v10670_v56, %v8242_v17  ;;  %v5630_v62 = vmax.bf16 %v10425_v25, %v5438_v28  ;;  %v10672_v22 = vld [vmem:[#allocation96_spill] sm:$0xff] }
 0x498   : > { %6300 = vst.msk [vmem:[%s9709_s23 + $0xc0] sm:$0xff] %vm6275_vm4, %v6171_v13  ;;  %6301 = vst.msk [vmem:[%s9709_s23 + $0xc8] sm:$0xff] %vm6275_vm4, %v6172_v60  ;;  %v2303_v8 = vpop.f32.mrb[198].mxu0  ;;  %v6978_v14 = vpop.f32.mrb[206].mxu1  ;;  %v6051_v34 = vsel %vm5698_vm3, %v5657_v10, 4286644096  ;;  %v6060_v33 = vmax.bf16 %v6058_v23, %v10665_v49  ;;  %v5979_v16 = vmax.bf16 %v5626_v38, %v5625_v26 }
 0x499   : > { %v3196_v36 = vpack.c.bf16 %v2303_v8, %v2299_v59  ;;  %v3234_v45 = vpack.c.bf16 %v6978_v14, %v6977_v52  ;;  %v2305_v27 = vpop.f32.mrb[199].mxu0  ;;  %v2981_v4 = vpop.f32.mrb[207].mxu1  ;;  %v6053_v7 = vmax.bf16 %v6051_v34, %v10668_v42  ;;  %v6699_v8 = vcombine.low %v4412_v54, %v4424_v24  ;;  %v10673_v14 = vld [vmem:[#allocation83_spill] sm:$0xff] }
 0x49a   : > { %v3197_v43 = vpack.c.bf16 %v2305_v27, %v2301_v48  ;;  %v3231_v31 = vpack.c.bf16 %v2981_v4, %v2978_v63  ;;  %5977 = vmax.xlane.bf16.xlu1 %v5976_v53  ;;  %v5983_v39 = vmax.bf16 %v5981_v44, %v5979_v16  ;;  %v4448_v34 = vrot.slane %v10673_v14, %v8242_v17  ;;  %v10675_v4 = vld [vmem:[#allocation116_spill] sm:$0xff] }
 0x49b   : > { %v5436_v18 = vadd.bf16 %v6698_v6, %v3196_v36  ;;  %v5474_v26 = vadd.bf16 %v10671_v61, %v3234_v45  ;;  %v5810_v3 = vpop.xlane.xlu1 %5809  ;;  %6054 = vmax.xlane.bf16.xlu0 %v6053_v7  ;;  %v10677_v32 = vmax.bf16 %v10675_v4, %v10676_v50  ;;  %v5988_v41 = vsel %vm5698_vm3, %v5630_v62, 4286644096  ;;  %v10679_v61 = vld [vmem:[#allocation113_spill] sm:$0xff]  ;;  %v10681_v62 = vld [vmem:[#allocation99_spill] sm:$0xff]  ;;  %v10683_v4 = vld [vmem:[#allocation12_spill] sm:$0xff] }
 0x49c   : > { %v5437_v55 = vadd.bf16 %v6698_v6, %v3197_v43  ;;  %v5471_v38 = vadd.bf16 %v10672_v22, %v3231_v31  ;;  %v6177_v10 = vunpack.c.l.bf16 %v5810_v3  ;;  %v6178_v13 = vunpack.c.h.bf16 %v5810_v3  ;;  %v10684_v50 = vld [vmem:[#allocation11_spill] sm:$0xff] }
 0x49d   : > { %v5628_v53 = vmax.bf16 %v10425_v25, %v5436_v18  ;;  %v5666_v60 = vmax.bf16 %v10425_v25, %v5474_v26  ;;  %v5803_v59 = vpop.xlane.xlu0 %5802  ;;  %v5441_v24 = vadd.bf16 %v6699_v8, %v3201_v19  ;;  %v10678_v18 = vld [vmem:[#allocation114_spill] sm:$0xff] }
 0x49e   : > { %v5629_v52 = vmax.bf16 %v10425_v25, %v5437_v55  ;;  %v5663_v28 = vmax.bf16 %v10425_v25, %v5471_v38  ;;  %6306 = vst.msk [vmem:[%s9709_s23 + $0xf0] sm:$0xff] %vm6275_vm4, %v6177_v10  ;;  %6307 = vst.msk [vmem:[%s9709_s23 + $0xf8] sm:$0xff] %vm6275_vm4, %v6178_v13  ;;  %v6175_v6 = vunpack.c.l.bf16 %v5803_v59  ;;  %v6176_v48 = vunpack.c.h.bf16 %v5803_v59  ;;  %v2309_v63 = vpop.f32.mrb[200].mxu0  ;;  %v6981_v23 = vpop.f32.mrb[208].mxu1  ;;  %v10682_v19 = vld [vmem:[#allocation98_spill] sm:$0xff] }
 0x49f   : > { %v2311_v49 = vpop.f32.mrb[201].mxu0  ;;  %v2994_v16 = vpop.f32.mrb[209].mxu1  ;;  %v6072_v36 = vsel %vm5698_vm3, %v5666_v60, 4286644096  ;;  %v10680_v26 = vmax.bf16 %v10678_v18, %v10679_v61  ;;  %v10689_v18 = vld [vmem:[#allocation85_spill] sm:$0xff] }
 0x4a0   : > { %6304 = vst.msk [vmem:[%s9709_s23 + $0xe0] sm:$0xff] %vm6275_vm4, %v6175_v6  ;;  %6305 = vst.msk [vmem:[%s9709_s23 + $0xe8] sm:$0xff] %vm6275_vm4, %v6176_v48  ;;  %v2313_v45 = vpop.f32.mrb[202].mxu0  ;;  %v6982_v27 = vpop.f32.mrb[210].mxu1  ;;  %v6074_v42 = vmax.bf16 %v6072_v36, %v10677_v32  ;;  %v6065_v7 = vsel %vm5698_vm3, %v5663_v28, 4286644096  ;;  %v5986_v44 = vmax.bf16 %v5629_v52, %v5628_v53  ;;  %v6700_v52 = vcombine.low %v4436_v11, %v4448_v34 }
 0x4a1   : > { %v3199_v43 = vpack.c.bf16 %v2313_v45, %v2309_v63  ;;  %v3240_v31 = vpack.c.bf16 %v6982_v27, %v6981_v23  ;;  %v2315_v56 = vpop.f32.mrb[203].mxu0  ;;  %v2997_v54 = vpop.f32.mrb[211].mxu1  ;;  %v6067_v3 = vmax.bf16 %v6065_v7, %v10680_v26  ;;  %v5633_v28 = vmax.bf16 %v10425_v25, %v5441_v24  ;;  %v10686_v24 = vld [vmem:[#allocation10_spill] sm:$0xff] }
 0x4a2   : > { %v3200_v55 = vpack.c.bf16 %v2315_v56, %v2311_v49  ;;  %v3237_v22 = vpack.c.bf16 %v2997_v54, %v2994_v16  ;;  %6061 = vmax.xlane.bf16.xlu1 %v6060_v33  ;;  %v9945_v38 = vmax.bf16 %v5988_v41, %v5986_v44  ;;  %v5444_v35 = vadd.bf16 %v6700_v52, %v3204_v29 }
 0x4a3   : > { %v5439_v10 = vadd.bf16 %v6699_v8, %v3199_v43  ;;  %v5480_v13 = vadd.bf16 %v10681_v62, %v3240_v31  ;;  %v5824_v57 = vpop.xlane.xlu1 %5823  ;;  %5984 = vmax.xlane.bf16.xlu0 %v5983_v39  ;;  %v10685_v32 = vmax.bf16 %v10683_v4, %v10684_v50  ;;  %v10687_v43 = vld [vmem:[#allocation9_spill] sm:$0xff]  ;;  %v5995_v54 = vsel %vm5698_vm3, %v5633_v28, 4286644096 }
 0x4a4   : > { %v5440_v1 = vadd.bf16 %v6699_v8, %v3200_v55  ;;  %v5477_v53 = vadd.bf16 %v10682_v19, %v3237_v22  ;;  %v6181_v60 = vunpack.c.l.bf16 %v5824_v57  ;;  %v6182_v59 = vunpack.c.h.bf16 %v5824_v57 }
 0x4a5   : > { %v5631_v33 = vmax.bf16 %v10425_v25, %v5439_v10  ;;  %v5672_v6 = vmax.bf16 %v10425_v25, %v5480_v13  ;;  %v5817_v48 = vpop.xlane.xlu0 %5816  ;;  %v10688_v31 = vmax.bf16 %v10686_v24, %v10687_v43  ;;  %v4472_v61 = vrot.slane %v10689_v18, %v8242_v17  ;;  %v10690_v10 = vld [vmem:[#allocation86_spill] sm:$0xff] }
 0x4a6   : > { %v5632_v63 = vmax.bf16 %v10425_v25, %v5440_v1  ;;  %v5669_v23 = vmax.bf16 %v10425_v25, %v5477_v53  ;;  %6310 = vst.msk [vmem:[%s9709_s23 + $0x110] sm:$0xff] %vm6275_vm4, %v6181_v60  ;;  %6311 = vst.msk [vmem:[%s9709_s23 + $0x118] sm:$0xff] %vm6275_vm4, %v6182_v59  ;;  %v6179_v39 = vunpack.c.l.bf16 %v5817_v48  ;;  %v6180_v8 = vunpack.c.h.bf16 %v5817_v48  ;;  %v2319_v14 = vpop.f32.mrb[204].mxu0  ;;  %v6985_v34 = vpop.f32.mrb[212].mxu1  ;;  %v10691_v1 = vld [vmem:[#allocation101_spill] sm:$0xff]  ;;  %v10692_v59 = vld [vmem:[#allocation100_spill] sm:$0xff] }
 0x4a7   : > { %v2321_v11 = vpop.f32.mrb[205].mxu0  ;;  %v3010_v49 = vpop.f32.mrb[213].mxu1  ;;  %v6086_v16 = vsel %vm5698_vm3, %v5672_v6, 4286644096  ;;  %v4460_v62 = vrot.slane %v10690_v10, %v8242_v17  ;;  %v5636_v13 = vmax.bf16 %v10425_v25, %v5444_v35  ;;  %v10693_v35 = vld [vmem:[#allocation87_spill] sm:$0xff] }
 0x4a8   : > { %6308 = vst.msk [vmem:[%s9709_s23 + $0x100] sm:$0xff] %vm6275_vm4, %v6179_v39  ;;  %6309 = vst.msk [vmem:[%s9709_s23 + $0x108] sm:$0xff] %vm6275_vm4, %v6180_v8  ;;  %v2323_v36 = vpop.f32.mrb[206].mxu0  ;;  %v6986_v45 = vpop.f32.mrb[214].mxu1  ;;  %v6079_v27 = vsel %vm5698_vm3, %v5669_v23, 4286644096  ;;  %v9970_v7 = vmax.bf16 %v6086_v16, %v10685_v32  ;;  %v5993_v44 = vmax.bf16 %v5632_v63, %v5631_v33 }
 0x4a9   : > { %v3202_v2 = vpack.c.bf16 %v2323_v36, %v2319_v14  ;;  %v3246_v21 = vpack.c.bf16 %v6986_v45, %v6985_v34  ;;  %v2325_v29 = vpop.f32.mrb[207].mxu0  ;;  %v3013_v41 = vpop.f32.mrb[215].mxu1  ;;  %v6081_v56 = vmax.bf16 %v6079_v27, %v10688_v31  ;;  %v6701_v34 = vcombine.low %v4460_v62, %v4472_v61  ;;  %v10695_v32 = vld [vmem:[#allocation118_spill] sm:$0xff] }
 0x4aa   : > { %v3203_v26 = vpack.c.bf16 %v2325_v29, %v2321_v11  ;;  %v3243_v55 = vpack.c.bf16 %v3013_v41, %v3010_v49  ;;  %6075 = vmax.xlane.bf16.xlu1 %v6074_v42  ;;  %v9978_v22 = vmax.bf16 %v5995_v54, %v5993_v44  ;;  %v4496_v11 = vrot.slane %v10693_v35, %v8242_v17  ;;  %v10694_v49 = vld [vmem:[#allocation88_spill] sm:$0xff] }
 0x4ab   : > { %v5442_v57 = vadd.bf16 %v6700_v52, %v3202_v2  ;;  %v5486_v19 = vadd.bf16 %v10691_v1, %v3246_v21  ;;  %v5838_v53 = vpop.xlane.xlu1 %5837  ;;  %6068 = vmax.xlane.bf16.xlu0 %v6067_v3  ;;  %v4484_v16 = vrot.slane %v10694_v49, %v8242_v17  ;;  %v10696_v44 = vld [vmem:[#allocation16_spill] sm:$0xff]  ;;  %v6002_v24 = vsel %vm5698_vm3, %v5636_v13, 4286644096 }
 0x4ac   : > { %v5443_v60 = vadd.bf16 %v6700_v52, %v3203_v26  ;;  %v5483_v28 = vadd.bf16 %v10692_v59, %v3243_v55  ;;  %v6185_v33 = vunpack.c.l.bf16 %v5838_v53  ;;  %v6186_v6 = vunpack.c.h.bf16 %v5838_v53  ;;  %v10698_v26 = vld [vmem:[#allocation14_spill] sm:$0xff]  ;;  %v10699_v55 = vld [vmem:[#allocation13_spill] sm:$0xff]  ;;  %v10701_v53 = vld [vmem:[#allocation103_spill] sm:$0xff] }
 0x4ad   : > { %v5634_v42 = vmax.bf16 %v10425_v25, %v5442_v57  ;;  %v5678_v48 = vmax.bf16 %v10425_v25, %v5486_v19  ;;  %v5831_v63 = vpop.xlane.xlu0 %5830  ;;  %v10697_v2 = vmax.bf16 %v10695_v32, %v10696_v44  ;;  %v5447_v43 = vadd.bf16 %v6701_v34, %v3207_v51 }
 0x4ae   : > { %v5635_v23 = vmax.bf16 %v10425_v25, %v5443_v60  ;;  %v5675_v39 = vmax.bf16 %v10425_v25, %v5483_v28  ;;  %6314 = vst.msk [vmem:[%s9709_s23 + $0x130] sm:$0xff] %vm6275_vm4, %v6185_v33  ;;  %6315 = vst.msk [vmem:[%s9709_s23 + $0x138] sm:$0xff] %vm6275_vm4, %v6186_v6  ;;  %v6183_v3 = vunpack.c.l.bf16 %v5831_v63  ;;  %v6184_v52 = vunpack.c.h.bf16 %v5831_v63  ;;  %v2329_v8 = vpop.f32.mrb[208].mxu0  ;;  %v6989_v14 = vpop.f32.mrb[216].mxu1  ;;  %v10702_v60 = vld [vmem:[#allocation102_spill] sm:$0xff] }
 0x4af   : > { %v2331_v36 = vpop.f32.mrb[209].mxu0  ;;  %v3026_v45 = vpop.f32.mrb[217].mxu1  ;;  %v6100_v27 = vsel %vm5698_vm3, %v5678_v48, 4286644096  ;;  %v10700_v10 = vmax.bf16 %v10698_v26, %v10699_v55  ;;  %v6702_v6 = vcombine.low %v4484_v16, %v4496_v11  ;;  %v10710_v55 = vld [vmem:[#allocation90_spill] sm:$0xff] }
 0x4b0   : > { %6312 = vst.msk [vmem:[%s9709_s23 + $0x120] sm:$0xff] %vm6275_vm4, %v6183_v3  ;;  %6313 = vst.msk [vmem:[%s9709_s23 + $0x128] sm:$0xff] %vm6275_vm4, %v6184_v52  ;;  %v2333_v4 = vpop.f32.mrb[210].mxu0  ;;  %v6990_v50 = vpop.f32.mrb[218].mxu1  ;;  %v10005_v21 = vmax.bf16 %v6100_v27, %v10697_v2  ;;  %v6093_v29 = vsel %vm5698_vm3, %v5675_v39, 4286644096  ;;  %v6000_v41 = vmax.bf16 %v5635_v23, %v5634_v42  ;;  %v5639_v42 = vmax.bf16 %v10425_v25, %v5447_v43 }
 0x4b1   : > { %v3205_v31 = vpack.c.bf16 %v2333_v4, %v2329_v8  ;;  %v3252_v54 = vpack.c.bf16 %v6990_v50, %v6989_v14  ;;  %v2335_v18 = vpop.f32.mrb[211].mxu0  ;;  %v3029_v61 = vpop.f32.mrb[219].mxu1  ;;  %v10015_v62 = vmax.bf16 %v6093_v29, %v10700_v10  ;;  %v5450_v14 = vadd.bf16 %v6702_v6, %v3210_v0  ;;  %v10704_v27 = vld [vmem:[#allocation20_spill] sm:$0xff]  ;;  %v10706_v2 = vld [vmem:[#allocation119_spill] sm:$0xff]  ;;  %v10707_v29 = vld [vmem:[#allocation18_spill] sm:$0xff] }
 0x4b2   : > { %v3206_v57 = vpack.c.bf16 %v2335_v18, %v2331_v36  ;;  %v3249_v1 = vpack.c.bf16 %v3029_v61, %v3026_v45  ;;  %5991 = vmax.xlane.bf16.xlu1 %v9945_v38  ;;  %v10018_v19 = vmax.bf16 %v6002_v24, %v6000_v41  ;;  %v10703_v45 = vld [vmem:[#allocation122_spill] sm:$0xff]  ;;  %v10708_v41 = vmax.bf16 %v10706_v2, %v10707_v29 }
 0x4b3   : > { %v5445_v13 = vadd.bf16 %v6701_v34, %v3205_v31  ;;  %v5492_v12 = vadd.bf16 %v10701_v53, %v3252_v54  ;;  %v5852_v40 = vpop.xlane.xlu1 %5851  ;;  %6082 = vmax.xlane.bf16.xlu0 %v6081_v56  ;;  %v10705_v4 = vmax.bf16 %v10703_v45, %v10704_v27  ;;  %v6009_v43 = vsel %vm5698_vm3, %v5639_v42, 4286644096  ;;  %v10709_v31 = vld [vmem:[#allocation89_spill] sm:$0xff] }
 0x4b4   : > { %v5446_v51 = vadd.bf16 %v6701_v34, %v3206_v57  ;;  %v5489_v59 = vadd.bf16 %v10702_v60, %v3249_v1  ;;  %v6189_v28 = vunpack.c.l.bf16 %v5852_v40  ;;  %v6190_v33 = vunpack.c.h.bf16 %v5852_v40 }
 0x4b5   : > { %v5637_v38 = vmax.bf16 %v10425_v25, %v5445_v13  ;;  %v5684_v48 = vmax.bf16 %v10425_v25, %v5492_v12  ;;  %v5845_v63 = vpop.xlane.xlu0 %5844  ;;  %v4520_v54 = vrot.slane %v10709_v31, %v8242_v17  ;;  %v4508_v10 = vrot.slane %v10710_v55, %v8242_v17  ;;  %v10711_v13 = vld [vmem:[#allocation105_spill] sm:$0xff] }
 0x4b6   : > { %v5638_v23 = vmax.bf16 %v10425_v25, %v5446_v51  ;;  %v5681_v39 = vmax.bf16 %v10425_v25, %v5489_v59  ;;  %6318 = vst.msk [vmem:[%s9709_s23 + $0x150] sm:$0xff] %vm6275_vm4, %v6189_v28  ;;  %6319 = vst.msk [vmem:[%s9709_s23 + $0x158] sm:$0xff] %vm6275_vm4, %v6190_v33  ;;  %v6187_v56 = vunpack.c.l.bf16 %v5845_v63  ;;  %v6188_v3 = vunpack.c.h.bf16 %v5845_v63  ;;  %v2339_v52 = vpop.f32.mrb[212].mxu0  ;;  %v6993_v8 = vpop.f32.mrb[220].mxu1  ;;  %v10712_v51 = vld [vmem:[#allocation104_spill] sm:$0xff] }
 0x4b7   : > { %v2341_v34 = vpop.f32.mrb[213].mxu0  ;;  %v3042_v35 = vpop.f32.mrb[221].mxu1  ;;  %v6114_v11 = vsel %vm5698_vm3, %v5684_v48, 4286644096  ;;  %v5642_v57 = vmax.bf16 %v10425_v25, %v5450_v14  ;;  %v10713_v14 = vld [vmem:[#allocation128_spill] sm:$0xff] }
 0x4b8   : > { %6316 = vst.msk [vmem:[%s9709_s23 + $0x140] sm:$0xff] %vm6275_vm4, %v6187_v56  ;;  %6317 = vst.msk [vmem:[%s9709_s23 + $0x148] sm:$0xff] %vm6275_vm4, %v6188_v3  ;;  %v2343_v49 = vpop.f32.mrb[214].mxu0  ;;  %v6994_v16 = vpop.f32.mrb[222].mxu1  ;;  %v6107_v36 = vsel %vm5698_vm3, %v5681_v39, 4286644096  ;;  %v10043_v50 = vmax.bf16 %v6114_v11, %v10705_v4  ;;  %v6007_v32 = vmax.bf16 %v5638_v23, %v5637_v38  ;;  %v6703_v23 = vcombine.low %v4508_v10, %v4520_v54 }
 0x4b9   : > { %v3208_v15 = vpack.c.bf16 %v2343_v49, %v2339_v52  ;;  %v3258_v5 = vpack.c.bf16 %v6994_v16, %v6993_v8  ;;  %v2345_v0 = vpop.f32.mrb[215].mxu0  ;;  %v3045_v44 = vpop.f32.mrb[223].mxu1  ;;  %v10048_v24 = vmax.bf16 %v6107_v36, %v10708_v41  ;;  %v6016_v36 = vsel %vm5698_vm3, %v5642_v57, 4286644096 }
 0x4ba   : > { %v3209_v18 = vpack.c.bf16 %v2345_v0, %v2341_v34  ;;  %v3255_v61 = vpack.c.bf16 %v3045_v44, %v3042_v35  ;;  %6089 = vmax.xlane.bf16.xlu1 %v9970_v7  ;;  %v10054_v26 = vmax.bf16 %v6009_v43, %v6007_v32  ;;  %v10714_v34 = vld [vmem:[#allocation24_spill] sm:$0xff]  ;;  %v5453_v45 = vadd.bf16 %v6703_v23, %v3213_v47  ;;  %v10717_v0 = vld [vmem:[#allocation22_spill] sm:$0xff] }
 0x4bb   : > { %v5448_v1 = vadd.bf16 %v6702_v6, %v3208_v15  ;;  %v5498_v53 = vadd.bf16 %v10711_v13, %v3258_v5  ;;  %v5866_v12 = vpop.xlane.xlu1 %5865  ;;  %5998 = vmax.xlane.bf16.xlu0 %v9978_v22  ;;  %v10715_v35 = vmax.bf16 %v10713_v14, %v10714_v34  ;;  %v10716_v5 = vld [vmem:[#allocation126_spill] sm:$0xff] }
 0x4bc   : > { %v5449_v40 = vadd.bf16 %v6702_v6, %v3209_v18  ;;  %v5495_v60 = vadd.bf16 %v10712_v51, %v3255_v61  ;;  %v6193_v59 = vunpack.c.l.bf16 %v5866_v12  ;;  %v6194_v7 = vunpack.c.h.bf16 %v5866_v12  ;;  %v10720_v18 = vld [vmem:[#allocation106_spill] sm:$0xff] }
 0x4bd   : > { %v5640_v28 = vmax.bf16 %v10425_v25, %v5448_v1  ;;  %v5690_v17 = vmax.bf16 %v10425_v25, %v5498_v53  ;;  %v5859_v33 = vpop.xlane.xlu0 %5858  ;;  %v10718_v44 = vmax.bf16 %v10716_v5, %v10717_v0  ;;  %v5645_v57 = vmax.bf16 %v10425_v25, %v5453_v45 }
 0x4be   : > { %v5641_v42 = vmax.bf16 %v10425_v25, %v5449_v40  ;;  %v5687_v38 = vmax.bf16 %v10425_v25, %v5495_v60  ;;  %6322 = vst.msk [vmem:[%s9709_s23 + $0x170] sm:$0xff] %vm6275_vm4, %v6193_v59  ;;  %6323 = vst.msk [vmem:[%s9709_s23 + $0x178] sm:$0xff] %vm6275_vm4, %v6194_v7  ;;  %v6191_v22 = vunpack.c.l.bf16 %v5859_v33  ;;  %v6192_v6 = vunpack.c.h.bf16 %v5859_v33  ;;  %v2349_v48 = vpop.f32.mrb[216].mxu0  ;;  %v6997_v63 = vpop.f32.mrb[224].mxu1  ;;  %v10722_v33 = vld [vmem:[#allocation28_spill] sm:$0xff] }
 0x4bf   : > { %v2351_v39 = vpop.f32.mrb[217].mxu0  ;;  %v3058_v56 = vpop.f32.mrb[225].mxu1  ;;  %v6128_v3 = vsel %vm5698_vm3, %v5690_v17, 4286644096  ;;  %v10721_v17 = vld [vmem:[#allocation130_spill] sm:$0xff] }
 0x4c0   : > { %6320 = vst.msk [vmem:[%s9709_s23 + $0x160] sm:$0xff] %vm6275_vm4, %v6191_v22  ;;  %6321 = vst.msk [vmem:[%s9709_s23 + $0x168] sm:$0xff] %vm6275_vm4, %v6192_v6  ;;  %v2353_v52 = vpop.f32.mrb[218].mxu0  ;;  %v6998_v8 = vpop.f32.mrb[226].mxu1  ;;  %v10078_v11 = vmax.bf16 %v6128_v3, %v10715_v35  ;;  %v6121_v49 = vsel %vm5698_vm3, %v5687_v38, 4286644096  ;;  %v6014_v16 = vmax.bf16 %v5641_v42, %v5640_v28  ;;  %v10723_v42 = vmax.bf16 %v10721_v17, %v10722_v33 }
 0x4c1   : > { %v3211_v27 = vpack.c.bf16 %v2353_v52, %v2349_v48  ;;  %v3264_v4 = vpack.c.bf16 %v6998_v8, %v6997_v63  ;;  %v2355_v32 = vpop.f32.mrb[219].mxu0  ;;  %v3061_v15 = vpop.f32.mrb[227].mxu1  ;;  %v10088_v2 = vmax.bf16 %v6121_v49, %v10718_v44  ;;  %v6023_v63 = vsel %vm5698_vm3, %v5645_v57, 4286644096 }
 0x4c2   : > { %v3212_v29 = vpack.c.bf16 %v2355_v32, %v2351_v39  ;;  %v3261_v41 = vpack.c.bf16 %v3061_v15, %v3058_v56  ;;  %6103 = vmax.xlane.bf16.xlu1 %v10005_v21  ;;  %v10091_v43 = vmax.bf16 %v6016_v36, %v6014_v16  ;;  %v10725_v39 = vld [vmem:[#allocation25_spill] sm:$0xff]  ;;  %v5648_v36 = vmax.bf16 %v10425_v25, %v9834_v46 }
 0x4c3   : > { %v5451_v31 = vadd.bf16 %v6703_v23, %v3211_v27  ;;  %v5504_v9 = vadd.bf16 %v10719_v30, %v3264_v4  ;;  %v5880_v47 = vpop.xlane.xlu1 %5879  ;;  %6096 = vmax.xlane.bf16.xlu0 %v10015_v62 }
 0x4c4   : > { %v5452_v54 = vadd.bf16 %v6703_v23, %v3212_v29  ;;  %v5501_v61 = vadd.bf16 %v10720_v18, %v3261_v41  ;;  %v6197_v55 = vunpack.c.l.bf16 %v5880_v47  ;;  %v6198_v10 = vunpack.c.h.bf16 %v5880_v47  ;;  %v10724_v23 = vld [vmem:[#allocation26_spill] sm:$0xff] }
 0x4c5   : > { %v5643_v21 = vmax.bf16 %v10425_v25, %v5451_v31  ;;  %v5696_v1 = vmax.bf16 %v10425_v25, %v5504_v9  ;;  %v5873_v13 = vpop.xlane.xlu0 %5872  ;;  %v10726_v56 = vmax.bf16 %v10724_v23, %v10725_v39  ;;  %v6030_v44 = vsel %vm5698_vm3, %v5648_v36, 4286644096 }
 0x4c6   : > { %v5644_v53 = vmax.bf16 %v10425_v25, %v5452_v54  ;;  %v5693_v12 = vmax.bf16 %v10425_v25, %v5501_v61  ;;  %6326 = vst.msk [vmem:[%s9709_s23 + $0x190] sm:$0xff] %vm6275_vm4, %v6197_v55  ;;  %6327 = vst.msk [vmem:[%s9709_s23 + $0x198] sm:$0xff] %vm6275_vm4, %v6198_v10  ;;  %v6195_v62 = vunpack.c.l.bf16 %v5873_v13  ;;  %v6196_v40 = vunpack.c.h.bf16 %v5873_v13  ;;  %v2359_v51 = vpop.f32.mrb[220].mxu0 }
 0x4c7   : > { %v2361_v60 = vpop.f32.mrb[221].mxu0  ;;  %v6142_v59 = vsel %vm5698_vm3, %v5696_v1, 4286644096  ;;  %v5651_v9 = vmax.bf16 %v10425_v25, %v9857_v37 }
 0x4c8   : > { %6324 = vst.msk [vmem:[%s9709_s23 + $0x180] sm:$0xff] %vm6275_vm4, %v6195_v62  ;;  %6325 = vst.msk [vmem:[%s9709_s23 + $0x188] sm:$0xff] %vm6275_vm4, %v6196_v40  ;;  %v2363_v7 = vpop.f32.mrb[222].mxu0  ;;  %v6021_v28 = vmax.bf16 %v5644_v53, %v5643_v21  ;;  %v10113_v38 = vmax.bf16 %v6142_v59, %v10723_v42  ;;  %v6135_v22 = vsel %vm5698_vm3, %v5693_v12, 4286644096 }
 0x4c9   : > { %v3214_v6 = vpack.c.bf16 %v2363_v7, %v2359_v51  ;;  %v2365_v48 = vpop.f32.mrb[223].mxu0  ;;  %v10120_v3 = vmax.bf16 %v6135_v22, %v10726_v56  ;;  %v6037_v37 = vsel %vm5698_vm3, %v5651_v9, 4286644096 }
 0x4ca   : > { %v3215_v52 = vpack.c.bf16 %v2365_v48, %v2361_v60  ;;  %6005 = vmax.xlane.bf16.xlu1 %v10018_v19  ;;  %v6025_v8 = vmax.bf16 %v6023_v63, %v6021_v28 }
 0x4cb   : > { %v5454_v14 = vadd.bf16 %v10651_v20, %v3214_v6  ;;  %v5894_v34 = vpop.xlane.xlu1 %5893  ;;  %6110 = vmax.xlane.bf16.xlu0 %v10048_v24 }
 0x4cc   : > { %v5455_v35 = vadd.bf16 %v10651_v20, %v3215_v52  ;;  %v6201_v49 = vunpack.c.l.bf16 %v5894_v34  ;;  %v6202_v16 = vunpack.c.h.bf16 %v5894_v34 }
 0x4cd   : > { %v5646_v45 = vmax.bf16 %v10425_v25, %v5454_v14  ;;  %v5887_v27 = vpop.xlane.xlu0 %5886 }
 0x4ce   : > { %v5647_v19 = vmax.bf16 %v10425_v25, %v5455_v35  ;;  %6330 = vst.msk [vmem:[%s9709_s23 + $0x1b0] sm:$0xff] %vm6275_vm4, %v6201_v49  ;;  %6331 = vst.msk [vmem:[%s9709_s23 + $0x1b8] sm:$0xff] %vm6275_vm4, %v6202_v16  ;;  %v6199_v4 = vunpack.c.l.bf16 %v5887_v27  ;;  %v6200_v32 = vunpack.c.h.bf16 %v5887_v27  ;;  %v2369_v15 = vpop.f32.mrb[224].mxu0 }
 0x4cf   : > { %v2371_v24 = vpop.f32.mrb[225].mxu0 }
 0x4d0   : > { %6328 = vst.msk [vmem:[%s9709_s23 + $0x1a0] sm:$0xff] %vm6275_vm4, %v6199_v4  ;;  %6329 = vst.msk [vmem:[%s9709_s23 + $0x1a8] sm:$0xff] %vm6275_vm4, %v6200_v32  ;;  %v2373_v20 = vpop.f32.mrb[226].mxu0  ;;  %v6028_v5 = vmax.bf16 %v5647_v19, %v5646_v45 }
 0x4d1   : > { %v3217_v46 = vpack.c.bf16 %v2373_v20, %v2369_v15  ;;  %v2375_v0 = vpop.f32.mrb[227].mxu0 }
 0x4d2   : > { %v3218_v29 = vpack.c.bf16 %v2375_v0, %v2371_v24  ;;  %6117 = vmax.xlane.bf16.xlu1 %v10043_v50  ;;  %v6032_v41 = vmax.bf16 %v6030_v44, %v6028_v5 }
 0x4d3   : > { %v5457_v31 = vadd.bf16 %v10655_v58, %v3217_v46  ;;  %6012 = vmax.xlane.bf16.xlu0 %v10054_v26 }
 0x4d4   : > { %v5458_v30 = vadd.bf16 %v10655_v58, %v3218_v29 }
 0x4d5   : > { %v5649_v47 = vmax.bf16 %v10425_v25, %v5457_v31  ;;  %v5901_v54 = vpop.xlane.xlu0 %5900  ;;  %v5908_v18 = vpop.xlane.xlu1 %5907 }
 0x4d6   : > { %v5650_v61 = vmax.bf16 %v10425_v25, %v5458_v30  ;;  %v6203_v55 = vunpack.c.l.bf16 %v5901_v54  ;;  %v6204_v50 = vunpack.c.h.bf16 %v5901_v54  ;;  %v6205_v10 = vunpack.c.l.bf16 %v5908_v18 }
 0x4d7   : > { %v6206_v57 = vunpack.c.h.bf16 %v5908_v18 }
 0x4d8   : > { %6332 = vst.msk [vmem:[%s9709_s23 + $0x1c0] sm:$0xff] %vm6275_vm4, %v6203_v55  ;;  %6333 = vst.msk [vmem:[%s9709_s23 + $0x1c8] sm:$0xff] %vm6275_vm4, %v6204_v50  ;;  %v6035_v58 = vmax.bf16 %v5650_v61, %v5649_v47 }
 0x4d9   : > { %6334 = vst.msk [vmem:[%s9709_s23 + $0x1d0] sm:$0xff] %vm6275_vm4, %v6205_v10  ;;  %6335 = vst.msk [vmem:[%s9709_s23 + $0x1d8] sm:$0xff] %vm6275_vm4, %v6206_v57 }
 0x4da   : > { %6131 = vmax.xlane.bf16.xlu1 %v10078_v11  ;;  %v6039_v25 = vmax.bf16 %v6037_v37, %v6035_v58 }
 0x4db   : > { %6124 = vmax.xlane.bf16.xlu0 %v10088_v2 }
 0x4dd   : > { %v5915_v26 = vpop.xlane.xlu0 %5914 }
 0x4de   : > { %v6207_v21 = vunpack.c.l.bf16 %v5915_v26  ;;  %v6208_v1 = vunpack.c.h.bf16 %v5915_v26 }
 0x4e0   : > { %6336 = vst.msk [vmem:[%s9709_s23 + $0x1e0] sm:$0xff] %vm6275_vm4, %v6207_v21  ;;  %6337 = vst.msk [vmem:[%s9709_s23 + $0x1e8] sm:$0xff] %vm6275_vm4, %v6208_v1 }
 0x4e2   : > { %6019 = vmax.xlane.bf16.xlu1 %v10091_v43 }
 0x4e3   : > { %6026 = vmax.xlane.bf16.xlu0 %v6025_v8 }
 0x4e5   : > { %v5922_v13 = vpop.xlane.xlu1 %5921 }
 0x4e6   : > { %v6209_v53 = vunpack.c.l.bf16 %v5922_v13  ;;  %v6210_v12 = vunpack.c.h.bf16 %v5922_v13 }
 0x4e8   : > { %6338 = vst.msk [vmem:[%s9709_s23 + $0x1f0] sm:$0xff] %vm6275_vm4, %v6209_v53  ;;  %6339 = vst.msk [vmem:[%s9709_s23 + $0x1f8] sm:$0xff] %vm6275_vm4, %v6210_v12 }
 0x4ea   : > { %6033 = vmax.xlane.bf16.xlu1 %v6032_v41 }
 0x4eb   : > { %6040 = vmax.xlane.bf16.xlu0 %v6039_v25 }
 0x4ed   : > { %v5929_v11 = vpop.xlane.xlu0 %5928 }
 0x4ee   : > { %v6211_v2 = vunpack.c.l.bf16 %v5929_v11  ;;  %v6212_v62 = vunpack.c.h.bf16 %v5929_v11 }
 0x4f0   : > { %6340 = vst.msk [vmem:[%s9709_s23 + $0x200] sm:$0xff] %vm6275_vm4, %v6211_v2  ;;  %6341 = vst.msk [vmem:[%s9709_s23 + $0x208] sm:$0xff] %vm6275_vm4, %v6212_v62 }
 0x4f2   : > { %6145 = vmax.xlane.bf16.xlu1 %v10113_v38 }
 0x4f3   : > { %6138 = vmax.xlane.bf16.xlu0 %v10120_v3 }
 0x4f5   : > { %v5936_v43 = vpop.xlane.xlu1 %5935 }
 0x4f6   : > { %v6213_v40 = vunpack.c.l.bf16 %v5936_v43  ;;  %v6214_v51 = vunpack.c.h.bf16 %v5936_v43 }
 0x4f8   : > { %6342 = vst.msk [vmem:[%s9709_s23 + $0x210] sm:$0xff] %vm6275_vm4, %v6213_v40  ;;  %6343 = vst.msk [vmem:[%s9709_s23 + $0x218] sm:$0xff] %vm6275_vm4, %v6214_v51 }
 0x4fd   : > { %v5943_v60 = vpop.xlane.xlu0 %5942 }
 0x4fe   : > { %v6215_v59 = vunpack.c.l.bf16 %v5943_v60  ;;  %v6216_v7 = vunpack.c.h.bf16 %v5943_v60 }
 0x500   : > { %6344 = vst.msk [vmem:[%s9709_s23 + $0x220] sm:$0xff] %vm6275_vm4, %v6215_v59  ;;  %6345 = vst.msk [vmem:[%s9709_s23 + $0x228] sm:$0xff] %vm6275_vm4, %v6216_v7 }
 0x505   : > { %v5950_v28 = vpop.xlane.xlu1 %5949 }
 0x506   : > { %v6217_v17 = vunpack.c.l.bf16 %v5950_v28  ;;  %v6218_v33 = vunpack.c.h.bf16 %v5950_v28 }
 0x508   : > { %6346 = vst.msk [vmem:[%s9709_s23 + $0x230] sm:$0xff] %vm6275_vm4, %v6217_v17  ;;  %6347 = vst.msk [vmem:[%s9709_s23 + $0x238] sm:$0xff] %vm6275_vm4, %v6218_v33 }
 0x50d   : > { %v5957_v42 = vpop.xlane.xlu0 %5956 }
 0x50e   : > { %v6219_v38 = vunpack.c.l.bf16 %v5957_v42  ;;  %v6220_v22 = vunpack.c.h.bf16 %v5957_v42 }
 0x510   : > { %6348 = vst.msk [vmem:[%s9709_s23 + $0x240] sm:$0xff] %vm6275_vm4, %v6219_v38  ;;  %6349 = vst.msk [vmem:[%s9709_s23 + $0x248] sm:$0xff] %vm6275_vm4, %v6220_v22 }
 0x515   : > { %v5964_v6 = vpop.xlane.xlu1 %5963 }
 0x516   : > { %v6221_v48 = vunpack.c.l.bf16 %v5964_v6  ;;  %v6222_v63 = vunpack.c.h.bf16 %v5964_v6 }
 0x518   : > { %6350 = vst.msk [vmem:[%s9709_s23 + $0x250] sm:$0xff] %vm6275_vm4, %v6221_v48  ;;  %6351 = vst.msk [vmem:[%s9709_s23 + $0x258] sm:$0xff] %vm6275_vm4, %v6222_v63 }
 0x51d   : > { %v5971_v23 = vpop.xlane.xlu0 %5970 }
 0x51e   : > { %v6223_v39 = vunpack.c.l.bf16 %v5971_v23  ;;  %v6224_v56 = vunpack.c.h.bf16 %v5971_v23 }
 0x520   : > { %6352 = vst.msk [vmem:[%s9709_s23 + $0x260] sm:$0xff] %vm6275_vm4, %v6223_v39  ;;  %6353 = vst.msk [vmem:[%s9709_s23 + $0x268] sm:$0xff] %vm6275_vm4, %v6224_v56 }
 0x523   : > { %v6048_v3 = vpop.xlane.xlu1 %6047 }
 0x524   : > { %v6245_v52 = vunpack.c.l.bf16 %v6048_v3  ;;  %v6246_v8 = vunpack.c.h.bf16 %v6048_v3 }
 0x526   : > { %6374 = vst.msk [vmem:[%s9709_s23 + $0x310] sm:$0xff] %vm6275_vm4, %v6245_v52  ;;  %6375 = vst.msk [vmem:[%s9709_s23 + $0x318] sm:$0xff] %vm6275_vm4, %v6246_v8 }
 0x52b   : > { %v5978_v14 = vpop.xlane.xlu1 %5977 }
 0x52c   : > { %v6225_v34 = vunpack.c.l.bf16 %v5978_v14  ;;  %v6226_v35 = vunpack.c.h.bf16 %v5978_v14  ;;  %v6055_v49 = vpop.xlane.xlu0 %6054 }
 0x52d   : > { %v6247_v16 = vunpack.c.l.bf16 %v6055_v49  ;;  %v6248_v36 = vunpack.c.h.bf16 %v6055_v49 }
 0x52e   : > { %6354 = vst.msk [vmem:[%s9709_s23 + $0x270] sm:$0xff] %vm6275_vm4, %v6225_v34  ;;  %6355 = vst.msk [vmem:[%s9709_s23 + $0x278] sm:$0xff] %vm6275_vm4, %v6226_v35 }
 0x52f   : > { %6376 = vst.msk [vmem:[%s9709_s23 + $0x320] sm:$0xff] %vm6275_vm4, %v6247_v16  ;;  %6377 = vst.msk [vmem:[%s9709_s23 + $0x328] sm:$0xff] %vm6275_vm4, %v6248_v36 }
 0x533   : > { %v6062_v45 = vpop.xlane.xlu1 %6061 }
 0x534   : > { %v6249_v27 = vunpack.c.l.bf16 %v6062_v45  ;;  %v6250_v19 = vunpack.c.h.bf16 %v6062_v45  ;;  %v5985_v4 = vpop.xlane.xlu0 %5984 }
 0x535   : > { %v6227_v32 = vunpack.c.l.bf16 %v5985_v4  ;;  %v6228_v15 = vunpack.c.h.bf16 %v5985_v4 }
 0x536   : > { %6378 = vst.msk [vmem:[%s9709_s23 + $0x330] sm:$0xff] %vm6275_vm4, %v6249_v27  ;;  %6379 = vst.msk [vmem:[%s9709_s23 + $0x338] sm:$0xff] %vm6275_vm4, %v6250_v19 }
 0x537   : > { %6356 = vst.msk [vmem:[%s9709_s23 + $0x280] sm:$0xff] %vm6275_vm4, %v6227_v32  ;;  %6357 = vst.msk [vmem:[%s9709_s23 + $0x288] sm:$0xff] %vm6275_vm4, %v6228_v15 }
 0x53b   : > { %v6076_v24 = vpop.xlane.xlu1 %6075 }
 0x53c   : > { %v6253_v20 = vunpack.c.l.bf16 %v6076_v24  ;;  %v6254_v5 = vunpack.c.h.bf16 %v6076_v24  ;;  %v6069_v46 = vpop.xlane.xlu0 %6068 }
 0x53d   : > { %v6251_v0 = vunpack.c.l.bf16 %v6069_v46  ;;  %v6252_v44 = vunpack.c.h.bf16 %v6069_v46 }
 0x53e   : > { %6382 = vst.msk [vmem:[%s9709_s23 + $0x350] sm:$0xff] %vm6275_vm4, %v6253_v20  ;;  %6383 = vst.msk [vmem:[%s9709_s23 + $0x358] sm:$0xff] %vm6275_vm4, %v6254_v5 }
 0x53f   : > { %6380 = vst.msk [vmem:[%s9709_s23 + $0x340] sm:$0xff] %vm6275_vm4, %v6251_v0  ;;  %6381 = vst.msk [vmem:[%s9709_s23 + $0x348] sm:$0xff] %vm6275_vm4, %v6252_v44 }
 0x543   : > { %v5992_v29 = vpop.xlane.xlu1 %5991 }
 0x544   : > { %v6229_v41 = vunpack.c.l.bf16 %v5992_v29  ;;  %v6230_v31 = vunpack.c.h.bf16 %v5992_v29  ;;  %v6083_v30 = vpop.xlane.xlu0 %6082 }
 0x545   : > { %v6255_v9 = vunpack.c.l.bf16 %v6083_v30  ;;  %v6256_v47 = vunpack.c.h.bf16 %v6083_v30 }
 0x546   : > { %6358 = vst.msk [vmem:[%s9709_s23 + $0x290] sm:$0xff] %vm6275_vm4, %v6229_v41  ;;  %6359 = vst.msk [vmem:[%s9709_s23 + $0x298] sm:$0xff] %vm6275_vm4, %v6230_v31 }
 0x547   : > { %6384 = vst.msk [vmem:[%s9709_s23 + $0x360] sm:$0xff] %vm6275_vm4, %v6255_v9  ;;  %6385 = vst.msk [vmem:[%s9709_s23 + $0x368] sm:$0xff] %vm6275_vm4, %v6256_v47 }
 0x54b   : > { %v6090_v54 = vpop.xlane.xlu1 %6089 }
 0x54c   : > { %v6257_v18 = vunpack.c.l.bf16 %v6090_v54  ;;  %v6258_v61 = vunpack.c.h.bf16 %v6090_v54  ;;  %v5999_v55 = vpop.xlane.xlu0 %5998 }
 0x54d   : > { %v6231_v50 = vunpack.c.l.bf16 %v5999_v55  ;;  %v6232_v10 = vunpack.c.h.bf16 %v5999_v55 }
 0x54e   : > { %6386 = vst.msk [vmem:[%s9709_s23 + $0x370] sm:$0xff] %vm6275_vm4, %v6257_v18  ;;  %6387 = vst.msk [vmem:[%s9709_s23 + $0x378] sm:$0xff] %vm6275_vm4, %v6258_v61 }
 0x54f   : > { %6360 = vst.msk [vmem:[%s9709_s23 + $0x2a0] sm:$0xff] %vm6275_vm4, %v6231_v50  ;;  %6361 = vst.msk [vmem:[%s9709_s23 + $0x2a8] sm:$0xff] %vm6275_vm4, %v6232_v10 }
 0x553   : > { %v6104_v57 = vpop.xlane.xlu1 %6103 }
 0x554   : > { %v6261_v58 = vunpack.c.l.bf16 %v6104_v57  ;;  %v6262_v37 = vunpack.c.h.bf16 %v6104_v57  ;;  %v6097_v25 = vpop.xlane.xlu0 %6096 }
 0x555   : > { %v6259_v26 = vunpack.c.l.bf16 %v6097_v25  ;;  %v6260_v21 = vunpack.c.h.bf16 %v6097_v25 }
 0x556   : > { %6390 = vst.msk [vmem:[%s9709_s23 + $0x390] sm:$0xff] %vm6275_vm4, %v6261_v58  ;;  %6391 = vst.msk [vmem:[%s9709_s23 + $0x398] sm:$0xff] %vm6275_vm4, %v6262_v37 }
 0x557   : > { %6388 = vst.msk [vmem:[%s9709_s23 + $0x380] sm:$0xff] %vm6275_vm4, %v6259_v26  ;;  %6389 = vst.msk [vmem:[%s9709_s23 + $0x388] sm:$0xff] %vm6275_vm4, %v6260_v21 }
 0x55b   : > { %v6006_v1 = vpop.xlane.xlu1 %6005 }
 0x55c   : > { %v6233_v13 = vunpack.c.l.bf16 %v6006_v1  ;;  %v6234_v53 = vunpack.c.h.bf16 %v6006_v1  ;;  %v6111_v12 = vpop.xlane.xlu0 %6110 }
 0x55d   : > { %v6263_v11 = vunpack.c.l.bf16 %v6111_v12  ;;  %v6264_v2 = vunpack.c.h.bf16 %v6111_v12 }
 0x55e   : > { %6362 = vst.msk [vmem:[%s9709_s23 + $0x2b0] sm:$0xff] %vm6275_vm4, %v6233_v13  ;;  %6363 = vst.msk [vmem:[%s9709_s23 + $0x2b8] sm:$0xff] %vm6275_vm4, %v6234_v53 }
 0x55f   : > { %6392 = vst.msk [vmem:[%s9709_s23 + $0x3a0] sm:$0xff] %vm6275_vm4, %v6263_v11  ;;  %6393 = vst.msk [vmem:[%s9709_s23 + $0x3a8] sm:$0xff] %vm6275_vm4, %v6264_v2 }
 0x563   : > { %v6118_v62 = vpop.xlane.xlu1 %6117 }
 0x564   : > { %v6265_v43 = vunpack.c.l.bf16 %v6118_v62  ;;  %v6266_v40 = vunpack.c.h.bf16 %v6118_v62  ;;  %v6013_v51 = vpop.xlane.xlu0 %6012 }
 0x565   : > { %v6235_v60 = vunpack.c.l.bf16 %v6013_v51  ;;  %v6236_v59 = vunpack.c.h.bf16 %v6013_v51 }
 0x566   : > { %6394 = vst.msk [vmem:[%s9709_s23 + $0x3b0] sm:$0xff] %vm6275_vm4, %v6265_v43  ;;  %6395 = vst.msk [vmem:[%s9709_s23 + $0x3b8] sm:$0xff] %vm6275_vm4, %v6266_v40 }
 0x567   : > { %6364 = vst.msk [vmem:[%s9709_s23 + $0x2c0] sm:$0xff] %vm6275_vm4, %v6235_v60  ;;  %6365 = vst.msk [vmem:[%s9709_s23 + $0x2c8] sm:$0xff] %vm6275_vm4, %v6236_v59 }
 0x56b   : > { %v6132_v7 = vpop.xlane.xlu1 %6131 }
 0x56c   : > { %v6269_v28 = vunpack.c.l.bf16 %v6132_v7  ;;  %v6270_v17 = vunpack.c.h.bf16 %v6132_v7  ;;  %v6125_v33 = vpop.xlane.xlu0 %6124 }
 0x56d   : > { %v6267_v42 = vunpack.c.l.bf16 %v6125_v33  ;;  %v6268_v38 = vunpack.c.h.bf16 %v6125_v33 }
 0x56e   : > { %6398 = vst.msk [vmem:[%s9709_s23 + $0x3d0] sm:$0xff] %vm6275_vm4, %v6269_v28  ;;  %6399 = vst.msk [vmem:[%s9709_s23 + $0x3d8] sm:$0xff] %vm6275_vm4, %v6270_v17 }
 0x56f   : > { %6396 = vst.msk [vmem:[%s9709_s23 + $0x3c0] sm:$0xff] %vm6275_vm4, %v6267_v42  ;;  %6397 = vst.msk [vmem:[%s9709_s23 + $0x3c8] sm:$0xff] %vm6275_vm4, %v6268_v38 }
 0x573   : > { %v6020_v22 = vpop.xlane.xlu1 %6019 }
 0x574   : > { %v6237_v6 = vunpack.c.l.bf16 %v6020_v22  ;;  %v6238_v48 = vunpack.c.h.bf16 %v6020_v22  ;;  %v6027_v63 = vpop.xlane.xlu0 %6026 }
 0x575   : > { %v6239_v23 = vunpack.c.l.bf16 %v6027_v63  ;;  %v6240_v39 = vunpack.c.h.bf16 %v6027_v63 }
 0x576   : > { %6366 = vst.msk [vmem:[%s9709_s23 + $0x2d0] sm:$0xff] %vm6275_vm4, %v6237_v6  ;;  %6367 = vst.msk [vmem:[%s9709_s23 + $0x2d8] sm:$0xff] %vm6275_vm4, %v6238_v48 }
 0x577   : > { %6368 = vst.msk [vmem:[%s9709_s23 + $0x2e0] sm:$0xff] %vm6275_vm4, %v6239_v23  ;;  %6369 = vst.msk [vmem:[%s9709_s23 + $0x2e8] sm:$0xff] %vm6275_vm4, %v6240_v39 }
 0x57b   : > { %v6034_v56 = vpop.xlane.xlu1 %6033 }
 0x57c   : > { %v6241_v3 = vunpack.c.l.bf16 %v6034_v56  ;;  %v6242_v52 = vunpack.c.h.bf16 %v6034_v56  ;;  %v6041_v8 = vpop.xlane.xlu0 %6040 }
 0x57d   : > { %v6243_v14 = vunpack.c.l.bf16 %v6041_v8  ;;  %v6244_v34 = vunpack.c.h.bf16 %v6041_v8 }
 0x57e   : > { %6370 = vst.msk [vmem:[%s9709_s23 + $0x2f0] sm:$0xff] %vm6275_vm4, %v6241_v3  ;;  %6371 = vst.msk [vmem:[%s9709_s23 + $0x2f8] sm:$0xff] %vm6275_vm4, %v6242_v52 }
 0x57f   : > { %6372 = vst.msk [vmem:[%s9709_s23 + $0x300] sm:$0xff] %vm6275_vm4, %v6243_v14  ;;  %6373 = vst.msk [vmem:[%s9709_s23 + $0x308] sm:$0xff] %vm6275_vm4, %v6244_v34 }
 0x583   : > { %v6146_v35 = vpop.xlane.xlu1 %6145 }
 0x584   : > { %v6273_v49 = vunpack.c.l.bf16 %v6146_v35  ;;  %v6274_v16 = vunpack.c.h.bf16 %v6146_v35  ;;  %v6139_v36 = vpop.xlane.xlu0 %6138 }
 0x585   : > { %v6271_v45 = vunpack.c.l.bf16 %v6139_v36  ;;  %v6272_v27 = vunpack.c.h.bf16 %v6139_v36 }
 0x586   : > { %6402 = vst.msk [vmem:[%s9709_s23 + $0x3f0] sm:$0xff] %vm6275_vm4, %v6273_v49  ;;  %6403 = vst.msk [vmem:[%s9709_s23 + $0x3f8] sm:$0xff] %vm6275_vm4, %v6274_v16 }
 0x587   : > { %6400 = vst.msk [vmem:[%s9709_s23 + $0x3e0] sm:$0xff] %vm6275_vm4, %v6271_v45  ;;  %6401 = vst.msk [vmem:[%s9709_s23 + $0x3e8] sm:$0xff] %vm6275_vm4, %v6272_v27 }
 0x588 PF: > { %s19_s26 = sadd.s32 1, %s7282_s26   ;;  %s10727_s24 = smov %s7278_s25 }
 0x589   : > { %p16_p5 = scmp.ge.s32.totalorder %s19_s26, 4   ;;  %s10728_s25 = smov %s10730_s10 }
 0x58b   :  { %18 = sbr.rel (!%p16_p5) target bundleno = 3 (0x3), region = 91 }
 0x592   :  { %6433 = vsyncpa [#allocation3], 1 }
 0x593   :  { %6435 = vsyncpa [#allocation3 + $0x1], 1 }
 0x594   :  { %6436 = vsyncpa [#allocation5], 1 }

// kernel: pointnetfeat_forward.5
= control target key start
LH: loop header
LB: loop body
LE: loop exit
PB: predicated region body
PF: predicated region fallthrough
CT: control target
= control target key end

     0   :  { %s6959_s24 = smov 0   ;;  %s6961_s25 = smov 0   ;;  %s9686_s0 = inlined_call_operand.vmem [shape: f32[2,3,300], index: 0, kind: input, shape index: {}]   ;;  %s9687_s1 = inlined_call_operand.vmem [shape: f32[2,64,3], index: 1, kind: input, shape index: {}]   ;;  %s9688_s2 = inlined_call_operand.vmem [shape: f32[64,1], index: 2, kind: input, shape index: {}]   ;;  %s9689_s3 = inlined_call_operand.vmem [shape: bf16[128,64], index: 3, kind: input, shape index: {}]   ;;  %s9690_s4 = inlined_call_operand.vmem [shape: bf16[128,1], index: 4, kind: input, shape index: {}]   ;;  %s9691_s5 = inlined_call_operand.vmem [shape: bf16[1024,128], index: 5, kind: input, shape index: {}]   ;;  %s9692_s6 = inlined_call_operand.vmem [shape: bf16[1024,1], index: 6, kind: input, shape index: {}]   ;;  %s9693_s7 = inlined_call_operand.vmem [shape: f32[1,2,1024,1], index: 7, kind: output, shape index: {}]  }
   0x1   :  { %s6963_s26 = smov 0  }
   0x2 LB: > { %s32_s27 = sadd.s32 1, %s6910_s25  ;;  %p6296_p0 = scmp.ge.s32.totalorder %s6914_s26, 1  ;;  %s6914_s26 = sphi %s6963_s26, %s17_s26   ;;  %s6910_s25 = sphi %s6961_s25, %s10093_s25   ;;  %s6906_s24 = sphi %s6959_s24, %s10092_s24  }
   0x3   : > { %p34_p1 = scmp.ge.s32.totalorder %s32_s27, 2  ;;  %p279_p2 = scmp.lt.s32.totalorder %s6914_s26, 3 }
   0x5   : > { %s10095_s27 = smov (%p34_p1, %s32_s27), 0  ;;  %p280_p3 = pnand %p6296_p0, %p279_p2 }
   0x7   : > { %283 = sbr.rel (%p280_p3) target bundleno = 1338 (0x53a), region = 48 }
   0xe   : > { %v365_v0 = vld [vmem:[%s9688_s2 + $0x10] sm:$0xff]  ;;  %v363_v1 = vld [vmem:[%s9688_s2] sm:$0xff]  ;;  %p327_p4 = scmp.lt.s32.totalorder %s6906_s24, 1  ;;  %v9694_v2 = vmov 0   ;;  %v366_v3 = vld [vmem:[%s9688_s2 + $0x18] sm:$0xff]  ;;  %v6917_v5 = vmov 0.0  }
   0xf   : > { %6805 = vset.pattern.permute.xlu1 %v9694_v2  ;;  %6804 = vset.pattern.permute.xlu0 %v9694_v2  ;;  %v364_v4 = vld [vmem:[%s9688_s2 + $0x8] sm:$0xff]  ;;  %vm414_vm0 = vcmask 23552   ;;  %vm439_vm1 = vcmask 1042432   ;;  %v367_v9 = vld [vmem:[%s9688_s2 + $0x20] sm:$0xff]  ;;  %v370_v14 = vld [vmem:[%s9688_s2 + $0x38] sm:$0xff]  ;;  %vm756_vm2 = vcmask 523264  }
  0x10   : > { %383 = vperm.xlu1 %6805, %v365_v0   ;;  %373 = vperm.xlu0 %6804, %v363_v1   ;;  %s10097_s24 = smov (!%p327_p4, %s6906_s24), 1  ;;  %v368_v7 = vld [vmem:[%s9688_s2 + $0x28] sm:$0xff]  ;;  %v369_v15 = vld [vmem:[%s9688_s2 + $0x30] sm:$0xff]  ;;  %v1016_v18 = vld [vmem:[%s9690_s4 + $0x4] sm:$0xf]  ;;  %vm5482_vm3 = vcmask 359424  }
  0x11   : > { %510 = vmatprep.mubr.f32.mxu0 %v6917_v5  ;;  %s6776_s13 = smul.u32 12, %s10097_s24  ;;  %s6483_s14 = sshll.u32 %s10097_s24, 6  ;;  %v1015_v19 = vld [vmem:[%s9690_s4] sm:$0xf]  ;;  %v1018_v22 = vld [vmem:[%s9690_s4 + $0xc] sm:$0xf] }
  0x12   : > { %s6999_s17 = scalar_lea.vmem %s9687_s1, %s6483_s14  ;;  %v1017_v23 = vld [vmem:[%s9690_s4 + $0x8] sm:$0xf]  ;;  %v1020_v25 = vld [vmem:[%s9690_s4 + $0x14] sm:$0xf]  ;;  %v1019_v26 = vld [vmem:[%s9690_s4 + $0x10] sm:$0xf] }
  0x13   : > { %s334_s20 = scalar_lea.vmem %s9686_s0, %s6776_s13  ;;  %v355_v6 = vld [vmem:[%s6999_s17] sm:$0xff]  ;;  %v356_v12 = vld [vmem:[%s6999_s17 + $0x8] sm:$0xff]  ;;  %v357_v13 = vld [vmem:[%s6999_s17 + $0x10] sm:$0xff]  ;;  %s6484_s12 = sshll.u32 %s10097_s24, 10  ;;  %vm6059_vm4 = vcmask 7168  }
  0x14   : > { %388 = vperm.xlu1 %6805, %v366_v3   ;;  %378 = vperm.xlu0 %6804, %v364_v4   ;;  %v354_v8 = vld [vmem:[%s334_s20 + $0x8] sm:$0x7]  ;;  %v353_v10 = vld [vmem:[%s334_s20] sm:$0x77]  ;;  %v358_v16 = vld [vmem:[%s6999_s17 + $0x18] sm:$0xff]  ;;  %s9143_s15 = scalar_lea.vmem %s9693_s7, %s6484_s12 }
  0x15   : > { %6580 = vmatprep.mubr.msk.f32.mxu1 %vm414_vm0, %v355_v6  ;;  %6578 = vmatprep.subr.msk.mxu1 %vm439_vm1, %v354_v8  ;;  %v413_v11 = vcombine.high %v353_v10, %v353_v10  ;;  %v359_v17 = vld [vmem:[%s6999_s17 + $0x20] sm:$0xff]  ;;  %v360_v20 = vld [vmem:[%s6999_s17 + $0x28] sm:$0xff]  ;;  %v361_v21 = vld [vmem:[%s6999_s17 + $0x30] sm:$0xff] }
  0x16   : > { %6579 = vmatpush3.msk.msra.mxu1 %vm439_vm1, %v354_v8  ;;  %v362_v24 = vld [vmem:[%s6999_s17 + $0x38] sm:$0xff]  ;;  %v1024_v29 = vld [vmem:[%s9690_s4 + $0x24] sm:$0xf]  ;;  %v1023_v30 = vld [vmem:[%s9690_s4 + $0x20] sm:$0xf] }
  0x17   : > { %6302 = vmatprep.subr.msk.mxu0 %vm439_vm1, %v413_v11  ;;  %6581 = vmatmul.mubr.msk.f32.vlgmr.msra.gmra.mrb[0].mxu1 %vm414_vm0, %v356_v12  ;;  %v1022_v27 = vld [vmem:[%s9690_s4 + $0x1c] sm:$0xf]  ;;  %v1021_v28 = vld [vmem:[%s9690_s4 + $0x18] sm:$0xf]  ;;  %v1026_v31 = vld [vmem:[%s9690_s4 + $0x2c] sm:$0xf] }
  0x18   : > { %398 = vperm.xlu1 %6805, %v368_v7   ;;  %393 = vperm.xlu0 %6804, %v367_v9   ;;  %v1025_v32 = vld [vmem:[%s9690_s4 + $0x28] sm:$0xf]  ;;  %v1028_v33 = vld [vmem:[%s9690_s4 + $0x34] sm:$0xf]  ;;  %v1027_v34 = vld [vmem:[%s9690_s4 + $0x30] sm:$0xf] }
  0x19   : > { %6303 = vmatpush1.msk.msra.mxu0 %vm439_vm1, %v353_v10  ;;  %6583 = vmatprep.mubr.msk.f32.mxu1 %vm414_vm0, %v357_v13  ;;  %v1030_v35 = vld [vmem:[%s9690_s4 + $0x3c] sm:$0xf]  ;;  %v1029_v36 = vld [vmem:[%s9690_s4 + $0x38] sm:$0xf]  ;;  %v3242_v37 = vld [vmem:[%s9692_s6 + $0x4] sm:$0xf] }
  0x1a   : > { %6304 = vmatmul.mubr.msk.f32.vlgmr.msra.gmra.mrb[0].mxu0 %vm414_vm0, %v355_v6  ;;  %v3241_v38 = vld [vmem:[%s9692_s6] sm:$0xf]  ;;  %v3244_v39 = vld [vmem:[%s9692_s6 + $0xc] sm:$0xf]  ;;  %v3243_v40 = vld [vmem:[%s9692_s6 + $0x8] sm:$0xf] }
  0x1b   : > { %6584 = vmatmul.mubr.msk.f32.gmra.mrb[2].mxu1 %vm414_vm0, %v358_v16  ;;  %516 = vmatprep.mubr.f32.mxu0 %v6917_v5  ;;  %v3246_v41 = vld [vmem:[%s9692_s6 + $0x14] sm:$0xf]  ;;  %v3245_v42 = vld [vmem:[%s9692_s6 + $0x10] sm:$0xf]  ;;  %v3248_v43 = vld [vmem:[%s9692_s6 + $0x1c] sm:$0xf] }
  0x1c   : > { %408 = vperm.xlu1 %6805, %v370_v14   ;;  %403 = vperm.xlu0 %6804, %v369_v15   ;;  %v3247_v44 = vld [vmem:[%s9692_s6 + $0x18] sm:$0xf]  ;;  %v3250_v45 = vld [vmem:[%s9692_s6 + $0x24] sm:$0xf]  ;;  %v3249_v46 = vld [vmem:[%s9692_s6 + $0x20] sm:$0xf] }
  0x1d   : > { %6586 = vmatprep.mubr.msk.f32.mxu1 %vm414_vm0, %v359_v17  ;;  %v3252_v47 = vld [vmem:[%s9692_s6 + $0x2c] sm:$0xf]  ;;  %v3251_v48 = vld [vmem:[%s9692_s6 + $0x28] sm:$0xf]  ;;  %v3254_v49 = vld [vmem:[%s9692_s6 + $0x34] sm:$0xf] }
  0x1e   : > { %6305 = vmatmul.mubr.msk.f32.gmra.mrb[2].mxu0 %vm414_vm0, %v356_v12  ;;  %v3253_v50 = vld [vmem:[%s9692_s6 + $0x30] sm:$0xf]  ;;  %v3256_v51 = vld [vmem:[%s9692_s6 + $0x3c] sm:$0xf]  ;;  %v3255_v52 = vld [vmem:[%s9692_s6 + $0x38] sm:$0xf] }
  0x1f   : > { %6587 = vmatmul.mubr.msk.f32.gmra.mrb[4].mxu1 %vm414_vm0, %v360_v20  ;;  %522 = vmatprep.mubr.f32.mxu0 %v6917_v5  ;;  %v3258_v53 = vld [vmem:[%s9692_s6 + $0x44] sm:$0xf]  ;;  %v3257_v54 = vld [vmem:[%s9692_s6 + $0x40] sm:$0xf]  ;;  %v3260_v55 = vld [vmem:[%s9692_s6 + $0x4c] sm:$0xf] }
  0x20   : > { %1045 = vperm.xlu1 %6805, %v1016_v18   ;;  %1033 = vperm.xlu0 %6804, %v1015_v19   ;;  %v3259_v56 = vld [vmem:[%s9692_s6 + $0x48] sm:$0xf]  ;;  %v3262_v57 = vld [vmem:[%s9692_s6 + $0x54] sm:$0xf]  ;;  %v3261_v58 = vld [vmem:[%s9692_s6 + $0x50] sm:$0xf] }
  0x21   : > { %6589 = vmatprep.mubr.msk.f32.mxu1 %vm414_vm0, %v361_v21  ;;  %v3264_v59 = vld [vmem:[%s9692_s6 + $0x5c] sm:$0xf]  ;;  %v3263_v60 = vld [vmem:[%s9692_s6 + $0x58] sm:$0xf]  ;;  %v3266_v61 = vld [vmem:[%s9692_s6 + $0x64] sm:$0xf] }
  0x22   : > { %6306 = vmatmul.mubr.msk.f32.gmra.mrb[4].mxu0 %vm414_vm0, %v357_v13  ;;  %v3265_v62 = vld [vmem:[%s9692_s6 + $0x60] sm:$0xf]  ;;  %v3268_v63 = vld [vmem:[%s9692_s6 + $0x6c] sm:$0xf]  ;;  %v3267_v0 = vld [vmem:[%s9692_s6 + $0x68] sm:$0xf] }
  0x23   : > { %6590 = vmatmul.mubr.msk.f32.gmra.mrb[6].mxu1 %vm414_vm0, %v362_v24  ;;  %528 = vmatprep.mubr.f32.mxu0 %v6917_v5  ;;  %v3270_v1 = vld [vmem:[%s9692_s6 + $0x74] sm:$0xf]  ;;  %v3269_v3 = vld [vmem:[%s9692_s6 + $0x70] sm:$0xf]  ;;  %v3272_v4 = vld [vmem:[%s9692_s6 + $0x7c] sm:$0xf] }
  0x24   : > { %1069 = vperm.xlu1 %6805, %v1018_v22   ;;  %1057 = vperm.xlu0 %6804, %v1017_v23   ;;  %v3274_v6 = vld [vmem:[%s9692_s6 + $0x84] sm:$0xf]  ;;  %v3273_v7 = vld [vmem:[%s9692_s6 + $0x80] sm:$0xf]  ;;  %v3276_v8 = vld [vmem:[%s9692_s6 + $0x8c] sm:$0xf] }
  0x25   : > { %813 = vmatprep.mubr.bf16.mxu1 %v9694_v2  ;;  %v3275_v9 = vld [vmem:[%s9692_s6 + $0x88] sm:$0xf]  ;;  %v7211_v10 = vld [vmem:[%s9689_s3] sm:$0xff]   ;;  %v3278_v11 = vld [vmem:[%s9692_s6 + $0x94] sm:$0xf] }
  0x26   : > { %6307 = vmatmul.mubr.msk.f32.gmra.mrb[6].mxu0 %vm414_vm0, %v358_v16  ;;  %v3277_v12 = vld [vmem:[%s9692_s6 + $0x90] sm:$0xf]  ;;  %v3280_v13 = vld [vmem:[%s9692_s6 + $0x9c] sm:$0xf]  ;;  %v3279_v14 = vld [vmem:[%s9692_s6 + $0x98] sm:$0xf] }
  0x27   : > { %534 = vmatprep.mubr.f32.mxu0 %v6917_v5  ;;  %v3282_v15 = vld [vmem:[%s9692_s6 + $0xa4] sm:$0xf]  ;;  %v3281_v16 = vld [vmem:[%s9692_s6 + $0xa0] sm:$0xf]  ;;  %v3284_v19 = vld [vmem:[%s9692_s6 + $0xac] sm:$0xf] }
  0x28   : > { %1093 = vperm.xlu1 %6805, %v1020_v25   ;;  %1081 = vperm.xlu0 %6804, %v1019_v26   ;;  %v3286_v23 = vld [vmem:[%s9692_s6 + $0xb4] sm:$0xf] }
  0x2a   : > { %6308 = vmatmul.mubr.msk.f32.gmra.mrb[8].mxu0 %vm414_vm0, %v359_v17 }
  0x2b   : > { %540 = vmatprep.mubr.f32.mxu0 %v6917_v5 }
  0x2c   : > { %1117 = vperm.xlu1 %6805, %v1022_v27   ;;  %1105 = vperm.xlu0 %6804, %v1021_v28   ;;  %v3288_v27 = vld [vmem:[%s9692_s6 + $0xbc] sm:$0xf]  ;;  %v3287_v28 = vld [vmem:[%s9692_s6 + $0xb8] sm:$0xf] }
  0x2e   : > { %6309 = vmatmul.mubr.msk.f32.gmra.mrb[10].mxu0 %vm414_vm0, %v360_v20  ;;  %v3283_v20 = vld [vmem:[%s9692_s6 + $0xa8] sm:$0xf] }
  0x2f   : > { %546 = vmatprep.mubr.f32.mxu0 %v6917_v5 }
  0x30   : > { %1141 = vperm.xlu1 %6805, %v1024_v29   ;;  %1129 = vperm.xlu0 %6804, %v1023_v30  }
  0x32   : > { %6310 = vmatmul.mubr.msk.f32.gmra.mrb[12].mxu0 %vm414_vm0, %v361_v21 }
  0x33   : > { %552 = vmatprep.mubr.f32.mxu0 %v6917_v5  ;;  %v3271_v5 = vld [vmem:[%s9692_s6 + $0x78] sm:$0xf] }
  0x34   : > { %1165 = vperm.xlu1 %6805, %v1026_v31   ;;  %1153 = vperm.xlu0 %6804, %v1025_v32   ;;  %v3290_v31 = vld [vmem:[%s9692_s6 + $0xc4] sm:$0xf]  ;;  %v3289_v32 = vld [vmem:[%s9692_s6 + $0xc0] sm:$0xf] }
  0x36   : > { %6311 = vmatmul.mubr.msk.f32.gmra.mrb[14].mxu0 %vm414_vm0, %v362_v24  ;;  %v3285_v24 = vld [vmem:[%s9692_s6 + $0xb0] sm:$0xf] }
  0x37   : > { %6600 = vmatprep.mubr.msk.bf16.mxu0 %vm756_vm2, %v7211_v10 }
  0x38   : > { %1189 = vperm.xlu1 %6805, %v1028_v33   ;;  %1177 = vperm.xlu0 %6804, %v1027_v34  }
  0x3c   : > { %1213 = vperm.xlu1 %6805, %v1030_v35   ;;  %1201 = vperm.xlu0 %6804, %v1029_v36   ;;  %v3292_v35 = vld [vmem:[%s9692_s6 + $0xcc] sm:$0xf]  ;;  %v3291_v36 = vld [vmem:[%s9692_s6 + $0xc8] sm:$0xf] }
  0x40   : > { %3383 = vperm.xlu1 %6805, %v3242_v37   ;;  %3371 = vperm.xlu0 %6804, %v3241_v38  }
  0x44   : > { %3407 = vperm.xlu1 %6805, %v3244_v39   ;;  %3395 = vperm.xlu0 %6804, %v3243_v40   ;;  %v3294_v39 = vld [vmem:[%s9692_s6 + $0xd4] sm:$0xf]  ;;  %v3293_v40 = vld [vmem:[%s9692_s6 + $0xd0] sm:$0xf] }
  0x48   : > { %3431 = vperm.xlu1 %6805, %v3246_v41   ;;  %3419 = vperm.xlu0 %6804, %v3245_v42  }
  0x4c   : > { %3455 = vperm.xlu1 %6805, %v3248_v43   ;;  %3443 = vperm.xlu0 %6804, %v3247_v44   ;;  %v3296_v43 = vld [vmem:[%s9692_s6 + $0xdc] sm:$0xf]  ;;  %v3295_v44 = vld [vmem:[%s9692_s6 + $0xd8] sm:$0xf] }
  0x50   : > { %3479 = vperm.xlu1 %6805, %v3250_v45   ;;  %3467 = vperm.xlu0 %6804, %v3249_v46  }
  0x54   : > { %3503 = vperm.xlu1 %6805, %v3252_v47   ;;  %3491 = vperm.xlu0 %6804, %v3251_v48   ;;  %v3298_v47 = vld [vmem:[%s9692_s6 + $0xe4] sm:$0xf]  ;;  %v3297_v48 = vld [vmem:[%s9692_s6 + $0xe0] sm:$0xf] }
  0x58   : > { %3527 = vperm.xlu1 %6805, %v3254_v49   ;;  %3515 = vperm.xlu0 %6804, %v3253_v50  }
  0x5c   : > { %3551 = vperm.xlu1 %6805, %v3256_v51   ;;  %3539 = vperm.xlu0 %6804, %v3255_v52   ;;  %v3300_v51 = vld [vmem:[%s9692_s6 + $0xec] sm:$0xf]  ;;  %v3299_v52 = vld [vmem:[%s9692_s6 + $0xe8] sm:$0xf] }
  0x60   : > { %3575 = vperm.xlu1 %6805, %v3258_v53   ;;  %3563 = vperm.xlu0 %6804, %v3257_v54  }
  0x64   : > { %3599 = vperm.xlu1 %6805, %v3260_v55   ;;  %3587 = vperm.xlu0 %6804, %v3259_v56   ;;  %v3302_v55 = vld [vmem:[%s9692_s6 + $0xf4] sm:$0xf]  ;;  %v3301_v56 = vld [vmem:[%s9692_s6 + $0xf0] sm:$0xf] }
  0x68   : > { %3623 = vperm.xlu1 %6805, %v3262_v57   ;;  %3611 = vperm.xlu0 %6804, %v3261_v58  }
  0x6c   : > { %3647 = vperm.xlu1 %6805, %v3264_v59   ;;  %3635 = vperm.xlu0 %6804, %v3263_v60   ;;  %v3304_v59 = vld [vmem:[%s9692_s6 + $0xfc] sm:$0xf]  ;;  %v3303_v60 = vld [vmem:[%s9692_s6 + $0xf8] sm:$0xf] }
  0x70   : > { %3671 = vperm.xlu1 %6805, %v3266_v61   ;;  %3659 = vperm.xlu0 %6804, %v3265_v62  }
  0x74   : > { %3695 = vperm.xlu1 %6805, %v3268_v63   ;;  %3683 = vperm.xlu0 %6804, %v3267_v0   ;;  %v3306_v63 = vld [vmem:[%s9692_s6 + $0x104] sm:$0xf]  ;;  %v3305_v0 = vld [vmem:[%s9692_s6 + $0x100] sm:$0xf] }
  0x78   : > { %3719 = vperm.xlu1 %6805, %v3270_v1   ;;  %3707 = vperm.xlu0 %6804, %v3269_v3  }
  0x7c   : > { %3743 = vperm.xlu1 %6805, %v3272_v4   ;;  %3731 = vperm.xlu0 %6804, %v3271_v5   ;;  %v3308_v4 = vld [vmem:[%s9692_s6 + $0x10c] sm:$0xf]  ;;  %v3307_v5 = vld [vmem:[%s9692_s6 + $0x108] sm:$0xf] }
  0x80   : > { %3767 = vperm.xlu1 %6805, %v3274_v6   ;;  %3755 = vperm.xlu0 %6804, %v3273_v7  }
  0x84   : > { %3791 = vperm.xlu1 %6805, %v3276_v8   ;;  %3779 = vperm.xlu0 %6804, %v3275_v9   ;;  %v3310_v8 = vld [vmem:[%s9692_s6 + $0x114] sm:$0xf]  ;;  %v3309_v9 = vld [vmem:[%s9692_s6 + $0x110] sm:$0xf] }
  0x88   : > { %3815 = vperm.xlu1 %6805, %v3278_v11   ;;  %3803 = vperm.xlu0 %6804, %v3277_v12  }
  0x8c   : > { %3839 = vperm.xlu1 %6805, %v3280_v13   ;;  %3827 = vperm.xlu0 %6804, %v3279_v14   ;;  %v3312_v13 = vld [vmem:[%s9692_s6 + $0x11c] sm:$0xf]  ;;  %v3311_v14 = vld [vmem:[%s9692_s6 + $0x118] sm:$0xf] }
  0x8f   : > { %v7233_v17 = vpop.permute.xlu1 %383  ;;  %v7235_v18 = vpop.permute.xlu0 %373 }
  0x90   : > { %3863 = vperm.xlu1 %6805, %v3282_v15   ;;  %3851 = vperm.xlu0 %6804, %v3281_v16  }
  0x93   : > { %v7243_v21 = vpop.permute.xlu1 %388  ;;  %v7245_v22 = vpop.permute.xlu0 %378 }
  0x94   : > { %3887 = vperm.xlu1 %6805, %v3284_v19   ;;  %3875 = vperm.xlu0 %6804, %v3283_v20   ;;  %v3314_v19 = vld [vmem:[%s9692_s6 + $0x124] sm:$0xf]  ;;  %v3313_v20 = vld [vmem:[%s9692_s6 + $0x120] sm:$0xf] }
  0x97   : > { %v7253_v25 = vpop.permute.xlu1 %398  ;;  %v7255_v26 = vpop.permute.xlu0 %393 }
  0x98   : > { %3911 = vperm.xlu1 %6805, %v3286_v23   ;;  %3899 = vperm.xlu0 %6804, %v3285_v24  }
  0x9b   : > { %v7263_v29 = vpop.permute.xlu1 %408  ;;  %v7265_v30 = vpop.permute.xlu0 %403 }
  0x9c   : > { %3935 = vperm.xlu1 %6805, %v3288_v27   ;;  %3923 = vperm.xlu0 %6804, %v3287_v28   ;;  %v3316_v27 = vld [vmem:[%s9692_s6 + $0x12c] sm:$0xf]  ;;  %v3315_v28 = vld [vmem:[%s9692_s6 + $0x128] sm:$0xf] }
  0x9f   : > { %v7273_v33 = vpop.permute.xlu1 %1045  ;;  %v7275_v34 = vpop.permute.xlu0 %1033 }
  0xa0   : > { %3959 = vperm.xlu1 %6805, %v3290_v31   ;;  %3947 = vperm.xlu0 %6804, %v3289_v32  }
  0xa3   : > { %v7283_v37 = vpop.permute.xlu1 %1069  ;;  %v7285_v38 = vpop.permute.xlu0 %1057 }
  0xa4   : > { %3983 = vperm.xlu1 %6805, %v3292_v35   ;;  %3971 = vperm.xlu0 %6804, %v3291_v36   ;;  %v3318_v35 = vld [vmem:[%s9692_s6 + $0x134] sm:$0xf]  ;;  %v3317_v36 = vld [vmem:[%s9692_s6 + $0x130] sm:$0xf] }
  0xa7   : > { %v7293_v41 = vpop.permute.xlu1 %1093  ;;  %v7295_v42 = vpop.permute.xlu0 %1081 }
  0xa8   : > { %4007 = vperm.xlu1 %6805, %v3294_v39   ;;  %3995 = vperm.xlu0 %6804, %v3293_v40  }
  0xab   : > { %v7303_v45 = vpop.permute.xlu1 %1117  ;;  %v7305_v46 = vpop.permute.xlu0 %1105 }
  0xac   : > { %4031 = vperm.xlu1 %6805, %v3296_v43   ;;  %4019 = vperm.xlu0 %6804, %v3295_v44   ;;  %v3320_v43 = vld [vmem:[%s9692_s6 + $0x13c] sm:$0xf]  ;;  %v3319_v44 = vld [vmem:[%s9692_s6 + $0x138] sm:$0xf] }
  0xaf   : > { %v7313_v49 = vpop.permute.xlu1 %1141  ;;  %v7315_v50 = vpop.permute.xlu0 %1129 }
  0xb0   : > { %4055 = vperm.xlu1 %6805, %v3298_v47   ;;  %4043 = vperm.xlu0 %6804, %v3297_v48  }
  0xb3   : > { %v7323_v53 = vpop.permute.xlu1 %1165  ;;  %v7325_v54 = vpop.permute.xlu0 %1153 }
  0xb4   : > { %4079 = vperm.xlu1 %6805, %v3300_v51   ;;  %4067 = vperm.xlu0 %6804, %v3299_v52   ;;  %v3322_v51 = vld [vmem:[%s9692_s6 + $0x144] sm:$0xf]  ;;  %v3321_v52 = vld [vmem:[%s9692_s6 + $0x140] sm:$0xf] }
  0xb7   : > { %v7333_v57 = vpop.permute.xlu1 %1189  ;;  %v7335_v58 = vpop.permute.xlu0 %1177 }
  0xb8   : > { %4103 = vperm.xlu1 %6805, %v3302_v55   ;;  %4091 = vperm.xlu0 %6804, %v3301_v56  }
  0xbb   : > { %v7343_v61 = vpop.permute.xlu1 %1213  ;;  %v7345_v62 = vpop.permute.xlu0 %1201 }
  0xbc   : > { %4127 = vperm.xlu1 %6805, %v3304_v59   ;;  %4115 = vperm.xlu0 %6804, %v3303_v60   ;;  %v3324_v59 = vld [vmem:[%s9692_s6 + $0x14c] sm:$0xf]  ;;  %v3323_v60 = vld [vmem:[%s9692_s6 + $0x148] sm:$0xf] }
  0xbf   : > { %v7353_v1 = vpop.permute.xlu1 %3383  ;;  %v7355_v3 = vpop.permute.xlu0 %3371 }
  0xc0   : > { %4151 = vperm.xlu1 %6805, %v3306_v63   ;;  %4139 = vperm.xlu0 %6804, %v3305_v0  }
  0xc3   : > { %v7363_v6 = vpop.permute.xlu1 %3407  ;;  %v7365_v7 = vpop.permute.xlu0 %3395 }
  0xc4   : > { %4175 = vperm.xlu1 %6805, %v3308_v4   ;;  %4163 = vperm.xlu0 %6804, %v3307_v5   ;;  %v3326_v4 = vld [vmem:[%s9692_s6 + $0x154] sm:$0xf]  ;;  %v3325_v5 = vld [vmem:[%s9692_s6 + $0x150] sm:$0xf] }
  0xc7   : > { %v7373_v11 = vpop.permute.xlu1 %3431  ;;  %v7375_v12 = vpop.permute.xlu0 %3419 }
  0xc8   : > { %4199 = vperm.xlu1 %6805, %v3310_v8   ;;  %4187 = vperm.xlu0 %6804, %v3309_v9  }
  0xcb   : > { %v7383_v15 = vpop.permute.xlu1 %3455  ;;  %v7385_v16 = vpop.permute.xlu0 %3443 }
  0xcc   : > { %4223 = vperm.xlu1 %6805, %v3312_v13   ;;  %4211 = vperm.xlu0 %6804, %v3311_v14   ;;  %v3328_v13 = vld [vmem:[%s9692_s6 + $0x15c] sm:$0xf]  ;;  %v3327_v14 = vld [vmem:[%s9692_s6 + $0x158] sm:$0xf] }
  0xcf   : > { %v7393_v23 = vpop.permute.xlu1 %3479  ;;  %v7395_v24 = vpop.permute.xlu0 %3467 }
  0xd0   : > { %4247 = vperm.xlu1 %6805, %v3314_v19   ;;  %4235 = vperm.xlu0 %6804, %v3313_v20  }
  0xd3   : > { %v7403_v31 = vpop.permute.xlu1 %3503  ;;  %v7405_v32 = vpop.permute.xlu0 %3491 }
  0xd4   : > { %4271 = vperm.xlu1 %6805, %v3316_v27   ;;  %4259 = vperm.xlu0 %6804, %v3315_v28  }
  0xd7   : > { %v7413_v39 = vpop.permute.xlu1 %3527  ;;  %v7415_v40 = vpop.permute.xlu0 %3515 }
  0xd8   : > { %9763 = vst [vmem:[#allocation2_spill] sm:$0xff] %v7413_v39  ;;  %9764 = vst [vmem:[#allocation3_spill] sm:$0xff] %v7415_v40  ;;  %4295 = vperm.xlu1 %6805, %v3318_v35   ;;  %4283 = vperm.xlu0 %6804, %v3317_v36   ;;  %v3330_v36 = vld [vmem:[%s9692_s6 + $0x164] sm:$0xf] }
  0xdb   : > { %v7423_v47 = vpop.permute.xlu1 %3551  ;;  %v7425_v48 = vpop.permute.xlu0 %3539 }
  0xdc   : > { %9765 = vst [vmem:[#allocation4_spill] sm:$0xff] %v7423_v47  ;;  %9766 = vst [vmem:[#allocation5_spill] sm:$0xff] %v7425_v48  ;;  %4319 = vperm.xlu1 %6805, %v3320_v43   ;;  %4307 = vperm.xlu0 %6804, %v3319_v44   ;;  %v3329_v43 = vld [vmem:[%s9692_s6 + $0x160] sm:$0xf] }
  0xdf   : > { %v7433_v55 = vpop.permute.xlu1 %3575  ;;  %v7435_v56 = vpop.permute.xlu0 %3563 }
  0xe0   : > { %9767 = vst [vmem:[#allocation6_spill] sm:$0xff] %v7433_v55  ;;  %9768 = vst [vmem:[#allocation7_spill] sm:$0xff] %v7435_v56  ;;  %4343 = vperm.xlu1 %6805, %v3322_v51   ;;  %4331 = vperm.xlu0 %6804, %v3321_v52  }
  0xe3   : > { %v7443_v63 = vpop.permute.xlu1 %3599  ;;  %v7445_v0 = vpop.permute.xlu0 %3587 }
  0xe4   : > { %9769 = vst [vmem:[#allocation8_spill] sm:$0xff] %v7443_v63  ;;  %9770 = vst [vmem:[#allocation9_spill] sm:$0xff] %v7445_v0  ;;  %4367 = vperm.xlu1 %6805, %v3324_v59   ;;  %4355 = vperm.xlu0 %6804, %v3323_v60  }
  0xe7   : > { %v7453_v8 = vpop.permute.xlu1 %3623  ;;  %v7455_v9 = vpop.permute.xlu0 %3611 }
  0xe8   : > { %9771 = vst [vmem:[#allocation10_spill] sm:$0xff] %v7453_v8  ;;  %9772 = vst [vmem:[#allocation11_spill] sm:$0xff] %v7455_v9  ;;  %4391 = vperm.xlu1 %6805, %v3326_v4   ;;  %4379 = vperm.xlu0 %6804, %v3325_v5  }
  0xea   : > { %v6582_v27 = vpop.f32.mrb[0].mxu1 }
  0xeb   : > { %v7463_v19 = vpop.permute.xlu1 %3647  ;;  %v7465_v20 = vpop.permute.xlu0 %3635  ;;  %v631_v28 = vadd.f32 %v6582_v27, %v7245_v22 }
  0xec   : > { %9773 = vst [vmem:[#allocation12_spill] sm:$0xff] %v7463_v19  ;;  %9774 = vst [vmem:[#allocation13_spill] sm:$0xff] %v7465_v20  ;;  %4415 = vperm.xlu1 %6805, %v3328_v13   ;;  %4403 = vperm.xlu0 %6804, %v3327_v14   ;;  %v625_v35 = vpop.f32.mrb[1].mxu1 }
  0xed   : > { %v626_v44 = vadd.f32 %v625_v35, %v7235_v18  ;;  %v512_v51 = vpop.f32.mrb[0].mxu0  ;;  %v669_v52 = vmax.f32 %v631_v28, 0.0  ;;  %v3332_v35 = vld [vmem:[%s9692_s6 + $0x16c] sm:$0xf] }
  0xee   : > { %v514_v59 = vpop.f32.mrb[1].mxu0  ;;  %v6585_v13 = vpop.f32.mrb[2].mxu1  ;;  %v513_v14 = vadd.f32 %v512_v51, %v7235_v18 }
  0xef   : > { %v7475_v60 = vpop.permute.xlu1 %3671  ;;  %v666_v4 = vmax.f32 %v626_v44, 0.0  ;;  %v7477_v5 = vpop.permute.xlu0 %3659  ;;  %v641_v27 = vadd.f32 %v6585_v13, %v7243_v21  ;;  %v515_v28 = vadd.f32 %v514_v59, %v7235_v18 }
  0xf0   : > { %9775 = vst [vmem:[#allocation14_spill] sm:$0xff] %v7475_v60  ;;  %9776 = vst [vmem:[#allocation15_spill] sm:$0xff] %v7477_v5  ;;  %4439 = vperm.xlu1 %6805, %v3330_v36   ;;  %4427 = vperm.xlu0 %6804, %v3329_v43   ;;  %v635_v2 = vpop.f32.mrb[3].mxu1  ;;  %v3331_v36 = vld [vmem:[%s9692_s6 + $0x168] sm:$0xf] }
  0xf1   : > { %v690_v20 = vpack.c.bf16 %v669_v52, %v666_v4  ;;  %v636_v60 = vadd.f32 %v635_v2, %v7233_v17  ;;  %v518_v44 = vpop.f32.mrb[2].mxu0  ;;  %v675_v43 = vmax.f32 %v641_v27, 0.0  ;;  %v664_v2 = vmax.f32 %v513_v14, 0.0  ;;  %v3334_v27 = vld [vmem:[%s9692_s6 + $0x174] sm:$0xf] }
  0xf2   : > { %v519_v51 = vadd.f32 %v518_v44, %v7245_v22  ;;  %v520_v5 = vpop.f32.mrb[3].mxu0  ;;  %v6588_v52 = vpop.f32.mrb[4].mxu1  ;;  %v665_v44 = vmax.f32 %v515_v28, 0.0  ;;  %v3333_v14 = vld [vmem:[%s9692_s6 + $0x170] sm:$0xf] }
  0xf3   : > { %v7490_v13 = vpop.permute.xlu1 %3695  ;;  %v672_v19 = vmax.f32 %v636_v60, 0.0  ;;  %v521_v9 = vadd.f32 %v520_v5, %v7245_v22  ;;  %v7493_v8 = vpop.permute.xlu0 %3683  ;;  %6592 = vmatprep.subr.bf16.mxu0 %v690_v20  ;;  %v651_v59 = vadd.f32 %v6588_v52, %v7253_v25 }
  0xf4   : > { %9777 = vst [vmem:[#allocation16_spill] sm:$0xff] %v7490_v13  ;;  %9778 = vst [vmem:[#allocation17_spill] sm:$0xff] %v7493_v8  ;;  %4463 = vperm.xlu1 %6805, %v3332_v35   ;;  %v667_v18 = vmax.f32 %v519_v51, 0.0  ;;  %4451 = vperm.xlu0 %6804, %v3331_v36   ;;  %v645_v4 = vpop.f32.mrb[5].mxu1 }
  0xf5   : > { %6593 = vmatpush3.bf16.msra.mxu0 %v690_v20  ;;  %v693_v60 = vpack.c.bf16 %v675_v43, %v672_v19  ;;  %v668_v13 = vmax.f32 %v521_v9, 0.0  ;;  %v646_v22 = vadd.f32 %v645_v4, %v7255_v26  ;;  %v524_v5 = vpop.f32.mrb[4].mxu0  ;;  %v681_v51 = vmax.f32 %v651_v59, 0.0  ;;  %v3336_v43 = vld [vmem:[%s9692_s6 + $0x17c] sm:$0xf] }
  0xf6   : > { %v688_v35 = vpack.c.bf16 %v667_v18, %v664_v2  ;;  %v526_v52 = vpop.f32.mrb[5].mxu0  ;;  %v6591_v63 = vpop.f32.mrb[6].mxu1  ;;  %v525_v9 = vadd.f32 %v524_v5, %v7233_v17  ;;  %v3335_v4 = vld [vmem:[%s9692_s6 + $0x178] sm:$0xf] }
  0xf7   : > { %v7503_v36 = vpop.permute.xlu1 %3719  ;;  %v689_v20 = vpack.c.bf16 %v668_v13, %v665_v44  ;;  %v678_v8 = vmax.f32 %v646_v22, 0.0  ;;  %v7505_v0 = vpop.permute.xlu0 %3707  ;;  %6594 = vmatprep.subr.bf16.mxu0 %v693_v60  ;;  %v661_v19 = vadd.f32 %v6591_v63, %v7263_v29  ;;  %v527_v13 = vadd.f32 %v526_v52, %v7233_v17 }
  0xf8   : > { %9779 = vst [vmem:[#allocation18_spill] sm:$0xff] %v7503_v36  ;;  %9780 = vst [vmem:[#allocation19_spill] sm:$0xff] %v7505_v0  ;;  %4487 = vperm.xlu1 %6805, %v3334_v27   ;;  %4475 = vperm.xlu0 %6804, %v3333_v14   ;;  %v655_v28 = vpop.f32.mrb[7].mxu1  ;;  %v670_v17 = vmax.f32 %v525_v9, 0.0 }
  0xf9   : > { %6595 = vmatpush3.bf16.msra.mxu0 %v693_v60  ;;  %v696_v2 = vpack.c.bf16 %v681_v51, %v678_v8  ;;  %v656_v18 = vadd.f32 %v655_v28, %v7265_v30  ;;  %v530_v59 = vpop.f32.mrb[6].mxu0  ;;  %781 = vmatprep.subr.bf16.mxu1 %v689_v20  ;;  %v687_v27 = vmax.f32 %v661_v19, 0.0  ;;  %v3338_v51 = vld [vmem:[%s9692_s6 + $0x184] sm:$0xf]  ;;  %v671_v52 = vmax.f32 %v527_v13, 0.0 }
  0xfa   : > { %v531_v63 = vadd.f32 %v530_v59, %v7243_v21  ;;  %v532_v44 = vpop.f32.mrb[7].mxu0  ;;  %782 = vmatpush1.bf16.msra.mxu1 %v688_v35 }
  0xfb   : > { %v7518_v60 = vpop.permute.xlu1 %3743  ;;  %v684_v22 = vmax.f32 %v656_v18, 0.0  ;;  %v533_v8 = vadd.f32 %v532_v44, %v7243_v21  ;;  %v7521_v5 = vpop.permute.xlu0 %3731  ;;  %6596 = vmatprep.subr.bf16.mxu0 %v696_v2  ;;  %v3337_v21 = vld [vmem:[%s9692_s6 + $0x180] sm:$0xf] }
  0xfc   : > { %9781 = vst [vmem:[#allocation20_spill] sm:$0xff] %v7518_v60  ;;  %9782 = vst [vmem:[#allocation21_spill] sm:$0xff] %v7521_v5  ;;  %4511 = vperm.xlu1 %6805, %v3336_v43   ;;  %v673_v14 = vmax.f32 %v531_v63, 0.0  ;;  %4499 = vperm.xlu0 %6804, %v3335_v4   ;;  %v3340_v4 = vld [vmem:[%s9692_s6 + $0x18c] sm:$0xf] }
  0xfd   : > { %6597 = vmatpush3.bf16.msra.mxu0 %v696_v2  ;;  %v699_v20 = vpack.c.bf16 %v687_v27, %v684_v22  ;;  %v674_v35 = vmax.f32 %v533_v8, 0.0  ;;  %v536_v19 = vpop.f32.mrb[8].mxu0  ;;  %v7536_v2 = vld [vmem:[%s9689_s3 + $0x8] sm:$0xff]   ;;  %v7545_v27 = vld [vmem:[%s9689_s3 + $0x10] sm:$0xff]  }
  0xfe   : > { %v691_v28 = vpack.c.bf16 %v673_v14, %v670_v17  ;;  %v538_v18 = vpop.f32.mrb[9].mxu0  ;;  %v537_v13 = vadd.f32 %v536_v19, %v7255_v26  ;;  %v3339_v22 = vld [vmem:[%s9692_s6 + $0x188] sm:$0xf] }
  0xff   : > { %v7529_v59 = vpop.permute.xlu1 %3767  ;;  %v692_v9 = vpack.c.bf16 %v674_v35, %v671_v52  ;;  %v7531_v43 = vpop.permute.xlu0 %3755  ;;  %6598 = vmatprep.subr.bf16.mxu0 %v699_v20  ;;  %v539_v63 = vadd.f32 %v538_v18, %v7255_v26  ;;  %v3342_v35 = vld [vmem:[%s9692_s6 + $0x194] sm:$0xf] }
 0x100   : > { %9783 = vst [vmem:[#allocation22_spill] sm:$0xff] %v7529_v59  ;;  %9784 = vst [vmem:[#allocation23_spill] sm:$0xff] %v7531_v43  ;;  %4535 = vperm.xlu1 %6805, %v3338_v51   ;;  %4523 = vperm.xlu0 %6804, %v3337_v21   ;;  %v676_v26 = vmax.f32 %v537_v13, 0.0 }
 0x101   : > { %6599 = vmatpush3.bf16.msra.mxu0 %v699_v20  ;;  %v542_v44 = vpop.f32.mrb[10].mxu0  ;;  %783 = vmatprep.subr.bf16.mxu1 %v692_v9  ;;  %v677_v19 = vmax.f32 %v539_v63, 0.0 }
 0x102   : > { %v543_v8 = vadd.f32 %v542_v44, %v7253_v25  ;;  %v544_v17 = vpop.f32.mrb[11].mxu0  ;;  %784 = vmatpush1.bf16.msra.mxu1 %v691_v28 }
 0x103   : > { %v7552_v14 = vpop.permute.xlu1 %3791  ;;  %v545_v51 = vadd.f32 %v544_v17, %v7253_v25  ;;  %v7555_v52 = vpop.permute.xlu0 %3779  ;;  %v3341_v25 = vld [vmem:[%s9692_s6 + $0x190] sm:$0xf]  ;;  %v7583_v17 = vld [vmem:[%s9689_s3 + $0x20] sm:$0xff]  }
 0x104   : > { %9785 = vst [vmem:[#allocation24_spill] sm:$0xff] %v7552_v14  ;;  %9786 = vst [vmem:[#allocation25_spill] sm:$0xff] %v7555_v52  ;;  %6601 = vmatmul.mubr.msk.bf16.vlgmr.msra.gmra.mrb[16].mxu0 %vm756_vm2, %v7536_v2  ;;  %4559 = vperm.xlu1 %6805, %v3340_v4   ;;  %v679_v20 = vmax.f32 %v543_v8, 0.0  ;;  %v3344_v8 = vld [vmem:[%s9692_s6 + $0x19c] sm:$0xf] }
 0x105   : > { %4547 = vperm.xlu0 %6804, %v3339_v22   ;;  %6604 = vmatprep.mubr.msk.bf16.mxu0 %vm756_vm2, %v7545_v27  ;;  %v680_v21 = vmax.f32 %v545_v51, 0.0  ;;  %v548_v28 = vpop.f32.mrb[12].mxu0  ;;  %v7574_v22 = vld [vmem:[%s9689_s3 + $0x18] sm:$0xff]  }
 0x106   : > { %v694_v18 = vpack.c.bf16 %v679_v20, %v676_v26  ;;  %v550_v9 = vpop.f32.mrb[13].mxu0  ;;  %v549_v63 = vadd.f32 %v548_v28, %v7265_v30  ;;  %v3343_v20 = vld [vmem:[%s9692_s6 + $0x198] sm:$0xf] }
 0x107   : > { %v7567_v4 = vpop.permute.xlu1 %3815  ;;  %v695_v13 = vpack.c.bf16 %v680_v21, %v677_v19  ;;  %v7569_v44 = vpop.permute.xlu0 %3803  ;;  %v551_v51 = vadd.f32 %v550_v9, %v7265_v30 }
 0x108   : > { %9787 = vst [vmem:[#allocation26_spill] sm:$0xff] %v7567_v4  ;;  %9788 = vst [vmem:[#allocation27_spill] sm:$0xff] %v7569_v44  ;;  %4583 = vperm.xlu1 %6805, %v3342_v35   ;;  %v682_v30 = vmax.f32 %v549_v63, 0.0 }
 0x109   : > { %4571 = vperm.xlu0 %6804, %v3341_v25   ;;  %v554_v26 = vpop.f32.mrb[14].mxu0  ;;  %785 = vmatprep.subr.bf16.mxu1 %v695_v13  ;;  %v3346_v13 = vld [vmem:[%s9692_s6 + $0x1a4] sm:$0xf] }
 0x10a   : > { %v555_v35 = vadd.f32 %v554_v26, %v7263_v29  ;;  %v556_v19 = vpop.f32.mrb[15].mxu0  ;;  %786 = vmatpush1.bf16.msra.mxu1 %v694_v18  ;;  %v683_v18 = vmax.f32 %v551_v51, 0.0  ;;  %v3348_v51 = vld [vmem:[%s9692_s6 + $0x1ac] sm:$0xf] }
 0x10b   : > { %v7590_v21 = vpop.permute.xlu1 %3839  ;;  %v557_v28 = vadd.f32 %v556_v19, %v7263_v29  ;;  %v7593_v25 = vpop.permute.xlu0 %3827  ;;  %v3345_v29 = vld [vmem:[%s9692_s6 + $0x1a0] sm:$0xf] }
 0x10c   : > { %9789 = vst [vmem:[#allocation28_spill] sm:$0xff] %v7590_v21  ;;  %9790 = vst [vmem:[#allocation29_spill] sm:$0xff] %v7593_v25  ;;  %6605 = vmatmul.mubr.msk.bf16.gmra.mrb[20].mxu0 %vm756_vm2, %v7574_v22  ;;  %4607 = vperm.xlu1 %6805, %v3344_v8   ;;  %v685_v9 = vmax.f32 %v555_v35, 0.0  ;;  %v7620_v35 = vld [vmem:[%s9689_s3 + $0x30] sm:$0xff]  }
 0x10d   : > { %4595 = vperm.xlu0 %6804, %v3343_v20   ;;  %6608 = vmatprep.mubr.msk.bf16.mxu0 %vm756_vm2, %v7583_v17  ;;  %v686_v26 = vmax.f32 %v557_v28, 0.0  ;;  %v7612_v20 = vld [vmem:[%s9689_s3 + $0x28] sm:$0xff]  }
 0x10e   : > { %v697_v19 = vpack.c.bf16 %v685_v9, %v682_v30  ;;  %v3347_v28 = vld [vmem:[%s9692_s6 + $0x1a8] sm:$0xf] }
 0x10f   : > { %v7605_v25 = vpop.permute.xlu1 %3863  ;;  %v698_v8 = vpack.c.bf16 %v686_v26, %v683_v18  ;;  %v7607_v63 = vpop.permute.xlu0 %3851  ;;  %v3349_v18 = vld [vmem:[%s9692_s6 + $0x1b0] sm:$0xf] }
 0x110   : > { %9791 = vst [vmem:[#allocation30_spill] sm:$0xff] %v7605_v25  ;;  %9792 = vst [vmem:[#allocation31_spill] sm:$0xff] %v7607_v63  ;;  %4631 = vperm.xlu1 %6805, %v3346_v13   ;;  %v3350_v13 = vld [vmem:[%s9692_s6 + $0x1b4] sm:$0xf] }
 0x111   : > { %4619 = vperm.xlu0 %6804, %v3345_v29   ;;  %787 = vmatprep.subr.bf16.mxu1 %v698_v8  ;;  %v9796_v29 = vmov 0   ;;  %v7649_v8 = vld [vmem:[%s9689_s3 + $0x38] sm:$0xff]  }
 0x112   : > { %788 = vmatpush1.bf16.msra.mxu1 %v697_v19 }
 0x113   : > { %v7625_v30 = vpop.permute.xlu1 %3887  ;;  %v7627_v9 = vpop.permute.xlu0 %3875 }
 0x114   : > { %9793 = vst [vmem:[#allocation32_spill] sm:$0xff] %v7625_v30  ;;  %9794 = vst [vmem:[#allocation33_spill] sm:$0xff] %v7627_v9  ;;  %6609 = vmatmul.mubr.msk.bf16.gmra.mrb[24].mxu0 %vm756_vm2, %v7612_v20  ;;  %4655 = vperm.xlu1 %6805, %v3348_v51   ;;  %v3351_v51 = vld [vmem:[%s9692_s6 + $0x1b8] sm:$0xf] }
 0x115   : > { %4643 = vperm.xlu0 %6804, %v3347_v28   ;;  %6612 = vmatprep.mubr.msk.bf16.mxu0 %vm756_vm2, %v7620_v35 }
 0x116   : > { %6329 = vmatmul.mubr.msk.bf16.vlgmr.msra.gmra.mrb[8].mxu1 %vm756_vm2, %v7211_v10  ;;  %v3352_v10 = vld [vmem:[%s9692_s6 + $0x1bc] sm:$0xf] }
 0x117   : > { %v7641_v26 = vpop.permute.xlu1 %3911  ;;  %823 = vmatprep.mubr.bf16.mxu1 %v9796_v29  ;;  %v7644_v19 = vpop.permute.xlu0 %3899 }
 0x118   : > { %9795 = vst [vmem:[#allocation34_spill] sm:$0xff] %v7641_v26  ;;  %9797 = vst [vmem:[#allocation35_spill] sm:$0xff] %v7644_v19  ;;  %4679 = vperm.xlu1 %6805, %v3350_v13   ;;  %v3354_v13 = vld [vmem:[%s9692_s6 + $0x1c4] sm:$0xf] }
 0x119   : > { %4667 = vperm.xlu0 %6804, %v3349_v18   ;;  %v3353_v18 = vld [vmem:[%s9692_s6 + $0x1c0] sm:$0xf] }
 0x11b   : > { %v7657_v28 = vpop.permute.xlu1 %3935  ;;  %v7659_v26 = vpop.permute.xlu0 %3923 }
 0x11c   : > { %9798 = vst [vmem:[#allocation36_spill] sm:$0xff] %v7657_v28  ;;  %9799 = vst [vmem:[#allocation37_spill] sm:$0xff] %v7659_v26  ;;  %6613 = vmatmul.mubr.msk.bf16.gmra.mrb[28].mxu0 %vm756_vm2, %v7649_v8  ;;  %4703 = vperm.xlu1 %6805, %v3352_v10   ;;  %v3356_v10 = vld [vmem:[%s9692_s6 + $0x1cc] sm:$0xf] }
 0x11d   : > { %4691 = vperm.xlu0 %6804, %v3351_v51   ;;  %1863 = vmatprep.mubr.bf16.mxu0 %v9796_v29 }
 0x11e   : > { %6330 = vmatmul.mubr.msk.bf16.gmra.mrb[12].mxu1 %vm756_vm2, %v7536_v2  ;;  %v3355_v2 = vld [vmem:[%s9692_s6 + $0x1c8] sm:$0xf] }
 0x11f   : > { %v7672_v28 = vpop.permute.xlu1 %3959  ;;  %833 = vmatprep.mubr.bf16.mxu1 %v9796_v29  ;;  %v7675_v26 = vpop.permute.xlu0 %3947 }
 0x120   : > { %9800 = vst [vmem:[#allocation38_spill] sm:$0xff] %v7672_v28  ;;  %9801 = vst [vmem:[#allocation39_spill] sm:$0xff] %v7675_v26  ;;  %4727 = vperm.xlu1 %6805, %v3354_v13   ;;  %v3358_v26 = vld [vmem:[%s9692_s6 + $0x1d4] sm:$0xf]  ;;  %v3357_v13 = vld [vmem:[%s9692_s6 + $0x1d0] sm:$0xf] }
 0x121   : > { %4715 = vperm.xlu0 %6804, %v3353_v18  }
 0x123   : > { %v7683_v51 = vpop.permute.xlu1 %3983  ;;  %v7685_v19 = vpop.permute.xlu0 %3971 }
 0x124   : > { %9802 = vst [vmem:[#allocation40_spill] sm:$0xff] %v7683_v51  ;;  %9803 = vst [vmem:[#allocation41_spill] sm:$0xff] %v7685_v19  ;;  %4751 = vperm.xlu1 %6805, %v3356_v10   ;;  %v3360_v10 = vld [vmem:[%s9692_s6 + $0x1dc] sm:$0xf] }
 0x125   : > { %4739 = vperm.xlu0 %6804, %v3355_v2  }
 0x126   : > { %6331 = vmatmul.mubr.msk.bf16.gmra.mrb[16].mxu1 %vm756_vm2, %v7545_v27  ;;  %v3359_v27 = vld [vmem:[%s9692_s6 + $0x1d8] sm:$0xf] }
 0x127   : > { %v7695_v18 = vpop.permute.xlu1 %4007  ;;  %843 = vmatprep.mubr.bf16.mxu1 %v9796_v29  ;;  %v7698_v51 = vpop.permute.xlu0 %3995 }
 0x128   : > { %9804 = vst [vmem:[#allocation42_spill] sm:$0xff] %v7695_v18  ;;  %9805 = vst [vmem:[#allocation43_spill] sm:$0xff] %v7698_v51  ;;  %4775 = vperm.xlu1 %6805, %v3358_v26   ;;  %v3362_v51 = vld [vmem:[%s9692_s6 + $0x1e4] sm:$0xf]  ;;  %v3361_v26 = vld [vmem:[%s9692_s6 + $0x1e0] sm:$0xf] }
 0x129   : > { %4763 = vperm.xlu0 %6804, %v3357_v13  }
 0x12b   : > { %v7706_v2 = vpop.permute.xlu1 %4031  ;;  %v7708_v19 = vpop.permute.xlu0 %4019 }
 0x12c   : > { %9806 = vst [vmem:[#allocation44_spill] sm:$0xff] %v7706_v2  ;;  %9807 = vst [vmem:[#allocation45_spill] sm:$0xff] %v7708_v19  ;;  %4799 = vperm.xlu1 %6805, %v3360_v10   ;;  %v3364_v10 = vld [vmem:[%s9692_s6 + $0x1ec] sm:$0xf] }
 0x12d   : > { %4787 = vperm.xlu0 %6804, %v3359_v27  }
 0x12e   : > { %6332 = vmatmul.mubr.msk.bf16.gmra.mrb[20].mxu1 %vm756_vm2, %v7574_v22  ;;  %v3363_v22 = vld [vmem:[%s9692_s6 + $0x1e8] sm:$0xf] }
 0x12f   : > { %v7718_v13 = vpop.permute.xlu1 %4055  ;;  %853 = vmatprep.mubr.bf16.mxu1 %v9796_v29  ;;  %v7721_v2 = vpop.permute.xlu0 %4043 }
 0x130   : > { %9808 = vst [vmem:[#allocation46_spill] sm:$0xff] %v7718_v13  ;;  %9809 = vst [vmem:[#allocation47_spill] sm:$0xff] %v7721_v2  ;;  %4823 = vperm.xlu1 %6805, %v3362_v51   ;;  %v3366_v2 = vld [vmem:[%s9692_s6 + $0x1f4] sm:$0xf]  ;;  %v3365_v51 = vld [vmem:[%s9692_s6 + $0x1f0] sm:$0xf]  ;;  %v1039_v13 = vlaneseq }
 0x131   : > { %4811 = vperm.xlu0 %6804, %v3361_v26  }
 0x132   : > { %v1040_v18 = vshrl.u32 %v1039_v13, 7 }
 0x133   : > { %v7729_v27 = vpop.permute.xlu1 %4079  ;;  %v7731_v19 = vpop.permute.xlu0 %4067 }
 0x134   : > { %9810 = vst [vmem:[#allocation48_spill] sm:$0xff] %v7729_v27  ;;  %9811 = vst [vmem:[#allocation49_spill] sm:$0xff] %v7731_v19  ;;  %4847 = vperm.xlu1 %6805, %v3364_v10   ;;  %v3368_v10 = vld [vmem:[%s9692_s6 + $0x1fc] sm:$0xf] }
 0x135   : > { %4835 = vperm.xlu0 %6804, %v3363_v22  }
 0x136   : > { %6333 = vmatmul.mubr.msk.bf16.gmra.mrb[24].mxu1 %vm756_vm2, %v7583_v17  ;;  %v3367_v17 = vld [vmem:[%s9692_s6 + $0x1f8] sm:$0xf] }
 0x137   : > { %v7741_v26 = vpop.permute.xlu1 %4103  ;;  %863 = vmatprep.mubr.bf16.mxu1 %v9796_v29  ;;  %v7744_v27 = vpop.permute.xlu0 %4091 }
 0x138   : > { %9812 = vst [vmem:[#allocation50_spill] sm:$0xff] %v7741_v26  ;;  %9813 = vst [vmem:[#allocation51_spill] sm:$0xff] %v7744_v27  ;;  %4871 = vperm.xlu1 %6805, %v3366_v2  }
 0x139   : > { %4859 = vperm.xlu0 %6804, %v3365_v51  }
 0x13b   : > { %v7752_v22 = vpop.permute.xlu1 %4127  ;;  %v7754_v19 = vpop.permute.xlu0 %4115 }
 0x13c   : > { %9814 = vst [vmem:[#allocation52_spill] sm:$0xff] %v7752_v22  ;;  %9815 = vst [vmem:[#allocation53_spill] sm:$0xff] %v7754_v19  ;;  %4895 = vperm.xlu1 %6805, %v3368_v10  }
 0x13d   : > { %4883 = vperm.xlu0 %6804, %v3367_v17  }
 0x13e   : > { %6334 = vmatmul.mubr.msk.bf16.gmra.mrb[28].mxu1 %vm756_vm2, %v7612_v20 }
 0x13f   : > { %v7758_v27 = vpop.permute.xlu1 %4151  ;;  %873 = vmatprep.mubr.bf16.mxu1 %v9796_v29  ;;  %v7761_v2 = vpop.permute.xlu0 %4139 }
 0x140   : > { %9816 = vst [vmem:[#allocation54_spill] sm:$0xff] %v7758_v27  ;;  %9817 = vst [vmem:[#allocation55_spill] sm:$0xff] %v7761_v2 }
 0x143   : > { %v7763_v51 = vpop.permute.xlu1 %4175  ;;  %v7765_v26 = vpop.permute.xlu0 %4163 }
 0x144   : > { %9818 = vst [vmem:[#allocation56_spill] sm:$0xff] %v7763_v51  ;;  %9819 = vst [vmem:[#allocation57_spill] sm:$0xff] %v7765_v26 }
 0x146   : > { %6335 = vmatmul.mubr.msk.bf16.gmra.mrb[32].mxu1 %vm756_vm2, %v7620_v35 }
 0x147   : > { %v7769_v22 = vpop.permute.xlu1 %4199  ;;  %883 = vmatprep.mubr.bf16.mxu1 %v9796_v29  ;;  %v7772_v10 = vpop.permute.xlu0 %4187 }
 0x148   : > { %9820 = vst [vmem:[#allocation58_spill] sm:$0xff] %v7769_v22  ;;  %9821 = vst [vmem:[#allocation59_spill] sm:$0xff] %v7772_v10 }
 0x14b   : > { %v7774_v20 = vpop.permute.xlu1 %4223  ;;  %v7776_v17 = vpop.permute.xlu0 %4211 }
 0x14c   : > { %9822 = vst [vmem:[#allocation60_spill] sm:$0xff] %v7774_v20  ;;  %9823 = vst [vmem:[#allocation61_spill] sm:$0xff] %v7776_v17 }
 0x14e   : > { %6336 = vmatmul.mubr.msk.bf16.gmra.mrb[36].mxu1 %vm756_vm2, %v7649_v8 }
 0x14f   : > { %v7780_v2 = vpop.permute.xlu1 %4247  ;;  %2353 = vmatprep.mubr.bf16.mxu1 %v9796_v29  ;;  %v7783_v26 = vpop.permute.xlu0 %4235 }
 0x150   : > { %9824 = vst [vmem:[#allocation62_spill] sm:$0xff] %v7780_v2  ;;  %9825 = vst [vmem:[#allocation63_spill] sm:$0xff] %v7783_v26 }
 0x153   : > { %v7785_v35 = vpop.permute.xlu1 %4271  ;;  %v7787_v22 = vpop.permute.xlu0 %4259 }
 0x154   : > { %9826 = vst [vmem:[#allocation64_spill] sm:$0xff] %v7785_v35  ;;  %9827 = vst [vmem:[#allocation65_spill] sm:$0xff] %v7787_v22 }
 0x157   : > { %v7789_v51 = vpop.permute.xlu1 %4295  ;;  %v7791_v10 = vpop.permute.xlu0 %4283 }
 0x158   : > { %9828 = vst [vmem:[#allocation66_spill] sm:$0xff] %v7789_v51  ;;  %9829 = vst [vmem:[#allocation67_spill] sm:$0xff] %v7791_v10 }
 0x15b   : > { %v7793_v20 = vpop.permute.xlu1 %4319  ;;  %v7795_v17 = vpop.permute.xlu0 %4307 }
 0x15c   : > { %9830 = vst [vmem:[#allocation68_spill] sm:$0xff] %v7793_v20  ;;  %9831 = vst [vmem:[#allocation69_spill] sm:$0xff] %v7795_v17  ;;  %v6918_v17 = vmov 839922192  }
 0x15f   : > { %v7797_v27 = vpop.permute.xlu1 %4343  ;;  %v7799_v8 = vpop.permute.xlu0 %4331 }
 0x160   : > { %9832 = vst [vmem:[#allocation70_spill] sm:$0xff] %v7797_v27  ;;  %9833 = vst [vmem:[#allocation71_spill] sm:$0xff] %v7799_v8  ;;  %v1037_v27 = vunpack.c.l.s4 %v6918_v17 }
 0x163   : > { %v7801_v2 = vpop.permute.xlu1 %4367  ;;  %v7803_v19 = vpop.permute.xlu0 %4355 }
 0x164   : > { %9834 = vst [vmem:[#allocation72_spill] sm:$0xff] %v7801_v2  ;;  %9835 = vst [vmem:[#allocation73_spill] sm:$0xff] %v7803_v19  ;;  %v1038_v19 = vunpack.c.0.s8 %v1037_v27 }
 0x167   : > { %v7805_v26 = vpop.permute.xlu1 %4391  ;;  %v7807_v35 = vpop.permute.xlu0 %4379 }
 0x168   : > { %9836 = vst [vmem:[#allocation74_spill] sm:$0xff] %v7805_v26  ;;  %9837 = vst [vmem:[#allocation75_spill] sm:$0xff] %v7807_v35 }
 0x16b   : > { %v7809_v22 = vpop.permute.xlu1 %4415  ;;  %v7811_v51 = vpop.permute.xlu0 %4403 }
 0x16c   : > { %9838 = vst [vmem:[#allocation76_spill] sm:$0xff] %v7809_v22  ;;  %9839 = vst [vmem:[#allocation77_spill] sm:$0xff] %v7811_v51  ;;  %v7825_v22 = vsub.s32 %v1038_v19, %v1040_v18 }
 0x16e   : > { %v1054_v0 = vrot.slane %v7273_v33, %v7825_v22  ;;  %v1066_v47 = vrot.slane %v7285_v38, %v7825_v22  ;;  %v1102_v39 = vrot.slane %v7293_v41, %v7825_v22 }
 0x16f   : > { %v7813_v10 = vpop.permute.xlu1 %4439  ;;  %v7815_v20 = vpop.permute.xlu0 %4427 }
 0x170   : > { %9840 = vst [vmem:[#allocation78_spill] sm:$0xff] %v7813_v10  ;;  %9841 = vst [vmem:[#allocation79_spill] sm:$0xff] %v7815_v20 }
 0x173   : > { %v7817_v8 = vpop.permute.xlu1 %4463  ;;  %v7819_v2 = vpop.permute.xlu0 %4451 }
 0x174   : > { %9842 = vst [vmem:[#allocation80_spill] sm:$0xff] %v7817_v8  ;;  %9843 = vst [vmem:[#allocation81_spill] sm:$0xff] %v7819_v2 }
 0x177   : > { %v7821_v26 = vpop.permute.xlu1 %4487  ;;  %v7823_v35 = vpop.permute.xlu0 %4475 }
 0x178   : > { %9844 = vst [vmem:[#allocation82_spill] sm:$0xff] %v7821_v26  ;;  %9845 = vst [vmem:[#allocation83_spill] sm:$0xff] %v7823_v35 }
 0x17b   : > { %v4512_v51 = vpop.permute.xlu1 %4511  ;;  %v4500_v28 = vpop.permute.xlu0 %4499 }
 0x17c   : > { %v4520_v10 = vrot.slane %v4512_v51, %v7825_v22  ;;  %v4508_v20 = vrot.slane %v4500_v28, %v7825_v22 }
 0x17e   : > { %v7829_v17 = vcombine.low %v4508_v20, %v4520_v10 }
 0x17f   : > { %v4536_v9 = vpop.permute.xlu1 %4535  ;;  %v4524_v2 = vpop.permute.xlu0 %4523 }
 0x180   : > { %9846 = vst [vmem:[#allocation84_spill] sm:$0xff] %v7829_v17  ;;  %v4544_v8 = vrot.slane %v4536_v9, %v7825_v22  ;;  %v4532_v13 = vrot.slane %v4524_v2, %v7825_v22 }
 0x182   : > { %v7833_v27 = vcombine.low %v4532_v13, %v4544_v8 }
 0x183   : > { %v4560_v26 = vpop.permute.xlu1 %4559 }
 0x184   : > { %9847 = vst [vmem:[#allocation85_spill] sm:$0xff] %v7833_v27  ;;  %v4568_v19 = vrot.slane %v4560_v26, %v7825_v22  ;;  %v4548_v18 = vpop.permute.xlu0 %4547 }
 0x185   : > { %v4556_v35 = vrot.slane %v4548_v18, %v7825_v22 }
 0x187   : > { %v7837_v51 = vcombine.low %v4556_v35, %v4568_v19  ;;  %v4584_v30 = vpop.permute.xlu1 %4583 }
 0x188   : > { %v4592_v28 = vrot.slane %v4584_v30, %v7825_v22  ;;  %v4572_v10 = vpop.permute.xlu0 %4571 }
 0x189   : > { %9848 = vst [vmem:[#allocation86_spill] sm:$0xff] %v7837_v51  ;;  %v4580_v20 = vrot.slane %v4572_v10, %v7825_v22 }
 0x18b   : > { %v7841_v9 = vcombine.low %v4580_v20, %v4592_v28  ;;  %v4608_v17 = vpop.permute.xlu1 %4607 }
 0x18c   : > { %v4616_v2 = vrot.slane %v4608_v17, %v7825_v22  ;;  %v4596_v8 = vpop.permute.xlu0 %4595 }
 0x18d   : > { %9849 = vst [vmem:[#allocation87_spill] sm:$0xff] %v7841_v9  ;;  %v4604_v13 = vrot.slane %v4596_v8, %v7825_v22 }
 0x18f   : > { %v7845_v26 = vcombine.low %v4604_v13, %v4616_v2  ;;  %v4632_v27 = vpop.permute.xlu1 %4631 }
 0x190   : > { %v4640_v35 = vrot.slane %v4632_v27, %v7825_v22  ;;  %v4620_v19 = vpop.permute.xlu0 %4619 }
 0x191   : > { %9850 = vst [vmem:[#allocation88_spill] sm:$0xff] %v7845_v26  ;;  %v4628_v18 = vrot.slane %v4620_v19, %v7825_v22 }
 0x193   : > { %v7849_v30 = vcombine.low %v4628_v18, %v4640_v35  ;;  %v4656_v63 = vpop.permute.xlu1 %4655 }
 0x194   : > { %v4664_v28 = vrot.slane %v4656_v63, %v7825_v22  ;;  %v4644_v10 = vpop.permute.xlu0 %4643 }
 0x195   : > { %9851 = vst [vmem:[#allocation89_spill] sm:$0xff] %v7849_v30  ;;  %v4652_v20 = vrot.slane %v4644_v10, %v7825_v22 }
 0x197   : > { %v7853_v17 = vcombine.low %v4652_v20, %v4664_v28  ;;  %v4680_v25 = vpop.permute.xlu1 %4679 }
 0x198   : > { %v4688_v2 = vrot.slane %v4680_v25, %v7825_v22  ;;  %v4668_v8 = vpop.permute.xlu0 %4667 }
 0x199   : > { %9852 = vst [vmem:[#allocation90_spill] sm:$0xff] %v7853_v17  ;;  %v4676_v13 = vrot.slane %v4668_v8, %v7825_v22 }
 0x19b   : > { %v7857_v27 = vcombine.low %v4676_v13, %v4688_v2  ;;  %v4704_v21 = vpop.permute.xlu1 %4703 }
 0x19c   : > { %v4712_v35 = vrot.slane %v4704_v21, %v7825_v22  ;;  %v4692_v19 = vpop.permute.xlu0 %4691 }
 0x19d   : > { %9853 = vst [vmem:[#allocation91_spill] sm:$0xff] %v7857_v27  ;;  %v4700_v18 = vrot.slane %v4692_v19, %v7825_v22 }
 0x19f   : > { %v7861_v63 = vcombine.low %v4700_v18, %v4712_v35  ;;  %v4728_v44 = vpop.permute.xlu1 %4727 }
 0x1a0   : > { %v4736_v28 = vrot.slane %v4728_v44, %v7825_v22  ;;  %v4716_v10 = vpop.permute.xlu0 %4715 }
 0x1a1   : > { %9854 = vst [vmem:[#allocation92_spill] sm:$0xff] %v7861_v63  ;;  %v4724_v20 = vrot.slane %v4716_v10, %v7825_v22 }
 0x1a3   : > { %v7865_v25 = vcombine.low %v4724_v20, %v4736_v28  ;;  %v4752_v4 = vpop.permute.xlu1 %4751 }
 0x1a4   : > { %v4760_v2 = vrot.slane %v4752_v4, %v7825_v22  ;;  %v4740_v8 = vpop.permute.xlu0 %4739 }
 0x1a5   : > { %9855 = vst [vmem:[#allocation93_spill] sm:$0xff] %v7865_v25  ;;  %v4748_v13 = vrot.slane %v4740_v8, %v7825_v22 }
 0x1a7   : > { %v7869_v21 = vcombine.low %v4748_v13, %v4760_v2  ;;  %v4776_v52 = vpop.permute.xlu1 %4775 }
 0x1a8   : > { %v4784_v35 = vrot.slane %v4776_v52, %v7825_v22  ;;  %v4764_v19 = vpop.permute.xlu0 %4763 }
 0x1a9   : > { %9856 = vst [vmem:[#allocation94_spill] sm:$0xff] %v7869_v21  ;;  %v4772_v18 = vrot.slane %v4764_v19, %v7825_v22 }
 0x1ab   : > { %v7873_v44 = vcombine.low %v4772_v18, %v4784_v35  ;;  %v4800_v14 = vpop.permute.xlu1 %4799 }
 0x1ac   : > { %v4808_v28 = vrot.slane %v4800_v14, %v7825_v22  ;;  %v4788_v10 = vpop.permute.xlu0 %4787 }
 0x1ad   : > { %9857 = vst [vmem:[#allocation95_spill] sm:$0xff] %v7873_v44  ;;  %v4796_v20 = vrot.slane %v4788_v10, %v7825_v22 }
 0x1af   : > { %v7877_v4 = vcombine.low %v4796_v20, %v4808_v28  ;;  %v4824_v43 = vpop.permute.xlu1 %4823 }
 0x1b0   : > { %v4832_v2 = vrot.slane %v4824_v43, %v7825_v22  ;;  %v4812_v8 = vpop.permute.xlu0 %4811 }
 0x1b1   : > { %9858 = vst [vmem:[#allocation96_spill] sm:$0xff] %v7877_v4  ;;  %v4820_v13 = vrot.slane %v4812_v8, %v7825_v22 }
 0x1b3   : > { %v7881_v52 = vcombine.low %v4820_v13, %v4832_v2  ;;  %v4848_v59 = vpop.permute.xlu1 %4847 }
 0x1b4   : > { %v4856_v35 = vrot.slane %v4848_v59, %v7825_v22  ;;  %v4836_v19 = vpop.permute.xlu0 %4835 }
 0x1b5   : > { %9859 = vst [vmem:[#allocation97_spill] sm:$0xff] %v7881_v52  ;;  %v4844_v18 = vrot.slane %v4836_v19, %v7825_v22 }
 0x1b7   : > { %v7885_v14 = vcombine.low %v4844_v18, %v4856_v35  ;;  %v4872_v5 = vpop.permute.xlu1 %4871  ;;  %v1042_v35 = vrot.slane %v7275_v34, %v7825_v22 }
 0x1b8   : > { %v4880_v28 = vrot.slane %v4872_v5, %v7825_v22  ;;  %v4860_v10 = vpop.permute.xlu0 %4859 }
 0x1b9   : > { %9860 = vst [vmem:[#allocation98_spill] sm:$0xff] %v7885_v14  ;;  %v4868_v20 = vrot.slane %v4860_v10, %v7825_v22  ;;  %v7931_v21 = vcombine.low %v1042_v35, %v1054_v0 }
 0x1bb   : > { %v7889_v43 = vcombine.low %v4868_v20, %v4880_v28  ;;  %v1078_v28 = vrot.slane %v7283_v37, %v7825_v22  ;;  %v1090_v37 = vrot.slane %v7295_v42, %v7825_v22 }
 0x1bd   : > { %9861 = vst [vmem:[#allocation99_spill] sm:$0xff] %v7889_v43  ;;  %v7953_v38 = vcombine.low %v1066_v47, %v1078_v28 }
 0x1d7   : > { %v7891_v60 = vpop.f32.mrb[16].mxu0 }
 0x1d8   : > { %v7893_v2 = vpop.f32.mrb[17].mxu0 }
 0x1d9   : > { %v7895_v8 = vpop.f32.mrb[18].mxu0 }
 0x1da   : > { %v7899_v13 = vpop.f32.mrb[19].mxu0 }
 0x1df   : > { %v7903_v5 = vpop.f32.mrb[20].mxu0 }
 0x1e0   : > { %v7905_v19 = vpop.f32.mrb[21].mxu0 }
 0x1e1   : > { %v7907_v18 = vpop.f32.mrb[22].mxu0 }
 0x1e2   : > { %v7911_v10 = vpop.f32.mrb[23].mxu0 }
 0x1e7   : > { %v7915_v59 = vpop.f32.mrb[24].mxu0 }
 0x1e8   : > { %v7921_v36 = vpop.f32.mrb[25].mxu0 }
 0x1e9   : > { %v815_v43 = vpop.f32.mrb[8].mxu1  ;;  %v7923_v14 = vpop.f32.mrb[26].mxu0 }
 0x1ea   : > { %v817_v52 = vpop.f32.mrb[9].mxu1  ;;  %v7927_v4 = vpop.f32.mrb[27].mxu0 }
 0x1eb   : > { %v819_v44 = vpop.f32.mrb[10].mxu1 }
 0x1ec   : > { %v991_v33 = vpack.c.bf16 %v819_v44, %v815_v43  ;;  %v821_v56 = vpop.f32.mrb[11].mxu1 }
 0x1ed   : > { %v992_v34 = vpack.c.bf16 %v821_v56, %v817_v52 }
 0x1ee   : > { %v1271_v55 = vadd.bf16 %v7931_v21, %v991_v33 }
 0x1ef   : > { %v1272_v25 = vadd.bf16 %v7931_v21, %v992_v34  ;;  %v7935_v48 = vpop.f32.mrb[28].mxu0 }
 0x1f0   : > { %v7941_v63 = vpop.f32.mrb[29].mxu0  ;;  %v1295_v56 = vmax.bf16 %v9796_v29, %v1271_v55 }
 0x1f1   : > { %v825_v20 = vpop.f32.mrb[12].mxu1  ;;  %v7943_v0 = vpop.f32.mrb[30].mxu0  ;;  %v1296_v44 = vmax.bf16 %v9796_v29, %v1272_v25 }
 0x1f2   : > { %v827_v43 = vpop.f32.mrb[13].mxu1  ;;  %v7949_v35 = vpop.f32.mrb[31].mxu0 }
 0x1f3   : > { %v829_v33 = vpop.f32.mrb[14].mxu1  ;;  %1831 = vmatprep.subr.bf16.mxu0 %v1296_v44  ;;  %6760 = vmatprep.subr.bf16.mxu1 %v1296_v44 }
 0x1f4   : > { %v994_v34 = vpack.c.bf16 %v829_v33, %v825_v20  ;;  %v831_v40 = vpop.f32.mrb[15].mxu1  ;;  %1832 = vmatpush1.bf16.msra.mxu0 %v1295_v56  ;;  %6768 = vmatpush1.bf16.msra.mxu1 %v1295_v56 }
 0x1f5   : > { %v995_v25 = vpack.c.bf16 %v831_v40, %v827_v43  ;;  %v7963_v40 = vcombine.low %v1090_v37, %v1102_v39 }
 0x1f6   : > { %v1274_v55 = vadd.bf16 %v7953_v38, %v994_v34  ;;  %v1114_v34 = vrot.slane %v7305_v46, %v7825_v22 }
 0x1f7   : > { %v1275_v52 = vadd.bf16 %v7953_v38, %v995_v25 }
 0x1f8   : > { %v1298_v47 = vmax.bf16 %v9796_v29, %v1274_v55 }
 0x1f9   : > { %v835_v27 = vpop.f32.mrb[16].mxu1  ;;  %v1299_v44 = vmax.bf16 %v9796_v29, %v1275_v52  ;;  %v1126_v52 = vrot.slane %v7303_v45, %v7825_v22 }
 0x1fa   : > { %v837_v28 = vpop.f32.mrb[17].mxu1 }
 0x1fb   : > { %v839_v20 = vpop.f32.mrb[18].mxu1  ;;  %1833 = vmatprep.subr.bf16.mxu0 %v1299_v44  ;;  %6761 = vmatprep.subr.bf16.mxu1 %v1299_v44  ;;  %v7973_v44 = vcombine.low %v1114_v34, %v1126_v52 }
 0x1fc   : > { %v997_v56 = vpack.c.bf16 %v839_v20, %v835_v27  ;;  %v841_v43 = vpop.f32.mrb[19].mxu1  ;;  %1834 = vmatpush1.bf16.msra.mxu0 %v1298_v47  ;;  %6769 = vmatpush1.bf16.msra.mxu1 %v1298_v47 }
 0x1fd   : > { %v998_v33 = vpack.c.bf16 %v841_v43, %v837_v28  ;;  %v1138_v43 = vrot.slane %v7315_v50, %v7825_v22 }
 0x1fe   : > { %v1277_v41 = vadd.bf16 %v7963_v40, %v997_v56  ;;  %v1150_v56 = vrot.slane %v7313_v49, %v7825_v22 }
 0x1ff   : > { %v1278_v42 = vadd.bf16 %v7963_v40, %v998_v33 }
 0x200   : > { %v1301_v39 = vmax.bf16 %v9796_v29, %v1277_v41 }
 0x201   : > { %v845_v25 = vpop.f32.mrb[20].mxu1  ;;  %v1302_v55 = vmax.bf16 %v9796_v29, %v1278_v42 }
 0x202   : > { %v847_v27 = vpop.f32.mrb[21].mxu1 }
 0x203   : > { %v849_v37 = vpop.f32.mrb[22].mxu1  ;;  %1835 = vmatprep.subr.bf16.mxu0 %v1302_v55  ;;  %6762 = vmatprep.subr.bf16.mxu1 %v1302_v55 }
 0x204   : > { %v1000_v47 = vpack.c.bf16 %v849_v37, %v845_v25  ;;  %v851_v28 = vpop.f32.mrb[23].mxu1  ;;  %1836 = vmatpush1.bf16.msra.mxu0 %v1301_v39  ;;  %6770 = vmatpush1.bf16.msra.mxu1 %v1301_v39  ;;  %v7983_v25 = vcombine.low %v1138_v43, %v1150_v56  ;;  %v1174_v37 = vrot.slane %v7323_v53, %v7825_v22 }
 0x205   : > { %v1001_v20 = vpack.c.bf16 %v851_v28, %v847_v27 }
 0x206   : > { %v1280_v45 = vadd.bf16 %v7973_v44, %v1000_v47  ;;  %v1162_v47 = vrot.slane %v7325_v54, %v7825_v22 }
 0x207   : > { %v1281_v46 = vadd.bf16 %v7973_v44, %v1001_v20 }
 0x208   : > { %v1304_v42 = vmax.bf16 %v9796_v29, %v1280_v45  ;;  %v7993_v43 = vcombine.low %v1162_v47, %v1174_v37 }
 0x209   : > { %v855_v33 = vpop.f32.mrb[24].mxu1  ;;  %v1305_v41 = vmax.bf16 %v9796_v29, %v1281_v46 }
 0x20a   : > { %v857_v52 = vpop.f32.mrb[25].mxu1 }
 0x20b   : > { %v859_v34 = vpop.f32.mrb[26].mxu1  ;;  %1837 = vmatprep.subr.bf16.mxu0 %v1305_v41  ;;  %6763 = vmatprep.subr.bf16.mxu1 %v1305_v41 }
 0x20c   : > { %v1003_v55 = vpack.c.bf16 %v859_v34, %v855_v33  ;;  %v861_v39 = vpop.f32.mrb[27].mxu1  ;;  %1838 = vmatpush1.bf16.msra.mxu0 %v1304_v42  ;;  %6771 = vmatpush1.bf16.msra.mxu1 %v1304_v42  ;;  %v1186_v34 = vrot.slane %v7335_v58, %v7825_v22 }
 0x20d   : > { %v1004_v27 = vpack.c.bf16 %v861_v39, %v857_v52  ;;  %v1198_v52 = vrot.slane %v7333_v57, %v7825_v22 }
 0x20e   : > { %v1283_v49 = vadd.bf16 %v7983_v25, %v1003_v55 }
 0x20f   : > { %v1284_v50 = vadd.bf16 %v7983_v25, %v1004_v27  ;;  %v8003_v37 = vcombine.low %v1186_v34, %v1198_v52 }
 0x210   : > { %v1307_v45 = vmax.bf16 %v9796_v29, %v1283_v49 }
 0x211   : > { %v865_v28 = vpop.f32.mrb[28].mxu1  ;;  %v1308_v20 = vmax.bf16 %v9796_v29, %v1284_v50 }
 0x212   : > { %v867_v46 = vpop.f32.mrb[29].mxu1 }
 0x213   : > { %v869_v56 = vpop.f32.mrb[30].mxu1  ;;  %1839 = vmatprep.subr.bf16.mxu0 %v1308_v20  ;;  %6764 = vmatprep.subr.bf16.mxu1 %v1308_v20 }
 0x214   : > { %v1006_v33 = vpack.c.bf16 %v869_v56, %v865_v28  ;;  %v871_v41 = vpop.f32.mrb[31].mxu1  ;;  %1840 = vmatpush1.bf16.msra.mxu0 %v1307_v45  ;;  %6772 = vmatpush1.bf16.msra.mxu1 %v1307_v45  ;;  %v1222_v45 = vrot.slane %v7343_v61, %v7825_v22  ;;  %v9862_v61 = vpack.c.bf16 %v7899_v13, %v7893_v2  ;;  %v8027_v2 = vld [vmem:[%s9691_s5] sm:$0xff]  }
 0x215   : > { %v1007_v42 = vpack.c.bf16 %v871_v41, %v867_v46  ;;  %v1210_v46 = vrot.slane %v7345_v62, %v7825_v22 }
 0x216   : > { %v1286_v53 = vadd.bf16 %v7993_v43, %v1006_v33  ;;  %v1273_v62 = vadd.bf16 %v7931_v21, %v9862_v61  ;;  %v6816_v21 = vld [vmem:[%s9691_s5 + $0x188] sm:$0xff]  }
 0x217   : > { %v1287_v54 = vadd.bf16 %v7993_v43, %v1007_v42  ;;  %v6833_v61 = vld [vmem:[%s9691_s5 + $0x48] sm:$0xff]  }
 0x218   : > { %v1310_v27 = vmax.bf16 %v9796_v29, %v1286_v53 }
 0x219   : > { %v875_v55 = vpop.f32.mrb[32].mxu1  ;;  %v1311_v39 = vmax.bf16 %v9796_v29, %v1287_v54  ;;  %v6352_v54 = vcombine.low %v1210_v46, %v1222_v45  ;;  %v9868_v46 = vpack.c.bf16 %v7949_v35, %v7941_v63  ;;  %v8092_v63 = vld [vmem:[%s9691_s5 + $0x18] sm:$0xff]   ;;  %v8097_v35 = vld [vmem:[%s9691_s5 + $0x1a0] sm:$0xff]  }
 0x21a   : > { %v877_v49 = vpop.f32.mrb[33].mxu1 }
 0x21b   : > { %v879_v50 = vpop.f32.mrb[34].mxu1  ;;  %1841 = vmatprep.subr.bf16.mxu0 %v1311_v39  ;;  %6765 = vmatprep.subr.bf16.mxu1 %v1311_v39 }
 0x21c   : > { %v1009_v47 = vpack.c.bf16 %v879_v50, %v875_v55  ;;  %v881_v28 = vpop.f32.mrb[35].mxu1  ;;  %1842 = vmatpush1.bf16.msra.mxu0 %v1310_v27  ;;  %6773 = vmatpush1.bf16.msra.mxu1 %v1310_v27 }
 0x21d   : > { %v1010_v20 = vpack.c.bf16 %v881_v28, %v877_v49 }
 0x21e   : > { %v1289_v57 = vadd.bf16 %v8003_v37, %v1009_v47  ;;  %v9863_v47 = vpack.c.bf16 %v7895_v8, %v7891_v60  ;;  %v9864_v60 = vpack.c.bf16 %v7911_v10, %v7905_v19  ;;  %v8048_v10 = vld [vmem:[%s9691_s5 + $0x8] sm:$0xff]  }
 0x21f   : > { %v1290_v58 = vadd.bf16 %v8003_v37, %v1010_v20  ;;  %v1297_v20 = vmax.bf16 %v9796_v29, %v1273_v62  ;;  %v6834_v62 = vld [vmem:[%s9691_s5 + $0x1d0] sm:$0xff]  }
 0x220   : > { %v1313_v41 = vmax.bf16 %v9796_v29, %v1289_v57  ;;  %v1276_v28 = vadd.bf16 %v7953_v38, %v9863_v47  ;;  %v1279_v8 = vadd.bf16 %v7963_v40, %v9864_v60  ;;  %v9865_v38 = vpack.c.bf16 %v7907_v18, %v7903_v5  ;;  %v8053_v40 = vld [vmem:[%s9691_s5 + $0x190] sm:$0xff]   ;;  %v6838_v47 = vld [vmem:[%s9691_s5 + $0x1e0] sm:$0xff]  }
 0x221   : > { %v885_v56 = vpop.f32.mrb[36].mxu1  ;;  %v1314_v33 = vmax.bf16 %v9796_v29, %v1290_v58  ;;  %v9866_v58 = vpack.c.bf16 %v7927_v4, %v7921_v36  ;;  %v8072_v4 = vld [vmem:[%s9691_s5 + $0x10] sm:$0xff]  }
 0x222   : > { %v887_v42 = vpop.f32.mrb[37].mxu1  ;;  %v1300_v13 = vmax.bf16 %v9796_v29, %v1276_v28  ;;  %v1282_v57 = vadd.bf16 %v7973_v44, %v9865_v38  ;;  %v1303_v19 = vmax.bf16 %v9796_v29, %v1279_v8  ;;  %v9867_v44 = vpack.c.bf16 %v7923_v14, %v7915_v59  ;;  %v6839_v28 = vld [vmem:[%s9691_s5 + $0x60] sm:$0xff]   ;;  %v6842_v60 = vld [vmem:[%s9691_s5 + $0x1f0] sm:$0xff]   ;;  %v6845_v38 = vld [vmem:[%s9691_s5 + $0x78] sm:$0xff]  }
 0x223   : > { %v889_v53 = vpop.f32.mrb[38].mxu1  ;;  %1843 = vmatprep.subr.bf16.mxu0 %v1314_v33  ;;  %6766 = vmatprep.subr.bf16.mxu1 %v1314_v33  ;;  %v1285_v5 = vadd.bf16 %v7983_v25, %v9866_v58  ;;  %v6820_v25 = vld [vmem:[%s9691_s5 + $0x198] sm:$0xff]   ;;  %v1291_v14 = vadd.bf16 %v8003_v37, %v9868_v46  ;;  %v6824_v37 = vld [vmem:[%s9691_s5 + $0x1a8] sm:$0xff]   ;;  %v6843_v8 = vld [vmem:[%s9691_s5 + $0x70] sm:$0xff]   ;;  %v3380_v46 = vrot.slane %v7355_v3, %v7825_v22 }
 0x224   : > { %v1012_v52 = vpack.c.bf16 %v889_v53, %v885_v56  ;;  %v891_v34 = vpop.f32.mrb[39].mxu1  ;;  %1844 = vmatpush1.bf16.msra.mxu0 %v1313_v41  ;;  %6774 = vmatpush1.bf16.msra.mxu1 %v1313_v41  ;;  %v1306_v18 = vmax.bf16 %v9796_v29, %v1282_v57  ;;  %v1288_v45 = vadd.bf16 %v7993_v43, %v9867_v44  ;;  %v8118_v41 = vld [vmem:[%s9691_s5 + $0x28] sm:$0xff]   ;;  %v8129_v53 = vld [vmem:[%s9691_s5 + $0x30] sm:$0xff]   ;;  %v6846_v57 = vld [vmem:[%s9691_s5 + $0x80] sm:$0xff]  }
 0x225   : > { %v1013_v55 = vpack.c.bf16 %v891_v34, %v887_v42  ;;  %v1309_v36 = vmax.bf16 %v9796_v29, %v1285_v5  ;;  %v9869_v43 = vpack.c.bf16 %v7943_v0, %v7935_v48  ;;  %v1315_v33 = vmax.bf16 %v9796_v29, %v1291_v14  ;;  %v8107_v0 = vld [vmem:[%s9691_s5 + $0x20] sm:$0xff]   ;;  %v6826_v42 = vld [vmem:[%s9691_s5 + $0x1b0] sm:$0xff]   ;;  %v6851_v5 = vld [vmem:[%s9691_s5 + $0xa8] sm:$0xff]  }
 0x226   : > { %v1292_v39 = vadd.bf16 %v6352_v54, %v1012_v52  ;;  %v1312_v59 = vmax.bf16 %v9796_v29, %v1288_v45  ;;  %v8140_v52 = vld [vmem:[%s9691_s5 + $0x38] sm:$0xff]   ;;  %v6830_v34 = vld [vmem:[%s9691_s5 + $0x1c0] sm:$0xff]  }
 0x227   : > { %v1293_v27 = vadd.bf16 %v6352_v54, %v1013_v55  ;;  %v1294_v56 = vadd.bf16 %v6352_v54, %v9869_v43  ;;  %v6828_v54 = vld [vmem:[%s9691_s5 + $0x1b8] sm:$0xff]   ;;  %v6831_v55 = vld [vmem:[%s9691_s5 + $0x40] sm:$0xff]  }
 0x228   : > { %v1316_v50 = vmax.bf16 %v9796_v29, %v1292_v39  ;;  %v6832_v39 = vld [vmem:[%s9691_s5 + $0x1c8] sm:$0xff]   ;;  %v6850_v58 = vld [vmem:[%s9691_s5 + $0xa0] sm:$0xff]   ;;  %v6853_v44 = vld [vmem:[%s9691_s5 + $0xb8] sm:$0xff]  }
 0x229   : > { %v1317_v49 = vmax.bf16 %v9796_v29, %v1293_v27  ;;  %v1318_v48 = vmax.bf16 %v9796_v29, %v1294_v56  ;;  %v6835_v27 = vld [vmem:[%s9691_s5 + $0x50] sm:$0xff]   ;;  %v6854_v45 = vld [vmem:[%s9691_s5 + $0xc0] sm:$0xff]  }
 0x22b   : > { %1845 = vmatprep.subr.bf16.mxu0 %v1317_v49  ;;  %6767 = vmatprep.subr.bf16.mxu1 %v1317_v49  ;;  %v6836_v49 = vld [vmem:[%s9691_s5 + $0x1d8] sm:$0xff]  }
 0x22c   : > { %1846 = vmatpush1.bf16.msra.mxu0 %v1316_v50  ;;  %6775 = vmatpush1.bf16.msra.mxu1 %v1316_v50  ;;  %v6837_v50 = vld [vmem:[%s9691_s5 + $0x58] sm:$0xff]  }
 0x22d   : > { %6616 = vmatprep.subr.bf16.mxu1 %v1297_v20 }
 0x22f   : > { %1864 = vmatmul.mubr.bf16.vlgmr.msra.gmra.mrb[32].mxu0 %v8027_v2  ;;  %2354 = vmatmul.mubr.bf16.vlgmr.msra.gmra.mrb[40].mxu1 %v6816_v21  ;;  %v6841_v21 = vld [vmem:[%s9691_s5 + $0x68] sm:$0xff]  }
 0x230   : > { %6617 = vmatpush3.bf16.msra.mxu1 %v1297_v20  ;;  %1873 = vmatprep.mubr.bf16.mxu0 %v9796_v29  ;;  %v6840_v20 = vld [vmem:[%s9691_s5 + $0x1e8] sm:$0xff]  }
 0x231   : > { %6618 = vmatprep.subr.bf16.mxu1 %v1300_v13  ;;  %2363 = vmatprep.mubr.bf16.mxu1 %v9796_v29 }
 0x234   : > { %6619 = vmatpush3.bf16.msra.mxu1 %v1300_v13  ;;  %v6844_v13 = vld [vmem:[%s9691_s5 + $0x1f8] sm:$0xff]  }
 0x235   : > { %6620 = vmatprep.subr.bf16.mxu1 %v1303_v19 }
 0x237   : > { %1874 = vmatmul.mubr.bf16.gmra.mrb[36].mxu0 %v8048_v10  ;;  %2364 = vmatmul.mubr.bf16.gmra.mrb[44].mxu1 %v8053_v40 }
 0x238   : > { %6621 = vmatpush3.bf16.msra.mxu1 %v1303_v19  ;;  %1883 = vmatprep.mubr.bf16.mxu0 %v9796_v29  ;;  %v6848_v19 = vld [vmem:[%s9691_s5 + $0x90] sm:$0xff]  }
 0x239   : > { %6622 = vmatprep.subr.bf16.mxu1 %v1306_v18  ;;  %2373 = vmatprep.mubr.bf16.mxu1 %v9796_v29 }
 0x23c   : > { %6623 = vmatpush3.bf16.msra.mxu1 %v1306_v18  ;;  %v6852_v18 = vld [vmem:[%s9691_s5 + $0xb0] sm:$0xff]  }
 0x23d   : > { %6624 = vmatprep.subr.bf16.mxu1 %v1309_v36 }
 0x23f   : > { %1884 = vmatmul.mubr.bf16.gmra.mrb[40].mxu0 %v8072_v4  ;;  %2374 = vmatmul.mubr.bf16.gmra.mrb[48].mxu1 %v6820_v25  ;;  %v3392_v25 = vrot.slane %v7353_v1, %v7825_v22 }
 0x240   : > { %6625 = vmatpush3.bf16.msra.mxu1 %v1309_v36  ;;  %1893 = vmatprep.mubr.bf16.mxu0 %v9796_v29  ;;  %v6855_v36 = vld [vmem:[%s9691_s5 + $0xc8] sm:$0xff]  }
 0x241   : > { %6626 = vmatprep.subr.bf16.mxu1 %v1312_v59  ;;  %2383 = vmatprep.mubr.bf16.mxu1 %v9796_v29 }
 0x244   : > { %6627 = vmatpush3.bf16.msra.mxu1 %v1312_v59 }
 0x245   : > { %6628 = vmatprep.subr.bf16.mxu1 %v1315_v33 }
 0x247   : > { %1894 = vmatmul.mubr.bf16.gmra.mrb[44].mxu0 %v8092_v63  ;;  %2384 = vmatmul.mubr.bf16.gmra.mrb[52].mxu1 %v8097_v35 }
 0x248   : > { %6629 = vmatpush3.bf16.msra.mxu1 %v1315_v33  ;;  %1903 = vmatprep.mubr.bf16.mxu0 %v9796_v29  ;;  %v6857_v33 = vld [vmem:[%s9691_s5 + $0xd8] sm:$0xff]  }
 0x249   : > { %6630 = vmatprep.subr.bf16.mxu1 %v1318_v48  ;;  %2393 = vmatprep.mubr.bf16.mxu1 %v9796_v29 }
 0x24c   : > { %6631 = vmatpush3.bf16.msra.mxu1 %v1318_v48 }
 0x24f   : > { %1904 = vmatmul.mubr.bf16.gmra.mrb[48].mxu0 %v8107_v0  ;;  %2394 = vmatmul.mubr.bf16.gmra.mrb[56].mxu1 %v6824_v37 }
 0x250   : > { %1913 = vmatprep.mubr.bf16.mxu0 %v9796_v29  ;;  %2403 = vmatprep.mubr.bf16.mxu1 %v9796_v29 }
 0x257   : > { %1914 = vmatmul.mubr.bf16.gmra.mrb[52].mxu0 %v8118_v41  ;;  %2404 = vmatmul.mubr.bf16.gmra.mrb[60].mxu1 %v6826_v42 }
 0x258   : > { %1923 = vmatprep.mubr.bf16.mxu0 %v9796_v29  ;;  %2413 = vmatprep.mubr.bf16.mxu1 %v9796_v29 }
 0x25f   : > { %1924 = vmatmul.mubr.bf16.gmra.mrb[56].mxu0 %v8129_v53  ;;  %2414 = vmatmul.mubr.bf16.gmra.mrb[64].mxu1 %v6828_v54 }
 0x260   : > { %1933 = vmatprep.mubr.bf16.mxu0 %v9796_v29  ;;  %2423 = vmatprep.mubr.bf16.mxu1 %v9796_v29 }
 0x267   : > { %1934 = vmatmul.mubr.bf16.gmra.mrb[60].mxu0 %v8140_v52  ;;  %2424 = vmatmul.mubr.bf16.gmra.mrb[68].mxu1 %v6830_v34 }
 0x268   : > { %1943 = vmatprep.mubr.bf16.mxu0 %v9796_v29  ;;  %2433 = vmatprep.mubr.bf16.mxu1 %v9796_v29 }
 0x26f   : > { %1944 = vmatmul.mubr.bf16.gmra.mrb[64].mxu0 %v6831_v55  ;;  %2434 = vmatmul.mubr.bf16.gmra.mrb[72].mxu1 %v6832_v39  ;;  %v3416_v39 = vrot.slane %v7363_v6, %v7825_v22 }
 0x270   : > { %1953 = vmatprep.mubr.bf16.mxu0 %v9796_v29  ;;  %2443 = vmatprep.mubr.bf16.mxu1 %v9796_v29 }
 0x277   : > { %1954 = vmatmul.mubr.bf16.gmra.mrb[68].mxu0 %v6833_v61  ;;  %2444 = vmatmul.mubr.bf16.gmra.mrb[76].mxu1 %v6834_v62  ;;  %v9885_v62 = vld [vmem:[#allocation92_spill] sm:$0xff] }
 0x278   : > { %1963 = vmatprep.mubr.bf16.mxu0 %v9796_v29  ;;  %2453 = vmatprep.mubr.bf16.mxu1 %v9796_v29 }
 0x27f   : > { %1964 = vmatmul.mubr.bf16.gmra.mrb[72].mxu0 %v6835_v27  ;;  %2454 = vmatmul.mubr.bf16.gmra.mrb[80].mxu1 %v6836_v49 }
 0x280   : > { %1973 = vmatprep.mubr.bf16.mxu0 %v9796_v29  ;;  %2463 = vmatprep.mubr.bf16.mxu1 %v9796_v29 }
 0x287   : > { %1974 = vmatmul.mubr.bf16.gmra.mrb[76].mxu0 %v6837_v50  ;;  %2464 = vmatmul.mubr.bf16.gmra.mrb[84].mxu1 %v6838_v47 }
 0x288   : > { %1983 = vmatprep.mubr.bf16.mxu0 %v9796_v29  ;;  %2473 = vmatprep.mubr.bf16.mxu1 %v9796_v29 }
 0x28f   : > { %1984 = vmatmul.mubr.bf16.gmra.mrb[80].mxu0 %v6839_v28  ;;  %2474 = vmatmul.mubr.bf16.gmra.mrb[88].mxu1 %v6840_v20  ;;  %v6858_v20 = vld [vmem:[%s9691_s5 + $0xe0] sm:$0xff]  }
 0x290   : > { %1993 = vmatprep.mubr.bf16.mxu0 %v9796_v29  ;;  %2483 = vmatprep.mubr.bf16.mxu1 %v9796_v29 }
 0x297   : > { %1994 = vmatmul.mubr.bf16.gmra.mrb[84].mxu0 %v6841_v21  ;;  %2484 = vmatmul.mubr.bf16.gmra.mrb[92].mxu1 %v6842_v60 }
 0x298   : > { %2003 = vmatprep.mubr.bf16.mxu0 %v9796_v29  ;;  %2493 = vmatprep.mubr.bf16.mxu1 %v9796_v29 }
 0x29f   : > { %2004 = vmatmul.mubr.bf16.gmra.mrb[88].mxu0 %v6843_v8  ;;  %2494 = vmatmul.mubr.bf16.gmra.mrb[96].mxu1 %v6844_v13 }
 0x2a0   : > { %2013 = vmatprep.mubr.bf16.mxu0 %v9796_v29  ;;  %6632 = vmatprep.mubr.bf16.mxu1 %v8027_v2  ;;  %v6847_v2 = vld [vmem:[%s9691_s5 + $0x88] sm:$0xff]  }
 0x2a7   : > { %2014 = vmatmul.mubr.bf16.gmra.mrb[92].mxu0 %v6845_v38  ;;  %6633 = vmatmul.mubr.bf16.vlgmr.msra.gmra.mrb[100].mxu1 %v8048_v10  ;;  %v6849_v10 = vld [vmem:[%s9691_s5 + $0x98] sm:$0xff]  }
 0x2a8   : > { %2023 = vmatprep.mubr.bf16.mxu0 %v9796_v29  ;;  %6636 = vmatprep.mubr.bf16.mxu1 %v8072_v4  ;;  %v6856_v4 = vld [vmem:[%s9691_s5 + $0xd0] sm:$0xff]  }
 0x2af   : > { %2024 = vmatmul.mubr.bf16.gmra.mrb[96].mxu0 %v6846_v57  ;;  %6637 = vmatmul.mubr.bf16.gmra.mrb[104].mxu1 %v8092_v63 }
 0x2b0   : > { %2033 = vmatprep.mubr.bf16.mxu0 %v9796_v29  ;;  %6640 = vmatprep.mubr.bf16.mxu1 %v8107_v0  ;;  %v8266_v0 = vcombine.low %v3380_v46, %v3392_v25 }
 0x2b7   : > { %2034 = vmatmul.mubr.bf16.gmra.mrb[100].mxu0 %v6847_v2  ;;  %6641 = vmatmul.mubr.bf16.gmra.mrb[108].mxu1 %v8118_v41 }
 0x2b8   : > { %2043 = vmatprep.mubr.bf16.mxu0 %v9796_v29  ;;  %6644 = vmatprep.mubr.bf16.mxu1 %v8129_v53 }
 0x2bf   : > { %2044 = vmatmul.mubr.bf16.gmra.mrb[104].mxu0 %v6848_v19  ;;  %6645 = vmatmul.mubr.bf16.gmra.mrb[112].mxu1 %v8140_v52 }
 0x2c0   : > { %2053 = vmatprep.mubr.bf16.mxu0 %v9796_v29  ;;  %6648 = vmatprep.mubr.bf16.mxu1 %v6831_v55 }
 0x2c7   : > { %2054 = vmatmul.mubr.bf16.gmra.mrb[108].mxu0 %v6849_v10  ;;  %6649 = vmatmul.mubr.bf16.gmra.mrb[116].mxu1 %v6833_v61  ;;  %v3404_v61 = vrot.slane %v7365_v7, %v7825_v22 }
 0x2c8   : > { %2063 = vmatprep.mubr.bf16.mxu0 %v9796_v29  ;;  %6652 = vmatprep.mubr.bf16.mxu1 %v6835_v27 }
 0x2c9   : > { %v8292_v6 = vcombine.low %v3404_v61, %v3416_v39  ;;  %v3464_v61 = vrot.slane %v7383_v15, %v7825_v22  ;;  %v8350_v15 = vld [vmem:[%s9691_s5 + $0x100] sm:$0xff]  }
 0x2cf   : > { %2064 = vmatmul.mubr.bf16.gmra.mrb[112].mxu0 %v6850_v58  ;;  %6653 = vmatmul.mubr.bf16.gmra.mrb[120].mxu1 %v6837_v50 }
 0x2d0   : > { %2073 = vmatprep.mubr.bf16.mxu0 %v9796_v29  ;;  %6656 = vmatprep.mubr.bf16.mxu1 %v6839_v28 }
 0x2d7   : > { %2074 = vmatmul.mubr.bf16.gmra.mrb[116].mxu0 %v6851_v5  ;;  %6657 = vmatmul.mubr.bf16.gmra.mrb[124].mxu1 %v6841_v21 }
 0x2d8   : > { %2083 = vmatprep.mubr.bf16.mxu0 %v9796_v29  ;;  %6660 = vmatprep.mubr.bf16.mxu1 %v6843_v8 }
 0x2df   : > { %2084 = vmatmul.mubr.bf16.gmra.mrb[120].mxu0 %v6852_v18  ;;  %6661 = vmatmul.mubr.bf16.gmra.mrb[128].mxu1 %v6845_v38 }
 0x2e0   : > { %2093 = vmatprep.mubr.bf16.mxu0 %v9796_v29  ;;  %6664 = vmatprep.mubr.bf16.mxu1 %v6846_v57 }
 0x2e7   : > { %2094 = vmatmul.mubr.bf16.gmra.mrb[124].mxu0 %v6853_v44  ;;  %6665 = vmatmul.mubr.bf16.gmra.mrb[132].mxu1 %v6847_v2 }
 0x2e8   : > { %2103 = vmatprep.mubr.bf16.mxu0 %v9796_v29  ;;  %6668 = vmatprep.mubr.bf16.mxu1 %v6848_v19 }
 0x2ef   : > { %2104 = vmatmul.mubr.bf16.gmra.mrb[128].mxu0 %v6854_v45  ;;  %6669 = vmatmul.mubr.bf16.gmra.mrb[136].mxu1 %v6849_v10 }
 0x2f0   : > { %2113 = vmatprep.mubr.bf16.mxu0 %v9796_v29  ;;  %6672 = vmatprep.mubr.bf16.mxu1 %v6850_v58 }
 0x2f7   : > { %2114 = vmatmul.mubr.bf16.gmra.mrb[132].mxu0 %v6855_v36  ;;  %6673 = vmatmul.mubr.bf16.gmra.mrb[140].mxu1 %v6851_v5 }
 0x2f8   : > { %2123 = vmatprep.mubr.bf16.mxu0 %v9796_v29  ;;  %6676 = vmatprep.mubr.bf16.mxu1 %v6852_v18  ;;  %v3440_v18 = vrot.slane %v7373_v11, %v7825_v22  ;;  %v6860_v11 = vld [vmem:[%s9691_s5 + $0xf0] sm:$0xff]  }
 0x2ff   : > { %2124 = vmatmul.mubr.bf16.gmra.mrb[136].mxu0 %v6856_v4  ;;  %6677 = vmatmul.mubr.bf16.gmra.mrb[144].mxu1 %v6853_v44  ;;  %v3428_v44 = vrot.slane %v7375_v12, %v7825_v22 }
 0x300   : > { %2133 = vmatprep.mubr.bf16.mxu0 %v9796_v29  ;;  %6680 = vmatprep.mubr.bf16.mxu1 %v6854_v45 }
 0x301   : > { %v8321_v12 = vcombine.low %v3428_v44, %v3440_v18 }
 0x302   : > { %v1865_v14 = vpop.f32.mrb[32].mxu0  ;;  %v2355_v59 = vpop.f32.mrb[40].mxu1 }
 0x303   : > { %v1867_v43 = vpop.f32.mrb[33].mxu0  ;;  %v2357_v56 = vpop.f32.mrb[41].mxu1 }
 0x304   : > { %v1869_v63 = vpop.f32.mrb[34].mxu0  ;;  %v2359_v48 = vpop.f32.mrb[42].mxu1 }
 0x305   : > { %v3049_v37 = vpack.c.bf16 %v1869_v63, %v1865_v14  ;;  %v3196_v41 = vpack.c.bf16 %v2359_v48, %v2355_v59  ;;  %v1871_v42 = vpop.f32.mrb[35].mxu0  ;;  %v2361_v53 = vpop.f32.mrb[43].mxu1  ;;  %v6859_v59 = vld [vmem:[%s9691_s5 + $0xe8] sm:$0xff]  }
 0x306   : > { %v3050_v1 = vpack.c.bf16 %v1871_v42, %v1867_v43  ;;  %v3197_v54 = vpack.c.bf16 %v2361_v53, %v2357_v56 }
 0x307   : > { %v8269_v3 = vadd.bf16 %v8266_v0, %v3049_v37  ;;  %v8272_v52 = vadd.bf16 %v7837_v51, %v3196_v41  ;;  %2134 = vmatmul.mubr.bf16.gmra.mrb[140].mxu0 %v6857_v33  ;;  %6681 = vmatmul.mubr.bf16.gmra.mrb[148].mxu1 %v6855_v36 }
 0x308   : > { %v8275_v34 = vadd.bf16 %v8266_v0, %v3050_v1  ;;  %v8278_v55 = vadd.bf16 %v7837_v51, %v3197_v54  ;;  %2143 = vmatprep.mubr.bf16.mxu0 %v9796_v29  ;;  %6684 = vmatprep.mubr.bf16.mxu1 %v6856_v4 }
 0x309   : > { %9870 = vst [vmem:[#allocation100_spill] sm:$0xff] %v8272_v52 }
 0x30a   : > { %9871 = vst [vmem:[#allocation101_spill] sm:$0xff] %v8278_v55  ;;  %v1875_v49 = vpop.f32.mrb[36].mxu0  ;;  %v2365_v50 = vpop.f32.mrb[44].mxu1 }
 0x30b   : > { %v1877_v47 = vpop.f32.mrb[37].mxu0  ;;  %v2367_v28 = vpop.f32.mrb[45].mxu1 }
 0x30c   : > { %v1879_v21 = vpop.f32.mrb[38].mxu0  ;;  %v2369_v60 = vpop.f32.mrb[46].mxu1 }
 0x30d   : > { %v3052_v8 = vpack.c.bf16 %v1879_v21, %v1875_v49  ;;  %v3199_v7 = vpack.c.bf16 %v2369_v60, %v2365_v50  ;;  %v1881_v13 = vpop.f32.mrb[39].mxu0  ;;  %v2371_v38 = vpop.f32.mrb[47].mxu1  ;;  %v3452_v49 = vrot.slane %v7385_v16, %v7825_v22 }
 0x30e   : > { %v3053_v57 = vpack.c.bf16 %v1881_v13, %v1877_v47  ;;  %v3200_v2 = vpack.c.bf16 %v2371_v38, %v2367_v28 }
 0x30f   : > { %v8295_v19 = vadd.bf16 %v8292_v6, %v3052_v8  ;;  %v8298_v10 = vadd.bf16 %v7841_v9, %v3199_v7  ;;  %2144 = vmatmul.mubr.bf16.gmra.mrb[144].mxu0 %v6858_v20  ;;  %6685 = vmatmul.mubr.bf16.gmra.mrb[152].mxu1 %v6857_v33  ;;  %v6861_v8 = vld [vmem:[%s9691_s5 + $0xf8] sm:$0xff]   ;;  %v8352_v16 = vcombine.low %v3452_v49, %v3464_v61 }
 0x310   : > { %v8301_v58 = vadd.bf16 %v8292_v6, %v3053_v57  ;;  %v8304_v5 = vadd.bf16 %v7841_v9, %v3200_v2  ;;  %2153 = vmatprep.mubr.bf16.mxu0 %v9796_v29  ;;  %6688 = vmatprep.mubr.bf16.mxu1 %v6858_v20 }
 0x311   : > { %9872 = vst [vmem:[#allocation102_spill] sm:$0xff] %v8298_v10 }
 0x312   : > { %9873 = vst [vmem:[#allocation103_spill] sm:$0xff] %v8304_v5  ;;  %v1885_v4 = vpop.f32.mrb[40].mxu0  ;;  %v2375_v25 = vpop.f32.mrb[48].mxu1  ;;  %v9900_v5 = vld [vmem:[#allocation95_spill] sm:$0xff] }
 0x313   : > { %v1887_v46 = vpop.f32.mrb[41].mxu0  ;;  %v2377_v14 = vpop.f32.mrb[49].mxu1 }
 0x314   : > { %v1889_v43 = vpop.f32.mrb[42].mxu0  ;;  %v2379_v56 = vpop.f32.mrb[50].mxu1 }
 0x315   : > { %v3055_v33 = vpack.c.bf16 %v1889_v43, %v1885_v4  ;;  %v3202_v63 = vpack.c.bf16 %v2379_v56, %v2375_v25  ;;  %v1891_v48 = vpop.f32.mrb[43].mxu0  ;;  %v2381_v37 = vpop.f32.mrb[51].mxu1  ;;  %v3488_v43 = vrot.slane %v7393_v23, %v7825_v22  ;;  %v3476_v56 = vrot.slane %v7395_v24, %v7825_v22  ;;  %v8384_v24 = vld [vmem:[%s9691_s5 + $0x110] sm:$0xff]  }
 0x316   : > { %v3056_v41 = vpack.c.bf16 %v1891_v48, %v1887_v46  ;;  %v3203_v42 = vpack.c.bf16 %v2381_v37, %v2377_v14 }
 0x317   : > { %v8324_v53 = vadd.bf16 %v8321_v12, %v3055_v33  ;;  %v8327_v1 = vadd.bf16 %v7845_v26, %v3202_v63  ;;  %2154 = vmatmul.mubr.bf16.gmra.mrb[148].mxu0 %v6859_v59  ;;  %6689 = vmatmul.mubr.bf16.gmra.mrb[156].mxu1 %v6859_v59  ;;  %v8386_v49 = vcombine.low %v3476_v56, %v3488_v43  ;;  %v9880_v43 = vld [vmem:[#allocation91_spill] sm:$0xff] }
 0x318   : > { %v8330_v54 = vadd.bf16 %v8321_v12, %v3056_v41  ;;  %v8333_v39 = vadd.bf16 %v7845_v26, %v3203_v42  ;;  %2163 = vmatprep.mubr.bf16.mxu0 %v9796_v29  ;;  %6692 = vmatprep.mubr.bf16.mxu1 %v6860_v11  ;;  %v8379_v42 = vld [vmem:[%s9691_s5 + $0x108] sm:$0xff]   ;;  %v9907_v26 = vld [vmem:[#allocation96_spill] sm:$0xff] }
 0x319   : > { %9874 = vst [vmem:[#allocation104_spill] sm:$0xff] %v8327_v1 }
 0x31a   : > { %9875 = vst [vmem:[#allocation105_spill] sm:$0xff] %v8333_v39  ;;  %v1895_v28 = vpop.f32.mrb[44].mxu0  ;;  %v2385_v20 = vpop.f32.mrb[52].mxu1 }
 0x31b   : > { %v1897_v21 = vpop.f32.mrb[45].mxu0  ;;  %v2387_v60 = vpop.f32.mrb[53].mxu1 }
 0x31c   : > { %v1899_v7 = vpop.f32.mrb[46].mxu0  ;;  %v2389_v13 = vpop.f32.mrb[54].mxu1 }
 0x31d   : > { %v3058_v38 = vpack.c.bf16 %v1899_v7, %v1895_v28  ;;  %v3205_v57 = vpack.c.bf16 %v2389_v13, %v2385_v20  ;;  %v1901_v2 = vpop.f32.mrb[47].mxu0  ;;  %v2391_v18 = vpop.f32.mrb[55].mxu1 }
 0x31e   : > { %v3059_v44 = vpack.c.bf16 %v1901_v2, %v1897_v21  ;;  %v3206_v4 = vpack.c.bf16 %v2391_v18, %v2387_v60 }
 0x31f   : > { %v8355_v25 = vadd.bf16 %v8352_v16, %v3058_v38  ;;  %v8358_v46 = vadd.bf16 %v7849_v30, %v3205_v57  ;;  %2164 = vmatmul.mubr.bf16.gmra.mrb[152].mxu0 %v6860_v11  ;;  %6693 = vmatmul.mubr.bf16.gmra.mrb[160].mxu1 %v6861_v8 }
 0x320   : > { %v8361_v14 = vadd.bf16 %v8352_v16, %v3059_v44  ;;  %v8364_v59 = vadd.bf16 %v7849_v30, %v3206_v4  ;;  %2173 = vmatprep.mubr.bf16.mxu0 %v9796_v29  ;;  %6696 = vmatprep.mubr.bf16.mxu1 %v8350_v15  ;;  %v3512_v44 = vrot.slane %v7403_v31, %v7825_v22 }
 0x321   : > { %9876 = vst [vmem:[#allocation106_spill] sm:$0xff] %v8358_v46  ;;  %v3500_v4 = vrot.slane %v7405_v32, %v7825_v22  ;;  %v8419_v32 = vld [vmem:[%s9691_s5 + $0x120] sm:$0xff]  }
 0x322   : > { %9877 = vst [vmem:[#allocation107_spill] sm:$0xff] %v8364_v59  ;;  %v1905_v63 = vpop.f32.mrb[48].mxu0  ;;  %v2395_v48 = vpop.f32.mrb[56].mxu1 }
 0x323   : > { %v1907_v37 = vpop.f32.mrb[49].mxu0  ;;  %v2397_v41 = vpop.f32.mrb[57].mxu1 }
 0x324   : > { %v1909_v61 = vpop.f32.mrb[50].mxu0  ;;  %v2399_v23 = vpop.f32.mrb[58].mxu1 }
 0x325   : > { %v3061_v28 = vpack.c.bf16 %v1909_v61, %v1905_v63  ;;  %v3208_v20 = vpack.c.bf16 %v2399_v23, %v2395_v48  ;;  %v1911_v21 = vpop.f32.mrb[51].mxu0  ;;  %v2401_v60 = vpop.f32.mrb[59].mxu1  ;;  %v8421_v23 = vcombine.low %v3500_v4, %v3512_v44  ;;  %v9883_v4 = vld [vmem:[#allocation2_spill] sm:$0xff] }
 0x326   : > { %v3062_v7 = vpack.c.bf16 %v1911_v21, %v1907_v37  ;;  %v3209_v13 = vpack.c.bf16 %v2401_v60, %v2397_v41  ;;  %v8414_v41 = vld [vmem:[%s9691_s5 + $0x118] sm:$0xff]  }
 0x327   : > { %v8389_v38 = vadd.bf16 %v8386_v49, %v3061_v28  ;;  %v8392_v57 = vadd.bf16 %v7853_v17, %v3208_v20  ;;  %2174 = vmatmul.mubr.bf16.gmra.mrb[156].mxu0 %v6861_v8  ;;  %6697 = vmatmul.mubr.bf16.gmra.mrb[164].mxu1 %v8379_v42 }
 0x328   : > { %v8396_v2 = vadd.bf16 %v8386_v49, %v3062_v7  ;;  %v8399_v18 = vadd.bf16 %v7853_v17, %v3209_v13  ;;  %2183 = vmatprep.mubr.bf16.mxu0 %v9796_v29  ;;  %6700 = vmatprep.mubr.bf16.mxu1 %v8384_v24 }
 0x329   : > { %9878 = vst [vmem:[#allocation108_spill] sm:$0xff] %v8392_v57 }
 0x32a   : > { %9879 = vst [vmem:[#allocation109_spill] sm:$0xff] %v8399_v18  ;;  %v1915_v56 = vpop.f32.mrb[52].mxu0  ;;  %v2405_v63 = vpop.f32.mrb[60].mxu1  ;;  %v9895_v18 = vld [vmem:[#allocation94_spill] sm:$0xff] }
 0x32b   : > { %v1917_v48 = vpop.f32.mrb[53].mxu0  ;;  %v2407_v37 = vpop.f32.mrb[61].mxu1 }
 0x32c   : > { %v1919_v61 = vpop.f32.mrb[54].mxu0  ;;  %v2409_v31 = vpop.f32.mrb[62].mxu1 }
 0x32d   : > { %v3064_v28 = vpack.c.bf16 %v1919_v61, %v1915_v56  ;;  %v3211_v20 = vpack.c.bf16 %v2409_v31, %v2405_v63  ;;  %v1921_v21 = vpop.f32.mrb[55].mxu0  ;;  %v2411_v60 = vpop.f32.mrb[63].mxu1  ;;  %v3536_v56 = vrot.slane %v9883_v4, %v7825_v22  ;;  %v9884_v63 = vld [vmem:[#allocation3_spill] sm:$0xff] }
 0x32e   : > { %v3065_v7 = vpack.c.bf16 %v1921_v21, %v1917_v48  ;;  %v3212_v13 = vpack.c.bf16 %v2411_v60, %v2407_v37  ;;  %v3524_v48 = vrot.slane %v9884_v63, %v7825_v22  ;;  %v8450_v21 = vld [vmem:[%s9691_s5 + $0x128] sm:$0xff]  }
 0x32f   : > { %v8424_v33 = vadd.bf16 %v8421_v23, %v3064_v28  ;;  %v8427_v36 = vadd.bf16 %v9880_v43, %v3211_v20  ;;  %2184 = vmatmul.mubr.bf16.gmra.mrb[160].mxu0 %v8350_v15  ;;  %6701 = vmatmul.mubr.bf16.gmra.mrb[168].mxu1 %v8414_v41 }
 0x330   : > { %v8432_v47 = vadd.bf16 %v8421_v23, %v3065_v7  ;;  %v8435_v44 = vadd.bf16 %v9880_v43, %v3212_v13  ;;  %2193 = vmatprep.mubr.bf16.mxu0 %v9796_v29  ;;  %6704 = vmatprep.mubr.bf16.mxu1 %v8419_v32  ;;  %v8455_v13 = vld [vmem:[%s9691_s5 + $0x130] sm:$0xff]   ;;  %v8457_v4 = vcombine.low %v3524_v48, %v3536_v56  ;;  %v9889_v48 = vld [vmem:[#allocation5_spill] sm:$0xff] }
 0x331   : > { %9881 = vst [vmem:[#allocation110_spill] sm:$0xff] %v8427_v36 }
 0x332   : > { %9882 = vst [vmem:[#allocation111_spill] sm:$0xff] %v8435_v44  ;;  %v1925_v61 = vpop.f32.mrb[56].mxu0  ;;  %v2415_v31 = vpop.f32.mrb[64].mxu1 }
 0x333   : > { %v1927_v28 = vpop.f32.mrb[57].mxu0  ;;  %v2417_v20 = vpop.f32.mrb[65].mxu1 }
 0x334   : > { %v1929_v60 = vpop.f32.mrb[58].mxu0  ;;  %v2419_v7 = vpop.f32.mrb[66].mxu1 }
 0x335   : > { %v3067_v63 = vpack.c.bf16 %v1929_v60, %v1925_v61  ;;  %v3214_v37 = vpack.c.bf16 %v2419_v7, %v2415_v31  ;;  %v1931_v27 = vpop.f32.mrb[59].mxu0  ;;  %v2421_v8 = vpop.f32.mrb[67].mxu1 }
 0x336   : > { %v3068_v15 = vpack.c.bf16 %v1931_v27, %v1927_v28  ;;  %v3215_v50 = vpack.c.bf16 %v2421_v8, %v2417_v20  ;;  %v9888_v27 = vld [vmem:[#allocation4_spill] sm:$0xff]  ;;  %v8486_v20 = vld [vmem:[%s9691_s5 + $0x138] sm:$0xff]  }
 0x337   : > { %v8460_v11 = vadd.bf16 %v8457_v4, %v3067_v63  ;;  %v8463_v45 = vadd.bf16 %v9885_v62, %v3214_v37  ;;  %2194 = vmatmul.mubr.bf16.gmra.mrb[164].mxu0 %v8379_v42  ;;  %6705 = vmatmul.mubr.bf16.gmra.mrb[172].mxu1 %v8450_v21  ;;  %v3560_v8 = vrot.slane %v9888_v27, %v7825_v22  ;;  %v8491_v63 = vld [vmem:[%s9691_s5 + $0x140] sm:$0xff]  }
 0x338   : > { %v8468_v36 = vadd.bf16 %v8457_v4, %v3068_v15  ;;  %v8471_v56 = vadd.bf16 %v9885_v62, %v3215_v50  ;;  %2203 = vmatprep.mubr.bf16.mxu0 %v9796_v29  ;;  %6708 = vmatprep.mubr.bf16.mxu1 %v8455_v13  ;;  %v3548_v37 = vrot.slane %v9889_v48, %v7825_v22  ;;  %v9890_v62 = vld [vmem:[#allocation93_spill] sm:$0xff] }
 0x339   : > { %9886 = vst [vmem:[#allocation2_spill] sm:$0xff] %v8463_v45 }
 0x33a   : > { %9887 = vst [vmem:[#allocation3_spill] sm:$0xff] %v8471_v56  ;;  %v1935_v61 = vpop.f32.mrb[60].mxu0  ;;  %v2425_v31 = vpop.f32.mrb[68].mxu1  ;;  %v8493_v27 = vcombine.low %v3548_v37, %v3560_v8 }
 0x33b   : > { %v1937_v50 = vpop.f32.mrb[61].mxu0  ;;  %v2427_v28 = vpop.f32.mrb[69].mxu1 }
 0x33c   : > { %v1939_v60 = vpop.f32.mrb[62].mxu0  ;;  %v2429_v7 = vpop.f32.mrb[70].mxu1 }
 0x33d   : > { %v3070_v48 = vpack.c.bf16 %v1939_v60, %v1935_v61  ;;  %v3217_v15 = vpack.c.bf16 %v2429_v7, %v2425_v31  ;;  %v1941_v42 = vpop.f32.mrb[63].mxu0  ;;  %v2431_v44 = vpop.f32.mrb[71].mxu1 }
 0x33e   : > { %v3071_v45 = vpack.c.bf16 %v1941_v42, %v1937_v50  ;;  %v3218_v56 = vpack.c.bf16 %v2431_v44, %v2427_v28  ;;  %v9893_v44 = vld [vmem:[#allocation6_spill] sm:$0xff]  ;;  %v9894_v42 = vld [vmem:[#allocation7_spill] sm:$0xff] }
 0x33f   : > { %v8496_v43 = vadd.bf16 %v8493_v27, %v3070_v48  ;;  %v8499_v46 = vadd.bf16 %v9890_v62, %v3217_v15  ;;  %2204 = vmatmul.mubr.bf16.gmra.mrb[168].mxu0 %v8384_v24  ;;  %6709 = vmatmul.mubr.bf16.gmra.mrb[176].mxu1 %v8486_v20  ;;  %v3584_v37 = vrot.slane %v9893_v44, %v7825_v22  ;;  %v8522_v28 = vld [vmem:[%s9691_s5 + $0x148] sm:$0xff]   ;;  %v8527_v48 = vld [vmem:[%s9691_s5 + $0x150] sm:$0xff]  }
 0x340   : > { %v8504_v59 = vadd.bf16 %v8493_v27, %v3071_v45  ;;  %v8507_v8 = vadd.bf16 %v9890_v62, %v3218_v56  ;;  %2213 = vmatprep.mubr.bf16.mxu0 %v9796_v29  ;;  %6712 = vmatprep.mubr.bf16.mxu1 %v8491_v63  ;;  %v3572_v15 = vrot.slane %v9894_v42, %v7825_v22 }
 0x341   : > { %9891 = vst [vmem:[#allocation4_spill] sm:$0xff] %v8499_v46 }
 0x342   : > { %9892 = vst [vmem:[#allocation5_spill] sm:$0xff] %v8507_v8  ;;  %v1945_v61 = vpop.f32.mrb[64].mxu0  ;;  %v2435_v31 = vpop.f32.mrb[72].mxu1  ;;  %v8529_v44 = vcombine.low %v3572_v15, %v3584_v37 }
 0x343   : > { %v1947_v56 = vpop.f32.mrb[65].mxu0  ;;  %v2437_v50 = vpop.f32.mrb[73].mxu1 }
 0x344   : > { %v1949_v60 = vpop.f32.mrb[66].mxu0  ;;  %v2439_v7 = vpop.f32.mrb[74].mxu1 }
 0x345   : > { %v3073_v42 = vpack.c.bf16 %v1949_v60, %v1945_v61  ;;  %v3220_v45 = vpack.c.bf16 %v2439_v7, %v2435_v31  ;;  %v1951_v24 = vpop.f32.mrb[67].mxu0  ;;  %v2441_v46 = vpop.f32.mrb[75].mxu1 }
 0x346   : > { %v3074_v8 = vpack.c.bf16 %v1951_v24, %v1947_v56  ;;  %v3221_v62 = vpack.c.bf16 %v2441_v46, %v2437_v50  ;;  %v9898_v46 = vld [vmem:[#allocation8_spill] sm:$0xff]  ;;  %v9899_v24 = vld [vmem:[#allocation9_spill] sm:$0xff] }
 0x347   : > { %v8532_v57 = vadd.bf16 %v8529_v44, %v3073_v42  ;;  %v8535_v30 = vadd.bf16 %v9895_v18, %v3220_v45  ;;  %2214 = vmatmul.mubr.bf16.gmra.mrb[172].mxu0 %v8414_v41  ;;  %6713 = vmatmul.mubr.bf16.gmra.mrb[180].mxu1 %v8522_v28  ;;  %v3608_v15 = vrot.slane %v9898_v46, %v7825_v22  ;;  %v8558_v50 = vld [vmem:[%s9691_s5 + $0x158] sm:$0xff]   ;;  %v8563_v42 = vld [vmem:[%s9691_s5 + $0x160] sm:$0xff]  }
 0x348   : > { %v8540_v17 = vadd.bf16 %v8529_v44, %v3074_v8  ;;  %v8543_v37 = vadd.bf16 %v9895_v18, %v3221_v62  ;;  %2223 = vmatprep.mubr.bf16.mxu0 %v9796_v29  ;;  %6716 = vmatprep.mubr.bf16.mxu1 %v8527_v48  ;;  %v3596_v45 = vrot.slane %v9899_v24, %v7825_v22 }
 0x349   : > { %9896 = vst [vmem:[#allocation6_spill] sm:$0xff] %v8535_v30 }
 0x34a   : > { %9897 = vst [vmem:[#allocation7_spill] sm:$0xff] %v8543_v37  ;;  %v1955_v61 = vpop.f32.mrb[68].mxu0  ;;  %v2445_v31 = vpop.f32.mrb[76].mxu1  ;;  %v8565_v46 = vcombine.low %v3596_v45, %v3608_v15 }
 0x34b   : > { %v1957_v62 = vpop.f32.mrb[69].mxu0  ;;  %v2447_v56 = vpop.f32.mrb[77].mxu1 }
 0x34c   : > { %v1959_v60 = vpop.f32.mrb[70].mxu0  ;;  %v2449_v7 = vpop.f32.mrb[78].mxu1 }
 0x34d   : > { %v3076_v24 = vpack.c.bf16 %v1959_v60, %v1955_v61  ;;  %v3223_v8 = vpack.c.bf16 %v2449_v7, %v2445_v31  ;;  %v1961_v41 = vpop.f32.mrb[71].mxu0  ;;  %v2451_v30 = vpop.f32.mrb[79].mxu1 }
 0x34e   : > { %v3077_v37 = vpack.c.bf16 %v1961_v41, %v1957_v62  ;;  %v3224_v18 = vpack.c.bf16 %v2451_v30, %v2447_v56  ;;  %v9903_v30 = vld [vmem:[#allocation10_spill] sm:$0xff]  ;;  %v9904_v41 = vld [vmem:[#allocation11_spill] sm:$0xff] }
 0x34f   : > { %v8568_v10 = vadd.bf16 %v8565_v46, %v3076_v24  ;;  %v8571_v1 = vadd.bf16 %v9900_v5, %v3223_v8  ;;  %2224 = vmatmul.mubr.bf16.gmra.mrb[176].mxu0 %v8419_v32  ;;  %6717 = vmatmul.mubr.bf16.gmra.mrb[184].mxu1 %v8558_v50  ;;  %v3632_v45 = vrot.slane %v9903_v30, %v7825_v22  ;;  %v8594_v56 = vld [vmem:[%s9691_s5 + $0x168] sm:$0xff]   ;;  %v8599_v24 = vld [vmem:[%s9691_s5 + $0x170] sm:$0xff]  }
 0x350   : > { %v8576_v39 = vadd.bf16 %v8565_v46, %v3077_v37  ;;  %v8579_v15 = vadd.bf16 %v9900_v5, %v3224_v18  ;;  %2233 = vmatprep.mubr.bf16.mxu0 %v9796_v29  ;;  %6720 = vmatprep.mubr.bf16.mxu1 %v8563_v42  ;;  %v3620_v8 = vrot.slane %v9904_v41, %v7825_v22 }
 0x351   : > { %9901 = vst [vmem:[#allocation8_spill] sm:$0xff] %v8571_v1 }
 0x352   : > { %9902 = vst [vmem:[#allocation9_spill] sm:$0xff] %v8579_v15  ;;  %v1965_v61 = vpop.f32.mrb[72].mxu0  ;;  %v2455_v31 = vpop.f32.mrb[80].mxu1  ;;  %v8601_v30 = vcombine.low %v3620_v8, %v3632_v45 }
 0x353   : > { %v1967_v18 = vpop.f32.mrb[73].mxu0  ;;  %v2457_v62 = vpop.f32.mrb[81].mxu1 }
 0x354   : > { %v1969_v60 = vpop.f32.mrb[74].mxu0  ;;  %v2459_v7 = vpop.f32.mrb[82].mxu1  ;;  %9905 = vst [vmem:[#allocation10_spill] sm:$0xff] %v8601_v30 }
 0x355   : > { %v3079_v41 = vpack.c.bf16 %v1969_v60, %v1965_v61  ;;  %v3226_v37 = vpack.c.bf16 %v2459_v7, %v2455_v31  ;;  %v1971_v32 = vpop.f32.mrb[75].mxu0  ;;  %v2461_v1 = vpop.f32.mrb[83].mxu1 }
 0x356   : > { %v3080_v15 = vpack.c.bf16 %v1971_v32, %v1967_v18  ;;  %v3227_v5 = vpack.c.bf16 %v2461_v1, %v2457_v62  ;;  %v9911_v1 = vld [vmem:[#allocation12_spill] sm:$0xff]  ;;  %v9912_v32 = vld [vmem:[#allocation13_spill] sm:$0xff] }
 0x357   : > { %v8604_v9 = vadd.bf16 %v8601_v30, %v3079_v41  ;;  %v8607_v52 = vadd.bf16 %v9907_v26, %v3226_v37  ;;  %2234 = vmatmul.mubr.bf16.gmra.mrb[180].mxu0 %v8450_v21  ;;  %6721 = vmatmul.mubr.bf16.gmra.mrb[188].mxu1 %v8594_v56  ;;  %v3656_v8 = vrot.slane %v9911_v1, %v7825_v22  ;;  %v8630_v62 = vld [vmem:[%s9691_s5 + $0x178] sm:$0xff]   ;;  %v8635_v41 = vld [vmem:[%s9691_s5 + $0x180] sm:$0xff]  }
 0x358   : > { %v8612_v55 = vadd.bf16 %v8601_v30, %v3080_v15  ;;  %v8615_v45 = vadd.bf16 %v9907_v26, %v3227_v5  ;;  %2243 = vmatprep.mubr.bf16.mxu0 %v9796_v29  ;;  %6724 = vmatprep.mubr.bf16.mxu1 %v8599_v24  ;;  %v3644_v37 = vrot.slane %v9912_v32, %v7825_v22 }
 0x359   : > { %9906 = vst [vmem:[#allocation11_spill] sm:$0xff] %v8604_v9  ;;  %9908 = vst [vmem:[#allocation112_spill] sm:$0xff] %v8607_v52  ;;  %v9917_v9 = vld [vmem:[#allocation97_spill] sm:$0xff] }
 0x35a   : > { %9909 = vst [vmem:[#allocation113_spill] sm:$0xff] %v8612_v55  ;;  %9910 = vst [vmem:[#allocation114_spill] sm:$0xff] %v8615_v45  ;;  %v1975_v61 = vpop.f32.mrb[76].mxu0  ;;  %v2465_v31 = vpop.f32.mrb[84].mxu1  ;;  %v8637_v1 = vcombine.low %v3644_v37, %v3656_v8 }
 0x35b   : > { %v1977_v5 = vpop.f32.mrb[77].mxu0  ;;  %v2467_v18 = vpop.f32.mrb[85].mxu1  ;;  %9913 = vst [vmem:[#allocation12_spill] sm:$0xff] %v8630_v62  ;;  %9914 = vst [vmem:[#allocation13_spill] sm:$0xff] %v8635_v41 }
 0x35c   : > { %v1979_v60 = vpop.f32.mrb[78].mxu0  ;;  %v2469_v7 = vpop.f32.mrb[86].mxu1  ;;  %9915 = vst [vmem:[#allocation115_spill] sm:$0xff] %v8637_v1 }
 0x35d   : > { %v3082_v32 = vpack.c.bf16 %v1979_v60, %v1975_v61  ;;  %v3229_v15 = vpack.c.bf16 %v2469_v7, %v2465_v31  ;;  %v1981_v21 = vpop.f32.mrb[79].mxu0  ;;  %v2471_v52 = vpop.f32.mrb[87].mxu1 }
 0x35e   : > { %v3083_v45 = vpack.c.bf16 %v1981_v21, %v1977_v5  ;;  %v3230_v26 = vpack.c.bf16 %v2471_v52, %v2467_v18  ;;  %v9920_v52 = vld [vmem:[#allocation14_spill] sm:$0xff]  ;;  %v9921_v21 = vld [vmem:[#allocation15_spill] sm:$0xff] }
 0x35f   : > { %v8640_v51 = vadd.bf16 %v8637_v1, %v3082_v32  ;;  %v8643_v55 = vadd.bf16 %v9917_v9, %v3229_v15  ;;  %2244 = vmatmul.mubr.bf16.gmra.mrb[184].mxu0 %v8455_v13  ;;  %6725 = vmatmul.mubr.bf16.gmra.mrb[192].mxu1 %v8630_v62  ;;  %v3680_v37 = vrot.slane %v9920_v52, %v7825_v22  ;;  %v9924_v13 = vld [vmem:[#allocation98_spill] sm:$0xff] }
 0x360   : > { %v8648_v30 = vadd.bf16 %v8637_v1, %v3083_v45  ;;  %v8651_v8 = vadd.bf16 %v9917_v9, %v3230_v26  ;;  %2253 = vmatprep.mubr.bf16.mxu0 %v9796_v29  ;;  %6728 = vmatprep.mubr.bf16.mxu1 %v8635_v41  ;;  %v3668_v15 = vrot.slane %v9921_v21, %v7825_v22  ;;  %v6879_v45 = vld [vmem:[%s9691_s5 + $0x188] sm:$0xff]  }
 0x361   : > { %9916 = vst [vmem:[#allocation116_spill] sm:$0xff] %v8640_v51  ;;  %9918 = vst [vmem:[#allocation117_spill] sm:$0xff] %v8643_v55 }
 0x362   : > { %9919 = vst [vmem:[#allocation118_spill] sm:$0xff] %v8651_v8  ;;  %v1985_v61 = vpop.f32.mrb[80].mxu0  ;;  %v2475_v31 = vpop.f32.mrb[88].mxu1  ;;  %v8663_v7 = vcombine.low %v3668_v15, %v3680_v37 }
 0x363   : > { %v1987_v26 = vpop.f32.mrb[81].mxu0  ;;  %v2477_v5 = vpop.f32.mrb[89].mxu1 }
 0x364   : > { %v1989_v18 = vpop.f32.mrb[82].mxu0  ;;  %v2479_v60 = vpop.f32.mrb[90].mxu1  ;;  %9922 = vst [vmem:[#allocation14_spill] sm:$0xff] %v8663_v7 }
 0x365   : > { %v3085_v32 = vpack.c.bf16 %v1989_v18, %v1985_v61  ;;  %v3232_v9 = vpack.c.bf16 %v2479_v60, %v2475_v31  ;;  %v1991_v52 = vpop.f32.mrb[83].mxu0  ;;  %v2481_v41 = vpop.f32.mrb[91].mxu1 }
 0x366   : > { %v3086_v62 = vpack.c.bf16 %v1991_v52, %v1987_v26  ;;  %v3233_v21 = vpack.c.bf16 %v2481_v41, %v2477_v5  ;;  %v4896_v8 = vpop.permute.xlu1 %4895 }
 0x367   : > { %v8666_v1 = vadd.bf16 %v8663_v7, %v3085_v32  ;;  %v8669_v51 = vadd.bf16 %v9924_v13, %v3232_v9  ;;  %2254 = vmatmul.mubr.bf16.gmra.mrb[188].mxu0 %v8486_v20  ;;  %6729 = vmatmul.mubr.bf16.gmra.mrb[196].mxu1 %v6879_v45  ;;  %v9928_v9 = vld [vmem:[#allocation16_spill] sm:$0xff]  ;;  %v9929_v20 = vld [vmem:[#allocation17_spill] sm:$0xff] }
 0x368   : > { %v8676_v37 = vadd.bf16 %v8663_v7, %v3086_v62  ;;  %v8679_v15 = vadd.bf16 %v9924_v13, %v3233_v21  ;;  %2263 = vmatprep.mubr.bf16.mxu0 %v9796_v29  ;;  %6732 = vmatprep.mubr.bf16.mxu1 %v8053_v40  ;;  %v3704_v41 = vrot.slane %v9928_v9, %v7825_v22  ;;  %v9930_v62 = vld [vmem:[#allocation99_spill] sm:$0xff] }
 0x369   : > { %9923 = vst [vmem:[#allocation15_spill] sm:$0xff] %v8666_v1  ;;  %9925 = vst [vmem:[#allocation119_spill] sm:$0xff] %v8669_v51  ;;  %v3692_v61 = vrot.slane %v9929_v20, %v7825_v22  ;;  %v4884_v20 = vpop.permute.xlu0 %4883 }
 0x36a   : > { %9926 = vst [vmem:[#allocation120_spill] sm:$0xff] %v8676_v37  ;;  %9927 = vst [vmem:[#allocation121_spill] sm:$0xff] %v8679_v15  ;;  %v1995_v45 = vpop.f32.mrb[84].mxu0  ;;  %v2485_v26 = vpop.f32.mrb[92].mxu1 }
 0x36b   : > { %v1997_v5 = vpop.f32.mrb[85].mxu0  ;;  %v2487_v18 = vpop.f32.mrb[93].mxu1  ;;  %v8691_v52 = vcombine.low %v3692_v61, %v3704_v41  ;;  %v6880_v41 = vld [vmem:[%s9691_s5 + $0x198] sm:$0xff]  }
 0x36c   : > { %v1999_v60 = vpop.f32.mrb[86].mxu0  ;;  %v2489_v32 = vpop.f32.mrb[94].mxu1 }
 0x36d   : > { %v3088_v40 = vpack.c.bf16 %v1999_v60, %v1995_v45  ;;  %v3235_v21 = vpack.c.bf16 %v2489_v32, %v2485_v26  ;;  %v2001_v9 = vpop.f32.mrb[87].mxu0  ;;  %v2491_v55 = vpop.f32.mrb[95].mxu1  ;;  %v4892_v60 = vrot.slane %v4884_v20, %v7825_v22 }
 0x36e   : > { %v3089_v13 = vpack.c.bf16 %v2001_v9, %v1997_v5  ;;  %v3236_v7 = vpack.c.bf16 %v2491_v55, %v2487_v18  ;;  %v9933_v55 = vld [vmem:[#allocation18_spill] sm:$0xff]  ;;  %v4904_v18 = vrot.slane %v4896_v8, %v7825_v22 }
 0x36f   : > { %v8694_v31 = vadd.bf16 %v8691_v52, %v3088_v40  ;;  %v8697_v51 = vadd.bf16 %v9930_v62, %v3235_v21  ;;  %2264 = vmatmul.mubr.bf16.gmra.mrb[192].mxu0 %v8491_v63  ;;  %6733 = vmatmul.mubr.bf16.gmra.mrb[200].mxu1 %v6880_v41  ;;  %v3728_v26 = vrot.slane %v9933_v55, %v7825_v22  ;;  %v9934_v63 = vld [vmem:[#allocation19_spill] sm:$0xff] }
 0x370   : > { %v8704_v61 = vadd.bf16 %v8691_v52, %v3089_v13  ;;  %v8707_v45 = vadd.bf16 %v9930_v62, %v3236_v7  ;;  %2273 = vmatprep.mubr.bf16.mxu0 %v9796_v29  ;;  %6736 = vmatprep.mubr.bf16.mxu1 %v8097_v35  ;;  %v3716_v5 = vrot.slane %v9934_v63, %v7825_v22 }
 0x371   : > { %9931 = vst [vmem:[#allocation16_spill] sm:$0xff] %v8697_v51  ;;  %v8723_v62 = vcombine.low %v4892_v60, %v4904_v18 }
 0x372   : > { %9932 = vst [vmem:[#allocation17_spill] sm:$0xff] %v8707_v45  ;;  %v2005_v32 = vpop.f32.mrb[88].mxu0  ;;  %v2495_v40 = vpop.f32.mrb[96].mxu1  ;;  %v8721_v55 = vcombine.low %v3716_v5, %v3728_v26  ;;  %v6881_v26 = vld [vmem:[%s9691_s5 + $0x1a8] sm:$0xff]  }
 0x373   : > { %v2007_v21 = vpop.f32.mrb[89].mxu0  ;;  %v2497_v35 = vpop.f32.mrb[97].mxu1  ;;  %9935 = vst [vmem:[#allocation18_spill] sm:$0xff] %v8723_v62 }
 0x374   : > { %v2009_v9 = vpop.f32.mrb[90].mxu0  ;;  %v2499_v41 = vpop.f32.mrb[98].mxu1 }
 0x375   : > { %v3091_v63 = vpack.c.bf16 %v2009_v9, %v2005_v32  ;;  %v3238_v8 = vpack.c.bf16 %v2499_v41, %v2495_v40  ;;  %v2011_v15 = vpop.f32.mrb[91].mxu0  ;;  %v2501_v20 = vpop.f32.mrb[99].mxu1  ;;  %v9940_v32 = vld [vmem:[#allocation21_spill] sm:$0xff] }
 0x376   : > { %v3092_v1 = vpack.c.bf16 %v2011_v15, %v2007_v21  ;;  %v3239_v37 = vpack.c.bf16 %v2501_v20, %v2497_v35  ;;  %v6882_v15 = vld [vmem:[%s9691_s5 + $0x1b0] sm:$0xff]   ;;  %v3740_v40 = vrot.slane %v9940_v32, %v7825_v22 }
 0x377   : > { %v8726_v13 = vadd.bf16 %v8721_v55, %v3091_v63  ;;  %v8729_v7 = vadd.bf16 %v8723_v62, %v3238_v8  ;;  %2274 = vmatmul.mubr.bf16.gmra.mrb[196].mxu0 %v8522_v28  ;;  %6737 = vmatmul.mubr.bf16.gmra.mrb[204].mxu1 %v6881_v26  ;;  %v9939_v28 = vld [vmem:[#allocation20_spill] sm:$0xff] }
 0x378   : > { %v8736_v5 = vadd.bf16 %v8721_v55, %v3092_v1  ;;  %v8739_v18 = vadd.bf16 %v8723_v62, %v3239_v37  ;;  %2283 = vmatprep.mubr.bf16.mxu0 %v9796_v29  ;;  %6740 = vmatprep.mubr.bf16.mxu1 %v6882_v15  ;;  %v3752_v60 = vrot.slane %v9939_v28, %v7825_v22 }
 0x379   : > { %9936 = vst [vmem:[#allocation19_spill] sm:$0xff] %v8726_v13  ;;  %9937 = vst [vmem:[#allocation122_spill] sm:$0xff] %v8729_v7  ;;  %v6883_v7 = vld [vmem:[%s9691_s5 + $0x1b8] sm:$0xff]  }
 0x37a   : > { %9938 = vst [vmem:[#allocation123_spill] sm:$0xff] %v8739_v18  ;;  %v2015_v21 = vpop.f32.mrb[92].mxu0  ;;  %v6634_v35 = vpop.f32.mrb[100].mxu1  ;;  %v8753_v20 = vcombine.low %v3740_v40, %v3752_v60 }
 0x37b   : > { %v2017_v9 = vpop.f32.mrb[93].mxu0  ;;  %v2538_v41 = vpop.f32.mrb[101].mxu1 }
 0x37c   : > { %v2019_v63 = vpop.f32.mrb[94].mxu0  ;;  %v6635_v8 = vpop.f32.mrb[102].mxu1 }
 0x37d   : > { %v3094_v26 = vpack.c.bf16 %v2019_v63, %v2015_v21  ;;  %v3054_v15 = vpack.c.bf16 %v6635_v8, %v6634_v35  ;;  %v2021_v28 = vpop.f32.mrb[95].mxu0  ;;  %v2541_v51 = vpop.f32.mrb[103].mxu1  ;;  %v9942_v21 = vld [vmem:[#allocation23_spill] sm:$0xff]  ;;  %v9943_v63 = vmax.bf16 %v8301_v58, %v8295_v19 }
 0x37e   : > { %v3095_v32 = vpack.c.bf16 %v2021_v28, %v2017_v9  ;;  %v3051_v45 = vpack.c.bf16 %v2541_v51, %v2538_v41  ;;  %v6884_v51 = vld [vmem:[%s9691_s5 + $0x1c0] sm:$0xff]   ;;  %v3764_v35 = vrot.slane %v9942_v21, %v7825_v22  ;;  %v9944_v28 = vmax.bf16 %v8275_v34, %v8269_v3  ;;  %v6885_v3 = vld [vmem:[%s9691_s5 + $0x1c8] sm:$0xff]  }
 0x37f   : > { %v8756_v1 = vadd.bf16 %v8753_v20, %v3094_v26  ;;  %v5294_v37 = vadd.bf16 %v8292_v6, %v3054_v15  ;;  %2284 = vmatmul.mubr.bf16.gmra.mrb[200].mxu0 %v8527_v48  ;;  %6741 = vmatmul.mubr.bf16.gmra.mrb[208].mxu1 %v6883_v7  ;;  %v9941_v6 = vld [vmem:[#allocation22_spill] sm:$0xff] }
 0x380   : > { %v8764_v60 = vadd.bf16 %v8753_v20, %v3095_v32  ;;  %v5291_v40 = vadd.bf16 %v8266_v0, %v3051_v45  ;;  %2293 = vmatprep.mubr.bf16.mxu0 %v9796_v29  ;;  %6744 = vmatprep.mubr.bf16.mxu1 %v6884_v51  ;;  %v3776_v48 = vrot.slane %v9941_v6, %v7825_v22 }
 0x381   : > { %v5492_v7 = vsel %vm5482_vm3, %v5294_v37, 4286644096 }
 0x382   : > { %v5485_v0 = vsel %vm5482_vm3, %v5291_v40, 4286644096  ;;  %v2025_v45 = vpop.f32.mrb[96].mxu0  ;;  %v6638_v41 = vpop.f32.mrb[104].mxu1  ;;  %v5494_v8 = vmax.bf16 %v5492_v7, %v9943_v63  ;;  %v8785_v6 = vcombine.low %v3764_v35, %v3776_v48  ;;  %v9946_v35 = vld [vmem:[#allocation25_spill] sm:$0xff] }
 0x383   : > { %v2027_v26 = vpop.f32.mrb[97].mxu0  ;;  %v2554_v15 = vpop.f32.mrb[105].mxu1  ;;  %v5487_v32 = vmax.bf16 %v5485_v0, %v9944_v28  ;;  %v3788_v7 = vrot.slane %v9946_v35, %v7825_v22 }
 0x384   : > { %v6639_v51 = vpop.f32.mrb[106].mxu1  ;;  %5495 = vmax.xlane.bf16.xlu1 %v5494_v8  ;;  %v2029_v37 = vpop.f32.mrb[98].mxu0 }
 0x385   : > { %v3060_v21 = vpack.c.bf16 %v6639_v51, %v6638_v41  ;;  %v3097_v9 = vpack.c.bf16 %v2029_v37, %v2025_v45  ;;  %v2557_v40 = vpop.f32.mrb[107].mxu1  ;;  %5488 = vmax.xlane.bf16.xlu0 %v5487_v32  ;;  %v2031_v18 = vpop.f32.mrb[99].mxu0  ;;  %v9947_v45 = vmax.bf16 %v8361_v14, %v8355_v25 }
 0x386   : > { %v3057_v62 = vpack.c.bf16 %v2557_v40, %v2554_v15  ;;  %v3098_v13 = vpack.c.bf16 %v2031_v18, %v2027_v26  ;;  %v9945_v18 = vld [vmem:[#allocation24_spill] sm:$0xff]  ;;  %v9948_v26 = vmax.bf16 %v8330_v54, %v8324_v53  ;;  %v6887_v53 = vld [vmem:[%s9691_s5 + $0x1d8] sm:$0xff]  }
 0x387   : > { %v5300_v19 = vadd.bf16 %v8352_v16, %v3060_v21  ;;  %v8789_v58 = vadd.bf16 %v8785_v6, %v3097_v9  ;;  %2294 = vmatmul.mubr.bf16.gmra.mrb[204].mxu0 %v8558_v50  ;;  %6745 = vmatmul.mubr.bf16.gmra.mrb[212].mxu1 %v6885_v3  ;;  %v6886_v16 = vld [vmem:[%s9691_s5 + $0x1d0] sm:$0xff]   ;;  %v3800_v50 = vrot.slane %v9945_v18, %v7825_v22  ;;  %v9949_v18 = vld [vmem:[#allocation26_spill] sm:$0xff] }
 0x388   : > { %v5297_v34 = vadd.bf16 %v8321_v12, %v3057_v62  ;;  %v8797_v48 = vadd.bf16 %v8785_v6, %v3098_v13  ;;  %2303 = vmatprep.mubr.bf16.mxu0 %v9796_v29  ;;  %6748 = vmatprep.mubr.bf16.mxu1 %v6886_v16 }
 0x389   : > { %v5506_v9 = vsel %vm5482_vm3, %v5300_v19, 4286644096  ;;  %v8817_v51 = vcombine.low %v3788_v7, %v3800_v50  ;;  %v9950_v50 = vld [vmem:[#allocation27_spill] sm:$0xff] }
 0x38a   : > { %v5499_v12 = vsel %vm5482_vm3, %v5297_v34, 4286644096  ;;  %v5595_v62 = vmax.bf16 %v8797_v48, %v8789_v58  ;;  %v2035_v13 = vpop.f32.mrb[100].mxu0  ;;  %v6642_v0 = vpop.f32.mrb[108].mxu1  ;;  %v5508_v41 = vmax.bf16 %v5506_v9, %v9947_v45  ;;  %v3812_v35 = vrot.slane %v9950_v50, %v7825_v22 }
 0x38b   : > { %v2037_v63 = vpop.f32.mrb[101].mxu0  ;;  %v2570_v8 = vpop.f32.mrb[109].mxu1  ;;  %v5501_v15 = vmax.bf16 %v5499_v12, %v9948_v26 }
 0x38c   : > { %v6643_v28 = vpop.f32.mrb[110].mxu1  ;;  %5509 = vmax.xlane.bf16.xlu1 %v5508_v41  ;;  %v2039_v32 = vpop.f32.mrb[102].mxu0 }
 0x38d   : > { %v3066_v37 = vpack.c.bf16 %v6643_v28, %v6642_v0  ;;  %v3100_v21 = vpack.c.bf16 %v2039_v32, %v2035_v13  ;;  %v2573_v40 = vpop.f32.mrb[111].mxu1  ;;  %5502 = vmax.xlane.bf16.xlu0 %v5501_v15  ;;  %v2041_v19 = vpop.f32.mrb[103].mxu0  ;;  %v9951_v0 = vmax.bf16 %v8432_v47, %v8424_v33 }
 0x38e   : > { %v3063_v3 = vpack.c.bf16 %v2573_v40, %v2570_v8  ;;  %v3101_v34 = vpack.c.bf16 %v2041_v19, %v2037_v63  ;;  %v9952_v8 = vmax.bf16 %v8396_v2, %v8389_v38  ;;  %v6889_v38 = vld [vmem:[%s9691_s5 + $0x1e8] sm:$0xff]  }
 0x38f   : > { %v5306_v25 = vadd.bf16 %v8421_v23, %v3066_v37  ;;  %v8821_v14 = vadd.bf16 %v8817_v51, %v3100_v21  ;;  %2304 = vmatmul.mubr.bf16.gmra.mrb[208].mxu0 %v8563_v42  ;;  %6749 = vmatmul.mubr.bf16.gmra.mrb[216].mxu1 %v6887_v53  ;;  %v6888_v23 = vld [vmem:[%s9691_s5 + $0x1e0] sm:$0xff]   ;;  %v3824_v42 = vrot.slane %v9949_v18, %v7825_v22  ;;  %v9953_v53 = vld [vmem:[#allocation28_spill] sm:$0xff] }
 0x390   : > { %v5303_v54 = vadd.bf16 %v8386_v49, %v3063_v3  ;;  %v8829_v16 = vadd.bf16 %v8817_v51, %v3101_v34  ;;  %2313 = vmatprep.mubr.bf16.mxu0 %v9796_v29  ;;  %6752 = vmatprep.mubr.bf16.mxu1 %v6888_v23 }
 0x391   : > { %v5520_v7 = vsel %vm5482_vm3, %v5306_v25, 4286644096  ;;  %v8849_v32 = vcombine.low %v3812_v35, %v3824_v42 }
 0x392   : > { %v5513_v49 = vsel %vm5482_vm3, %v5303_v54, 4286644096  ;;  %v5602_v9 = vmax.bf16 %v8829_v16, %v8821_v14  ;;  %v2045_v12 = vpop.f32.mrb[104].mxu0  ;;  %v6646_v13 = vpop.f32.mrb[112].mxu1  ;;  %v5522_v45 = vmax.bf16 %v5520_v7, %v9951_v0  ;;  %v9954_v54 = vld [vmem:[#allocation29_spill] sm:$0xff]  ;;  %v9955_v7 = vmax.bf16 %v8504_v59, %v8496_v43 }
 0x393   : > { %v2047_v41 = vpop.f32.mrb[105].mxu0  ;;  %v2586_v63 = vpop.f32.mrb[113].mxu1  ;;  %v5515_v26 = vmax.bf16 %v5513_v49, %v9952_v8  ;;  %v3836_v23 = vrot.slane %v9954_v54, %v7825_v22  ;;  %v9956_v0 = vmax.bf16 %v8468_v36, %v8460_v11  ;;  %v6891_v36 = vld [vmem:[%s9691_s5 + $0x1f8] sm:$0xff]  }
 0x394   : > { %v6647_v15 = vpop.f32.mrb[114].mxu1  ;;  %5523 = vmax.xlane.bf16.xlu1 %v5522_v45  ;;  %v2049_v28 = vpop.f32.mrb[106].mxu0 }
 0x395   : > { %v3072_v37 = vpack.c.bf16 %v6647_v15, %v6646_v13  ;;  %v3103_v21 = vpack.c.bf16 %v2049_v28, %v2045_v12  ;;  %v2589_v40 = vpop.f32.mrb[115].mxu1  ;;  %5516 = vmax.xlane.bf16.xlu0 %v5515_v26  ;;  %v2051_v19 = vpop.f32.mrb[107].mxu0 }
 0x396   : > { %v3069_v3 = vpack.c.bf16 %v2589_v40, %v2586_v63  ;;  %v3104_v34 = vpack.c.bf16 %v2051_v19, %v2047_v41 }
 0x397   : > { %v5312_v47 = vadd.bf16 %v8493_v27, %v3072_v37  ;;  %v8853_v33 = vadd.bf16 %v8849_v32, %v3103_v21  ;;  %2314 = vmatmul.mubr.bf16.gmra.mrb[212].mxu0 %v8594_v56  ;;  %6753 = vmatmul.mubr.bf16.gmra.mrb[220].mxu1 %v6889_v38  ;;  %v6890_v27 = vld [vmem:[%s9691_s5 + $0x1f0] sm:$0xff]   ;;  %v3848_v56 = vrot.slane %v9953_v53, %v7825_v22 }
 0x398   : > { %v5309_v2 = vadd.bf16 %v8457_v4, %v3069_v3  ;;  %v8861_v25 = vadd.bf16 %v8849_v32, %v3104_v34  ;;  %2323 = vmatprep.mubr.bf16.mxu0 %v9796_v29  ;;  %6756 = vmatprep.mubr.bf16.mxu1 %v6890_v27  ;;  %v9957_v3 = vld [vmem:[#allocation30_spill] sm:$0xff]  ;;  %v9958_v34 = vld [vmem:[#allocation31_spill] sm:$0xff]  ;;  %v9959_v53 = vmax.bf16 %v8576_v39, %v8568_v10 }
 0x399   : > { %v5534_v18 = vsel %vm5482_vm3, %v5312_v47, 4286644096  ;;  %v8881_v8 = vcombine.low %v3836_v23, %v3848_v56  ;;  %v3860_v47 = vrot.slane %v9958_v34, %v7825_v22  ;;  %v9961_v10 = vld [vmem:[#allocation115_spill] sm:$0xff]  ;;  %v9966_v34 = vld [vmem:[#allocation116_spill] sm:$0xff] }
 0x39a   : > { %v5527_v4 = vsel %vm5482_vm3, %v5309_v2, 4286644096  ;;  %v5609_v42 = vmax.bf16 %v8861_v25, %v8853_v33  ;;  %v2055_v50 = vpop.f32.mrb[108].mxu0  ;;  %v6650_v35 = vpop.f32.mrb[116].mxu1  ;;  %v5536_v49 = vmax.bf16 %v5534_v18, %v9955_v7  ;;  %v9960_v18 = vmax.bf16 %v8540_v17, %v8532_v57  ;;  %v9963_v17 = vld [vmem:[#allocation10_spill] sm:$0xff] }
 0x39b   : > { %v2057_v12 = vpop.f32.mrb[109].mxu0  ;;  %v2602_v13 = vpop.f32.mrb[117].mxu1  ;;  %v5529_v45 = vmax.bf16 %v5527_v4, %v9956_v0  ;;  %v9988_v33 = vld [vmem:[#allocation42_spill] sm:$0xff] }
 0x39c   : > { %v6651_v41 = vpop.f32.mrb[118].mxu1  ;;  %5537 = vmax.xlane.bf16.xlu1 %v5536_v49  ;;  %v2059_v63 = vpop.f32.mrb[110].mxu0  ;;  %v4016_v25 = vrot.slane %v9988_v33, %v7825_v22 }
 0x39d   : > { %v3078_v26 = vpack.c.bf16 %v6651_v41, %v6650_v35  ;;  %v3106_v15 = vpack.c.bf16 %v2059_v63, %v2055_v50  ;;  %v2605_v28 = vpop.f32.mrb[119].mxu1  ;;  %5530 = vmax.xlane.bf16.xlu0 %v5529_v45  ;;  %v2061_v37 = vpop.f32.mrb[111].mxu0 }
 0x39e   : > { %v3075_v21 = vpack.c.bf16 %v2605_v28, %v2602_v13  ;;  %v3107_v40 = vpack.c.bf16 %v2061_v37, %v2057_v12  ;;  %v9964_v28 = vld [vmem:[#allocation32_spill] sm:$0xff] }
 0x39f   : > { %v5318_v59 = vadd.bf16 %v8565_v46, %v3078_v26  ;;  %v8885_v43 = vadd.bf16 %v8881_v8, %v3106_v15  ;;  %2324 = vmatmul.mubr.bf16.gmra.mrb[216].mxu0 %v8599_v24  ;;  %6757 = vmatmul.mubr.bf16.gmra.mrb[224].mxu1 %v6891_v36  ;;  %v3872_v46 = vrot.slane %v9957_v3, %v7825_v22  ;;  %v9962_v26 = vld [vmem:[#allocation12_spill] sm:$0xff] }
 0x3a0   : > { %v5315_v11 = vadd.bf16 %v8529_v44, %v3075_v21  ;;  %v8893_v19 = vadd.bf16 %v8881_v8, %v3107_v40  ;;  %2333 = vmatprep.mubr.bf16.mxu0 %v9796_v29  ;;  %v3896_v37 = vrot.slane %v9964_v28, %v7825_v22  ;;  %v9965_v21 = vld [vmem:[#allocation33_spill] sm:$0xff] }
 0x3a1   : > { %v5548_v24 = vsel %vm5482_vm3, %v5318_v59, 4286644096  ;;  %v8910_v7 = vcombine.low %v3860_v47, %v3872_v46  ;;  %v3884_v40 = vrot.slane %v9965_v21, %v7825_v22  ;;  %v9967_v47 = vmax.bf16 %v8648_v30, %v9966_v34 }
 0x3a2   : > { %v5541_v38 = vsel %vm5482_vm3, %v5315_v11, 4286644096  ;;  %v5616_v2 = vmax.bf16 %v8893_v19, %v8885_v43  ;;  %v2065_v27 = vpop.f32.mrb[112].mxu0  ;;  %v6654_v44 = vpop.f32.mrb[120].mxu1  ;;  %v5550_v56 = vmax.bf16 %v5548_v24, %v9959_v53 }
 0x3a3   : > { %v2067_v54 = vpop.f32.mrb[113].mxu0  ;;  %v2618_v23 = vpop.f32.mrb[121].mxu1  ;;  %v5543_v4 = vmax.bf16 %v5541_v38, %v9960_v18  ;;  %v8936_v18 = vcombine.low %v3884_v40, %v3896_v37 }
 0x3a4   : > { %v6655_v50 = vpop.f32.mrb[122].mxu1  ;;  %5551 = vmax.xlane.bf16.xlu1 %v5550_v56  ;;  %v2069_v35 = vpop.f32.mrb[114].mxu0 }
 0x3a5   : > { %v3084_v49 = vpack.c.bf16 %v6655_v50, %v6654_v44  ;;  %v3109_v12 = vpack.c.bf16 %v2069_v35, %v2065_v27  ;;  %v2621_v13 = vpop.f32.mrb[123].mxu1  ;;  %5544 = vmax.xlane.bf16.xlu0 %v5543_v4  ;;  %v2071_v0 = vpop.f32.mrb[115].mxu0  ;;  %v9968_v27 = vld [vmem:[#allocation113_spill] sm:$0xff]  ;;  %v9969_v44 = vld [vmem:[#allocation11_spill] sm:$0xff] }
 0x3a6   : > { %v3081_v45 = vpack.c.bf16 %v2621_v13, %v2618_v23  ;;  %v3110_v41 = vpack.c.bf16 %v2071_v0, %v2067_v54  ;;  %v9970_v53 = vmax.bf16 %v9968_v27, %v9969_v44 }
 0x3a7   : > { %v5324_v39 = vadd.bf16 %v9961_v10, %v3084_v49  ;;  %v8914_v63 = vadd.bf16 %v8910_v7, %v3109_v12  ;;  %2334 = vmatmul.mubr.bf16.gmra.mrb[220].mxu0 %v9962_v26  ;;  %v9973_v26 = vld [vmem:[#allocation34_spill] sm:$0xff] }
 0x3a8   : > { %v5321_v57 = vadd.bf16 %v9963_v17, %v3081_v45  ;;  %v8919_v15 = vadd.bf16 %v8910_v7, %v3110_v41  ;;  %2343 = vmatprep.mubr.bf16.mxu0 %v9796_v29  ;;  %v9971_v45 = vld [vmem:[#allocation13_spill] sm:$0xff]  ;;  %v9972_v41 = vld [vmem:[#allocation14_spill] sm:$0xff]  ;;  %v3920_v17 = vrot.slane %v9973_v26, %v7825_v22 }
 0x3a9   : > { %v5562_v59 = vsel %vm5482_vm3, %v5324_v39, 4286644096 }
 0x3aa   : > { %v5555_v36 = vsel %vm5482_vm3, %v5321_v57, 4286644096  ;;  %v5623_v11 = vmax.bf16 %v8919_v15, %v8914_v63  ;;  %v2075_v3 = vpop.f32.mrb[116].mxu0  ;;  %v6658_v46 = vpop.f32.mrb[124].mxu1  ;;  %v5564_v24 = vmax.bf16 %v5562_v59, %v9967_v47  ;;  %v9974_v57 = vld [vmem:[#allocation35_spill] sm:$0xff]  ;;  %v9976_v47 = vld [vmem:[#allocation120_spill] sm:$0xff] }
 0x3ab   : > { %v2077_v29 = vpop.f32.mrb[117].mxu0  ;;  %v2634_v38 = vpop.f32.mrb[125].mxu1  ;;  %v5557_v56 = vmax.bf16 %v5555_v36, %v9970_v53  ;;  %v3908_v28 = vrot.slane %v9974_v57, %v7825_v22  ;;  %v9975_v36 = vmax.bf16 %v8704_v61, %v8694_v31  ;;  %v9990_v63 = vld [vmem:[#allocation44_spill] sm:$0xff] }
 0x3ac   : > { %v6659_v54 = vpop.f32.mrb[126].mxu1  ;;  %5565 = vmax.xlane.bf16.xlu1 %v5564_v24  ;;  %v2079_v23 = vpop.f32.mrb[118].mxu0  ;;  %v9977_v24 = vld [vmem:[#allocation15_spill] sm:$0xff]  ;;  %v4040_v15 = vrot.slane %v9990_v63, %v7825_v22 }
 0x3ad   : > { %v3090_v4 = vpack.c.bf16 %v6659_v54, %v6658_v46  ;;  %v3112_v50 = vpack.c.bf16 %v2079_v23, %v2075_v3  ;;  %v2637_v35 = vpop.f32.mrb[127].mxu1  ;;  %5558 = vmax.xlane.bf16.xlu0 %v5557_v56  ;;  %v2081_v49 = vpop.f32.mrb[119].mxu0  ;;  %v8961_v53 = vcombine.low %v3908_v28, %v3920_v17 }
 0x3ae   : > { %v3087_v12 = vpack.c.bf16 %v2637_v35, %v2634_v38  ;;  %v3113_v13 = vpack.c.bf16 %v2081_v49, %v2077_v29  ;;  %v9978_v29 = vmax.bf16 %v9976_v47, %v9977_v24 }
 0x3af   : > { %v5330_v30 = vadd.bf16 %v8691_v52, %v3090_v4  ;;  %v8940_v0 = vadd.bf16 %v8936_v18, %v3112_v50  ;;  %2344 = vmatmul.mubr.bf16.gmra.mrb[224].mxu0 %v9971_v45  ;;  %v9980_v45 = vld [vmem:[#allocation37_spill] sm:$0xff] }
 0x3b0   : > { %v5327_v10 = vadd.bf16 %v9972_v41, %v3087_v12  ;;  %v8945_v39 = vadd.bf16 %v8936_v18, %v3113_v13  ;;  %v9979_v13 = vld [vmem:[#allocation36_spill] sm:$0xff]  ;;  %v3932_v41 = vrot.slane %v9980_v45, %v7825_v22 }
 0x3b1   : > { %v5576_v37 = vsel %vm5482_vm3, %v5330_v30, 4286644096  ;;  %v3944_v30 = vrot.slane %v9979_v13, %v7825_v22 }
 0x3b2   : > { %v5569_v52 = vsel %vm5482_vm3, %v5327_v10, 4286644096  ;;  %v5630_v21 = vmax.bf16 %v8945_v39, %v8940_v0  ;;  %v2085_v40 = vpop.f32.mrb[120].mxu0  ;;  %v6662_v59 = vpop.f32.mrb[128].mxu1  ;;  %v5578_v3 = vmax.bf16 %v5576_v37, %v9975_v36 }
 0x3b3   : > { %v2087_v46 = vpop.f32.mrb[121].mxu0  ;;  %v2650_v34 = vpop.f32.mrb[129].mxu1  ;;  %v5571_v38 = vmax.bf16 %v5569_v52, %v9978_v29 }
 0x3b4   : > { %v6663_v27 = vpop.f32.mrb[130].mxu1  ;;  %5579 = vmax.xlane.bf16.xlu1 %v5578_v3  ;;  %v2089_v44 = vpop.f32.mrb[122].mxu0 }
 0x3b5   : > { %v3096_v56 = vpack.c.bf16 %v6663_v27, %v6662_v59  ;;  %v3115_v54 = vpack.c.bf16 %v2089_v44, %v2085_v40  ;;  %v2653_v23 = vpop.f32.mrb[131].mxu1  ;;  %5572 = vmax.xlane.bf16.xlu0 %v5571_v38  ;;  %v2091_v4 = vpop.f32.mrb[123].mxu0  ;;  %v9982_v40 = vld [vmem:[#allocation19_spill] sm:$0xff] }
 0x3b6   : > { %v3093_v50 = vpack.c.bf16 %v2653_v23, %v2650_v34  ;;  %v3116_v35 = vpack.c.bf16 %v2091_v4, %v2087_v46  ;;  %v9983_v59 = vmax.bf16 %v8736_v5, %v9982_v40  ;;  %v8985_v34 = vcombine.low %v3932_v41, %v3944_v30  ;;  %v9985_v4 = vld [vmem:[#allocation39_spill] sm:$0xff] }
 0x3b7   : > { %v5336_v31 = vadd.bf16 %v8753_v20, %v3096_v56  ;;  %v8965_v61 = vadd.bf16 %v8961_v53, %v3115_v54  ;;  %v9984_v54 = vld [vmem:[#allocation38_spill] sm:$0xff] }
 0x3b8   : > { %v5333_v49 = vadd.bf16 %v8721_v55, %v3093_v50  ;;  %v8969_v12 = vadd.bf16 %v8961_v53, %v3116_v35  ;;  %v9981_v55 = vmax.bf16 %v8764_v60, %v8756_v1  ;;  %v3968_v23 = vrot.slane %v9984_v54, %v7825_v22 }
 0x3b9   : > { %v5590_v10 = vsel %vm5482_vm3, %v5336_v31, 4286644096  ;;  %v3956_v50 = vrot.slane %v9985_v4, %v7825_v22 }
 0x3ba   : > { %v5583_v26 = vsel %vm5482_vm3, %v5333_v49, 4286644096  ;;  %v5637_v20 = vmax.bf16 %v8969_v12, %v8965_v61  ;;  %v2095_v17 = vpop.f32.mrb[124].mxu0  ;;  %v6666_v57 = vpop.f32.mrb[132].mxu1  ;;  %v5592_v28 = vmax.bf16 %v5590_v10, %v9981_v55  ;;  %v9993_v12 = vld [vmem:[#allocation47_spill] sm:$0xff] }
 0x3bb   : > { %v2097_v37 = vpop.f32.mrb[125].mxu0  ;;  %v2666_v52 = vpop.f32.mrb[133].mxu1  ;;  %v5585_v36 = vmax.bf16 %v5583_v26, %v9983_v59  ;;  %v9987_v59 = vld [vmem:[#allocation41_spill] sm:$0xff] }
 0x3bc   : > { %v6667_v3 = vpop.f32.mrb[134].mxu1  ;;  %5593 = vmax.xlane.bf16.xlu1 %v5592_v28  ;;  %v2099_v46 = vpop.f32.mrb[126].mxu0 }
 0x3bd   : > { %v3102_v47 = vpack.c.bf16 %v6667_v3, %v6666_v57  ;;  %v3118_v24 = vpack.c.bf16 %v2099_v46, %v2095_v17  ;;  %v2669_v29 = vpop.f32.mrb[135].mxu1  ;;  %5586 = vmax.xlane.bf16.xlu0 %v5585_v36  ;;  %v2101_v38 = vpop.f32.mrb[127].mxu0  ;;  %v9009_v17 = vcombine.low %v3956_v50, %v3968_v23  ;;  %v3980_v36 = vrot.slane %v9987_v59, %v7825_v22 }
 0x3be   : > { %v3099_v27 = vpack.c.bf16 %v2669_v29, %v2666_v52  ;;  %v3119_v44 = vpack.c.bf16 %v2101_v38, %v2097_v37 }
 0x3bf   : > { %v5342_v1 = vadd.bf16 %v8817_v51, %v3102_v47  ;;  %v8989_v60 = vadd.bf16 %v8985_v34, %v3118_v24 }
 0x3c0   : > { %v5339_v5 = vadd.bf16 %v8785_v6, %v3099_v27  ;;  %v8993_v56 = vadd.bf16 %v8985_v34, %v3119_v44 }
 0x3c1   : > { %v5604_v35 = vsel %vm5482_vm3, %v5342_v1, 4286644096 }
 0x3c2   : > { %v5597_v31 = vsel %vm5482_vm3, %v5339_v5, 4286644096  ;;  %v5644_v51 = vmax.bf16 %v8993_v56, %v8989_v60  ;;  %v2105_v49 = vpop.f32.mrb[128].mxu0  ;;  %v6670_v13 = vpop.f32.mrb[136].mxu1  ;;  %v5606_v6 = vmax.bf16 %v5604_v35, %v5602_v9 }
 0x3c3   : > { %v2107_v30 = vpop.f32.mrb[129].mxu0  ;;  %v2682_v45 = vpop.f32.mrb[137].mxu1  ;;  %v5599_v41 = vmax.bf16 %v5597_v31, %v5595_v62  ;;  %v9986_v62 = vld [vmem:[#allocation40_spill] sm:$0xff] }
 0x3c4   : > { %v6671_v10 = vpop.f32.mrb[138].mxu1  ;;  %5607 = vmax.xlane.bf16.xlu1 %v5606_v6  ;;  %v2109_v26 = vpop.f32.mrb[130].mxu0  ;;  %v3992_v9 = vrot.slane %v9986_v62, %v7825_v22 }
 0x3c5   : > { %v3108_v57 = vpack.c.bf16 %v6671_v10, %v6670_v13  ;;  %v3121_v55 = vpack.c.bf16 %v2109_v26, %v2105_v49  ;;  %v2685_v28 = vpop.f32.mrb[139].mxu1  ;;  %5600 = vmax.xlane.bf16.xlu0 %v5599_v41  ;;  %v2111_v37 = vpop.f32.mrb[131].mxu0 }
 0x3c6   : > { %v3105_v52 = vpack.c.bf16 %v2685_v28, %v2682_v45  ;;  %v3122_v40 = vpack.c.bf16 %v2111_v37, %v2107_v30  ;;  %v6442_v5 = vcombine.low %v3980_v36, %v3992_v9 }
 0x3c7   : > { %v5348_v14 = vadd.bf16 %v8881_v8, %v3108_v57  ;;  %v9013_v16 = vadd.bf16 %v9009_v17, %v3121_v55 }
 0x3c8   : > { %v5345_v58 = vadd.bf16 %v8849_v32, %v3105_v52  ;;  %v9017_v48 = vadd.bf16 %v9009_v17, %v3122_v40 }
 0x3c9   : > { %v5618_v3 = vsel %vm5482_vm3, %v5348_v14, 4286644096 }
 0x3ca   : > { %v5611_v46 = vsel %vm5482_vm3, %v5345_v58, 4286644096  ;;  %v5651_v8 = vmax.bf16 %v9017_v48, %v9013_v16  ;;  %v2115_v47 = vpop.f32.mrb[132].mxu0  ;;  %v6674_v24 = vpop.f32.mrb[140].mxu1  ;;  %v5620_v32 = vmax.bf16 %v5618_v3, %v5616_v2  ;;  %v9995_v16 = vld [vmem:[#allocation49_spill] sm:$0xff] }
 0x3cb   : > { %v2117_v29 = vpop.f32.mrb[133].mxu0  ;;  %v2698_v38 = vpop.f32.mrb[141].mxu1  ;;  %v5613_v27 = vmax.bf16 %v5611_v46, %v5609_v42  ;;  %v9989_v42 = vld [vmem:[#allocation43_spill] sm:$0xff]  ;;  %v4076_v48 = vrot.slane %v9995_v16, %v7825_v22 }
 0x3cc   : > { %v6675_v44 = vpop.f32.mrb[142].mxu1  ;;  %5621 = vmax.xlane.bf16.xlu1 %v5620_v32  ;;  %v2119_v1 = vpop.f32.mrb[134].mxu0  ;;  %v4004_v13 = vrot.slane %v9989_v42, %v7825_v22 }
 0x3cd   : > { %v3114_v54 = vpack.c.bf16 %v6675_v44, %v6674_v24  ;;  %v3124_v23 = vpack.c.bf16 %v2119_v1, %v2115_v47  ;;  %v2701_v4 = vpop.f32.mrb[143].mxu1  ;;  %5614 = vmax.xlane.bf16.xlu0 %v5613_v27  ;;  %v2121_v50 = vpop.f32.mrb[135].mxu0 }
 0x3ce   : > { %v3111_v35 = vpack.c.bf16 %v2701_v4, %v2698_v38  ;;  %v3125_v31 = vpack.c.bf16 %v2121_v50, %v2117_v29  ;;  %v6443_v37 = vcombine.low %v4004_v13, %v4016_v25 }
 0x3cf   : > { %v5354_v43 = vadd.bf16 %v8936_v18, %v3114_v54  ;;  %v9034_v19 = vadd.bf16 %v6442_v5, %v3124_v23 }
 0x3d0   : > { %v5351_v2 = vadd.bf16 %v8910_v7, %v3111_v35  ;;  %v5365_v49 = vadd.bf16 %v6442_v5, %v3125_v31 }
 0x3d1   : > { %v5632_v6 = vsel %vm5482_vm3, %v5354_v43, 4286644096 }
 0x3d2   : > { %v5625_v30 = vsel %vm5482_vm3, %v5351_v2, 4286644096  ;;  %v5658_v45 = vmax.bf16 %v5365_v49, %v9034_v19  ;;  %v2125_v41 = vpop.f32.mrb[136].mxu0  ;;  %v6678_v10 = vpop.f32.mrb[144].mxu1  ;;  %v5634_v18 = vmax.bf16 %v5632_v6, %v5630_v21  ;;  %v9992_v19 = vld [vmem:[#allocation46_spill] sm:$0xff] }
 0x3d3   : > { %v2127_v7 = vpop.f32.mrb[137].mxu0  ;;  %v2714_v26 = vpop.f32.mrb[145].mxu1  ;;  %v5627_v57 = vmax.bf16 %v5625_v30, %v5623_v11  ;;  %v9991_v11 = vld [vmem:[#allocation45_spill] sm:$0xff]  ;;  %v4064_v61 = vrot.slane %v9992_v19, %v7825_v22 }
 0x3d4   : > { %v6679_v55 = vpop.f32.mrb[146].mxu1  ;;  %5635 = vmax.xlane.bf16.xlu1 %v5634_v18  ;;  %v2129_v28 = vpop.f32.mrb[138].mxu0  ;;  %v4028_v36 = vrot.slane %v9991_v11, %v7825_v22 }
 0x3d5   : > { %v3120_v52 = vpack.c.bf16 %v6679_v55, %v6678_v10  ;;  %v3127_v40 = vpack.c.bf16 %v2129_v28, %v2125_v41  ;;  %v2717_v14 = vpop.f32.mrb[147].mxu1  ;;  %5628 = vmax.xlane.bf16.xlu0 %v5627_v57  ;;  %v2131_v58 = vpop.f32.mrb[139].mxu0 }
 0x3d6   : > { %v3117_v62 = vpack.c.bf16 %v2717_v14, %v2714_v26  ;;  %v3128_v9 = vpack.c.bf16 %v2131_v58, %v2127_v7  ;;  %v6444_v1 = vcombine.low %v4028_v36, %v4040_v15  ;;  %v9994_v58 = vld [vmem:[#allocation48_spill] sm:$0xff] }
 0x3d7   : > { %v5360_v0 = vadd.bf16 %v8985_v34, %v3120_v52  ;;  %v9051_v39 = vadd.bf16 %v6443_v37, %v3127_v40 }
 0x3d8   : > { %v5357_v21 = vadd.bf16 %v8961_v53, %v3117_v62  ;;  %v9054_v59 = vadd.bf16 %v6443_v37, %v3128_v9  ;;  %v4088_v62 = vrot.slane %v9994_v58, %v7825_v22 }
 0x3d9   : > { %v5646_v3 = vsel %vm5482_vm3, %v5360_v0, 4286644096 }
 0x3da   : > { %v5639_v46 = vsel %vm5482_vm3, %v5357_v21, 4286644096  ;;  %v5665_v47 = vmax.bf16 %v9054_v59, %v9051_v39  ;;  %v2135_v34 = vpop.f32.mrb[140].mxu0  ;;  %v6682_v24 = vpop.f32.mrb[148].mxu1  ;;  %v5648_v53 = vmax.bf16 %v5646_v3, %v5644_v51  ;;  %v6446_v3 = vcombine.low %v4076_v48, %v4088_v62 }
 0x3db   : > { %v2137_v32 = vpop.f32.mrb[141].mxu0  ;;  %v2730_v29 = vpop.f32.mrb[149].mxu1  ;;  %v5641_v38 = vmax.bf16 %v5639_v46, %v5637_v20  ;;  %v4052_v20 = vrot.slane %v9993_v12, %v7825_v22 }
 0x3dc   : > { %v6683_v27 = vpop.f32.mrb[150].mxu1  ;;  %5649 = vmax.xlane.bf16.xlu1 %v5648_v53  ;;  %v2139_v44 = vpop.f32.mrb[142].mxu0 }
 0x3dd   : > { %v3126_v54 = vpack.c.bf16 %v6683_v27, %v6682_v24  ;;  %v3130_v23 = vpack.c.bf16 %v2139_v44, %v2135_v34  ;;  %v2733_v4 = vpop.f32.mrb[151].mxu1  ;;  %5642 = vmax.xlane.bf16.xlu0 %v5641_v38  ;;  %v2141_v50 = vpop.f32.mrb[143].mxu0  ;;  %v6445_v10 = vcombine.low %v4052_v20, %v4064_v61 }
 0x3de   : > { %v3123_v35 = vpack.c.bf16 %v2733_v4, %v2730_v29  ;;  %v3131_v31 = vpack.c.bf16 %v2141_v50, %v2137_v32 }
 0x3df   : > { %v5366_v43 = vadd.bf16 %v6442_v5, %v3126_v54  ;;  %v5370_v60 = vadd.bf16 %v6444_v1, %v3130_v23  ;;  %v9996_v54 = vld [vmem:[#allocation50_spill] sm:$0xff] }
 0x3e0   : > { %v5363_v56 = vadd.bf16 %v9009_v17, %v3123_v35  ;;  %v5371_v51 = vadd.bf16 %v6444_v1, %v3131_v31  ;;  %v4112_v23 = vrot.slane %v9996_v54, %v7825_v22 }
 0x3e1   : > { %v5660_v2 = vsel %vm5482_vm3, %v5366_v43, 4286644096 }
 0x3e2   : > { %v5653_v49 = vsel %vm5482_vm3, %v5363_v56, 4286644096  ;;  %v5672_v33 = vmax.bf16 %v5371_v51, %v5370_v60  ;;  %v2145_v25 = vpop.f32.mrb[144].mxu0  ;;  %v6686_v42 = vpop.f32.mrb[152].mxu1  ;;  %v5662_v13 = vmax.bf16 %v5660_v2, %v5658_v45 }
 0x3e3   : > { %v2147_v6 = vpop.f32.mrb[145].mxu0  ;;  %v2746_v5 = vpop.f32.mrb[153].mxu1  ;;  %v5655_v17 = vmax.bf16 %v5653_v49, %v5651_v8 }
 0x3e4   : > { %v6687_v30 = vpop.f32.mrb[154].mxu1  ;;  %5663 = vmax.xlane.bf16.xlu1 %v5662_v13  ;;  %v2149_v41 = vpop.f32.mrb[146].mxu0 }
 0x3e5   : > { %v3132_v18 = vpack.c.bf16 %v6687_v30, %v6686_v42  ;;  %v3133_v7 = vpack.c.bf16 %v2149_v41, %v2145_v25  ;;  %v2749_v26 = vpop.f32.mrb[155].mxu1  ;;  %5656 = vmax.xlane.bf16.xlu0 %v5655_v17  ;;  %v2151_v57 = vpop.f32.mrb[147].mxu0  ;;  %v9998_v41 = vld [vmem:[#allocation52_spill] sm:$0xff] }
 0x3e6   : > { %v3129_v55 = vpack.c.bf16 %v2749_v26, %v2746_v5  ;;  %v3134_v28 = vpack.c.bf16 %v2151_v57, %v2147_v6 }
 0x3e7   : > { %v5372_v52 = vadd.bf16 %v6444_v1, %v3132_v18  ;;  %v5373_v40 = vadd.bf16 %v6445_v10, %v3133_v7  ;;  %v9999_v18 = vld [vmem:[#allocation53_spill] sm:$0xff] }
 0x3e8   : > { %v5369_v45 = vadd.bf16 %v6443_v37, %v3129_v55  ;;  %v5374_v14 = vadd.bf16 %v6445_v10, %v3134_v28  ;;  %v4124_v7 = vrot.slane %v9999_v18, %v7825_v22 }
 0x3e9   : > { %v5674_v8 = vsel %vm5482_vm3, %v5372_v52, 4286644096 }
 0x3ea   : > { %v5667_v9 = vsel %vm5482_vm3, %v5369_v45, 4286644096  ;;  %v5679_v0 = vmax.bf16 %v5374_v14, %v5373_v40  ;;  %v2155_v39 = vpop.f32.mrb[148].mxu0  ;;  %v6690_v21 = vpop.f32.mrb[156].mxu1  ;;  %v5676_v59 = vmax.bf16 %v5674_v8, %v5672_v33 }
 0x3eb   : > { %v2157_v63 = vpop.f32.mrb[149].mxu0  ;;  %v2762_v15 = vpop.f32.mrb[157].mxu1  ;;  %v5669_v11 = vmax.bf16 %v5667_v9, %v5665_v47  ;;  %v9997_v47 = vld [vmem:[#allocation51_spill] sm:$0xff] }
 0x3ec   : > { %v6691_v36 = vpop.f32.mrb[158].mxu1  ;;  %5677 = vmax.xlane.bf16.xlu1 %v5676_v59  ;;  %v2159_v37 = vpop.f32.mrb[150].mxu0  ;;  %v4100_v4 = vrot.slane %v9997_v47, %v7825_v22 }
 0x3ed   : > { %v3138_v46 = vpack.c.bf16 %v6691_v36, %v6690_v21  ;;  %v3136_v34 = vpack.c.bf16 %v2159_v37, %v2155_v39  ;;  %v2765_v24 = vpop.f32.mrb[159].mxu1  ;;  %5670 = vmax.xlane.bf16.xlu0 %v5669_v11  ;;  %v2161_v53 = vpop.f32.mrb[151].mxu0  ;;  %v10001_v36 = vld [vmem:[#allocation55_spill] sm:$0xff] }
 0x3ee   : > { %v3135_v32 = vpack.c.bf16 %v2765_v24, %v2762_v15  ;;  %v3137_v29 = vpack.c.bf16 %v2161_v53, %v2157_v63  ;;  %v6447_v2 = vcombine.low %v4100_v4, %v4112_v23  ;;  %v10000_v15 = vld [vmem:[#allocation54_spill] sm:$0xff]  ;;  %v4148_v37 = vrot.slane %v10001_v36, %v7825_v22 }
 0x3ef   : > { %v5378_v38 = vadd.bf16 %v6446_v3, %v3138_v46  ;;  %v5376_v27 = vadd.bf16 %v6446_v3, %v3136_v34  ;;  %v4160_v11 = vrot.slane %v10000_v15, %v7825_v22 }
 0x3f0   : > { %v5375_v44 = vadd.bf16 %v6445_v10, %v3135_v32  ;;  %v5377_v1 = vadd.bf16 %v6446_v3, %v3137_v29  ;;  %v4136_v10 = vrot.slane %v9998_v41, %v7825_v22 }
 0x3f1   : > { %v5688_v60 = vsel %vm5482_vm3, %v5378_v38, 4286644096 }
 0x3f2   : > { %v5681_v50 = vsel %vm5482_vm3, %v5375_v44, 4286644096  ;;  %v5686_v35 = vmax.bf16 %v5377_v1, %v5376_v27  ;;  %v2165_v31 = vpop.f32.mrb[152].mxu0  ;;  %v6694_v43 = vpop.f32.mrb[160].mxu1  ;;  %v6448_v62 = vcombine.low %v4124_v7, %v4136_v10  ;;  %v6449_v44 = vcombine.low %v4148_v37, %v4160_v11 }
 0x3f3   : > { %v2167_v56 = vpop.f32.mrb[153].mxu0  ;;  %v2778_v51 = vpop.f32.mrb[161].mxu1  ;;  %v5683_v19 = vmax.bf16 %v5681_v50, %v5679_v0 }
 0x3f4   : > { %v2169_v61 = vpop.f32.mrb[154].mxu0  ;;  %v6695_v12 = vpop.f32.mrb[162].mxu1  ;;  %v5690_v20 = vmax.bf16 %v5688_v60, %v5686_v35  ;;  %v10002_v60 = vld [vmem:[#allocation56_spill] sm:$0xff] }
 0x3f5   : > { %v3139_v49 = vpack.c.bf16 %v2169_v61, %v2165_v31  ;;  %v3144_v33 = vpack.c.bf16 %v6695_v12, %v6694_v43  ;;  %v2781_v25 = vpop.f32.mrb[163].mxu1  ;;  %5684 = vmax.xlane.bf16.xlu0 %v5683_v19  ;;  %v2171_v42 = vpop.f32.mrb[155].mxu0 }
 0x3f6   : > { %v3141_v13 = vpack.c.bf16 %v2781_v25, %v2778_v51  ;;  %v3140_v6 = vpack.c.bf16 %v2171_v42, %v2167_v56  ;;  %5691 = vmax.xlane.bf16.xlu1 %v5690_v20  ;;  %v4184_v56 = vrot.slane %v10002_v60, %v7825_v22  ;;  %v10003_v51 = vld [vmem:[#allocation57_spill] sm:$0xff] }
 0x3f7   : > { %v5379_v5 = vadd.bf16 %v6447_v2, %v3139_v49  ;;  %v5384_v21 = vadd.bf16 %v6448_v62, %v3144_v33  ;;  %v4172_v19 = vrot.slane %v10003_v51, %v7825_v22 }
 0x3f8   : > { %v5381_v17 = vadd.bf16 %v6447_v2, %v3141_v13  ;;  %v5380_v30 = vadd.bf16 %v6447_v2, %v3140_v6 }
 0x3f9   : > { %v5702_v24 = vsel %vm5482_vm3, %v5384_v21, 4286644096  ;;  %v6450_v6 = vcombine.low %v4172_v19, %v4184_v56 }
 0x3fa   : > { %v5695_v26 = vsel %vm5482_vm3, %v5381_v17, 4286644096  ;;  %v5693_v57 = vmax.bf16 %v5380_v30, %v5379_v5  ;;  %v2175_v55 = vpop.f32.mrb[156].mxu0  ;;  %v6698_v28 = vpop.f32.mrb[164].mxu1 }
 0x3fb   : > { %v2177_v52 = vpop.f32.mrb[157].mxu0  ;;  %v2794_v40 = vpop.f32.mrb[165].mxu1 }
 0x3fc   : > { %v2179_v45 = vpop.f32.mrb[158].mxu0  ;;  %v6699_v14 = vpop.f32.mrb[166].mxu1  ;;  %v5697_v58 = vmax.bf16 %v5695_v26, %v5693_v57 }
 0x3fd   : > { %v3142_v16 = vpack.c.bf16 %v2179_v45, %v2175_v55  ;;  %v3150_v48 = vpack.c.bf16 %v6699_v14, %v6698_v28  ;;  %v2181_v8 = vpop.f32.mrb[159].mxu0  ;;  %v2797_v9 = vpop.f32.mrb[167].mxu1  ;;  %v10004_v55 = vld [vmem:[#allocation58_spill] sm:$0xff] }
 0x3fe   : > { %v3143_v0 = vpack.c.bf16 %v2181_v8, %v2177_v52  ;;  %v3147_v39 = vpack.c.bf16 %v2797_v9, %v2794_v40  ;;  %5698 = vmax.xlane.bf16.xlu0 %v5697_v58  ;;  %v4208_v28 = vrot.slane %v10004_v55, %v7825_v22  ;;  %v10005_v52 = vld [vmem:[#allocation59_spill] sm:$0xff] }
 0x3ff   : > { %v5382_v59 = vadd.bf16 %v6448_v62, %v3142_v16  ;;  %v5390_v7 = vadd.bf16 %v6450_v6, %v3150_v48  ;;  %v4196_v40 = vrot.slane %v10005_v52, %v7825_v22 }
 0x400   : > { %v5383_v63 = vadd.bf16 %v6448_v62, %v3143_v0  ;;  %v5387_v35 = vadd.bf16 %v6449_v44, %v3147_v39 }
 0x401   : > { %v5716_v62 = vsel %vm5482_vm3, %v5390_v7, 4286644096  ;;  %v6451_v39 = vcombine.low %v4196_v40, %v4208_v28  ;;  %v10008_v40 = vld [vmem:[#allocation62_spill] sm:$0xff] }
 0x402   : > { %v5700_v3 = vmax.bf16 %v5383_v63, %v5382_v59  ;;  %v2185_v46 = vpop.f32.mrb[160].mxu0  ;;  %v9101_v34 = vpop.f32.mrb[168].mxu1  ;;  %v5709_v2 = vsel %vm5482_vm3, %v5387_v35, 4286644096 }
 0x403   : > { %v2187_v53 = vpop.f32.mrb[161].mxu0  ;;  %v9104_v32 = vpop.f32.mrb[169].mxu1 }
 0x404   : > { %v2189_v29 = vpop.f32.mrb[162].mxu0  ;;  %v9106_v38 = vpop.f32.mrb[170].mxu1  ;;  %v5704_v27 = vmax.bf16 %v5702_v24, %v5700_v3 }
 0x405   : > { %v3145_v1 = vpack.c.bf16 %v2189_v29, %v2185_v46  ;;  %v3156_v54 = vpack.c.bf16 %v9106_v38, %v9101_v34  ;;  %v2191_v23 = vpop.f32.mrb[163].mxu0  ;;  %v2813_v47 = vpop.f32.mrb[171].mxu1 }
 0x406   : > { %v3146_v4 = vpack.c.bf16 %v2191_v23, %v2187_v53  ;;  %v3153_v50 = vpack.c.bf16 %v2813_v47, %v9104_v32  ;;  %5705 = vmax.xlane.bf16.xlu1 %v5704_v27  ;;  %v10007_v23 = vld [vmem:[#allocation61_spill] sm:$0xff] }
 0x407   : > { %v5385_v31 = vadd.bf16 %v6449_v44, %v3145_v1  ;;  %v4220_v47 = vrot.slane %v10007_v23, %v7825_v22 }
 0x408   : > { %v5386_v43 = vadd.bf16 %v6449_v44, %v3146_v4  ;;  %v5393_v29 = vadd.bf16 %v6451_v39, %v3153_v50  ;;  %v10006_v44 = vld [vmem:[#allocation60_spill] sm:$0xff] }
 0x409   : > { %v4232_v1 = vrot.slane %v10006_v44, %v7825_v22 }
 0x40a   : > { %v5707_v61 = vmax.bf16 %v5386_v43, %v5385_v31  ;;  %v2195_v12 = vpop.f32.mrb[164].mxu0  ;;  %v9115_v20 = vpop.f32.mrb[172].mxu1  ;;  %v5723_v56 = vsel %vm5482_vm3, %v5393_v29, 4286644096 }
 0x40b   : > { %v2197_v49 = vpop.f32.mrb[165].mxu0  ;;  %v9118_v33 = vpop.f32.mrb[173].mxu1 }
 0x40c   : > { %v2199_v25 = vpop.f32.mrb[166].mxu0  ;;  %v9120_v42 = vpop.f32.mrb[174].mxu1  ;;  %v5711_v13 = vmax.bf16 %v5709_v2, %v5707_v61  ;;  %v6452_v61 = vcombine.low %v4220_v47, %v4232_v1 }
 0x40d   : > { %v3148_v5 = vpack.c.bf16 %v2199_v25, %v2195_v12  ;;  %v3162_v17 = vpack.c.bf16 %v9120_v42, %v9115_v20  ;;  %v2201_v30 = vpop.f32.mrb[167].mxu0  ;;  %v9124_v41 = vpop.f32.mrb[175].mxu1 }
 0x40e   : > { %v3149_v10 = vpack.c.bf16 %v2201_v30, %v2197_v49  ;;  %v3159_v18 = vpack.c.bf16 %v9124_v41, %v9118_v33  ;;  %5712 = vmax.xlane.bf16.xlu0 %v5711_v13  ;;  %v5396_v28 = vadd.bf16 %v6452_v61, %v3156_v54 }
 0x40f   : > { %v5388_v26 = vadd.bf16 %v6450_v6, %v3148_v5 }
 0x410   : > { %v5389_v57 = vadd.bf16 %v6450_v6, %v3149_v10 }
 0x412   : > { %v5714_v45 = vmax.bf16 %v5389_v57, %v5388_v26  ;;  %v2205_v14 = vpop.f32.mrb[168].mxu0  ;;  %v9133_v58 = vpop.f32.mrb[176].mxu1 }
 0x413   : > { %v2207_v16 = vpop.f32.mrb[169].mxu0  ;;  %v9136_v8 = vpop.f32.mrb[177].mxu1 }
 0x414   : > { %v2209_v9 = vpop.f32.mrb[170].mxu0  ;;  %v9138_v48 = vpop.f32.mrb[178].mxu1  ;;  %v5718_v0 = vmax.bf16 %v5716_v62, %v5714_v45  ;;  %v4256_v45 = vrot.slane %v10008_v40, %v7825_v22 }
 0x415   : > { %v3151_v21 = vpack.c.bf16 %v2209_v9, %v2205_v14  ;;  %v3168_v59 = vpack.c.bf16 %v9138_v48, %v9133_v58  ;;  %v9147_v63 = vpop.f32.mrb[179].mxu1  ;;  %v5496_v15 = vpop.xlane.xlu1 %5495  ;;  %v10009_v14 = vld [vmem:[#allocation63_spill] sm:$0xff] }
 0x416   : > { %v3165_v11 = vpack.c.bf16 %v9147_v63, %v9136_v8  ;;  %v5933_v36 = vunpack.c.l.bf16 %v5496_v15  ;;  %v5934_v37 = vunpack.c.h.bf16 %v5496_v15  ;;  %v2211_v3 = vpop.f32.mrb[171].mxu0  ;;  %v5489_v46 = vpop.xlane.xlu0 %5488  ;;  %5719 = vmax.xlane.bf16.xlu1 %v5718_v0  ;;  %v4244_v62 = vrot.slane %v10009_v14, %v7825_v22 }
 0x417   : > { %v5391_v24 = vadd.bf16 %v6451_v39, %v3151_v21  ;;  %v3152_v53 = vpack.c.bf16 %v2211_v3, %v2207_v16  ;;  %v5931_v32 = vunpack.c.l.bf16 %v5489_v46  ;;  %v5932_v27 = vunpack.c.h.bf16 %v5489_v46 }
 0x418   : > { %6062 = vst.msk [vmem:[%s9143_s15 + $0x10] sm:$0xff] %vm6059_vm4, %v5933_v36  ;;  %6063 = vst.msk [vmem:[%s9143_s15 + $0x18] sm:$0xff] %vm6059_vm4, %v5934_v37  ;;  %v6453_v36 = vcombine.low %v4244_v62, %v4256_v45 }
 0x419   : > { %v5392_v4 = vadd.bf16 %v6451_v39, %v3152_v53  ;;  %6060 = vst.msk [vmem:[%s9143_s15] sm:$0xff] %vm6059_vm4, %v5931_v32  ;;  %6061 = vst.msk [vmem:[%s9143_s15 + $0x8] sm:$0xff] %vm6059_vm4, %v5932_v27  ;;  %v5730_v39 = vsel %vm5482_vm3, %v5396_v28, 4286644096 }
 0x41a   : > { %v2215_v35 = vpop.f32.mrb[172].mxu0  ;;  %v9163_v31 = vpop.f32.mrb[180].mxu1 }
 0x41b   : > { %v5721_v50 = vmax.bf16 %v5392_v4, %v5391_v24  ;;  %v2217_v43 = vpop.f32.mrb[173].mxu0  ;;  %v9165_v60 = vpop.f32.mrb[181].mxu1 }
 0x41c   : > { %v2219_v51 = vpop.f32.mrb[174].mxu0  ;;  %v9168_v19 = vpop.f32.mrb[182].mxu1 }
 0x41d   : > { %v3154_v12 = vpack.c.bf16 %v2219_v51, %v2215_v35  ;;  %v3174_v2 = vpack.c.bf16 %v9168_v19, %v9163_v31  ;;  %v9172_v49 = vpop.f32.mrb[183].mxu1  ;;  %v5510_v25 = vpop.xlane.xlu1 %5509  ;;  %v5725_v13 = vmax.bf16 %v5723_v56, %v5721_v50  ;;  %v5399_v35 = vadd.bf16 %v6453_v36, %v3159_v18  ;;  %v10011_v51 = vld [vmem:[#allocation65_spill] sm:$0xff] }
 0x41e   : > { %v3171_v6 = vpack.c.bf16 %v9172_v49, %v9165_v60  ;;  %v5937_v5 = vunpack.c.l.bf16 %v5510_v25  ;;  %v5938_v30 = vunpack.c.h.bf16 %v5510_v25  ;;  %v2221_v10 = vpop.f32.mrb[175].mxu0  ;;  %v5503_v7 = vpop.xlane.xlu0 %5502 }
 0x41f   : > { %v5394_v26 = vadd.bf16 %v6452_v61, %v3154_v12  ;;  %v3155_v57 = vpack.c.bf16 %v2221_v10, %v2217_v43  ;;  %v5935_v55 = vunpack.c.l.bf16 %v5503_v7  ;;  %5726 = vmax.xlane.bf16.xlu0 %v5725_v13  ;;  %v5936_v52 = vunpack.c.h.bf16 %v5503_v7  ;;  %v10010_v43 = vld [vmem:[#allocation64_spill] sm:$0xff] }
 0x420   : > { %6066 = vst.msk [vmem:[%s9143_s15 + $0x30] sm:$0xff] %vm6059_vm4, %v5937_v5  ;;  %6067 = vst.msk [vmem:[%s9143_s15 + $0x38] sm:$0xff] %vm6059_vm4, %v5938_v30  ;;  %v4280_v56 = vrot.slane %v10010_v43, %v7825_v22  ;;  %v5737_v5 = vsel %vm5482_vm3, %v5399_v35, 4286644096 }
 0x421   : > { %v5395_v16 = vadd.bf16 %v6452_v61, %v3155_v57  ;;  %6064 = vst.msk [vmem:[%s9143_s15 + $0x20] sm:$0xff] %vm6059_vm4, %v5935_v55  ;;  %6065 = vst.msk [vmem:[%s9143_s15 + $0x28] sm:$0xff] %vm6059_vm4, %v5936_v52  ;;  %v4268_v61 = vrot.slane %v10011_v51, %v7825_v22 }
 0x422   : > { %v2225_v9 = vpop.f32.mrb[176].mxu0  ;;  %v9191_v0 = vpop.f32.mrb[184].mxu1 }
 0x423   : > { %v5728_v34 = vmax.bf16 %v5395_v16, %v5394_v26  ;;  %v2227_v38 = vpop.f32.mrb[177].mxu0  ;;  %v9193_v54 = vpop.f32.mrb[185].mxu1  ;;  %v6454_v7 = vcombine.low %v4268_v61, %v4280_v56 }
 0x424   : > { %v2229_v21 = vpop.f32.mrb[178].mxu0  ;;  %v9196_v15 = vpop.f32.mrb[186].mxu1 }
 0x425   : > { %v3157_v37 = vpack.c.bf16 %v2229_v21, %v2225_v9  ;;  %v3180_v3 = vpack.c.bf16 %v9196_v15, %v9191_v0  ;;  %v9200_v46 = vpop.f32.mrb[187].mxu1  ;;  %v5524_v24 = vpop.xlane.xlu1 %5523  ;;  %v5732_v53 = vmax.bf16 %v5730_v39, %v5728_v34  ;;  %v5402_v39 = vadd.bf16 %v6454_v7, %v3162_v17 }
 0x426   : > { %v3177_v32 = vpack.c.bf16 %v9200_v46, %v9193_v54  ;;  %v5941_v29 = vunpack.c.l.bf16 %v5524_v24  ;;  %v5942_v27 = vunpack.c.h.bf16 %v5524_v24  ;;  %v2231_v44 = vpop.f32.mrb[179].mxu0  ;;  %v5517_v1 = vpop.xlane.xlu0 %5516  ;;  %v10013_v24 = vld [vmem:[#allocation67_spill] sm:$0xff] }
 0x427   : > { %v5397_v23 = vadd.bf16 %v6453_v36, %v3157_v37  ;;  %v3158_v47 = vpack.c.bf16 %v2231_v44, %v2227_v38  ;;  %v5939_v4 = vunpack.c.l.bf16 %v5517_v1  ;;  %5733 = vmax.xlane.bf16.xlu1 %v5732_v53  ;;  %v5940_v50 = vunpack.c.h.bf16 %v5517_v1 }
 0x428   : > { %6070 = vst.msk [vmem:[%s9143_s15 + $0x50] sm:$0xff] %vm6059_vm4, %v5941_v29  ;;  %6071 = vst.msk [vmem:[%s9143_s15 + $0x58] sm:$0xff] %vm6059_vm4, %v5942_v27  ;;  %v4292_v53 = vrot.slane %v10013_v24, %v7825_v22  ;;  %v5744_v1 = vsel %vm5482_vm3, %v5402_v39, 4286644096 }
 0x429   : > { %v5398_v12 = vadd.bf16 %v6453_v36, %v3158_v47  ;;  %6068 = vst.msk [vmem:[%s9143_s15 + $0x40] sm:$0xff] %vm6059_vm4, %v5939_v4  ;;  %6069 = vst.msk [vmem:[%s9143_s15 + $0x48] sm:$0xff] %vm6059_vm4, %v5940_v50  ;;  %v10012_v36 = vld [vmem:[#allocation66_spill] sm:$0xff] }
 0x42a   : > { %v2235_v25 = vpop.f32.mrb[180].mxu0  ;;  %v9219_v13 = vpop.f32.mrb[188].mxu1  ;;  %v4304_v37 = vrot.slane %v10012_v36, %v7825_v22 }
 0x42b   : > { %v5735_v33 = vmax.bf16 %v5398_v12, %v5397_v23  ;;  %v2237_v41 = vpop.f32.mrb[181].mxu0  ;;  %v9221_v18 = vpop.f32.mrb[189].mxu1 }
 0x42c   : > { %v2239_v30 = vpop.f32.mrb[182].mxu0  ;;  %v9224_v10 = vpop.f32.mrb[190].mxu1  ;;  %v6455_v4 = vcombine.low %v4292_v53, %v4304_v37 }
 0x42d   : > { %v3160_v26 = vpack.c.bf16 %v2239_v30, %v2235_v25  ;;  %v3186_v57 = vpack.c.bf16 %v9224_v10, %v9219_v13  ;;  %v9228_v55 = vpop.f32.mrb[191].mxu1  ;;  %v5538_v28 = vpop.xlane.xlu1 %5537  ;;  %v5739_v52 = vmax.bf16 %v5737_v5, %v5735_v33  ;;  %v10014_v30 = vld [vmem:[#allocation84_spill] sm:$0xff] }
 0x42e   : > { %v3183_v40 = vpack.c.bf16 %v9228_v55, %v9221_v18  ;;  %v5945_v45 = vunpack.c.l.bf16 %v5538_v28  ;;  %v5946_v14 = vunpack.c.h.bf16 %v5538_v28  ;;  %v2241_v62 = vpop.f32.mrb[183].mxu0  ;;  %v5531_v16 = vpop.xlane.xlu0 %5530 }
 0x42f   : > { %v5400_v9 = vadd.bf16 %v6454_v7, %v3160_v26  ;;  %v3161_v34 = vpack.c.bf16 %v2241_v62, %v2237_v41  ;;  %v5943_v38 = vunpack.c.l.bf16 %v5531_v16  ;;  %5740 = vmax.xlane.bf16.xlu0 %v5739_v52  ;;  %v5944_v21 = vunpack.c.h.bf16 %v5531_v16  ;;  %v10016_v16 = vld [vmem:[#allocation69_spill] sm:$0xff] }
 0x430   : > { %6074 = vst.msk [vmem:[%s9143_s15 + $0x70] sm:$0xff] %vm6059_vm4, %v5945_v45  ;;  %6075 = vst.msk [vmem:[%s9143_s15 + $0x78] sm:$0xff] %vm6059_vm4, %v5946_v14  ;;  %v5405_v52 = vadd.bf16 %v6455_v4, %v3165_v11  ;;  %v10015_v14 = vld [vmem:[#allocation68_spill] sm:$0xff] }
 0x431   : > { %v5401_v29 = vadd.bf16 %v6454_v7, %v3161_v34  ;;  %6072 = vst.msk [vmem:[%s9143_s15 + $0x60] sm:$0xff] %vm6059_vm4, %v5943_v38  ;;  %6073 = vst.msk [vmem:[%s9143_s15 + $0x68] sm:$0xff] %vm6059_vm4, %v5944_v21  ;;  %v4328_v62 = vrot.slane %v10015_v14, %v7825_v22 }
 0x432   : > { %v2245_v27 = vpop.f32.mrb[184].mxu0  ;;  %v6726_v44 = vpop.f32.mrb[192].mxu1  ;;  %v5751_v21 = vsel %vm5482_vm3, %v5405_v52, 4286644096  ;;  %v10020_v52 = vld [vmem:[#allocation71_spill] sm:$0xff] }
 0x433   : > { %v5742_v20 = vmax.bf16 %v5401_v29, %v5400_v9  ;;  %v2247_v42 = vpop.f32.mrb[185].mxu0  ;;  %v9247_v17 = vpop.f32.mrb[193].mxu1  ;;  %v4316_v9 = vrot.slane %v10016_v16, %v7825_v22  ;;  %v10022_v16 = vld [vmem:[#allocation100_spill] sm:$0xff] }
 0x434   : > { %v2249_v23 = vpop.f32.mrb[186].mxu0  ;;  %v6727_v47 = vpop.f32.mrb[194].mxu1 }
 0x435   : > { %v3163_v35 = vpack.c.bf16 %v2249_v23, %v2245_v27  ;;  %v3192_v50 = vpack.c.bf16 %v6727_v47, %v6726_v44  ;;  %v9250_v43 = vpop.f32.mrb[195].mxu1  ;;  %v5552_v56 = vpop.xlane.xlu1 %5551  ;;  %v5746_v51 = vmax.bf16 %v5744_v1, %v5742_v20  ;;  %v6456_v24 = vcombine.low %v4316_v9, %v4328_v62 }
 0x436   : > { %v3189_v61 = vpack.c.bf16 %v9250_v43, %v9247_v17  ;;  %v5949_v12 = vunpack.c.l.bf16 %v5552_v56  ;;  %v5950_v25 = vunpack.c.h.bf16 %v5552_v56  ;;  %v2251_v33 = vpop.f32.mrb[187].mxu0  ;;  %v5545_v41 = vpop.xlane.xlu0 %5544  ;;  %v10087_v17 = vld [vmem:[#allocation122_spill] sm:$0xff] }
 0x437   : > { %v5403_v5 = vadd.bf16 %v6455_v4, %v3163_v35  ;;  %v9255_v7 = vadd.bf16 %v10014_v30, %v3192_v50  ;;  %v3164_v26 = vpack.c.bf16 %v2251_v33, %v2247_v42  ;;  %v5947_v28 = vunpack.c.l.bf16 %v5545_v41  ;;  %5747 = vmax.xlane.bf16.xlu1 %v5746_v51  ;;  %v10017_v50 = vld [vmem:[#allocation86_spill] sm:$0xff]  ;;  %v10018_v33 = vld [vmem:[#allocation85_spill] sm:$0xff] }
 0x438   : > { %6078 = vst.msk [vmem:[%s9143_s15 + $0x90] sm:$0xff] %vm6059_vm4, %v5949_v12  ;;  %6079 = vst.msk [vmem:[%s9143_s15 + $0x98] sm:$0xff] %vm6059_vm4, %v5950_v25  ;;  %v5948_v45 = vunpack.c.h.bf16 %v5545_v41  ;;  %v5408_v25 = vadd.bf16 %v6456_v24, %v3168_v59  ;;  %v10021_v59 = vld [vmem:[#allocation101_spill] sm:$0xff] }
 0x439   : > { %v5404_v34 = vadd.bf16 %v6455_v4, %v3164_v26  ;;  %6076 = vst.msk [vmem:[%s9143_s15 + $0x80] sm:$0xff] %vm6059_vm4, %v5947_v28  ;;  %v10019_v26 = vld [vmem:[#allocation70_spill] sm:$0xff]  ;;  %v10023_v9 = vmax.bf16 %v10021_v59, %v10022_v16 }
 0x43a   : > { %6077 = vst.msk [vmem:[%s9143_s15 + $0x88] sm:$0xff] %vm6059_vm4, %v5948_v45  ;;  %v2255_v38 = vpop.f32.mrb[188].mxu0  ;;  %v6730_v39 = vpop.f32.mrb[196].mxu1  ;;  %v4352_v28 = vrot.slane %v10019_v26, %v7825_v22  ;;  %v4340_v45 = vrot.slane %v10020_v52, %v7825_v22  ;;  %v10026_v26 = vld [vmem:[#allocation72_spill] sm:$0xff]  ;;  %v10027_v52 = vld [vmem:[#allocation73_spill] sm:$0xff] }
 0x43b   : > { %v5749_v8 = vmax.bf16 %v5404_v34, %v5403_v5  ;;  %v2257_v63 = vpop.f32.mrb[189].mxu0  ;;  %v2922_v11 = vpop.f32.mrb[197].mxu1 }
 0x43c   : > { %v2259_v36 = vpop.f32.mrb[190].mxu0  ;;  %v6731_v37 = vpop.f32.mrb[198].mxu1 }
 0x43d   : > { %v3166_v53 = vpack.c.bf16 %v2259_v36, %v2255_v38  ;;  %v3198_v29 = vpack.c.bf16 %v6731_v37, %v6730_v39  ;;  %v2925_v27 = vpop.f32.mrb[199].mxu1  ;;  %v5566_v44 = vpop.xlane.xlu1 %5565  ;;  %v5753_v20 = vmax.bf16 %v5751_v21, %v5749_v8  ;;  %v6457_v36 = vcombine.low %v4340_v45, %v4352_v28 }
 0x43e   : > { %v3195_v42 = vpack.c.bf16 %v2925_v27, %v2922_v11  ;;  %v5953_v1 = vunpack.c.l.bf16 %v5566_v44  ;;  %v5954_v23 = vunpack.c.h.bf16 %v5566_v44  ;;  %v2261_v47 = vpop.f32.mrb[191].mxu0  ;;  %v5559_v4 = vpop.xlane.xlu0 %5558  ;;  %v4376_v28 = vrot.slane %v10026_v26, %v7825_v22 }
 0x43f   : > { %v5406_v35 = vadd.bf16 %v6456_v24, %v3166_v53  ;;  %v5438_v56 = vadd.bf16 %v10017_v50, %v3198_v29  ;;  %v3167_v51 = vpack.c.bf16 %v2261_v47, %v2257_v63  ;;  %v5951_v12 = vunpack.c.l.bf16 %v5559_v4  ;;  %5754 = vmax.xlane.bf16.xlu0 %v5753_v20  ;;  %v10024_v47 = vld [vmem:[#allocation88_spill] sm:$0xff] }
 0x440   : > { %v9278_v41 = vadd.bf16 %v10018_v33, %v3195_v42  ;;  %6082 = vst.msk [vmem:[%s9143_s15 + $0xb0] sm:$0xff] %vm6059_vm4, %v5953_v1  ;;  %6083 = vst.msk [vmem:[%s9143_s15 + $0xb8] sm:$0xff] %vm6059_vm4, %v5954_v23  ;;  %v5952_v5 = vunpack.c.h.bf16 %v5559_v4  ;;  %v5758_v63 = vsel %vm5482_vm3, %v5408_v25, 4286644096  ;;  %v4364_v45 = vrot.slane %v10027_v52, %v7825_v22  ;;  %v10036_v52 = vld [vmem:[#allocation74_spill] sm:$0xff] }
 0x441   : > { %v5828_v14 = vsel %vm5482_vm3, %v5438_v56, 4286644096  ;;  %v5407_v62 = vadd.bf16 %v6456_v24, %v3167_v51  ;;  %6080 = vst.msk [vmem:[%s9143_s15 + $0xa0] sm:$0xff] %vm6059_vm4, %v5951_v12  ;;  %v5411_v51 = vadd.bf16 %v6457_v36, %v3171_v6  ;;  %v10025_v12 = vld [vmem:[#allocation87_spill] sm:$0xff] }
 0x442   : > { %6081 = vst.msk [vmem:[%s9143_s15 + $0xa8] sm:$0xff] %vm6059_vm4, %v5952_v5  ;;  %v2265_v58 = vpop.f32.mrb[192].mxu0  ;;  %v6734_v48 = vpop.f32.mrb[200].mxu1  ;;  %v5830_v34 = vmax.bf16 %v5828_v14, %v10023_v9 }
 0x443   : > { %v5756_v38 = vmax.bf16 %v5407_v62, %v5406_v35  ;;  %v2267_v39 = vpop.f32.mrb[193].mxu0  ;;  %v2938_v8 = vpop.f32.mrb[201].mxu1 }
 0x444   : > { %v6735_v11 = vpop.f32.mrb[202].mxu1  ;;  %5831 = vmax.xlane.bf16.xlu1 %v5830_v34  ;;  %v2269_v21 = vpop.f32.mrb[194].mxu0 }
 0x445   : > { %v3204_v37 = vpack.c.bf16 %v6735_v11, %v6734_v48  ;;  %v3169_v24 = vpack.c.bf16 %v2269_v21, %v2265_v58  ;;  %v2941_v53 = vpop.f32.mrb[203].mxu1  ;;  %v5580_v29 = vpop.xlane.xlu1 %5579  ;;  %v5760_v27 = vmax.bf16 %v5758_v63, %v5756_v38  ;;  %v10028_v58 = vld [vmem:[#allocation105_spill] sm:$0xff]  ;;  %v10029_v48 = vld [vmem:[#allocation104_spill] sm:$0xff]  ;;  %v5765_v21 = vsel %vm5482_vm3, %v5411_v51, 4286644096 }
 0x446   : > { %v3201_v44 = vpack.c.bf16 %v2941_v53, %v2938_v8  ;;  %v5957_v20 = vunpack.c.l.bf16 %v5580_v29  ;;  %v5958_v42 = vunpack.c.h.bf16 %v5580_v29  ;;  %v2271_v1 = vpop.f32.mrb[195].mxu0  ;;  %v5573_v23 = vpop.xlane.xlu0 %5572  ;;  %v10030_v59 = vmax.bf16 %v10028_v58, %v10029_v48  ;;  %v10032_v8 = vld [vmem:[#allocation102_spill] sm:$0xff]  ;;  %v10039_v58 = vld [vmem:[#allocation108_spill] sm:$0xff] }
 0x447   : > { %v5444_v4 = vadd.bf16 %v10024_v47, %v3204_v37  ;;  %v5409_v35 = vadd.bf16 %v6457_v36, %v3169_v24  ;;  %v3170_v50 = vpack.c.bf16 %v2271_v1, %v2267_v39  ;;  %v5955_v56 = vunpack.c.l.bf16 %v5573_v23  ;;  %v10031_v39 = vld [vmem:[#allocation103_spill] sm:$0xff] }
 0x448   : > { %v5441_v25 = vadd.bf16 %v10025_v12, %v3201_v44  ;;  %6086 = vst.msk [vmem:[%s9143_s15 + $0xd0] sm:$0xff] %vm6059_vm4, %v5957_v20  ;;  %6087 = vst.msk [vmem:[%s9143_s15 + $0xd8] sm:$0xff] %vm6059_vm4, %v5958_v42  ;;  %v5956_v5 = vunpack.c.h.bf16 %v5573_v23  ;;  %v10033_v63 = vmax.bf16 %v10031_v39, %v10032_v8  ;;  %v6458_v24 = vcombine.low %v4364_v45, %v4376_v28  ;;  %v10041_v39 = vld [vmem:[#allocation107_spill] sm:$0xff]  ;;  %v10042_v8 = vld [vmem:[#allocation106_spill] sm:$0xff] }
 0x449   : > { %v5842_v14 = vsel %vm5482_vm3, %v5444_v4, 4286644096  ;;  %v5410_v62 = vadd.bf16 %v6457_v36, %v3170_v50  ;;  %6084 = vst.msk [vmem:[%s9143_s15 + $0xc0] sm:$0xff] %vm6059_vm4, %v5955_v56  ;;  %v10034_v50 = vld [vmem:[#allocation90_spill] sm:$0xff]  ;;  %v4400_v45 = vrot.slane %v10036_v52, %v7825_v22 }
 0x44a   : > { %v5835_v60 = vsel %vm5482_vm3, %v5441_v25, 4286644096  ;;  %6085 = vst.msk [vmem:[%s9143_s15 + $0xc8] sm:$0xff] %vm6059_vm4, %v5956_v5  ;;  %v2275_v49 = vpop.f32.mrb[196].mxu0  ;;  %v6738_v6 = vpop.f32.mrb[204].mxu1  ;;  %v5844_v16 = vmax.bf16 %v5842_v14, %v10030_v59  ;;  %v5414_v25 = vadd.bf16 %v6458_v24, %v3174_v2  ;;  %v10035_v5 = vld [vmem:[#allocation89_spill] sm:$0xff] }
 0x44b   : > { %v5763_v9 = vmax.bf16 %v5410_v62, %v5409_v35  ;;  %v2277_v34 = vpop.f32.mrb[197].mxu0  ;;  %v2954_v38 = vpop.f32.mrb[205].mxu1  ;;  %v5837_v11 = vmax.bf16 %v5835_v60, %v10033_v63  ;;  %v10037_v14 = vld [vmem:[#allocation75_spill] sm:$0xff]  ;;  %v10043_v63 = vmax.bf16 %v10041_v39, %v10042_v8 }
 0x44c   : > { %v6739_v36 = vpop.f32.mrb[206].mxu1  ;;  %5761 = vmax.xlane.bf16.xlu1 %v5760_v27  ;;  %v2279_v37 = vpop.f32.mrb[198].mxu0  ;;  %v4388_v62 = vrot.slane %v10037_v14, %v7825_v22 }
 0x44d   : > { %v3210_v53 = vpack.c.bf16 %v6739_v36, %v6738_v6  ;;  %v3172_v29 = vpack.c.bf16 %v2279_v37, %v2275_v49  ;;  %v2957_v44 = vpop.f32.mrb[207].mxu1  ;;  %v5594_v20 = vpop.xlane.xlu1 %5593  ;;  %5838 = vmax.xlane.bf16.xlu0 %v5837_v11  ;;  %v5767_v42 = vmax.bf16 %v5765_v21, %v5763_v9  ;;  %v10038_v6 = vld [vmem:[#allocation109_spill] sm:$0xff]  ;;  %v5772_v21 = vsel %vm5482_vm3, %v5414_v25, 4286644096 }
 0x44e   : > { %v3207_v1 = vpack.c.bf16 %v2957_v44, %v2954_v38  ;;  %v5961_v23 = vunpack.c.l.bf16 %v5594_v20  ;;  %v5962_v47 = vunpack.c.h.bf16 %v5594_v20  ;;  %v2281_v4 = vpop.f32.mrb[199].mxu0  ;;  %v5587_v35 = vpop.xlane.xlu0 %5586  ;;  %v10040_v48 = vmax.bf16 %v10038_v6, %v10039_v58 }
 0x44f   : > { %v5450_v56 = vadd.bf16 %v10034_v50, %v3210_v53  ;;  %v5412_v27 = vadd.bf16 %v6458_v24, %v3172_v29  ;;  %v3173_v51 = vpack.c.bf16 %v2281_v4, %v2277_v34  ;;  %v5959_v12 = vunpack.c.l.bf16 %v5587_v35 }
 0x450   : > { %v5447_v26 = vadd.bf16 %v10035_v5, %v3207_v1  ;;  %6090 = vst.msk [vmem:[%s9143_s15 + $0xf0] sm:$0xff] %vm6059_vm4, %v5961_v23  ;;  %6091 = vst.msk [vmem:[%s9143_s15 + $0xf8] sm:$0xff] %vm6059_vm4, %v5962_v47  ;;  %v5960_v28 = vunpack.c.h.bf16 %v5587_v35  ;;  %v10045_v5 = vld [vmem:[#allocation91_spill] sm:$0xff] }
 0x451   : > { %v5856_v60 = vsel %vm5482_vm3, %v5450_v56, 4286644096  ;;  %v5413_v49 = vadd.bf16 %v6458_v24, %v3173_v51  ;;  %6088 = vst.msk [vmem:[%s9143_s15 + $0xe0] sm:$0xff] %vm6059_vm4, %v5959_v12  ;;  %v6459_v24 = vcombine.low %v4388_v62, %v4400_v45  ;;  %v10044_v56 = vld [vmem:[#allocation92_spill] sm:$0xff]  ;;  %v10047_v45 = vld [vmem:[#allocation77_spill] sm:$0xff] }
 0x452   : > { %v5849_v31 = vsel %vm5482_vm3, %v5447_v26, 4286644096  ;;  %6089 = vst.msk [vmem:[%s9143_s15 + $0xe8] sm:$0xff] %vm6059_vm4, %v5960_v28  ;;  %v2285_v19 = vpop.f32.mrb[200].mxu0  ;;  %v6742_v2 = vpop.f32.mrb[208].mxu1  ;;  %v5858_v59 = vmax.bf16 %v5856_v60, %v10040_v48  ;;  %v10046_v28 = vld [vmem:[#allocation76_spill] sm:$0xff]  ;;  %v4412_v14 = vrot.slane %v10047_v45, %v7825_v22 }
 0x453   : > { %v5770_v9 = vmax.bf16 %v5413_v49, %v5412_v27  ;;  %v2287_v34 = vpop.f32.mrb[201].mxu0  ;;  %v2970_v38 = vpop.f32.mrb[209].mxu1  ;;  %v5851_v11 = vmax.bf16 %v5849_v31, %v10043_v63  ;;  %v5417_v25 = vadd.bf16 %v6459_v24, %v3177_v32  ;;  %v4424_v52 = vrot.slane %v10046_v28, %v7825_v22  ;;  %v10048_v49 = vld [vmem:[#allocation3_spill] sm:$0xff]  ;;  %v10049_v31 = vld [vmem:[#allocation2_spill] sm:$0xff] }
 0x454   : > { %v6743_v36 = vpop.f32.mrb[210].mxu1  ;;  %5845 = vmax.xlane.bf16.xlu1 %v5844_v16  ;;  %v2289_v37 = vpop.f32.mrb[202].mxu0 }
 0x455   : > { %v3216_v53 = vpack.c.bf16 %v6743_v36, %v6742_v2  ;;  %v3175_v29 = vpack.c.bf16 %v2289_v37, %v2285_v19  ;;  %v2973_v44 = vpop.f32.mrb[211].mxu1  ;;  %v5608_v20 = vpop.xlane.xlu1 %5607  ;;  %5768 = vmax.xlane.bf16.xlu0 %v5767_v42  ;;  %v9349_v1 = vmax.bf16 %v5772_v21, %v5770_v9  ;;  %v10050_v19 = vmax.bf16 %v10048_v49, %v10049_v31  ;;  %v10051_v9 = vld [vmem:[#allocation111_spill] sm:$0xff]  ;;  %v10061_v31 = vld [vmem:[#allocation5_spill] sm:$0xff] }
 0x456   : > { %v3213_v23 = vpack.c.bf16 %v2973_v44, %v2970_v38  ;;  %v5965_v47 = vunpack.c.l.bf16 %v5608_v20  ;;  %v5966_v4 = vunpack.c.h.bf16 %v5608_v20  ;;  %v2291_v35 = vpop.f32.mrb[203].mxu0  ;;  %v5601_v50 = vpop.xlane.xlu0 %5600  ;;  %v5779_v8 = vsel %vm5482_vm3, %v5417_v25, 4286644096 }
 0x457   : > { %v5456_v16 = vadd.bf16 %v10044_v56, %v3216_v53  ;;  %v5415_v27 = vadd.bf16 %v6459_v24, %v3175_v29  ;;  %v3176_v51 = vpack.c.bf16 %v2291_v35, %v2287_v34  ;;  %v5963_v12 = vunpack.c.l.bf16 %v5601_v50  ;;  %v10052_v34 = vld [vmem:[#allocation110_spill] sm:$0xff] }
 0x458   : > { %v5453_v42 = vadd.bf16 %v10045_v5, %v3213_v23  ;;  %6094 = vst.msk [vmem:[%s9143_s15 + $0x110] sm:$0xff] %vm6059_vm4, %v5965_v47  ;;  %6095 = vst.msk [vmem:[%s9143_s15 + $0x118] sm:$0xff] %vm6059_vm4, %v5966_v4  ;;  %v5964_v26 = vunpack.c.h.bf16 %v5601_v50  ;;  %v10053_v38 = vmax.bf16 %v10051_v9, %v10052_v34  ;;  %v6460_v36 = vcombine.low %v4412_v14, %v4424_v52  ;;  %v10054_v50 = vld [vmem:[#allocation94_spill] sm:$0xff]  ;;  %v10058_v14 = vld [vmem:[#allocation7_spill] sm:$0xff] }
 0x459   : > { %v5870_v62 = vsel %vm5482_vm3, %v5456_v16, 4286644096  ;;  %v5416_v60 = vadd.bf16 %v6459_v24, %v3176_v51  ;;  %6092 = vst.msk [vmem:[%s9143_s15 + $0x100] sm:$0xff] %vm6059_vm4, %v5963_v12  ;;  %v10055_v12 = vld [vmem:[#allocation93_spill] sm:$0xff]  ;;  %v10056_v5 = vld [vmem:[#allocation78_spill] sm:$0xff] }
 0x45a   : > { %v5863_v54 = vsel %vm5482_vm3, %v5453_v42, 4286644096  ;;  %6093 = vst.msk [vmem:[%s9143_s15 + $0x108] sm:$0xff] %vm6059_vm4, %v5964_v26  ;;  %v2295_v46 = vpop.f32.mrb[204].mxu0  ;;  %v6746_v32 = vpop.f32.mrb[212].mxu1  ;;  %v9373_v2 = vmax.bf16 %v5870_v62, %v10050_v19  ;;  %v5420_v51 = vadd.bf16 %v6460_v36, %v3180_v3  ;;  %v4448_v42 = vrot.slane %v10056_v5, %v7825_v22  ;;  %v10057_v26 = vld [vmem:[#allocation79_spill] sm:$0xff] }
 0x45b   : > { %v5777_v6 = vmax.bf16 %v5416_v60, %v5415_v27  ;;  %v2297_v58 = vpop.f32.mrb[205].mxu0  ;;  %v2986_v48 = vpop.f32.mrb[213].mxu1  ;;  %v5865_v39 = vmax.bf16 %v5863_v54, %v10053_v38  ;;  %v4436_v28 = vrot.slane %v10057_v26, %v7825_v22  ;;  %v10059_v62 = vld [vmem:[#allocation6_spill] sm:$0xff]  ;;  %v10062_v19 = vld [vmem:[#allocation4_spill] sm:$0xff] }
 0x45c   : > { %v6747_v63 = vpop.f32.mrb[214].mxu1  ;;  %5859 = vmax.xlane.bf16.xlu1 %v5858_v59  ;;  %v2299_v21 = vpop.f32.mrb[206].mxu0  ;;  %v10060_v60 = vmax.bf16 %v10058_v14, %v10059_v62  ;;  %v10069_v26 = vld [vmem:[#allocation112_spill] sm:$0xff] }
 0x45d   : > { %v3222_v37 = vpack.c.bf16 %v6747_v63, %v6746_v32  ;;  %v3178_v24 = vpack.c.bf16 %v2299_v21, %v2295_v46  ;;  %v2989_v53 = vpop.f32.mrb[215].mxu1  ;;  %v5622_v29 = vpop.xlane.xlu1 %5621  ;;  %5852 = vmax.xlane.bf16.xlu0 %v5851_v11  ;;  %v9379_v44 = vmax.bf16 %v5779_v8, %v5777_v6  ;;  %v10063_v6 = vmax.bf16 %v10061_v31, %v10062_v19  ;;  %v10072_v14 = vld [vmem:[#allocation8_spill] sm:$0xff] }
 0x45e   : > { %v3219_v20 = vpack.c.bf16 %v2989_v53, %v2986_v48  ;;  %v5969_v23 = vunpack.c.l.bf16 %v5622_v29  ;;  %v5970_v47 = vunpack.c.h.bf16 %v5622_v29  ;;  %v2301_v4 = vpop.f32.mrb[207].mxu0  ;;  %v5615_v35 = vpop.xlane.xlu0 %5614  ;;  %v5786_v48 = vsel %vm5482_vm3, %v5420_v51, 4286644096 }
 0x45f   : > { %v5462_v59 = vadd.bf16 %v10054_v50, %v3222_v37  ;;  %v5418_v56 = vadd.bf16 %v6460_v36, %v3178_v24  ;;  %v3179_v16 = vpack.c.bf16 %v2301_v4, %v2297_v58  ;;  %v5967_v27 = vunpack.c.l.bf16 %v5615_v35 }
 0x460   : > { %v5459_v11 = vadd.bf16 %v10055_v12, %v3219_v20  ;;  %6098 = vst.msk [vmem:[%s9143_s15 + $0x130] sm:$0xff] %vm6059_vm4, %v5969_v23  ;;  %6099 = vst.msk [vmem:[%s9143_s15 + $0x138] sm:$0xff] %vm6059_vm4, %v5970_v47  ;;  %v5968_v25 = vunpack.c.h.bf16 %v5615_v35  ;;  %v6461_v38 = vcombine.low %v4436_v28, %v4448_v42  ;;  %v10064_v47 = vld [vmem:[#allocation96_spill] sm:$0xff]  ;;  %v10067_v12 = vld [vmem:[#allocation81_spill] sm:$0xff] }
 0x461   : > { %v5884_v52 = vsel %vm5482_vm3, %v5462_v59, 4286644096  ;;  %v5419_v45 = vadd.bf16 %v6460_v36, %v3179_v16  ;;  %6096 = vst.msk [vmem:[%s9143_s15 + $0x120] sm:$0xff] %vm6059_vm4, %v5967_v27  ;;  %v10066_v27 = vld [vmem:[#allocation80_spill] sm:$0xff]  ;;  %v10068_v42 = vld [vmem:[#allocation114_spill] sm:$0xff] }
 0x462   : > { %v5877_v0 = vsel %vm5482_vm3, %v5459_v11, 4286644096  ;;  %6097 = vst.msk [vmem:[%s9143_s15 + $0x128] sm:$0xff] %vm6059_vm4, %v5968_v25  ;;  %v2305_v15 = vpop.f32.mrb[208].mxu0  ;;  %v6750_v3 = vpop.f32.mrb[216].mxu1  ;;  %v9403_v54 = vmax.bf16 %v5884_v52, %v10060_v60  ;;  %v5423_v59 = vadd.bf16 %v6461_v38, %v3183_v40  ;;  %v4472_v51 = vrot.slane %v10066_v27, %v7825_v22  ;;  %v10079_v27 = vld [vmem:[#allocation119_spill] sm:$0xff] }
 0x463   : > { %v5784_v46 = vmax.bf16 %v5419_v45, %v5418_v56  ;;  %v2307_v32 = vpop.f32.mrb[209].mxu0  ;;  %v3002_v49 = vpop.f32.mrb[217].mxu1  ;;  %v9408_v58 = vmax.bf16 %v5877_v0, %v10063_v6  ;;  %v10065_v56 = vld [vmem:[#allocation95_spill] sm:$0xff]  ;;  %v4460_v11 = vrot.slane %v10067_v12, %v7825_v22  ;;  %v10070_v28 = vmax.bf16 %v10068_v42, %v10069_v26 }
 0x464   : > { %v6751_v9 = vpop.f32.mrb[218].mxu1  ;;  %5775 = vmax.xlane.bf16.xlu1 %v9349_v1  ;;  %v2309_v34 = vpop.f32.mrb[210].mxu0 }
 0x465   : > { %v3228_v8 = vpack.c.bf16 %v6751_v9, %v6750_v3  ;;  %v3181_v63 = vpack.c.bf16 %v2309_v34, %v2305_v15  ;;  %v3005_v21 = vpop.f32.mrb[219].mxu1  ;;  %v5636_v36 = vpop.xlane.xlu1 %5635  ;;  %5866 = vmax.xlane.bf16.xlu0 %v5865_v39  ;;  %v9412_v37 = vmax.bf16 %v5786_v48, %v5784_v46  ;;  %v10071_v3 = vld [vmem:[#allocation9_spill] sm:$0xff]  ;;  %v5793_v46 = vsel %vm5482_vm3, %v5423_v59, 4286644096 }
 0x466   : > { %v3225_v24 = vpack.c.bf16 %v3005_v21, %v3002_v49  ;;  %v5973_v53 = vunpack.c.l.bf16 %v5636_v36  ;;  %v5974_v29 = vunpack.c.h.bf16 %v5636_v36  ;;  %v2311_v20 = vpop.f32.mrb[211].mxu0  ;;  %v5629_v23 = vpop.xlane.xlu0 %5628  ;;  %v10073_v62 = vmax.bf16 %v10071_v3, %v10072_v14 }
 0x467   : > { %v5468_v1 = vadd.bf16 %v10064_v47, %v3228_v8  ;;  %v5421_v4 = vadd.bf16 %v6461_v38, %v3181_v63  ;;  %v3182_v35 = vpack.c.bf16 %v2311_v20, %v2307_v32  ;;  %v5971_v50 = vunpack.c.l.bf16 %v5629_v23  ;;  %v10075_v47 = vld [vmem:[#allocation97_spill] sm:$0xff] }
 0x468   : > { %v5465_v39 = vadd.bf16 %v10065_v56, %v3225_v24  ;;  %6102 = vst.msk [vmem:[%s9143_s15 + $0x150] sm:$0xff] %vm6059_vm4, %v5973_v53  ;;  %6103 = vst.msk [vmem:[%s9143_s15 + $0x158] sm:$0xff] %vm6059_vm4, %v5974_v29  ;;  %v5972_v16 = vunpack.c.h.bf16 %v5629_v23  ;;  %v6462_v31 = vcombine.low %v4460_v11, %v4472_v51  ;;  %v10074_v24 = vld [vmem:[#allocation98_spill] sm:$0xff] }
 0x469   : > { %v5898_v25 = vsel %vm5482_vm3, %v5468_v1, 4286644096  ;;  %v5422_v5 = vadd.bf16 %v6461_v38, %v3182_v35  ;;  %6100 = vst.msk [vmem:[%s9143_s15 + $0x140] sm:$0xff] %vm6059_vm4, %v5971_v50  ;;  %v10077_v50 = vld [vmem:[#allocation83_spill] sm:$0xff] }
 0x46a   : > { %v5891_v18 = vsel %vm5482_vm3, %v5465_v39, 4286644096  ;;  %6101 = vst.msk [vmem:[%s9143_s15 + $0x148] sm:$0xff] %vm6059_vm4, %v5972_v16  ;;  %v2315_v55 = vpop.f32.mrb[212].mxu0  ;;  %v6754_v40 = vpop.f32.mrb[220].mxu1  ;;  %v9436_v52 = vmax.bf16 %v5898_v25, %v10070_v28  ;;  %v5426_v23 = vadd.bf16 %v6462_v31, %v3186_v57  ;;  %v4484_v59 = vrot.slane %v10077_v50, %v7825_v22  ;;  %v10078_v16 = vld [vmem:[#allocation121_spill] sm:$0xff] }
 0x46b   : > { %v5791_v45 = vmax.bf16 %v5422_v5, %v5421_v4  ;;  %v2317_v0 = vpop.f32.mrb[213].mxu0  ;;  %v3018_v15 = vpop.f32.mrb[221].mxu1  ;;  %v9441_v60 = vmax.bf16 %v5891_v18, %v10073_v62  ;;  %v10076_v4 = vld [vmem:[#allocation82_spill] sm:$0xff]  ;;  %v10080_v51 = vmax.bf16 %v10078_v16, %v10079_v27  ;;  %v10082_v18 = vld [vmem:[#allocation117_spill] sm:$0xff] }
 0x46c   : > { %v6755_v32 = vpop.f32.mrb[222].mxu1  ;;  %5873 = vmax.xlane.bf16.xlu1 %v9373_v2  ;;  %v2319_v49 = vpop.f32.mrb[214].mxu0  ;;  %v4496_v35 = vrot.slane %v10076_v4, %v7825_v22  ;;  %v10081_v22 = vld [vmem:[#allocation118_spill] sm:$0xff]  ;;  %v5800_v42 = vsel %vm5482_vm3, %v5426_v23, 4286644096 }
 0x46d   : > { %v3234_v19 = vpack.c.bf16 %v6755_v32, %v6754_v40  ;;  %v3184_v6 = vpack.c.bf16 %v2319_v49, %v2315_v55  ;;  %v3021_v48 = vpop.f32.mrb[223].mxu1  ;;  %v5650_v9 = vpop.xlane.xlu1 %5649  ;;  %5782 = vmax.xlane.bf16.xlu0 %v9379_v44  ;;  %v9446_v34 = vmax.bf16 %v5793_v46, %v5791_v45  ;;  %v10083_v55 = vmax.bf16 %v10081_v22, %v10082_v18 }
 0x46e   : > { %v3231_v38 = vpack.c.bf16 %v3021_v48, %v3018_v15  ;;  %v5977_v8 = vunpack.c.l.bf16 %v5650_v9  ;;  %v5978_v63 = vunpack.c.h.bf16 %v5650_v9  ;;  %v2321_v21 = vpop.f32.mrb[215].mxu0  ;;  %v5643_v36 = vpop.xlane.xlu0 %5642  ;;  %v6463_v45 = vcombine.low %v4484_v59, %v4496_v35 }
 0x46f   : > { %v5474_v2 = vadd.bf16 %v10074_v24, %v3234_v19  ;;  %v5424_v53 = vadd.bf16 %v6462_v31, %v3184_v6  ;;  %v3185_v29 = vpack.c.bf16 %v2321_v21, %v2317_v0  ;;  %v5975_v20 = vunpack.c.l.bf16 %v5643_v36 }
 0x470   : > { %v5471_v44 = vadd.bf16 %v10075_v47, %v3231_v38  ;;  %6106 = vst.msk [vmem:[%s9143_s15 + $0x170] sm:$0xff] %vm6059_vm4, %v5977_v8  ;;  %6107 = vst.msk [vmem:[%s9143_s15 + $0x178] sm:$0xff] %vm6059_vm4, %v5978_v63  ;;  %v5976_v1 = vunpack.c.h.bf16 %v5643_v36  ;;  %v5429_v8 = vadd.bf16 %v6463_v45, %v3189_v61  ;;  %v10085_v63 = vld [vmem:[#allocation99_spill] sm:$0xff]  ;;  %v10089_v47 = vld [vmem:[#allocation17_spill] sm:$0xff]  ;;  %v5814_v22 = vsel %vm5482_vm3, %v9255_v7, 4286644096 }
 0x471   : > { %v5912_v56 = vsel %vm5482_vm3, %v5474_v2, 4286644096  ;;  %v5425_v39 = vadd.bf16 %v6462_v31, %v3185_v29  ;;  %6104 = vst.msk [vmem:[%s9143_s15 + $0x160] sm:$0xff] %vm6059_vm4, %v5975_v20  ;;  %v10086_v29 = vld [vmem:[#allocation123_spill] sm:$0xff] }
 0x472   : > { %v5905_v13 = vsel %vm5482_vm3, %v5471_v44, 4286644096  ;;  %6105 = vst.msk [vmem:[%s9143_s15 + $0x168] sm:$0xff] %vm6059_vm4, %v5976_v1  ;;  %v2325_v10 = vpop.f32.mrb[216].mxu0  ;;  %v6758_v57 = vpop.f32.mrb[224].mxu1  ;;  %v9470_v12 = vmax.bf16 %v5912_v56, %v10080_v51  ;;  %v10088_v43 = vmax.bf16 %v10086_v29, %v10087_v17  ;;  %v10090_v44 = vld [vmem:[#allocation16_spill] sm:$0xff] }
 0x473   : > { %v5798_v11 = vmax.bf16 %v5425_v39, %v5424_v53  ;;  %v2327_v25 = vpop.f32.mrb[217].mxu0  ;;  %v3034_v5 = vpop.f32.mrb[225].mxu1  ;;  %v9475_v40 = vmax.bf16 %v5905_v13, %v10083_v55  ;;  %v10091_v1 = vmax.bf16 %v10089_v47, %v10090_v44  ;;  %v5807_v35 = vsel %vm5482_vm3, %v5429_v8, 4286644096 }
 0x474   : > { %v6759_v26 = vpop.f32.mrb[226].mxu1  ;;  %5887 = vmax.xlane.bf16.xlu1 %v9403_v54  ;;  %v2329_v28 = vpop.f32.mrb[218].mxu0  ;;  %v10084_v54 = vld [vmem:[#allocation18_spill] sm:$0xff] }
 0x475   : > { %v3240_v0 = vpack.c.bf16 %v6759_v26, %v6758_v57  ;;  %v3187_v15 = vpack.c.bf16 %v2329_v28, %v2325_v10  ;;  %v3037_v3 = vpop.f32.mrb[227].mxu1  ;;  %v5664_v14 = vpop.xlane.xlu1 %5663  ;;  %5880 = vmax.xlane.bf16.xlu0 %v9408_v58  ;;  %v9480_v62 = vmax.bf16 %v5800_v42, %v5798_v11 }
 0x476   : > { %v3237_v46 = vpack.c.bf16 %v3037_v3, %v3034_v5  ;;  %v5981_v32 = vunpack.c.l.bf16 %v5664_v14  ;;  %v5982_v49 = vunpack.c.h.bf16 %v5664_v14  ;;  %v2331_v31 = vpop.f32.mrb[219].mxu0  ;;  %v5657_v19 = vpop.xlane.xlu0 %5656 }
 0x477   : > { %v5480_v6 = vadd.bf16 %v10084_v54, %v3240_v0  ;;  %v5427_v48 = vadd.bf16 %v6463_v45, %v3187_v15  ;;  %v3188_v9 = vpack.c.bf16 %v2331_v31, %v2327_v25  ;;  %v5979_v38 = vunpack.c.l.bf16 %v5657_v19 }
 0x478   : > { %v5477_v58 = vadd.bf16 %v10085_v63, %v3237_v46  ;;  %6110 = vst.msk [vmem:[%s9143_s15 + $0x190] sm:$0xff] %vm6059_vm4, %v5981_v32  ;;  %6111 = vst.msk [vmem:[%s9143_s15 + $0x198] sm:$0xff] %vm6059_vm4, %v5982_v49  ;;  %v5980_v21 = vunpack.c.h.bf16 %v5657_v19 }
 0x479   : > { %v5926_v36 = vsel %vm5482_vm3, %v5480_v6, 4286644096  ;;  %v5428_v24 = vadd.bf16 %v6463_v45, %v3188_v9  ;;  %6108 = vst.msk [vmem:[%s9143_s15 + $0x180] sm:$0xff] %vm6059_vm4, %v5979_v38 }
 0x47a   : > { %v5919_v2 = vsel %vm5482_vm3, %v5477_v58, 4286644096  ;;  %6109 = vst.msk [vmem:[%s9143_s15 + $0x188] sm:$0xff] %vm6059_vm4, %v5980_v21  ;;  %v2335_v53 = vpop.f32.mrb[220].mxu0  ;;  %v9500_v61 = vmax.bf16 %v5926_v36, %v10088_v43 }
 0x47b   : > { %v5805_v20 = vmax.bf16 %v5428_v24, %v5427_v48  ;;  %v2337_v23 = vpop.f32.mrb[221].mxu0  ;;  %v9505_v4 = vmax.bf16 %v5919_v2, %v10091_v1 }
 0x47c   : > { %5789 = vmax.xlane.bf16.xlu1 %v9412_v37  ;;  %v2339_v50 = vpop.f32.mrb[222].mxu0 }
 0x47d   : > { %v3190_v59 = vpack.c.bf16 %v2339_v50, %v2335_v53  ;;  %v5678_v56 = vpop.xlane.xlu1 %5677  ;;  %5894 = vmax.xlane.bf16.xlu0 %v9441_v60  ;;  %v2341_v39 = vpop.f32.mrb[223].mxu0  ;;  %v5809_v13 = vmax.bf16 %v5807_v35, %v5805_v20 }
 0x47e   : > { %v5985_v10 = vunpack.c.l.bf16 %v5678_v56  ;;  %v5986_v57 = vunpack.c.h.bf16 %v5678_v56  ;;  %v3191_v16 = vpack.c.bf16 %v2341_v39, %v2337_v23  ;;  %v5671_v27 = vpop.xlane.xlu0 %5670 }
 0x47f   : > { %v5430_v51 = vadd.bf16 %v10014_v30, %v3190_v59  ;;  %v5983_v11 = vunpack.c.l.bf16 %v5671_v27  ;;  %v5984_v25 = vunpack.c.h.bf16 %v5671_v27 }
 0x480   : > { %6114 = vst.msk [vmem:[%s9143_s15 + $0x1b0] sm:$0xff] %vm6059_vm4, %v5985_v10  ;;  %6115 = vst.msk [vmem:[%s9143_s15 + $0x1b8] sm:$0xff] %vm6059_vm4, %v5986_v57  ;;  %v5431_v37 = vadd.bf16 %v10014_v30, %v3191_v16 }
 0x481   : > { %6112 = vst.msk [vmem:[%s9143_s15 + $0x1a0] sm:$0xff] %vm6059_vm4, %v5983_v11  ;;  %6113 = vst.msk [vmem:[%s9143_s15 + $0x1a8] sm:$0xff] %vm6059_vm4, %v5984_v25 }
 0x482   : > { %v5812_v60 = vmax.bf16 %v5431_v37, %v5430_v51  ;;  %v2345_v5 = vpop.f32.mrb[224].mxu0 }
 0x483   : > { %v2347_v18 = vpop.f32.mrb[225].mxu0 }
 0x484   : > { %5901 = vmax.xlane.bf16.xlu1 %v9436_v52  ;;  %v2349_v55 = vpop.f32.mrb[226].mxu0  ;;  %v5816_v42 = vmax.bf16 %v5814_v22, %v5812_v60 }
 0x485   : > { %v3193_v26 = vpack.c.bf16 %v2349_v55, %v2345_v5  ;;  %5796 = vmax.xlane.bf16.xlu0 %v9446_v34  ;;  %v2351_v30 = vpop.f32.mrb[227].mxu0  ;;  %v5821_v34 = vsel %vm5482_vm3, %v9278_v41, 4286644096 }
 0x486   : > { %v3194_v28 = vpack.c.bf16 %v2351_v30, %v2347_v18  ;;  %v5685_v45 = vpop.xlane.xlu0 %5684 }
 0x487   : > { %v5433_v0 = vadd.bf16 %v10018_v33, %v3193_v26  ;;  %v5987_v15 = vunpack.c.l.bf16 %v5685_v45  ;;  %v5988_v3 = vunpack.c.h.bf16 %v5685_v45  ;;  %v5692_v7 = vpop.xlane.xlu1 %5691 }
 0x488   : > { %v5434_v14 = vadd.bf16 %v10018_v33, %v3194_v28  ;;  %v5989_v52 = vunpack.c.l.bf16 %v5692_v7  ;;  %v5990_v46 = vunpack.c.h.bf16 %v5692_v7 }
 0x489   : > { %6116 = vst.msk [vmem:[%s9143_s15 + $0x1c0] sm:$0xff] %vm6059_vm4, %v5987_v15  ;;  %6117 = vst.msk [vmem:[%s9143_s15 + $0x1c8] sm:$0xff] %vm6059_vm4, %v5988_v3 }
 0x48a   : > { %v5819_v32 = vmax.bf16 %v5434_v14, %v5433_v0  ;;  %6118 = vst.msk [vmem:[%s9143_s15 + $0x1d0] sm:$0xff] %vm6059_vm4, %v5989_v52  ;;  %6119 = vst.msk [vmem:[%s9143_s15 + $0x1d8] sm:$0xff] %vm6059_vm4, %v5990_v46 }
 0x48c   : > { %5915 = vmax.xlane.bf16.xlu1 %v9470_v12  ;;  %v5823_v33 = vmax.bf16 %v5821_v34, %v5819_v32 }
 0x48d   : > { %5908 = vmax.xlane.bf16.xlu0 %v9475_v40 }
 0x48f   : > { %v5699_v49 = vpop.xlane.xlu0 %5698 }
 0x490   : > { %v5991_v31 = vunpack.c.l.bf16 %v5699_v49  ;;  %v5992_v19 = vunpack.c.h.bf16 %v5699_v49 }
 0x492   : > { %6120 = vst.msk [vmem:[%s9143_s15 + $0x1e0] sm:$0xff] %vm6059_vm4, %v5991_v31  ;;  %6121 = vst.msk [vmem:[%s9143_s15 + $0x1e8] sm:$0xff] %vm6059_vm4, %v5992_v19 }
 0x494   : > { %5803 = vmax.xlane.bf16.xlu1 %v9480_v62 }
 0x495   : > { %5810 = vmax.xlane.bf16.xlu0 %v5809_v13 }
 0x497   : > { %v5706_v54 = vpop.xlane.xlu1 %5705 }
 0x498   : > { %v5993_v6 = vunpack.c.l.bf16 %v5706_v54  ;;  %v5994_v41 = vunpack.c.h.bf16 %v5706_v54 }
 0x49a   : > { %6122 = vst.msk [vmem:[%s9143_s15 + $0x1f0] sm:$0xff] %vm6059_vm4, %v5993_v6  ;;  %6123 = vst.msk [vmem:[%s9143_s15 + $0x1f8] sm:$0xff] %vm6059_vm4, %v5994_v41 }
 0x49c   : > { %5817 = vmax.xlane.bf16.xlu1 %v5816_v42 }
 0x49d   : > { %5824 = vmax.xlane.bf16.xlu0 %v5823_v33 }
 0x49f   : > { %v5713_v12 = vpop.xlane.xlu0 %5712 }
 0x4a0   : > { %v5995_v40 = vunpack.c.l.bf16 %v5713_v12  ;;  %v5996_v48 = vunpack.c.h.bf16 %v5713_v12 }
 0x4a2   : > { %6124 = vst.msk [vmem:[%s9143_s15 + $0x200] sm:$0xff] %vm6059_vm4, %v5995_v40  ;;  %6125 = vst.msk [vmem:[%s9143_s15 + $0x208] sm:$0xff] %vm6059_vm4, %v5996_v48 }
 0x4a4   : > { %5929 = vmax.xlane.bf16.xlu1 %v9500_v61 }
 0x4a5   : > { %5922 = vmax.xlane.bf16.xlu0 %v9505_v4 }
 0x4a7   : > { %v5720_v62 = vpop.xlane.xlu1 %5719 }
 0x4a8   : > { %v5997_v9 = vunpack.c.l.bf16 %v5720_v62  ;;  %v5998_v38 = vunpack.c.h.bf16 %v5720_v62 }
 0x4aa   : > { %6126 = vst.msk [vmem:[%s9143_s15 + $0x210] sm:$0xff] %vm6059_vm4, %v5997_v9  ;;  %6127 = vst.msk [vmem:[%s9143_s15 + $0x218] sm:$0xff] %vm6059_vm4, %v5998_v38 }
 0x4b0   : > { %v5727_v8 = vpop.xlane.xlu0 %5726 }
 0x4b1   : > { %v5999_v63 = vunpack.c.l.bf16 %v5727_v8  ;;  %v6000_v58 = vunpack.c.h.bf16 %v5727_v8 }
 0x4b3   : > { %6128 = vst.msk [vmem:[%s9143_s15 + $0x220] sm:$0xff] %vm6059_vm4, %v5999_v63  ;;  %6129 = vst.msk [vmem:[%s9143_s15 + $0x228] sm:$0xff] %vm6059_vm4, %v6000_v58 }
 0x4b8   : > { %v5734_v21 = vpop.xlane.xlu1 %5733 }
 0x4b9   : > { %v6001_v36 = vunpack.c.l.bf16 %v5734_v21  ;;  %v6002_v24 = vunpack.c.h.bf16 %v5734_v21 }
 0x4bb   : > { %6130 = vst.msk [vmem:[%s9143_s15 + $0x230] sm:$0xff] %vm6059_vm4, %v6001_v36  ;;  %6131 = vst.msk [vmem:[%s9143_s15 + $0x238] sm:$0xff] %vm6059_vm4, %v6002_v24 }
 0x4c0   : > { %v5741_v2 = vpop.xlane.xlu0 %5740 }
 0x4c1   : > { %v6003_v53 = vunpack.c.l.bf16 %v5741_v2  ;;  %v6004_v29 = vunpack.c.h.bf16 %v5741_v2 }
 0x4c3   : > { %6132 = vst.msk [vmem:[%s9143_s15 + $0x240] sm:$0xff] %vm6059_vm4, %v6003_v53  ;;  %6133 = vst.msk [vmem:[%s9143_s15 + $0x248] sm:$0xff] %vm6059_vm4, %v6004_v29 }
 0x4c8   : > { %v5748_v17 = vpop.xlane.xlu1 %5747 }
 0x4c9   : > { %v6005_v43 = vunpack.c.l.bf16 %v5748_v17  ;;  %v6006_v61 = vunpack.c.h.bf16 %v5748_v17 }
 0x4cb   : > { %6134 = vst.msk [vmem:[%s9143_s15 + $0x250] sm:$0xff] %vm6059_vm4, %v6005_v43  ;;  %6135 = vst.msk [vmem:[%s9143_s15 + $0x258] sm:$0xff] %vm6059_vm4, %v6006_v61 }
 0x4d0   : > { %v5755_v20 = vpop.xlane.xlu0 %5754 }
 0x4d1   : > { %v6007_v23 = vunpack.c.l.bf16 %v5755_v20  ;;  %v6008_v47 = vunpack.c.h.bf16 %v5755_v20 }
 0x4d3   : > { %6136 = vst.msk [vmem:[%s9143_s15 + $0x260] sm:$0xff] %vm6059_vm4, %v6007_v23  ;;  %6137 = vst.msk [vmem:[%s9143_s15 + $0x268] sm:$0xff] %vm6059_vm4, %v6008_v47 }
 0x4d5   : > { %v5832_v44 = vpop.xlane.xlu1 %5831 }
 0x4d6   : > { %v6029_v1 = vunpack.c.l.bf16 %v5832_v44  ;;  %v6030_v4 = vunpack.c.h.bf16 %v5832_v44 }
 0x4d8   : > { %6158 = vst.msk [vmem:[%s9143_s15 + $0x310] sm:$0xff] %vm6059_vm4, %v6029_v1  ;;  %6159 = vst.msk [vmem:[%s9143_s15 + $0x318] sm:$0xff] %vm6059_vm4, %v6030_v4 }
 0x4dd   : > { %v5762_v35 = vpop.xlane.xlu1 %5761 }
 0x4de   : > { %v6009_v50 = vunpack.c.l.bf16 %v5762_v35  ;;  %v6010_v59 = vunpack.c.h.bf16 %v5762_v35  ;;  %v5839_v56 = vpop.xlane.xlu0 %5838 }
 0x4df   : > { %v6031_v39 = vunpack.c.l.bf16 %v5839_v56  ;;  %v6032_v13 = vunpack.c.h.bf16 %v5839_v56 }
 0x4e0   : > { %6138 = vst.msk [vmem:[%s9143_s15 + $0x270] sm:$0xff] %vm6059_vm4, %v6009_v50  ;;  %6139 = vst.msk [vmem:[%s9143_s15 + $0x278] sm:$0xff] %vm6059_vm4, %v6010_v59 }
 0x4e1   : > { %6160 = vst.msk [vmem:[%s9143_s15 + $0x320] sm:$0xff] %vm6059_vm4, %v6031_v39  ;;  %6161 = vst.msk [vmem:[%s9143_s15 + $0x328] sm:$0xff] %vm6059_vm4, %v6032_v13 }
 0x4e5   : > { %v5846_v10 = vpop.xlane.xlu1 %5845 }
 0x4e6   : > { %v6033_v57 = vunpack.c.l.bf16 %v5846_v10  ;;  %v6034_v16 = vunpack.c.h.bf16 %v5846_v10  ;;  %v5769_v27 = vpop.xlane.xlu0 %5768 }
 0x4e7   : > { %v6011_v51 = vunpack.c.l.bf16 %v5769_v27  ;;  %v6012_v11 = vunpack.c.h.bf16 %v5769_v27 }
 0x4e8   : > { %6162 = vst.msk [vmem:[%s9143_s15 + $0x330] sm:$0xff] %vm6059_vm4, %v6033_v57  ;;  %6163 = vst.msk [vmem:[%s9143_s15 + $0x338] sm:$0xff] %vm6059_vm4, %v6034_v16 }
 0x4e9   : > { %6140 = vst.msk [vmem:[%s9143_s15 + $0x280] sm:$0xff] %vm6059_vm4, %v6011_v51  ;;  %6141 = vst.msk [vmem:[%s9143_s15 + $0x288] sm:$0xff] %vm6059_vm4, %v6012_v11 }
 0x4ed   : > { %v5860_v25 = vpop.xlane.xlu1 %5859 }
 0x4ee   : > { %v6037_v37 = vunpack.c.l.bf16 %v5860_v25  ;;  %v6038_v60 = vunpack.c.h.bf16 %v5860_v25  ;;  %v5853_v5 = vpop.xlane.xlu0 %5852 }
 0x4ef   : > { %v6035_v22 = vunpack.c.l.bf16 %v5853_v5  ;;  %v6036_v18 = vunpack.c.h.bf16 %v5853_v5 }
 0x4f0   : > { %6166 = vst.msk [vmem:[%s9143_s15 + $0x350] sm:$0xff] %vm6059_vm4, %v6037_v37  ;;  %6167 = vst.msk [vmem:[%s9143_s15 + $0x358] sm:$0xff] %vm6059_vm4, %v6038_v60 }
 0x4f1   : > { %6164 = vst.msk [vmem:[%s9143_s15 + $0x340] sm:$0xff] %vm6059_vm4, %v6035_v22  ;;  %6165 = vst.msk [vmem:[%s9143_s15 + $0x348] sm:$0xff] %vm6059_vm4, %v6036_v18 }
 0x4f5   : > { %v5776_v55 = vpop.xlane.xlu1 %5775 }
 0x4f6   : > { %v6013_v42 = vunpack.c.l.bf16 %v5776_v55  ;;  %v6014_v26 = vunpack.c.h.bf16 %v5776_v55  ;;  %v5867_v30 = vpop.xlane.xlu0 %5866 }
 0x4f7   : > { %v6039_v28 = vunpack.c.l.bf16 %v5867_v30  ;;  %v6040_v45 = vunpack.c.h.bf16 %v5867_v30 }
 0x4f8   : > { %6142 = vst.msk [vmem:[%s9143_s15 + $0x290] sm:$0xff] %vm6059_vm4, %v6013_v42  ;;  %6143 = vst.msk [vmem:[%s9143_s15 + $0x298] sm:$0xff] %vm6059_vm4, %v6014_v26 }
 0x4f9   : > { %6168 = vst.msk [vmem:[%s9143_s15 + $0x360] sm:$0xff] %vm6059_vm4, %v6039_v28  ;;  %6169 = vst.msk [vmem:[%s9143_s15 + $0x368] sm:$0xff] %vm6059_vm4, %v6040_v45 }
 0x4fd   : > { %v5874_v0 = vpop.xlane.xlu1 %5873 }
 0x4fe   : > { %v6041_v15 = vunpack.c.l.bf16 %v5874_v0  ;;  %v6042_v3 = vunpack.c.h.bf16 %v5874_v0  ;;  %v5783_v7 = vpop.xlane.xlu0 %5782 }
 0x4ff   : > { %v6015_v14 = vunpack.c.l.bf16 %v5783_v7  ;;  %v6016_v52 = vunpack.c.h.bf16 %v5783_v7 }
 0x500   : > { %6170 = vst.msk [vmem:[%s9143_s15 + $0x370] sm:$0xff] %vm6059_vm4, %v6041_v15  ;;  %6171 = vst.msk [vmem:[%s9143_s15 + $0x378] sm:$0xff] %vm6059_vm4, %v6042_v3 }
 0x501   : > { %6144 = vst.msk [vmem:[%s9143_s15 + $0x2a0] sm:$0xff] %vm6059_vm4, %v6015_v14  ;;  %6145 = vst.msk [vmem:[%s9143_s15 + $0x2a8] sm:$0xff] %vm6059_vm4, %v6016_v52 }
 0x505   : > { %v5888_v46 = vpop.xlane.xlu1 %5887 }
 0x506   : > { %v6045_v32 = vunpack.c.l.bf16 %v5888_v46  ;;  %v6046_v34 = vunpack.c.h.bf16 %v5888_v46  ;;  %v5881_v33 = vpop.xlane.xlu0 %5880 }
 0x507   : > { %v6043_v49 = vunpack.c.l.bf16 %v5881_v33  ;;  %v6044_v31 = vunpack.c.h.bf16 %v5881_v33 }
 0x508   : > { %6174 = vst.msk [vmem:[%s9143_s15 + $0x390] sm:$0xff] %vm6059_vm4, %v6045_v32  ;;  %6175 = vst.msk [vmem:[%s9143_s15 + $0x398] sm:$0xff] %vm6059_vm4, %v6046_v34 }
 0x509   : > { %6172 = vst.msk [vmem:[%s9143_s15 + $0x380] sm:$0xff] %vm6059_vm4, %v6043_v49  ;;  %6173 = vst.msk [vmem:[%s9143_s15 + $0x388] sm:$0xff] %vm6059_vm4, %v6044_v31 }
 0x50d   : > { %v5790_v19 = vpop.xlane.xlu1 %5789 }
 0x50e   : > { %v6017_v54 = vunpack.c.l.bf16 %v5790_v19  ;;  %v6018_v6 = vunpack.c.h.bf16 %v5790_v19  ;;  %v5895_v41 = vpop.xlane.xlu0 %5894 }
 0x50f   : > { %v6047_v12 = vunpack.c.l.bf16 %v5895_v41  ;;  %v6048_v40 = vunpack.c.h.bf16 %v5895_v41 }
 0x510   : > { %6146 = vst.msk [vmem:[%s9143_s15 + $0x2b0] sm:$0xff] %vm6059_vm4, %v6017_v54  ;;  %6147 = vst.msk [vmem:[%s9143_s15 + $0x2b8] sm:$0xff] %vm6059_vm4, %v6018_v6 }
 0x511   : > { %6176 = vst.msk [vmem:[%s9143_s15 + $0x3a0] sm:$0xff] %vm6059_vm4, %v6047_v12  ;;  %6177 = vst.msk [vmem:[%s9143_s15 + $0x3a8] sm:$0xff] %vm6059_vm4, %v6048_v40 }
 0x515   : > { %v5902_v48 = vpop.xlane.xlu1 %5901 }
 0x516   : > { %v6049_v62 = vunpack.c.l.bf16 %v5902_v48  ;;  %v6050_v9 = vunpack.c.h.bf16 %v5902_v48  ;;  %v5797_v38 = vpop.xlane.xlu0 %5796 }
 0x517   : > { %v6019_v8 = vunpack.c.l.bf16 %v5797_v38  ;;  %v6020_v63 = vunpack.c.h.bf16 %v5797_v38 }
 0x518   : > { %6178 = vst.msk [vmem:[%s9143_s15 + $0x3b0] sm:$0xff] %vm6059_vm4, %v6049_v62  ;;  %6179 = vst.msk [vmem:[%s9143_s15 + $0x3b8] sm:$0xff] %vm6059_vm4, %v6050_v9 }
 0x519   : > { %6148 = vst.msk [vmem:[%s9143_s15 + $0x2c0] sm:$0xff] %vm6059_vm4, %v6019_v8  ;;  %6149 = vst.msk [vmem:[%s9143_s15 + $0x2c8] sm:$0xff] %vm6059_vm4, %v6020_v63 }
 0x51d   : > { %v5916_v58 = vpop.xlane.xlu1 %5915 }
 0x51e   : > { %v6053_v21 = vunpack.c.l.bf16 %v5916_v58  ;;  %v6054_v36 = vunpack.c.h.bf16 %v5916_v58  ;;  %v5909_v24 = vpop.xlane.xlu0 %5908 }
 0x51f   : > { %v6051_v2 = vunpack.c.l.bf16 %v5909_v24  ;;  %v6052_v53 = vunpack.c.h.bf16 %v5909_v24 }
 0x520   : > { %6182 = vst.msk [vmem:[%s9143_s15 + $0x3d0] sm:$0xff] %vm6059_vm4, %v6053_v21  ;;  %6183 = vst.msk [vmem:[%s9143_s15 + $0x3d8] sm:$0xff] %vm6059_vm4, %v6054_v36 }
 0x521   : > { %6180 = vst.msk [vmem:[%s9143_s15 + $0x3c0] sm:$0xff] %vm6059_vm4, %v6051_v2  ;;  %6181 = vst.msk [vmem:[%s9143_s15 + $0x3c8] sm:$0xff] %vm6059_vm4, %v6052_v53 }
 0x525   : > { %v5804_v29 = vpop.xlane.xlu1 %5803 }
 0x526   : > { %v6021_v17 = vunpack.c.l.bf16 %v5804_v29  ;;  %v6022_v43 = vunpack.c.h.bf16 %v5804_v29  ;;  %v5811_v61 = vpop.xlane.xlu0 %5810 }
 0x527   : > { %v6023_v20 = vunpack.c.l.bf16 %v5811_v61  ;;  %v6024_v23 = vunpack.c.h.bf16 %v5811_v61 }
 0x528   : > { %6150 = vst.msk [vmem:[%s9143_s15 + $0x2d0] sm:$0xff] %vm6059_vm4, %v6021_v17  ;;  %6151 = vst.msk [vmem:[%s9143_s15 + $0x2d8] sm:$0xff] %vm6059_vm4, %v6022_v43 }
 0x529   : > { %6152 = vst.msk [vmem:[%s9143_s15 + $0x2e0] sm:$0xff] %vm6059_vm4, %v6023_v20  ;;  %6153 = vst.msk [vmem:[%s9143_s15 + $0x2e8] sm:$0xff] %vm6059_vm4, %v6024_v23 }
 0x52d   : > { %v5818_v47 = vpop.xlane.xlu1 %5817 }
 0x52e   : > { %v6025_v44 = vunpack.c.l.bf16 %v5818_v47  ;;  %v6026_v1 = vunpack.c.h.bf16 %v5818_v47  ;;  %v5825_v4 = vpop.xlane.xlu0 %5824 }
 0x52f   : > { %v6027_v35 = vunpack.c.l.bf16 %v5825_v4  ;;  %v6028_v50 = vunpack.c.h.bf16 %v5825_v4 }
 0x530   : > { %6154 = vst.msk [vmem:[%s9143_s15 + $0x2f0] sm:$0xff] %vm6059_vm4, %v6025_v44  ;;  %6155 = vst.msk [vmem:[%s9143_s15 + $0x2f8] sm:$0xff] %vm6059_vm4, %v6026_v1 }
 0x531   : > { %6156 = vst.msk [vmem:[%s9143_s15 + $0x300] sm:$0xff] %vm6059_vm4, %v6027_v35  ;;  %6157 = vst.msk [vmem:[%s9143_s15 + $0x308] sm:$0xff] %vm6059_vm4, %v6028_v50 }
 0x535   : > { %v5930_v59 = vpop.xlane.xlu1 %5929 }
 0x536   : > { %v6057_v56 = vunpack.c.l.bf16 %v5930_v59  ;;  %v6058_v39 = vunpack.c.h.bf16 %v5930_v59  ;;  %v5923_v13 = vpop.xlane.xlu0 %5922 }
 0x537   : > { %v6055_v10 = vunpack.c.l.bf16 %v5923_v13  ;;  %v6056_v57 = vunpack.c.h.bf16 %v5923_v13 }
 0x538   : > { %6186 = vst.msk [vmem:[%s9143_s15 + $0x3f0] sm:$0xff] %vm6059_vm4, %v6057_v56  ;;  %6187 = vst.msk [vmem:[%s9143_s15 + $0x3f8] sm:$0xff] %vm6059_vm4, %v6058_v39 }
 0x539   : > { %6184 = vst.msk [vmem:[%s9143_s15 + $0x3e0] sm:$0xff] %vm6059_vm4, %v6055_v10  ;;  %6185 = vst.msk [vmem:[%s9143_s15 + $0x3e8] sm:$0xff] %vm6059_vm4, %v6056_v57 }
 0x53a PF: > { %s17_s26 = sadd.s32 1, %s6914_s26   ;;  %s10092_s24 = smov %s6910_s25 }
 0x53b   : > { %p14_p5 = scmp.ge.s32.totalorder %s17_s26, 4   ;;  %s10093_s25 = smov %s10095_s27 }
 0x53d   :  { %16 = sbr.rel (!%p14_p5) target bundleno = 2 (0x2), region = 81 }

</bundles_post_ra>
